<compile_context>
chip_gen: v6e
topology: v6e:2x2x1
jax: 0.10.0
libtpu: 0.0.40
codegen_flags: <defaults>
</compile_context>

<pallas_src>
import math

import numpy as np
import jax
import jax.numpy as jnp
from jax import lax
from jax.experimental import pallas as pl
from jax.experimental.pallas import tpu as pltpu


# ----------------------------- static geometry ------------------------------

def _stage_geometry(h0, batch, in_channels):
    """Static per-stage shape bookkeeping (input is square h0 x h0)."""
    chans = [(in_channels, 4), (4, 8), (8, 16), (16, 16), (16, 16)]
    stages, h = [], h0
    for cin, cout in chans:
        ho = -(-h // 2)                       # ceil-mode pooled size
        stages.append(dict(H=h, Ho=ho, Cin=cin, Cout=cout,
                           R=batch * (h + 2), Rout=batch * (h + 2) - 2))
        h = ho
    return stages


def _build_static_mats(stages, batch):
    """0/1 pooling-selection matrices (exact in bf16, parameter independent).

    rse/rso: vertical pair-max row selectors ("anchor" / "anchor+1" conv row),
             also repacking rows into the next stage's zero-padded layout.
             Missing odd rows (ceil-mode edge) stay all-zero -> contribute 0,
             which is safe because activations are post-ReLU >= 0.
    ce/co:   horizontal pair-max even/odd pixel-column selectors + 2x
             downsample into the next stage's padded packed columns (last
             stage: into a dense (wo, c) layout).
    """
    mats = []
    last = len(stages) - 1
    for i, st in enumerate(stages):
        H, Ho, C, Rout = st["H"], st["Ho"], st["Cout"], st["Rout"]
        if i < last:
            rse = np.zeros((batch * (Ho + 2), Rout), np.float32)
            rso = np.zeros((batch * (Ho + 2), Rout), np.float32)
            for n in range(batch):
                for ho in range(Ho):
                    rse[n * (Ho + 2) + 1 + ho, n * (H + 2) + 2 * ho] = 1.0
                    if 2 * ho + 1 < H:
                        rso[n * (Ho + 2) + 1 + ho, n * (H + 2) + 2 * ho + 1] = 1.0
            ce = np.zeros((H * C, (Ho + 2) * C), np.float32)
            co = np.zeros((H * C, (Ho + 2) * C), np.float32)
            for wo in range(Ho):
                for c in range(C):
                    ce[(2 * wo) * C + c, (wo + 1) * C + c] = 1.0
                    if 2 * wo + 1 < H:
                        co[(2 * wo + 1) * C + c, (wo + 1) * C + c] = 1.0
        else:
            # last stage: rows ordered ho-major so each ho block is one
            # contiguous row slice; columns dense (wo, c).
            rse = np.zeros((Ho * batch, Rout), np.float32)
            rso = np.zeros((Ho * batch, Rout), np.float32)
            for ho in range(Ho):
                for n in range(batch):
                    rse[ho * batch + n, n * (H + 2) + 2 * ho] = 1.0
                    if 2 * ho + 1 < H:
                        rso[ho * batch + n, n * (H + 2) + 2 * ho + 1] = 1.0
            ce = np.zeros((H * C, Ho * C), np.float32)
            co = np.zeros((H * C, Ho * C), np.float32)
            for wo in range(Ho):
                for c in range(C):
                    ce[(2 * wo) * C + c, wo * C + c] = 1.0
                    if 2 * wo + 1 < H:
                        co[(2 * wo + 1) * C + c, wo * C + c] = 1.0
        mats.append((rse, rso, ce, co))
    return mats


def _toeplitz_conv_weights(w_hwio, width):
    """(3,3,Cin,Cout) -> (3, (width+2)*Cin, width*Cout) block-Toeplitz (one per dy)."""
    per_dy = []
    for dy in range(3):
        mat = None
        for dx in range(3):
            shift = np.eye(width + 2, width, k=-dx, dtype=np.float32)
            term = jnp.kron(shift, w_hwio[dy, dx])
            mat = term if mat is None else mat + term
        per_dy.append(mat)
    return jnp.stack(per_dy, axis=0)


# ------------------------------ the fused kernel -----------------------------

def _make_kernel(stages, batch):
    n_stages = len(stages)
    n_pref = n_stages - 1     # stages whose big operands are prefetched in-kernel

    def kernel(*refs):
        pos = 0
        a_in = refs[pos]; pos += 1
        st_ops = []
        for _ in range(n_stages):
            st_ops.append(refs[pos:pos + 6]); pos += 6
        wa1, ba1, wa2, ba2, wv1, bv1, wv2, bv2 = refs[pos:pos + 8]; pos += 8
        out_ref = refs[pos]; pos += 1
        wbuf = []
        for _ in range(n_pref):
            wbuf.append(refs[pos:pos + 3]); pos += 3
        a_scr = refs[pos:pos + n_pref]; pos += n_pref
        feat_scr = refs[pos]; pos += 1
        sems = refs[pos]; pos += 1

        # Kick off HBM->VMEM prefetch of stage 2..5 matmul operands so the DMAs
        # overlap with earlier stages' compute (waited on right before use).
        for s in range(n_pref):
            wt_h, _, _, _, ce_h, co_h = st_ops[s + 1]
            wt_v, ce_v, co_v = wbuf[s]
            pltpu.make_async_copy(wt_h, wt_v, sems.at[3 * s + 0]).start()
            pltpu.make_async_copy(ce_h, ce_v, sems.at[3 * s + 1]).start()
            pltpu.make_async_copy(co_h, co_v, sems.at[3 * s + 2]).start()

        cur = a_in                 # packed, zero-padded activation (f32, VMEM)
        for i, st in enumerate(stages):
            Ho, Cout, Rout = st["Ho"], st["Cout"], st["Rout"]
            wt_h, b_ref, rse_ref, rso_ref, ce_h, co_h = st_ops[i]
            if i == 0:
                wt_ref, ce_ref, co_ref = wt_h, ce_h, co_h
            else:
                wt_v, ce_v, co_v = wbuf[i - 1]
                pltpu.make_async_copy(wt_h, wt_v, sems.at[3 * (i - 1) + 0]).wait()
                pltpu.make_async_copy(ce_h, ce_v, sems.at[3 * (i - 1) + 1]).wait()
                pltpu.make_async_copy(co_h, co_v, sems.at[3 * (i - 1) + 2]).wait()
                wt_ref, ce_ref, co_ref = wt_v, ce_v, co_v

            # conv3x3 (padding=1): 3 block-Toeplitz MXU matmuls on row-shifted
            # slabs, bf16 operands, f32 accumulation.
            acc = jnp.dot(cur[0:Rout, :].astype(jnp.bfloat16), wt_ref[0],
                          preferred_element_type=jnp.float32)
            acc = acc + jnp.dot(cur[1:Rout + 1, :].astype(jnp.bfloat16), wt_ref[1],
                                preferred_element_type=jnp.float32)
            acc = acc + jnp.dot(cur[2:Rout + 2, :].astype(jnp.bfloat16), wt_ref[2],
                                preferred_element_type=jnp.float32)
            acc = jnp.maximum(acc + b_ref[...], 0.0)          # bias + ReLU (f32)
            acc_bf = acc.astype(jnp.bfloat16)

            # 2x2 ceil-mode max-pool, vertical half: anchor / anchor+1 row
            # selection matmuls (also repack rows into the next padded layout).
            v = jnp.maximum(
                jnp.dot(rse_ref[...], acc_bf, preferred_element_type=jnp.float32),
                jnp.dot(rso_ref[...], acc_bf, preferred_element_type=jnp.float32))
            v_bf = v.astype(jnp.bfloat16)

            # horizontal half: even/odd pixel-column selectors + 2x downsample.
            hp = jnp.maximum(
                jnp.dot(v_bf, ce_ref[...], preferred_element_type=jnp.float32),
                jnp.dot(v_bf, co_ref[...], preferred_element_type=jnp.float32))

            if i < n_stages - 1:
                a_scr[i][...] = hp               # next stage's packed activation
                cur = a_scr[i]
            else:
                # hp rows are ho-major: three static block copies lay the pooled
                # map out in (ho, wo, c) feature order -> (batch, 144).
                blk = Ho * Cout
                for ho in range(Ho):
                    feat_scr[:, ho * blk:(ho + 1) * blk] = \
                        hp[ho * batch:(ho + 1) * batch, :]

        # dueling head (f32).  First-layer weights were pre-permuted on the host
        # to the kernel's (ho, wo, c) feature order, so no in-kernel flatten.
        feat = feat_scr[...]
        adv = jnp.maximum(
            jnp.dot(feat, wa1[...], preferred_element_type=jnp.float32) + ba1[...], 0.0)
        adv = jnp.dot(adv, wa2[...], preferred_element_type=jnp.float32) + ba2[...]
        adv = adv - jnp.mean(adv, axis=-1, keepdims=True)
        val = jnp.maximum(
            jnp.dot(feat, wv1[...], preferred_element_type=jnp.float32) + bv1[...], 0.0)
        val = jnp.dot(val, wv2[...], preferred_element_type=jnp.float32) + bv2[...]
        out_ref[...] = val + adv

    return kernel


# --------------------------------- wrappers ----------------------------------

def prepare_kernel_params(params, stages, batch):
    """One-time restructuring of parameters into kernel operands (bf16 where safe)."""
    static = _build_static_mats(stages, batch)
    stage_args = []
    for i, st in enumerate(stages):
        w = params[f"conv{i + 1}_w"]
        b = params[f"conv{i + 1}_b"]
        wt = _toeplitz_conv_weights(w, st["H"]).astype(jnp.bfloat16)
        bias = jnp.tile(b, st["H"]).reshape(1, st["H"] * st["Cout"]).astype(jnp.float32)
        rse, rso, ce, co = (jnp.asarray(m, jnp.bfloat16) for m in static[i])
        stage_args.append((wt, bias, rse, rso, ce, co))

    # Fold the torch NCHW flatten into the head's first-layer weights:
    # kernel feature j = ho*(Wo*C) + wo*C + c  <->  torch k = c*Ho*Wo + ho*Wo + wo.
    Ho, C = stages[-1]["Ho"], stages[-1]["Cout"]
    perm = np.empty(Ho * Ho * C, np.int32)
    for ho in range(Ho):
        for wo in range(Ho):
            for c in range(C):
                perm[ho * Ho * C + wo * C + c] = c * Ho * Ho + ho * Ho + wo
    head = (params["wadv1"][perm, :], params["badv1"].reshape(1, -1),
            params["wadv2"], params["badv2"].reshape(1, -1),
            params["wval1"][perm, :], params["bval1"].reshape(1, -1),
            params["wval2"], params["bval2"].reshape(1, -1))
    return {"stage": stage_args, "head": head}


def make_forward(stages, batch):
    kernel = _make_kernel(stages, batch)
    n_stages = len(stages)
    vmem = pl.BlockSpec(memory_space=pltpu.MemorySpace.VMEM)
    hbm = pl.BlockSpec(memory_space=pl.ANY)        # stays in HBM, prefetched in-kernel

    def forward(x_nchw, prepped):
        n, c, h, w = x_nchw.shape
        x = jnp.transpose(x_nchw, (0, 2, 3, 1)).astype(jnp.float32)   # NHWC
        xp = jnp.pad(x, ((0, 0), (1, 1), (1, 1), (0, 0)))             # spatial zero-pad
        a1 = xp.reshape(n * (h + 2), (w + 2) * c)                     # packed layout

        args, in_specs = [a1], [vmem]
        for i, tup in enumerate(prepped["stage"]):
            args.extend(tup)
            if i == 0:
                in_specs.extend([vmem] * 6)
            else:
                # big matmul operands (wt, ce, co) are manually DMA'd; the tiny
                # bias/rse/rso ride the normal VMEM prologue copy.
                in_specs.extend([hbm, vmem, vmem, vmem, hbm, hbm])
        args.extend(prepped["head"])
        in_specs.extend([vmem] * 8)

        scratch = []
        for i in range(1, n_stages):                       # prefetch destinations
            wt, _, _, _, ce, co = prepped["stage"][i]
            scratch += [pltpu.VMEM(wt.shape, jnp.bfloat16),
                        pltpu.VMEM(ce.shape, jnp.bfloat16),
                        pltpu.VMEM(co.shape, jnp.bfloat16)]
        for st in stages[1:]:                              # packed activations
            scratch.append(pltpu.VMEM((st["R"], (st["H"] + 2) * st["Cin"]),
                                      jnp.float32))
        feat_dim = stages[-1]["Cout"] * stages[-1]["Ho"] ** 2
        scratch.append(pltpu.VMEM((n, feat_dim), jnp.float32))
        scratch.append(pltpu.SemaphoreType.DMA((3 * (n_stages - 1),)))

        action_size = prepped["head"][2].shape[-1]
        return pl.pallas_call(
            kernel,
            out_shape=jax.ShapeDtypeStruct((n, action_size), jnp.float32),
            in_specs=in_specs,
            out_specs=pl.BlockSpec(memory_space=pltpu.MemorySpace.VMEM),
            scratch_shapes=scratch,
            compiler_params=pltpu.CompilerParams(vmem_limit_bytes=16 * 1024 * 1024),
        )(*args)

    return forward


# --------------------------- parameters (synthetic) --------------------------

def init_params(key, in_channels, action_size):
    convs = [(in_channels, 4), (4, 8), (8, 16), (16, 16), (16, 16)]
    keys = iter(jax.random.split(key, 32))
    params = {}
    for i, (cin, cout) in enumerate(convs, start=1):
        bound = 1.0 / math.sqrt(cin * 9)
        params[f"conv{i}_w"] = jax.random.uniform(
            next(keys), (3, 3, cin, cout), jnp.float32, -bound, bound)
        params[f"conv{i}_b"] = jax.random.uniform(
            next(keys), (cout,), jnp.float32, -bound, bound)

    def linear(fin, fout):
        bound = 1.0 / math.sqrt(fin)
        w = jax.random.uniform(next(keys), (fin, fout), jnp.float32, -bound, bound)
        b = jax.random.uniform(next(keys), (fout,), jnp.float32, -bound, bound)
        return w, b

    params["wval1"], params["bval1"] = linear(3 * 3 * 16, 10)
    params["wval2"], params["bval2"] = linear(10, 1)
    params["wadv1"], params["badv1"] = linear(3 * 3 * 16, 10)
    params["wadv2"], params["badv2"] = linear(10, action_size)
    return params


# ------------------------------ pure-JAX reference ---------------------------

def reference_forward(x_nchw, params):
    x = jnp.transpose(x_nchw, (0, 2, 3, 1)).astype(jnp.float32)
    for i in range(1, 6):
        w, b = params[f"conv{i}_w"], params[f"conv{i}_b"]
        x = lax.conv_general_dilated(
            x, w, (1, 1), ((1, 1), (1, 1)),
            dimension_numbers=("NHWC", "HWIO", "NHWC"))
        x = jnp.maximum(x + b, 0.0)
        N, H, W, C = x.shape
        Ho, Wo = -(-H // 2), -(-W // 2)
        xp = jnp.pad(x, ((0, 0), (0, 2 * Ho - H), (0, 2 * Wo - W), (0, 0)),
                     constant_values=-jnp.inf)
        x = lax.reduce_window(xp, -jnp.inf, lax.max,
                              (1, 2, 2, 1), (1, 2, 2, 1), "VALID")
    B = x.shape[0]
    xf = jnp.transpose(x, (0, 3, 1, 2)).reshape(B, -1)
    adv = jnp.maximum(xf @ params["wadv1"] + params["badv1"], 0.0)
    adv = adv @ params["wadv2"] + params["badv2"]
    adv = adv - jnp.mean(adv, axis=-1, keepdims=True)
    val = jnp.maximum(xf @ params["wval1"] + params["bval1"], 0.0)
    val = val @ params["wval2"] + params["bval2"]
    return val + adv


# ---------------------------------- main -------------------------------------

if __name__ == "__main__":
    key = jax.random.PRNGKey(0)
    k_params, k_x = jax.random.split(key)

    # state_size = (72, 72, 4): 72 -> 36 -> 18 -> 9 -> 5 -> 3 under ceil-mode
    # pooling, so the flattened feature size is 3*3*16 = 144 as the FCs expect.
    state_size = (72, 72, 4)
    action_size = 6
    batch = 2    # NOTE: for throughput, batch >= ~16 fills the MXU much better.

    params = init_params(k_params, state_size[-1], action_size)
    # PyTorch-style NCHW input
    x = jax.random.uniform(
        k_x, (batch, state_size[-1], state_size[0], state_size[1]), jnp.float32)

    stages = _stage_geometry(state_size[0], batch, state_size[-1])
    prepped = prepare_kernel_params(params, stages, batch)   # one-time weight prep
    forward = jax.jit(make_forward(stages, batch))

    out = jax.block_until_ready(forward(x, prepped))
    ref = jax.block_until_ready(reference_forward(x, params))

    assert out.shape == (batch, action_size), out.shape
    # bf16 matmul operands in the kernel vs default-precision f32 reference;
    # keep a modest tolerance (errors observed are well below this).
    assert jnp.allclose(out, ref, rtol=2e-2, atol=2e-2), (out, ref)

    print("KERNEL_OK")
</pallas_src>

<mosaic_0001>
module attributes {stable_mosaic.version = 11 : i64} {
  func.func @kernel(%arg0: memref<148x296xf32, #tpu.memory_space<vmem>>, %arg1: memref<3x296x288xbf16, #tpu.memory_space<vmem>>, %arg2: memref<1x288xf32, #tpu.memory_space<vmem>>, %arg3: memref<76x146xbf16, #tpu.memory_space<vmem>>, %arg4: memref<76x146xbf16, #tpu.memory_space<vmem>>, %arg5: memref<288x152xbf16, #tpu.memory_space<vmem>>, %arg6: memref<288x152xbf16, #tpu.memory_space<vmem>>, %arg7: memref<3x152x288xbf16, #tpu.memory_space<any>>, %arg8: memref<1x288xf32, #tpu.memory_space<vmem>>, %arg9: memref<40x74xbf16, #tpu.memory_space<vmem>>, %arg10: memref<40x74xbf16, #tpu.memory_space<vmem>>, %arg11: memref<288x160xbf16, #tpu.memory_space<any>>, %arg12: memref<288x160xbf16, #tpu.memory_space<any>>, %arg13: memref<3x160x288xbf16, #tpu.memory_space<any>>, %arg14: memref<1x288xf32, #tpu.memory_space<vmem>>, %arg15: memref<22x38xbf16, #tpu.memory_space<vmem>>, %arg16: memref<22x38xbf16, #tpu.memory_space<vmem>>, %arg17: memref<288x176xbf16, #tpu.memory_space<any>>, %arg18: memref<288x176xbf16, #tpu.memory_space<any>>, %arg19: memref<3x176x144xbf16, #tpu.memory_space<any>>, %arg20: memref<1x144xf32, #tpu.memory_space<vmem>>, %arg21: memref<14x20xbf16, #tpu.memory_space<vmem>>, %arg22: memref<14x20xbf16, #tpu.memory_space<vmem>>, %arg23: memref<144x112xbf16, #tpu.memory_space<any>>, %arg24: memref<144x112xbf16, #tpu.memory_space<any>>, %arg25: memref<3x112x80xbf16, #tpu.memory_space<any>>, %arg26: memref<1x80xf32, #tpu.memory_space<vmem>>, %arg27: memref<6x12xbf16, #tpu.memory_space<vmem>>, %arg28: memref<6x12xbf16, #tpu.memory_space<vmem>>, %arg29: memref<80x48xbf16, #tpu.memory_space<any>>, %arg30: memref<80x48xbf16, #tpu.memory_space<any>>, %arg31: memref<144x10xf32, #tpu.memory_space<vmem>>, %arg32: memref<1x10xf32, #tpu.memory_space<vmem>>, %arg33: memref<10x6xf32, #tpu.memory_space<vmem>>, %arg34: memref<1x6xf32, #tpu.memory_space<vmem>>, %arg35: memref<144x10xf32, #tpu.memory_space<vmem>>, %arg36: memref<1x10xf32, #tpu.memory_space<vmem>>, %arg37: memref<10x1xf32, #tpu.memory_space<vmem>>, %arg38: memref<1x1xf32, #tpu.memory_space<vmem>>, %arg39: memref<2x6xf32, #tpu.memory_space<vmem>>, %arg40: memref<3x152x288xbf16, #tpu.memory_space<vmem>>, %arg41: memref<288x160xbf16, #tpu.memory_space<vmem>>, %arg42: memref<288x160xbf16, #tpu.memory_space<vmem>>, %arg43: memref<3x160x288xbf16, #tpu.memory_space<vmem>>, %arg44: memref<288x176xbf16, #tpu.memory_space<vmem>>, %arg45: memref<288x176xbf16, #tpu.memory_space<vmem>>, %arg46: memref<3x176x144xbf16, #tpu.memory_space<vmem>>, %arg47: memref<144x112xbf16, #tpu.memory_space<vmem>>, %arg48: memref<144x112xbf16, #tpu.memory_space<vmem>>, %arg49: memref<3x112x80xbf16, #tpu.memory_space<vmem>>, %arg50: memref<80x48xbf16, #tpu.memory_space<vmem>>, %arg51: memref<80x48xbf16, #tpu.memory_space<vmem>>, %arg52: memref<76x152xf32, #tpu.memory_space<vmem>>, %arg53: memref<40x160xf32, #tpu.memory_space<vmem>>, %arg54: memref<22x176xf32, #tpu.memory_space<vmem>>, %arg55: memref<14x112xf32, #tpu.memory_space<vmem>>, %arg56: memref<2x144xf32, #tpu.memory_space<vmem>>, %arg57: memref<12x!tpu.dma_semaphore, #tpu.memory_space<semaphore_mem>>) attributes {dimension_semantics = [], scalar_prefetch = 0 : i64, scratch_operands = 18 : i64, tpu.core_type = #tpu.core_type<tc>} {
    %c0_i32 = arith.constant 0 : i32
    %0 = tpu.memref_slice %arg57[%c0_i32] : memref<12x!tpu.dma_semaphore, #tpu.memory_space<semaphore_mem>> -> memref<1x!tpu.dma_semaphore, #tpu.memory_space<semaphore_mem>>
    %1 = tpu.memref_squeeze %0 : memref<1x!tpu.dma_semaphore, #tpu.memory_space<semaphore_mem>> -> memref<!tpu.dma_semaphore, #tpu.memory_space<semaphore_mem>>
    tpu.enqueue_dma source(%arg7 : memref<3x152x288xbf16, #tpu.memory_space<any>>) target(%arg40 : memref<3x152x288xbf16, #tpu.memory_space<vmem>>) target_semaphore(%1 : memref<!tpu.dma_semaphore, #tpu.memory_space<semaphore_mem>>)
    %c1_i32 = arith.constant 1 : i32
    %2 = tpu.memref_slice %arg57[%c1_i32] : memref<12x!tpu.dma_semaphore, #tpu.memory_space<semaphore_mem>> -> memref<1x!tpu.dma_semaphore, #tpu.memory_space<semaphore_mem>>
    %3 = tpu.memref_squeeze %2 : memref<1x!tpu.dma_semaphore, #tpu.memory_space<semaphore_mem>> -> memref<!tpu.dma_semaphore, #tpu.memory_space<semaphore_mem>>
    tpu.enqueue_dma source(%arg11 : memref<288x160xbf16, #tpu.memory_space<any>>) target(%arg41 : memref<288x160xbf16, #tpu.memory_space<vmem>>) target_semaphore(%3 : memref<!tpu.dma_semaphore, #tpu.memory_space<semaphore_mem>>)
    %c2_i32 = arith.constant 2 : i32
    %4 = tpu.memref_slice %arg57[%c2_i32] : memref<12x!tpu.dma_semaphore, #tpu.memory_space<semaphore_mem>> -> memref<1x!tpu.dma_semaphore, #tpu.memory_space<semaphore_mem>>
    %5 = tpu.memref_squeeze %4 : memref<1x!tpu.dma_semaphore, #tpu.memory_space<semaphore_mem>> -> memref<!tpu.dma_semaphore, #tpu.memory_space<semaphore_mem>>
    tpu.enqueue_dma source(%arg12 : memref<288x160xbf16, #tpu.memory_space<any>>) target(%arg42 : memref<288x160xbf16, #tpu.memory_space<vmem>>) target_semaphore(%5 : memref<!tpu.dma_semaphore, #tpu.memory_space<semaphore_mem>>)
    %c3_i32 = arith.constant 3 : i32
    %6 = tpu.memref_slice %arg57[%c3_i32] : memref<12x!tpu.dma_semaphore, #tpu.memory_space<semaphore_mem>> -> memref<1x!tpu.dma_semaphore, #tpu.memory_space<semaphore_mem>>
    %7 = tpu.memref_squeeze %6 : memref<1x!tpu.dma_semaphore, #tpu.memory_space<semaphore_mem>> -> memref<!tpu.dma_semaphore, #tpu.memory_space<semaphore_mem>>
    tpu.enqueue_dma source(%arg13 : memref<3x160x288xbf16, #tpu.memory_space<any>>) target(%arg43 : memref<3x160x288xbf16, #tpu.memory_space<vmem>>) target_semaphore(%7 : memref<!tpu.dma_semaphore, #tpu.memory_space<semaphore_mem>>)
    %c4_i32 = arith.constant 4 : i32
    %8 = tpu.memref_slice %arg57[%c4_i32] : memref<12x!tpu.dma_semaphore, #tpu.memory_space<semaphore_mem>> -> memref<1x!tpu.dma_semaphore, #tpu.memory_space<semaphore_mem>>
    %9 = tpu.memref_squeeze %8 : memref<1x!tpu.dma_semaphore, #tpu.memory_space<semaphore_mem>> -> memref<!tpu.dma_semaphore, #tpu.memory_space<semaphore_mem>>
    tpu.enqueue_dma source(%arg17 : memref<288x176xbf16, #tpu.memory_space<any>>) target(%arg44 : memref<288x176xbf16, #tpu.memory_space<vmem>>) target_semaphore(%9 : memref<!tpu.dma_semaphore, #tpu.memory_space<semaphore_mem>>)
    %c5_i32 = arith.constant 5 : i32
    %10 = tpu.memref_slice %arg57[%c5_i32] : memref<12x!tpu.dma_semaphore, #tpu.memory_space<semaphore_mem>> -> memref<1x!tpu.dma_semaphore, #tpu.memory_space<semaphore_mem>>
    %11 = tpu.memref_squeeze %10 : memref<1x!tpu.dma_semaphore, #tpu.memory_space<semaphore_mem>> -> memref<!tpu.dma_semaphore, #tpu.memory_space<semaphore_mem>>
    tpu.enqueue_dma source(%arg18 : memref<288x176xbf16, #tpu.memory_space<any>>) target(%arg45 : memref<288x176xbf16, #tpu.memory_space<vmem>>) target_semaphore(%11 : memref<!tpu.dma_semaphore, #tpu.memory_space<semaphore_mem>>)
    %c6_i32 = arith.constant 6 : i32
    %12 = tpu.memref_slice %arg57[%c6_i32] : memref<12x!tpu.dma_semaphore, #tpu.memory_space<semaphore_mem>> -> memref<1x!tpu.dma_semaphore, #tpu.memory_space<semaphore_mem>>
    %13 = tpu.memref_squeeze %12 : memref<1x!tpu.dma_semaphore, #tpu.memory_space<semaphore_mem>> -> memref<!tpu.dma_semaphore, #tpu.memory_space<semaphore_mem>>
    tpu.enqueue_dma source(%arg19 : memref<3x176x144xbf16, #tpu.memory_space<any>>) target(%arg46 : memref<3x176x144xbf16, #tpu.memory_space<vmem>>) target_semaphore(%13 : memref<!tpu.dma_semaphore, #tpu.memory_space<semaphore_mem>>)
    %c7_i32 = arith.constant 7 : i32
    %14 = tpu.memref_slice %arg57[%c7_i32] : memref<12x!tpu.dma_semaphore, #tpu.memory_space<semaphore_mem>> -> memref<1x!tpu.dma_semaphore, #tpu.memory_space<semaphore_mem>>
    %15 = tpu.memref_squeeze %14 : memref<1x!tpu.dma_semaphore, #tpu.memory_space<semaphore_mem>> -> memref<!tpu.dma_semaphore, #tpu.memory_space<semaphore_mem>>
    tpu.enqueue_dma source(%arg23 : memref<144x112xbf16, #tpu.memory_space<any>>) target(%arg47 : memref<144x112xbf16, #tpu.memory_space<vmem>>) target_semaphore(%15 : memref<!tpu.dma_semaphore, #tpu.memory_space<semaphore_mem>>)
    %c8_i32 = arith.constant 8 : i32
    %16 = tpu.memref_slice %arg57[%c8_i32] : memref<12x!tpu.dma_semaphore, #tpu.memory_space<semaphore_mem>> -> memref<1x!tpu.dma_semaphore, #tpu.memory_space<semaphore_mem>>
    %17 = tpu.memref_squeeze %16 : memref<1x!tpu.dma_semaphore, #tpu.memory_space<semaphore_mem>> -> memref<!tpu.dma_semaphore, #tpu.memory_space<semaphore_mem>>
    tpu.enqueue_dma source(%arg24 : memref<144x112xbf16, #tpu.memory_space<any>>) target(%arg48 : memref<144x112xbf16, #tpu.memory_space<vmem>>) target_semaphore(%17 : memref<!tpu.dma_semaphore, #tpu.memory_space<semaphore_mem>>)
    %c9_i32 = arith.constant 9 : i32
    %18 = tpu.memref_slice %arg57[%c9_i32] : memref<12x!tpu.dma_semaphore, #tpu.memory_space<semaphore_mem>> -> memref<1x!tpu.dma_semaphore, #tpu.memory_space<semaphore_mem>>
    %19 = tpu.memref_squeeze %18 : memref<1x!tpu.dma_semaphore, #tpu.memory_space<semaphore_mem>> -> memref<!tpu.dma_semaphore, #tpu.memory_space<semaphore_mem>>
    tpu.enqueue_dma source(%arg25 : memref<3x112x80xbf16, #tpu.memory_space<any>>) target(%arg49 : memref<3x112x80xbf16, #tpu.memory_space<vmem>>) target_semaphore(%19 : memref<!tpu.dma_semaphore, #tpu.memory_space<semaphore_mem>>)
    %c10_i32 = arith.constant 10 : i32
    %20 = tpu.memref_slice %arg57[%c10_i32] : memref<12x!tpu.dma_semaphore, #tpu.memory_space<semaphore_mem>> -> memref<1x!tpu.dma_semaphore, #tpu.memory_space<semaphore_mem>>
    %21 = tpu.memref_squeeze %20 : memref<1x!tpu.dma_semaphore, #tpu.memory_space<semaphore_mem>> -> memref<!tpu.dma_semaphore, #tpu.memory_space<semaphore_mem>>
    tpu.enqueue_dma source(%arg29 : memref<80x48xbf16, #tpu.memory_space<any>>) target(%arg50 : memref<80x48xbf16, #tpu.memory_space<vmem>>) target_semaphore(%21 : memref<!tpu.dma_semaphore, #tpu.memory_space<semaphore_mem>>)
    %c11_i32 = arith.constant 11 : i32
    %22 = tpu.memref_slice %arg57[%c11_i32] : memref<12x!tpu.dma_semaphore, #tpu.memory_space<semaphore_mem>> -> memref<1x!tpu.dma_semaphore, #tpu.memory_space<semaphore_mem>>
    %23 = tpu.memref_squeeze %22 : memref<1x!tpu.dma_semaphore, #tpu.memory_space<semaphore_mem>> -> memref<!tpu.dma_semaphore, #tpu.memory_space<semaphore_mem>>
    tpu.enqueue_dma source(%arg30 : memref<80x48xbf16, #tpu.memory_space<any>>) target(%arg51 : memref<80x48xbf16, #tpu.memory_space<vmem>>) target_semaphore(%23 : memref<!tpu.dma_semaphore, #tpu.memory_space<semaphore_mem>>)
    %c0 = arith.constant 0 : index
    %c0_0 = arith.constant 0 : index
    %24 = vector.load %arg0[%c0, %c0_0] : memref<148x296xf32, #tpu.memory_space<vmem>>, vector<146x296xf32>
    %25 = arith.truncf %24 : vector<146x296xf32> to vector<146x296xbf16>
    %c0_1 = arith.constant 0 : index
    %c0_2 = arith.constant 0 : index
    %c0_3 = arith.constant 0 : index
    %26 = vector.load %arg1[%c0_1, %c0_2, %c0_3] : memref<3x296x288xbf16, #tpu.memory_space<vmem>>, vector<1x296x288xbf16>
    %27 = vector.shape_cast %26 : vector<1x296x288xbf16> to vector<296x288xbf16>
    %cst = arith.constant dense<0.000000e+00> : vector<146x288xf32>
    %28 = tpu.matmul %25, %27, %cst {dimension_numbers = #tpu.dot_dimension_numbers<[1], [0], [0], [1], [0, 0, 1, 1], [], []>} : vector<146x296xbf16>, vector<296x288xbf16>, vector<146x288xf32> -> vector<146x288xf32>
    %c1 = arith.constant 1 : index
    %c0_4 = arith.constant 0 : index
    %29 = vector.load %arg0[%c1, %c0_4] : memref<148x296xf32, #tpu.memory_space<vmem>>, vector<146x296xf32>
    %30 = arith.truncf %29 : vector<146x296xf32> to vector<146x296xbf16>
    %c1_5 = arith.constant 1 : index
    %c0_6 = arith.constant 0 : index
    %c0_7 = arith.constant 0 : index
    %31 = vector.load %arg1[%c1_5, %c0_6, %c0_7] : memref<3x296x288xbf16, #tpu.memory_space<vmem>>, vector<1x296x288xbf16>
    %32 = vector.shape_cast %31 : vector<1x296x288xbf16> to vector<296x288xbf16>
    %cst_8 = arith.constant dense<0.000000e+00> : vector<146x288xf32>
    %33 = tpu.matmul %30, %32, %cst_8 {dimension_numbers = #tpu.dot_dimension_numbers<[1], [0], [0], [1], [0, 0, 1, 1], [], []>} : vector<146x296xbf16>, vector<296x288xbf16>, vector<146x288xf32> -> vector<146x288xf32>
    %34 = arith.addf %28, %33 : vector<146x288xf32>
    %c2 = arith.constant 2 : index
    %c0_9 = arith.constant 0 : index
    %35 = vector.load %arg0[%c2, %c0_9] : memref<148x296xf32, #tpu.memory_space<vmem>>, vector<146x296xf32>
    %36 = arith.truncf %35 : vector<146x296xf32> to vector<146x296xbf16>
    %c2_10 = arith.constant 2 : index
    %c0_11 = arith.constant 0 : index
    %c0_12 = arith.constant 0 : index
    %37 = vector.load %arg1[%c2_10, %c0_11, %c0_12] : memref<3x296x288xbf16, #tpu.memory_space<vmem>>, vector<1x296x288xbf16>
    %38 = vector.shape_cast %37 : vector<1x296x288xbf16> to vector<296x288xbf16>
    %cst_13 = arith.constant dense<0.000000e+00> : vector<146x288xf32>
    %39 = tpu.matmul %36, %38, %cst_13 {dimension_numbers = #tpu.dot_dimension_numbers<[1], [0], [0], [1], [0, 0, 1, 1], [], []>} : vector<146x296xbf16>, vector<296x288xbf16>, vector<146x288xf32> -> vector<146x288xf32>
    %40 = arith.addf %34, %39 : vector<146x288xf32>
    %c0_14 = arith.constant 0 : index
    %c0_15 = arith.constant 0 : index
    %41 = vector.load %arg2[%c0_14, %c0_15] : memref<1x288xf32, #tpu.memory_space<vmem>>, vector<1x288xf32>
    %42 = vector.broadcast %41 : vector<1x288xf32> to vector<146x288xf32>
    %43 = arith.addf %40, %42 : vector<146x288xf32>
    %cst_16 = arith.constant 0.000000e+00 : f32
    %44 = vector.broadcast %cst_16 : f32 to vector<146x288xf32>
    %45 = arith.maximumf %43, %44 : vector<146x288xf32>
    %46 = arith.truncf %45 : vector<146x288xf32> to vector<146x288xbf16>
    %c0_17 = arith.constant 0 : index
    %c0_18 = arith.constant 0 : index
    %47 = vector.load %arg3[%c0_17, %c0_18] : memref<76x146xbf16, #tpu.memory_space<vmem>>, vector<76x146xbf16>
    %cst_19 = arith.constant dense<0.000000e+00> : vector<76x288xf32>
    %48 = tpu.matmul %47, %46, %cst_19 {dimension_numbers = #tpu.dot_dimension_numbers<[1], [0], [0], [1], [0, 0, 1, 1], [], []>} : vector<76x146xbf16>, vector<146x288xbf16>, vector<76x288xf32> -> vector<76x288xf32>
    %c0_20 = arith.constant 0 : index
    %c0_21 = arith.constant 0 : index
    %49 = vector.load %arg4[%c0_20, %c0_21] : memref<76x146xbf16, #tpu.memory_space<vmem>>, vector<76x146xbf16>
    %cst_22 = arith.constant dense<0.000000e+00> : vector<76x288xf32>
    %50 = tpu.matmul %49, %46, %cst_22 {dimension_numbers = #tpu.dot_dimension_numbers<[1], [0], [0], [1], [0, 0, 1, 1], [], []>} : vector<76x146xbf16>, vector<146x288xbf16>, vector<76x288xf32> -> vector<76x288xf32>
    %51 = arith.maximumf %48, %50 : vector<76x288xf32>
    %52 = arith.truncf %51 : vector<76x288xf32> to vector<76x288xbf16>
    %c0_23 = arith.constant 0 : index
    %c0_24 = arith.constant 0 : index
    %53 = vector.load %arg5[%c0_23, %c0_24] : memref<288x152xbf16, #tpu.memory_space<vmem>>, vector<288x152xbf16>
    %cst_25 = arith.constant dense<0.000000e+00> : vector<76x152xf32>
    %54 = tpu.matmul %52, %53, %cst_25 {dimension_numbers = #tpu.dot_dimension_numbers<[1], [0], [0], [1], [0, 0, 1, 1], [], []>} : vector<76x288xbf16>, vector<288x152xbf16>, vector<76x152xf32> -> vector<76x152xf32>
    %c0_26 = arith.constant 0 : index
    %c0_27 = arith.constant 0 : index
    %55 = vector.load %arg6[%c0_26, %c0_27] : memref<288x152xbf16, #tpu.memory_space<vmem>>, vector<288x152xbf16>
    %cst_28 = arith.constant dense<0.000000e+00> : vector<76x152xf32>
    %56 = tpu.matmul %52, %55, %cst_28 {dimension_numbers = #tpu.dot_dimension_numbers<[1], [0], [0], [1], [0, 0, 1, 1], [], []>} : vector<76x288xbf16>, vector<288x152xbf16>, vector<76x152xf32> -> vector<76x152xf32>
    %57 = arith.maximumf %54, %56 : vector<76x152xf32>
    %c0_29 = arith.constant 0 : index
    %c0_30 = arith.constant 0 : index
    %58 = vector.load %arg52[%c0_29, %c0_30] : memref<76x152xf32, #tpu.memory_space<vmem>>, vector<76x152xf32>
    tpu.vector_store %arg52[%c0_29, %c0_30], %57 {strides = array<i32>} : memref<76x152xf32, #tpu.memory_space<vmem>>, vector<76x152xf32>,
    %c0_i32_31 = arith.constant 0 : i32
    %59 = tpu.memref_slice %arg57[%c0_i32_31] : memref<12x!tpu.dma_semaphore, #tpu.memory_space<semaphore_mem>> -> memref<1x!tpu.dma_semaphore, #tpu.memory_space<semaphore_mem>>
    %60 = tpu.memref_squeeze %59 : memref<1x!tpu.dma_semaphore, #tpu.memory_space<semaphore_mem>> -> memref<!tpu.dma_semaphore, #tpu.memory_space<semaphore_mem>>
    tpu.wait_dma2 semaphore(%60 : memref<!tpu.dma_semaphore, #tpu.memory_space<semaphore_mem>>) src(%arg7 : memref<3x152x288xbf16, #tpu.memory_space<any>>) dst(%arg40 : memref<3x152x288xbf16, #tpu.memory_space<vmem>>)
    %c1_i32_32 = arith.constant 1 : i32
    %61 = tpu.memref_slice %arg57[%c1_i32_32] : memref<12x!tpu.dma_semaphore, #tpu.memory_space<semaphore_mem>> -> memref<1x!tpu.dma_semaphore, #tpu.memory_space<semaphore_mem>>
    %62 = tpu.memref_squeeze %61 : memref<1x!tpu.dma_semaphore, #tpu.memory_space<semaphore_mem>> -> memref<!tpu.dma_semaphore, #tpu.memory_space<semaphore_mem>>
    tpu.wait_dma2 semaphore(%62 : memref<!tpu.dma_semaphore, #tpu.memory_space<semaphore_mem>>) src(%arg11 : memref<288x160xbf16, #tpu.memory_space<any>>) dst(%arg41 : memref<288x160xbf16, #tpu.memory_space<vmem>>)
    %c2_i32_33 = arith.constant 2 : i32
    %63 = tpu.memref_slice %arg57[%c2_i32_33] : memref<12x!tpu.dma_semaphore, #tpu.memory_space<semaphore_mem>> -> memref<1x!tpu.dma_semaphore, #tpu.memory_space<semaphore_mem>>
    %64 = tpu.memref_squeeze %63 : memref<1x!tpu.dma_semaphore, #tpu.memory_space<semaphore_mem>> -> memref<!tpu.dma_semaphore, #tpu.memory_space<semaphore_mem>>
    tpu.wait_dma2 semaphore(%64 : memref<!tpu.dma_semaphore, #tpu.memory_space<semaphore_mem>>) src(%arg12 : memref<288x160xbf16, #tpu.memory_space<any>>) dst(%arg42 : memref<288x160xbf16, #tpu.memory_space<vmem>>)
    %c0_34 = arith.constant 0 : index
    %c0_35 = arith.constant 0 : index
    %65 = vector.load %arg52[%c0_34, %c0_35] : memref<76x152xf32, #tpu.memory_space<vmem>>, vector<74x152xf32>
    %66 = arith.truncf %65 : vector<74x152xf32> to vector<74x152xbf16>
    %c0_36 = arith.constant 0 : index
    %c0_37 = arith.constant 0 : index
    %c0_38 = arith.constant 0 : index
    %67 = vector.load %arg40[%c0_36, %c0_37, %c0_38] : memref<3x152x288xbf16, #tpu.memory_space<vmem>>, vector<1x152x288xbf16>
    %68 = vector.shape_cast %67 : vector<1x152x288xbf16> to vector<152x288xbf16>
    %cst_39 = arith.constant dense<0.000000e+00> : vector<74x288xf32>
    %69 = tpu.matmul %66, %68, %cst_39 {dimension_numbers = #tpu.dot_dimension_numbers<[1], [0], [0], [1], [0, 0, 1, 1], [], []>} : vector<74x152xbf16>, vector<152x288xbf16>, vector<74x288xf32> -> vector<74x288xf32>
    %c1_40 = arith.constant 1 : index
    %c0_41 = arith.constant 0 : index
    %70 = vector.load %arg52[%c1_40, %c0_41] : memref<76x152xf32, #tpu.memory_space<vmem>>, vector<74x152xf32>
    %71 = arith.truncf %70 : vector<74x152xf32> to vector<74x152xbf16>
    %c1_42 = arith.constant 1 : index
    %c0_43 = arith.constant 0 : index
    %c0_44 = arith.constant 0 : index
    %72 = vector.load %arg40[%c1_42, %c0_43, %c0_44] : memref<3x152x288xbf16, #tpu.memory_space<vmem>>, vector<1x152x288xbf16>
    %73 = vector.shape_cast %72 : vector<1x152x288xbf16> to vector<152x288xbf16>
    %cst_45 = arith.constant dense<0.000000e+00> : vector<74x288xf32>
    %74 = tpu.matmul %71, %73, %cst_45 {dimension_numbers = #tpu.dot_dimension_numbers<[1], [0], [0], [1], [0, 0, 1, 1], [], []>} : vector<74x152xbf16>, vector<152x288xbf16>, vector<74x288xf32> -> vector<74x288xf32>
    %75 = arith.addf %69, %74 : vector<74x288xf32>
    %c2_46 = arith.constant 2 : index
    %c0_47 = arith.constant 0 : index
    %76 = vector.load %arg52[%c2_46, %c0_47] : memref<76x152xf32, #tpu.memory_space<vmem>>, vector<74x152xf32>
    %77 = arith.truncf %76 : vector<74x152xf32> to vector<74x152xbf16>
    %c2_48 = arith.constant 2 : index
    %c0_49 = arith.constant 0 : index
    %c0_50 = arith.constant 0 : index
    %78 = vector.load %arg40[%c2_48, %c0_49, %c0_50] : memref<3x152x288xbf16, #tpu.memory_space<vmem>>, vector<1x152x288xbf16>
    %79 = vector.shape_cast %78 : vector<1x152x288xbf16> to vector<152x288xbf16>
    %cst_51 = arith.constant dense<0.000000e+00> : vector<74x288xf32>
    %80 = tpu.matmul %77, %79, %cst_51 {dimension_numbers = #tpu.dot_dimension_numbers<[1], [0], [0], [1], [0, 0, 1, 1], [], []>} : vector<74x152xbf16>, vector<152x288xbf16>, vector<74x288xf32> -> vector<74x288xf32>
    %81 = arith.addf %75, %80 : vector<74x288xf32>
    %c0_52 = arith.constant 0 : index
    %c0_53 = arith.constant 0 : index
    %82 = vector.load %arg8[%c0_52, %c0_53] : memref<1x288xf32, #tpu.memory_space<vmem>>, vector<1x288xf32>
    %83 = vector.broadcast %82 : vector<1x288xf32> to vector<74x288xf32>
    %84 = arith.addf %81, %83 : vector<74x288xf32>
    %cst_54 = arith.constant 0.000000e+00 : f32
    %85 = vector.broadcast %cst_54 : f32 to vector<74x288xf32>
    %86 = arith.maximumf %84, %85 : vector<74x288xf32>
    %87 = arith.truncf %86 : vector<74x288xf32> to vector<74x288xbf16>
    %c0_55 = arith.constant 0 : index
    %c0_56 = arith.constant 0 : index
    %88 = vector.load %arg9[%c0_55, %c0_56] : memref<40x74xbf16, #tpu.memory_space<vmem>>, vector<40x74xbf16>
    %cst_57 = arith.constant dense<0.000000e+00> : vector<40x288xf32>
    %89 = tpu.matmul %88, %87, %cst_57 {dimension_numbers = #tpu.dot_dimension_numbers<[1], [0], [0], [1], [0, 0, 1, 1], [], []>} : vector<40x74xbf16>, vector<74x288xbf16>, vector<40x288xf32> -> vector<40x288xf32>
    %c0_58 = arith.constant 0 : index
    %c0_59 = arith.constant 0 : index
    %90 = vector.load %arg10[%c0_58, %c0_59] : memref<40x74xbf16, #tpu.memory_space<vmem>>, vector<40x74xbf16>
    %cst_60 = arith.constant dense<0.000000e+00> : vector<40x288xf32>
    %91 = tpu.matmul %90, %87, %cst_60 {dimension_numbers = #tpu.dot_dimension_numbers<[1], [0], [0], [1], [0, 0, 1, 1], [], []>} : vector<40x74xbf16>, vector<74x288xbf16>, vector<40x288xf32> -> vector<40x288xf32>
    %92 = arith.maximumf %89, %91 : vector<40x288xf32>
    %93 = arith.truncf %92 : vector<40x288xf32> to vector<40x288xbf16>
    %c0_61 = arith.constant 0 : index
    %c0_62 = arith.constant 0 : index
    %94 = vector.load %arg41[%c0_61, %c0_62] : memref<288x160xbf16, #tpu.memory_space<vmem>>, vector<288x160xbf16>
    %cst_63 = arith.constant dense<0.000000e+00> : vector<40x160xf32>
    %95 = tpu.matmul %93, %94, %cst_63 {dimension_numbers = #tpu.dot_dimension_numbers<[1], [0], [0], [1], [0, 0, 1, 1], [], []>} : vector<40x288xbf16>, vector<288x160xbf16>, vector<40x160xf32> -> vector<40x160xf32>
    %c0_64 = arith.constant 0 : index
    %c0_65 = arith.constant 0 : index
    %96 = vector.load %arg42[%c0_64, %c0_65] : memref<288x160xbf16, #tpu.memory_space<vmem>>, vector<288x160xbf16>
    %cst_66 = arith.constant dense<0.000000e+00> : vector<40x160xf32>
    %97 = tpu.matmul %93, %96, %cst_66 {dimension_numbers = #tpu.dot_dimension_numbers<[1], [0], [0], [1], [0, 0, 1, 1], [], []>} : vector<40x288xbf16>, vector<288x160xbf16>, vector<40x160xf32> -> vector<40x160xf32>
    %98 = arith.maximumf %95, %97 : vector<40x160xf32>
    %c0_67 = arith.constant 0 : index
    %c0_68 = arith.constant 0 : index
    %99 = vector.load %arg53[%c0_67, %c0_68] : memref<40x160xf32, #tpu.memory_space<vmem>>, vector<40x160xf32>
    tpu.vector_store %arg53[%c0_67, %c0_68], %98 {strides = array<i32>} : memref<40x160xf32, #tpu.memory_space<vmem>>, vector<40x160xf32>,
    %c3_i32_69 = arith.constant 3 : i32
    %100 = tpu.memref_slice %arg57[%c3_i32_69] : memref<12x!tpu.dma_semaphore, #tpu.memory_space<semaphore_mem>> -> memref<1x!tpu.dma_semaphore, #tpu.memory_space<semaphore_mem>>
    %101 = tpu.memref_squeeze %100 : memref<1x!tpu.dma_semaphore, #tpu.memory_space<semaphore_mem>> -> memref<!tpu.dma_semaphore, #tpu.memory_space<semaphore_mem>>
    tpu.wait_dma2 semaphore(%101 : memref<!tpu.dma_semaphore, #tpu.memory_space<semaphore_mem>>) src(%arg13 : memref<3x160x288xbf16, #tpu.memory_space<any>>) dst(%arg43 : memref<3x160x288xbf16, #tpu.memory_space<vmem>>)
    %c4_i32_70 = arith.constant 4 : i32
    %102 = tpu.memref_slice %arg57[%c4_i32_70] : memref<12x!tpu.dma_semaphore, #tpu.memory_space<semaphore_mem>> -> memref<1x!tpu.dma_semaphore, #tpu.memory_space<semaphore_mem>>
    %103 = tpu.memref_squeeze %102 : memref<1x!tpu.dma_semaphore, #tpu.memory_space<semaphore_mem>> -> memref<!tpu.dma_semaphore, #tpu.memory_space<semaphore_mem>>
    tpu.wait_dma2 semaphore(%103 : memref<!tpu.dma_semaphore, #tpu.memory_space<semaphore_mem>>) src(%arg17 : memref<288x176xbf16, #tpu.memory_space<any>>) dst(%arg44 : memref<288x176xbf16, #tpu.memory_space<vmem>>)
    %c5_i32_71 = arith.constant 5 : i32
    %104 = tpu.memref_slice %arg57[%c5_i32_71] : memref<12x!tpu.dma_semaphore, #tpu.memory_space<semaphore_mem>> -> memref<1x!tpu.dma_semaphore, #tpu.memory_space<semaphore_mem>>
    %105 = tpu.memref_squeeze %104 : memref<1x!tpu.dma_semaphore, #tpu.memory_space<semaphore_mem>> -> memref<!tpu.dma_semaphore, #tpu.memory_space<semaphore_mem>>
    tpu.wait_dma2 semaphore(%105 : memref<!tpu.dma_semaphore, #tpu.memory_space<semaphore_mem>>) src(%arg18 : memref<288x176xbf16, #tpu.memory_space<any>>) dst(%arg45 : memref<288x176xbf16, #tpu.memory_space<vmem>>)
    %c0_72 = arith.constant 0 : index
    %c0_73 = arith.constant 0 : index
    %106 = vector.load %arg53[%c0_72, %c0_73] : memref<40x160xf32, #tpu.memory_space<vmem>>, vector<38x160xf32>
    %107 = arith.truncf %106 : vector<38x160xf32> to vector<38x160xbf16>
    %c0_74 = arith.constant 0 : index
    %c0_75 = arith.constant 0 : index
    %c0_76 = arith.constant 0 : index
    %108 = vector.load %arg43[%c0_74, %c0_75, %c0_76] : memref<3x160x288xbf16, #tpu.memory_space<vmem>>, vector<1x160x288xbf16>
    %109 = vector.shape_cast %108 : vector<1x160x288xbf16> to vector<160x288xbf16>
    %cst_77 = arith.constant dense<0.000000e+00> : vector<38x288xf32>
    %110 = tpu.matmul %107, %109, %cst_77 {dimension_numbers = #tpu.dot_dimension_numbers<[1], [0], [0], [1], [0, 0, 1, 1], [], []>} : vector<38x160xbf16>, vector<160x288xbf16>, vector<38x288xf32> -> vector<38x288xf32>
    %c1_78 = arith.constant 1 : index
    %c0_79 = arith.constant 0 : index
    %111 = vector.load %arg53[%c1_78, %c0_79] : memref<40x160xf32, #tpu.memory_space<vmem>>, vector<38x160xf32>
    %112 = arith.truncf %111 : vector<38x160xf32> to vector<38x160xbf16>
    %c1_80 = arith.constant 1 : index
    %c0_81 = arith.constant 0 : index
    %c0_82 = arith.constant 0 : index
    %113 = vector.load %arg43[%c1_80, %c0_81, %c0_82] : memref<3x160x288xbf16, #tpu.memory_space<vmem>>, vector<1x160x288xbf16>
    %114 = vector.shape_cast %113 : vector<1x160x288xbf16> to vector<160x288xbf16>
    %cst_83 = arith.constant dense<0.000000e+00> : vector<38x288xf32>
    %115 = tpu.matmul %112, %114, %cst_83 {dimension_numbers = #tpu.dot_dimension_numbers<[1], [0], [0], [1], [0, 0, 1, 1], [], []>} : vector<38x160xbf16>, vector<160x288xbf16>, vector<38x288xf32> -> vector<38x288xf32>
    %116 = arith.addf %110, %115 : vector<38x288xf32>
    %c2_84 = arith.constant 2 : index
    %c0_85 = arith.constant 0 : index
    %117 = vector.load %arg53[%c2_84, %c0_85] : memref<40x160xf32, #tpu.memory_space<vmem>>, vector<38x160xf32>
    %118 = arith.truncf %117 : vector<38x160xf32> to vector<38x160xbf16>
    %c2_86 = arith.constant 2 : index
    %c0_87 = arith.constant 0 : index
    %c0_88 = arith.constant 0 : index
    %119 = vector.load %arg43[%c2_86, %c0_87, %c0_88] : memref<3x160x288xbf16, #tpu.memory_space<vmem>>, vector<1x160x288xbf16>
    %120 = vector.shape_cast %119 : vector<1x160x288xbf16> to vector<160x288xbf16>
    %cst_89 = arith.constant dense<0.000000e+00> : vector<38x288xf32>
    %121 = tpu.matmul %118, %120, %cst_89 {dimension_numbers = #tpu.dot_dimension_numbers<[1], [0], [0], [1], [0, 0, 1, 1], [], []>} : vector<38x160xbf16>, vector<160x288xbf16>, vector<38x288xf32> -> vector<38x288xf32>
    %122 = arith.addf %116, %121 : vector<38x288xf32>
    %c0_90 = arith.constant 0 : index
    %c0_91 = arith.constant 0 : index
    %123 = vector.load %arg14[%c0_90, %c0_91] : memref<1x288xf32, #tpu.memory_space<vmem>>, vector<1x288xf32>
    %124 = vector.broadcast %123 : vector<1x288xf32> to vector<38x288xf32>
    %125 = arith.addf %122, %124 : vector<38x288xf32>
    %cst_92 = arith.constant 0.000000e+00 : f32
    %126 = vector.broadcast %cst_92 : f32 to vector<38x288xf32>
    %127 = arith.maximumf %125, %126 : vector<38x288xf32>
    %128 = arith.truncf %127 : vector<38x288xf32> to vector<38x288xbf16>
    %c0_93 = arith.constant 0 : index
    %c0_94 = arith.constant 0 : index
    %129 = vector.load %arg15[%c0_93, %c0_94] : memref<22x38xbf16, #tpu.memory_space<vmem>>, vector<22x38xbf16>
    %cst_95 = arith.constant dense<0.000000e+00> : vector<22x288xf32>
    %130 = tpu.matmul %129, %128, %cst_95 {dimension_numbers = #tpu.dot_dimension_numbers<[1], [0], [0], [1], [0, 0, 1, 1], [], []>} : vector<22x38xbf16>, vector<38x288xbf16>, vector<22x288xf32> -> vector<22x288xf32>
    %c0_96 = arith.constant 0 : index
    %c0_97 = arith.constant 0 : index
    %131 = vector.load %arg16[%c0_96, %c0_97] : memref<22x38xbf16, #tpu.memory_space<vmem>>, vector<22x38xbf16>
    %cst_98 = arith.constant dense<0.000000e+00> : vector<22x288xf32>
    %132 = tpu.matmul %131, %128, %cst_98 {dimension_numbers = #tpu.dot_dimension_numbers<[1], [0], [0], [1], [0, 0, 1, 1], [], []>} : vector<22x38xbf16>, vector<38x288xbf16>, vector<22x288xf32> -> vector<22x288xf32>
    %133 = arith.maximumf %130, %132 : vector<22x288xf32>
    %134 = arith.truncf %133 : vector<22x288xf32> to vector<22x288xbf16>
    %c0_99 = arith.constant 0 : index
    %c0_100 = arith.constant 0 : index
    %135 = vector.load %arg44[%c0_99, %c0_100] : memref<288x176xbf16, #tpu.memory_space<vmem>>, vector<288x176xbf16>
    %cst_101 = arith.constant dense<0.000000e+00> : vector<22x176xf32>
    %136 = tpu.matmul %134, %135, %cst_101 {dimension_numbers = #tpu.dot_dimension_numbers<[1], [0], [0], [1], [0, 0, 1, 1], [], []>} : vector<22x288xbf16>, vector<288x176xbf16>, vector<22x176xf32> -> vector<22x176xf32>
    %c0_102 = arith.constant 0 : index
    %c0_103 = arith.constant 0 : index
    %137 = vector.load %arg45[%c0_102, %c0_103] : memref<288x176xbf16, #tpu.memory_space<vmem>>, vector<288x176xbf16>
    %cst_104 = arith.constant dense<0.000000e+00> : vector<22x176xf32>
    %138 = tpu.matmul %134, %137, %cst_104 {dimension_numbers = #tpu.dot_dimension_numbers<[1], [0], [0], [1], [0, 0, 1, 1], [], []>} : vector<22x288xbf16>, vector<288x176xbf16>, vector<22x176xf32> -> vector<22x176xf32>
    %139 = arith.maximumf %136, %138 : vector<22x176xf32>
    %c0_105 = arith.constant 0 : index
    %c0_106 = arith.constant 0 : index
    %140 = vector.load %arg54[%c0_105, %c0_106] : memref<22x176xf32, #tpu.memory_space<vmem>>, vector<22x176xf32>
    tpu.vector_store %arg54[%c0_105, %c0_106], %139 {strides = array<i32>} : memref<22x176xf32, #tpu.memory_space<vmem>>, vector<22x176xf32>,
    %c6_i32_107 = arith.constant 6 : i32
    %141 = tpu.memref_slice %arg57[%c6_i32_107] : memref<12x!tpu.dma_semaphore, #tpu.memory_space<semaphore_mem>> -> memref<1x!tpu.dma_semaphore, #tpu.memory_space<semaphore_mem>>
    %142 = tpu.memref_squeeze %141 : memref<1x!tpu.dma_semaphore, #tpu.memory_space<semaphore_mem>> -> memref<!tpu.dma_semaphore, #tpu.memory_space<semaphore_mem>>
    tpu.wait_dma2 semaphore(%142 : memref<!tpu.dma_semaphore, #tpu.memory_space<semaphore_mem>>) src(%arg19 : memref<3x176x144xbf16, #tpu.memory_space<any>>) dst(%arg46 : memref<3x176x144xbf16, #tpu.memory_space<vmem>>)
    %c7_i32_108 = arith.constant 7 : i32
    %143 = tpu.memref_slice %arg57[%c7_i32_108] : memref<12x!tpu.dma_semaphore, #tpu.memory_space<semaphore_mem>> -> memref<1x!tpu.dma_semaphore, #tpu.memory_space<semaphore_mem>>
    %144 = tpu.memref_squeeze %143 : memref<1x!tpu.dma_semaphore, #tpu.memory_space<semaphore_mem>> -> memref<!tpu.dma_semaphore, #tpu.memory_space<semaphore_mem>>
    tpu.wait_dma2 semaphore(%144 : memref<!tpu.dma_semaphore, #tpu.memory_space<semaphore_mem>>) src(%arg23 : memref<144x112xbf16, #tpu.memory_space<any>>) dst(%arg47 : memref<144x112xbf16, #tpu.memory_space<vmem>>)
    %c8_i32_109 = arith.constant 8 : i32
    %145 = tpu.memref_slice %arg57[%c8_i32_109] : memref<12x!tpu.dma_semaphore, #tpu.memory_space<semaphore_mem>> -> memref<1x!tpu.dma_semaphore, #tpu.memory_space<semaphore_mem>>
    %146 = tpu.memref_squeeze %145 : memref<1x!tpu.dma_semaphore, #tpu.memory_space<semaphore_mem>> -> memref<!tpu.dma_semaphore, #tpu.memory_space<semaphore_mem>>
    tpu.wait_dma2 semaphore(%146 : memref<!tpu.dma_semaphore, #tpu.memory_space<semaphore_mem>>) src(%arg24 : memref<144x112xbf16, #tpu.memory_space<any>>) dst(%arg48 : memref<144x112xbf16, #tpu.memory_space<vmem>>)
    %c0_110 = arith.constant 0 : index
    %c0_111 = arith.constant 0 : index
    %147 = vector.load %arg54[%c0_110, %c0_111] : memref<22x176xf32, #tpu.memory_space<vmem>>, vector<20x176xf32>
    %148 = arith.truncf %147 : vector<20x176xf32> to vector<20x176xbf16>
    %c0_112 = arith.constant 0 : index
    %c0_113 = arith.constant 0 : index
    %c0_114 = arith.constant 0 : index
    %149 = vector.load %arg46[%c0_112, %c0_113, %c0_114] : memref<3x176x144xbf16, #tpu.memory_space<vmem>>, vector<1x176x144xbf16>
    %150 = vector.shape_cast %149 : vector<1x176x144xbf16> to vector<176x144xbf16>
    %cst_115 = arith.constant dense<0.000000e+00> : vector<20x144xf32>
    %151 = tpu.matmul %148, %150, %cst_115 {dimension_numbers = #tpu.dot_dimension_numbers<[1], [0], [0], [1], [0, 0, 1, 1], [], []>} : vector<20x176xbf16>, vector<176x144xbf16>, vector<20x144xf32> -> vector<20x144xf32>
    %c1_116 = arith.constant 1 : index
    %c0_117 = arith.constant 0 : index
    %152 = vector.load %arg54[%c1_116, %c0_117] : memref<22x176xf32, #tpu.memory_space<vmem>>, vector<20x176xf32>
    %153 = arith.truncf %152 : vector<20x176xf32> to vector<20x176xbf16>
    %c1_118 = arith.constant 1 : index
    %c0_119 = arith.constant 0 : index
    %c0_120 = arith.constant 0 : index
    %154 = vector.load %arg46[%c1_118, %c0_119, %c0_120] : memref<3x176x144xbf16, #tpu.memory_space<vmem>>, vector<1x176x144xbf16>
    %155 = vector.shape_cast %154 : vector<1x176x144xbf16> to vector<176x144xbf16>
    %cst_121 = arith.constant dense<0.000000e+00> : vector<20x144xf32>
    %156 = tpu.matmul %153, %155, %cst_121 {dimension_numbers = #tpu.dot_dimension_numbers<[1], [0], [0], [1], [0, 0, 1, 1], [], []>} : vector<20x176xbf16>, vector<176x144xbf16>, vector<20x144xf32> -> vector<20x144xf32>
    %157 = arith.addf %151, %156 : vector<20x144xf32>
    %c2_122 = arith.constant 2 : index
    %c0_123 = arith.constant 0 : index
    %158 = vector.load %arg54[%c2_122, %c0_123] : memref<22x176xf32, #tpu.memory_space<vmem>>, vector<20x176xf32>
    %159 = arith.truncf %158 : vector<20x176xf32> to vector<20x176xbf16>
    %c2_124 = arith.constant 2 : index
    %c0_125 = arith.constant 0 : index
    %c0_126 = arith.constant 0 : index
    %160 = vector.load %arg46[%c2_124, %c0_125, %c0_126] : memref<3x176x144xbf16, #tpu.memory_space<vmem>>, vector<1x176x144xbf16>
    %161 = vector.shape_cast %160 : vector<1x176x144xbf16> to vector<176x144xbf16>
    %cst_127 = arith.constant dense<0.000000e+00> : vector<20x144xf32>
    %162 = tpu.matmul %159, %161, %cst_127 {dimension_numbers = #tpu.dot_dimension_numbers<[1], [0], [0], [1], [0, 0, 1, 1], [], []>} : vector<20x176xbf16>, vector<176x144xbf16>, vector<20x144xf32> -> vector<20x144xf32>
    %163 = arith.addf %157, %162 : vector<20x144xf32>
    %c0_128 = arith.constant 0 : index
    %c0_129 = arith.constant 0 : index
    %164 = vector.load %arg20[%c0_128, %c0_129] : memref<1x144xf32, #tpu.memory_space<vmem>>, vector<1x144xf32>
    %165 = vector.broadcast %164 : vector<1x144xf32> to vector<20x144xf32>
    %166 = arith.addf %163, %165 : vector<20x144xf32>
    %cst_130 = arith.constant 0.000000e+00 : f32
    %167 = vector.broadcast %cst_130 : f32 to vector<20x144xf32>
    %168 = arith.maximumf %166, %167 : vector<20x144xf32>
    %169 = arith.truncf %168 : vector<20x144xf32> to vector<20x144xbf16>
    %c0_131 = arith.constant 0 : index
    %c0_132 = arith.constant 0 : index
    %170 = vector.load %arg21[%c0_131, %c0_132] : memref<14x20xbf16, #tpu.memory_space<vmem>>, vector<14x20xbf16>
    %cst_133 = arith.constant dense<0.000000e+00> : vector<14x144xf32>
    %171 = tpu.matmul %170, %169, %cst_133 {dimension_numbers = #tpu.dot_dimension_numbers<[1], [0], [0], [1], [0, 0, 1, 1], [], []>} : vector<14x20xbf16>, vector<20x144xbf16>, vector<14x144xf32> -> vector<14x144xf32>
    %c0_134 = arith.constant 0 : index
    %c0_135 = arith.constant 0 : index
    %172 = vector.load %arg22[%c0_134, %c0_135] : memref<14x20xbf16, #tpu.memory_space<vmem>>, vector<14x20xbf16>
    %cst_136 = arith.constant dense<0.000000e+00> : vector<14x144xf32>
    %173 = tpu.matmul %172, %169, %cst_136 {dimension_numbers = #tpu.dot_dimension_numbers<[1], [0], [0], [1], [0, 0, 1, 1], [], []>} : vector<14x20xbf16>, vector<20x144xbf16>, vector<14x144xf32> -> vector<14x144xf32>
    %174 = arith.maximumf %171, %173 : vector<14x144xf32>
    %175 = arith.truncf %174 : vector<14x144xf32> to vector<14x144xbf16>
    %c0_137 = arith.constant 0 : index
    %c0_138 = arith.constant 0 : index
    %176 = vector.load %arg47[%c0_137, %c0_138] : memref<144x112xbf16, #tpu.memory_space<vmem>>, vector<144x112xbf16>
    %cst_139 = arith.constant dense<0.000000e+00> : vector<14x112xf32>
    %177 = tpu.matmul %175, %176, %cst_139 {dimension_numbers = #tpu.dot_dimension_numbers<[1], [0], [0], [1], [0, 0, 1, 1], [], []>} : vector<14x144xbf16>, vector<144x112xbf16>, vector<14x112xf32> -> vector<14x112xf32>
    %c0_140 = arith.constant 0 : index
    %c0_141 = arith.constant 0 : index
    %178 = vector.load %arg48[%c0_140, %c0_141] : memref<144x112xbf16, #tpu.memory_space<vmem>>, vector<144x112xbf16>
    %cst_142 = arith.constant dense<0.000000e+00> : vector<14x112xf32>
    %179 = tpu.matmul %175, %178, %cst_142 {dimension_numbers = #tpu.dot_dimension_numbers<[1], [0], [0], [1], [0, 0, 1, 1], [], []>} : vector<14x144xbf16>, vector<144x112xbf16>, vector<14x112xf32> -> vector<14x112xf32>
    %180 = arith.maximumf %177, %179 : vector<14x112xf32>
    %c0_143 = arith.constant 0 : index
    %c0_144 = arith.constant 0 : index
    %181 = vector.load %arg55[%c0_143, %c0_144] : memref<14x112xf32, #tpu.memory_space<vmem>>, vector<14x112xf32>
    tpu.vector_store %arg55[%c0_143, %c0_144], %180 {strides = array<i32>} : memref<14x112xf32, #tpu.memory_space<vmem>>, vector<14x112xf32>,
    %c9_i32_145 = arith.constant 9 : i32
    %182 = tpu.memref_slice %arg57[%c9_i32_145] : memref<12x!tpu.dma_semaphore, #tpu.memory_space<semaphore_mem>> -> memref<1x!tpu.dma_semaphore, #tpu.memory_space<semaphore_mem>>
    %183 = tpu.memref_squeeze %182 : memref<1x!tpu.dma_semaphore, #tpu.memory_space<semaphore_mem>> -> memref<!tpu.dma_semaphore, #tpu.memory_space<semaphore_mem>>
    tpu.wait_dma2 semaphore(%183 : memref<!tpu.dma_semaphore, #tpu.memory_space<semaphore_mem>>) src(%arg25 : memref<3x112x80xbf16, #tpu.memory_space<any>>) dst(%arg49 : memref<3x112x80xbf16, #tpu.memory_space<vmem>>)
    %c10_i32_146 = arith.constant 10 : i32
    %184 = tpu.memref_slice %arg57[%c10_i32_146] : memref<12x!tpu.dma_semaphore, #tpu.memory_space<semaphore_mem>> -> memref<1x!tpu.dma_semaphore, #tpu.memory_space<semaphore_mem>>
    %185 = tpu.memref_squeeze %184 : memref<1x!tpu.dma_semaphore, #tpu.memory_space<semaphore_mem>> -> memref<!tpu.dma_semaphore, #tpu.memory_space<semaphore_mem>>
    tpu.wait_dma2 semaphore(%185 : memref<!tpu.dma_semaphore, #tpu.memory_space<semaphore_mem>>) src(%arg29 : memref<80x48xbf16, #tpu.memory_space<any>>) dst(%arg50 : memref<80x48xbf16, #tpu.memory_space<vmem>>)
    %c11_i32_147 = arith.constant 11 : i32
    %186 = tpu.memref_slice %arg57[%c11_i32_147] : memref<12x!tpu.dma_semaphore, #tpu.memory_space<semaphore_mem>> -> memref<1x!tpu.dma_semaphore, #tpu.memory_space<semaphore_mem>>
    %187 = tpu.memref_squeeze %186 : memref<1x!tpu.dma_semaphore, #tpu.memory_space<semaphore_mem>> -> memref<!tpu.dma_semaphore, #tpu.memory_space<semaphore_mem>>
    tpu.wait_dma2 semaphore(%187 : memref<!tpu.dma_semaphore, #tpu.memory_space<semaphore_mem>>) src(%arg30 : memref<80x48xbf16, #tpu.memory_space<any>>) dst(%arg51 : memref<80x48xbf16, #tpu.memory_space<vmem>>)
    %c0_148 = arith.constant 0 : index
    %c0_149 = arith.constant 0 : index
    %188 = vector.load %arg55[%c0_148, %c0_149] : memref<14x112xf32, #tpu.memory_space<vmem>>, vector<12x112xf32>
    %189 = arith.truncf %188 : vector<12x112xf32> to vector<12x112xbf16>
    %c0_150 = arith.constant 0 : index
    %c0_151 = arith.constant 0 : index
    %c0_152 = arith.constant 0 : index
    %190 = vector.load %arg49[%c0_150, %c0_151, %c0_152] : memref<3x112x80xbf16, #tpu.memory_space<vmem>>, vector<1x112x80xbf16>
    %191 = vector.shape_cast %190 : vector<1x112x80xbf16> to vector<112x80xbf16>
    %cst_153 = arith.constant dense<0.000000e+00> : vector<12x80xf32>
    %192 = tpu.matmul %189, %191, %cst_153 {dimension_numbers = #tpu.dot_dimension_numbers<[1], [0], [0], [1], [0, 0, 1, 1], [], []>} : vector<12x112xbf16>, vector<112x80xbf16>, vector<12x80xf32> -> vector<12x80xf32>
    %c1_154 = arith.constant 1 : index
    %c0_155 = arith.constant 0 : index
    %193 = vector.load %arg55[%c1_154, %c0_155] : memref<14x112xf32, #tpu.memory_space<vmem>>, vector<12x112xf32>
    %194 = arith.truncf %193 : vector<12x112xf32> to vector<12x112xbf16>
    %c1_156 = arith.constant 1 : index
    %c0_157 = arith.constant 0 : index
    %c0_158 = arith.constant 0 : index
    %195 = vector.load %arg49[%c1_156, %c0_157, %c0_158] : memref<3x112x80xbf16, #tpu.memory_space<vmem>>, vector<1x112x80xbf16>
    %196 = vector.shape_cast %195 : vector<1x112x80xbf16> to vector<112x80xbf16>
    %cst_159 = arith.constant dense<0.000000e+00> : vector<12x80xf32>
    %197 = tpu.matmul %194, %196, %cst_159 {dimension_numbers = #tpu.dot_dimension_numbers<[1], [0], [0], [1], [0, 0, 1, 1], [], []>} : vector<12x112xbf16>, vector<112x80xbf16>, vector<12x80xf32> -> vector<12x80xf32>
    %198 = arith.addf %192, %197 : vector<12x80xf32>
    %c2_160 = arith.constant 2 : index
    %c0_161 = arith.constant 0 : index
    %199 = vector.load %arg55[%c2_160, %c0_161] : memref<14x112xf32, #tpu.memory_space<vmem>>, vector<12x112xf32>
    %200 = arith.truncf %199 : vector<12x112xf32> to vector<12x112xbf16>
    %c2_162 = arith.constant 2 : index
    %c0_163 = arith.constant 0 : index
    %c0_164 = arith.constant 0 : index
    %201 = vector.load %arg49[%c2_162, %c0_163, %c0_164] : memref<3x112x80xbf16, #tpu.memory_space<vmem>>, vector<1x112x80xbf16>
    %202 = vector.shape_cast %201 : vector<1x112x80xbf16> to vector<112x80xbf16>
    %cst_165 = arith.constant dense<0.000000e+00> : vector<12x80xf32>
    %203 = tpu.matmul %200, %202, %cst_165 {dimension_numbers = #tpu.dot_dimension_numbers<[1], [0], [0], [1], [0, 0, 1, 1], [], []>} : vector<12x112xbf16>, vector<112x80xbf16>, vector<12x80xf32> -> vector<12x80xf32>
    %204 = arith.addf %198, %203 : vector<12x80xf32>
    %c0_166 = arith.constant 0 : index
    %c0_167 = arith.constant 0 : index
    %205 = vector.load %arg26[%c0_166, %c0_167] : memref<1x80xf32, #tpu.memory_space<vmem>>, vector<1x80xf32>
    %206 = vector.broadcast %205 : vector<1x80xf32> to vector<12x80xf32>
    %207 = arith.addf %204, %206 : vector<12x80xf32>
    %cst_168 = arith.constant 0.000000e+00 : f32
    %208 = vector.broadcast %cst_168 : f32 to vector<12x80xf32>
    %209 = arith.maximumf %207, %208 : vector<12x80xf32>
    %210 = arith.truncf %209 : vector<12x80xf32> to vector<12x80xbf16>
    %c0_169 = arith.constant 0 : index
    %c0_170 = arith.constant 0 : index
    %211 = vector.load %arg27[%c0_169, %c0_170] : memref<6x12xbf16, #tpu.memory_space<vmem>>, vector<6x12xbf16>
    %cst_171 = arith.constant dense<0.000000e+00> : vector<6x80xf32>
    %212 = tpu.matmul %211, %210, %cst_171 {dimension_numbers = #tpu.dot_dimension_numbers<[1], [0], [0], [1], [0, 0, 1, 1], [], []>} : vector<6x12xbf16>, vector<12x80xbf16>, vector<6x80xf32> -> vector<6x80xf32>
    %c0_172 = arith.constant 0 : index
    %c0_173 = arith.constant 0 : index
    %213 = vector.load %arg28[%c0_172, %c0_173] : memref<6x12xbf16, #tpu.memory_space<vmem>>, vector<6x12xbf16>
    %cst_174 = arith.constant dense<0.000000e+00> : vector<6x80xf32>
    %214 = tpu.matmul %213, %210, %cst_174 {dimension_numbers = #tpu.dot_dimension_numbers<[1], [0], [0], [1], [0, 0, 1, 1], [], []>} : vector<6x12xbf16>, vector<12x80xbf16>, vector<6x80xf32> -> vector<6x80xf32>
    %215 = arith.maximumf %212, %214 : vector<6x80xf32>
    %216 = arith.truncf %215 : vector<6x80xf32> to vector<6x80xbf16>
    %c0_175 = arith.constant 0 : index
    %c0_176 = arith.constant 0 : index
    %217 = vector.load %arg50[%c0_175, %c0_176] : memref<80x48xbf16, #tpu.memory_space<vmem>>, vector<80x48xbf16>
    %cst_177 = arith.constant dense<0.000000e+00> : vector<6x48xf32>
    %218 = tpu.matmul %216, %217, %cst_177 {dimension_numbers = #tpu.dot_dimension_numbers<[1], [0], [0], [1], [0, 0, 1, 1], [], []>} : vector<6x80xbf16>, vector<80x48xbf16>, vector<6x48xf32> -> vector<6x48xf32>
    %c0_178 = arith.constant 0 : index
    %c0_179 = arith.constant 0 : index
    %219 = vector.load %arg51[%c0_178, %c0_179] : memref<80x48xbf16, #tpu.memory_space<vmem>>, vector<80x48xbf16>
    %cst_180 = arith.constant dense<0.000000e+00> : vector<6x48xf32>
    %220 = tpu.matmul %216, %219, %cst_180 {dimension_numbers = #tpu.dot_dimension_numbers<[1], [0], [0], [1], [0, 0, 1, 1], [], []>} : vector<6x80xbf16>, vector<80x48xbf16>, vector<6x48xf32> -> vector<6x48xf32>
    %221 = arith.maximumf %218, %220 : vector<6x48xf32>
    %222 = vector.extract_strided_slice %221 {offsets = [0, 0], sizes = [2, 48], strides = [1, 1]} : vector<6x48xf32> to vector<2x48xf32>
    %c0_181 = arith.constant 0 : index
    %c0_182 = arith.constant 0 : index
    %223 = vector.load %arg56[%c0_181, %c0_182] : memref<2x144xf32, #tpu.memory_space<vmem>>, vector<2x48xf32>
    tpu.vector_store %arg56[%c0_181, %c0_182], %222 {strides = array<i32>} : memref<2x144xf32, #tpu.memory_space<vmem>>, vector<2x48xf32>,
    %224 = vector.extract_strided_slice %221 {offsets = [2, 0], sizes = [2, 48], strides = [1, 1]} : vector<6x48xf32> to vector<2x48xf32>
    %c0_183 = arith.constant 0 : index
    %c48 = arith.constant 48 : index
    %225 = vector.load %arg56[%c0_183, %c48] : memref<2x144xf32, #tpu.memory_space<vmem>>, vector<2x48xf32>
    tpu.vector_store %arg56[%c0_183, %c48], %224 {strides = array<i32>} : memref<2x144xf32, #tpu.memory_space<vmem>>, vector<2x48xf32>,
    %226 = vector.extract_strided_slice %221 {offsets = [4, 0], sizes = [2, 48], strides = [1, 1]} : vector<6x48xf32> to vector<2x48xf32>
    %c0_184 = arith.constant 0 : index
    %c96 = arith.constant 96 : index
    %227 = vector.load %arg56[%c0_184, %c96] : memref<2x144xf32, #tpu.memory_space<vmem>>, vector<2x48xf32>
    tpu.vector_store %arg56[%c0_184, %c96], %226 {strides = array<i32>} : memref<2x144xf32, #tpu.memory_space<vmem>>, vector<2x48xf32>,
    %c0_185 = arith.constant 0 : index
    %c0_186 = arith.constant 0 : index
    %228 = vector.load %arg56[%c0_185, %c0_186] : memref<2x144xf32, #tpu.memory_space<vmem>>, vector<2x144xf32>
    %c0_187 = arith.constant 0 : index
    %c0_188 = arith.constant 0 : index
    %229 = vector.load %arg31[%c0_187, %c0_188] : memref<144x10xf32, #tpu.memory_space<vmem>>, vector<144x10xf32>
    %cst_189 = arith.constant dense<0.000000e+00> : vector<2x10xf32>
    %230 = tpu.matmul %228, %229, %cst_189 {dimension_numbers = #tpu.dot_dimension_numbers<[1], [0], [0], [1], [0, 0, 1, 1], [], []>} : vector<2x144xf32>, vector<144x10xf32>, vector<2x10xf32> -> vector<2x10xf32>
    %c0_190 = arith.constant 0 : index
    %c0_191 = arith.constant 0 : index
    %231 = vector.load %arg32[%c0_190, %c0_191] : memref<1x10xf32, #tpu.memory_space<vmem>>, vector<1x10xf32>
    %232 = vector.broadcast %231 : vector<1x10xf32> to vector<2x10xf32>
    %233 = arith.addf %230, %232 : vector<2x10xf32>
    %cst_192 = arith.constant 0.000000e+00 : f32
    %234 = vector.broadcast %cst_192 : f32 to vector<2x10xf32>
    %235 = arith.maximumf %233, %234 : vector<2x10xf32>
    %c0_193 = arith.constant 0 : index
    %c0_194 = arith.constant 0 : index
    %236 = vector.load %arg33[%c0_193, %c0_194] : memref<10x6xf32, #tpu.memory_space<vmem>>, vector<10x6xf32>
    %cst_195 = arith.constant dense<0.000000e+00> : vector<2x6xf32>
    %237 = tpu.matmul %235, %236, %cst_195 {dimension_numbers = #tpu.dot_dimension_numbers<[1], [0], [0], [1], [0, 0, 1, 1], [], []>} : vector<2x10xf32>, vector<10x6xf32>, vector<2x6xf32> -> vector<2x6xf32>
    %c0_196 = arith.constant 0 : index
    %c0_197 = arith.constant 0 : index
    %238 = vector.load %arg34[%c0_196, %c0_197] : memref<1x6xf32, #tpu.memory_space<vmem>>, vector<1x6xf32>
    %239 = vector.broadcast %238 : vector<1x6xf32> to vector<2x6xf32>
    %240 = arith.addf %237, %239 : vector<2x6xf32>
    %cst_198 = arith.constant dense<0.000000e+00> : vector<2xf32>
    %241 = vector.multi_reduction <add>, %240, %cst_198 [1] : vector<2x6xf32> to vector<2xf32>
    %242 = vector.shape_cast %241 : vector<2xf32> to vector<2x1xf32>
    %cst_199 = arith.constant 6.000000e+00 : f32
    %243 = vector.broadcast %cst_199 : f32 to vector<2x1xf32>
    %244 = arith.divf %242, %243 : vector<2x1xf32>
    %245 = vector.broadcast %244 : vector<2x1xf32> to vector<2x6xf32>
    %246 = arith.subf %240, %245 : vector<2x6xf32>
    %c0_200 = arith.constant 0 : index
    %c0_201 = arith.constant 0 : index
    %247 = vector.load %arg35[%c0_200, %c0_201] : memref<144x10xf32, #tpu.memory_space<vmem>>, vector<144x10xf32>
    %cst_202 = arith.constant dense<0.000000e+00> : vector<2x10xf32>
    %248 = tpu.matmul %228, %247, %cst_202 {dimension_numbers = #tpu.dot_dimension_numbers<[1], [0], [0], [1], [0, 0, 1, 1], [], []>} : vector<2x144xf32>, vector<144x10xf32>, vector<2x10xf32> -> vector<2x10xf32>
    %c0_203 = arith.constant 0 : index
    %c0_204 = arith.constant 0 : index
    %249 = vector.load %arg36[%c0_203, %c0_204] : memref<1x10xf32, #tpu.memory_space<vmem>>, vector<1x10xf32>
    %250 = vector.broadcast %249 : vector<1x10xf32> to vector<2x10xf32>
    %251 = arith.addf %248, %250 : vector<2x10xf32>
    %cst_205 = arith.constant 0.000000e+00 : f32
    %252 = vector.broadcast %cst_205 : f32 to vector<2x10xf32>
    %253 = arith.maximumf %251, %252 : vector<2x10xf32>
    %c0_206 = arith.constant 0 : index
    %c0_207 = arith.constant 0 : index
    %254 = vector.load %arg37[%c0_206, %c0_207] : memref<10x1xf32, #tpu.memory_space<vmem>>, vector<10x1xf32>
    %cst_208 = arith.constant dense<0.000000e+00> : vector<2x1xf32>
    %255 = tpu.matmul %253, %254, %cst_208 {dimension_numbers = #tpu.dot_dimension_numbers<[1], [0], [0], [1], [0, 0, 1, 1], [], []>} : vector<2x10xf32>, vector<10x1xf32>, vector<2x1xf32> -> vector<2x1xf32>
    %c0_209 = arith.constant 0 : index
    %c0_210 = arith.constant 0 : index
    %256 = vector.load %arg38[%c0_209, %c0_210] : memref<1x1xf32, #tpu.memory_space<vmem>>, vector<1x1xf32>
    %257 = vector.broadcast %256 : vector<1x1xf32> to vector<2x1xf32>
    %258 = arith.addf %255, %257 : vector<2x1xf32>
    %259 = vector.broadcast %258 : vector<2x1xf32> to vector<2x6xf32>
    %260 = arith.addf %259, %246 : vector<2x6xf32>
    %c0_211 = arith.constant 0 : index
    %c0_212 = arith.constant 0 : index
    %261 = vector.load %arg39[%c0_211, %c0_212] : memref<2x6xf32, #tpu.memory_space<vmem>>, vector<2x6xf32>
    tpu.vector_store %arg39[%c0_211, %c0_212], %260 {strides = array<i32>} : memref<2x6xf32, #tpu.memory_space<vmem>>, vector<2x6xf32>,
    return
  }
}

</mosaic_0001>

<bundles_post_ra>
// kernel: forward.1
= control target key start
LH: loop header
LB: loop body
LE: loop exit
PB: predicated region body
PF: predicated region fallthrough
CT: control target
= control target key end

     0   :  { %s15470_s6 = smov 1   ;;  %s15471_s10 = smov 2   ;;  %s19940_s0 = inlined_call_operand.smem [shape: u32[40], index: -1, kind: input, shape index: {}] }
   0x1   :  { %s15524_s5 = sld [smem:[%s19940_s0]]   ;;  %s15472_s14 = smov 3  }
   0x2   :  { %s15529_s9 = sld [smem:[%s19940_s0 + %s15470_s6]]   ;;  %s15473_s18 = smov 4  }
   0x3   :  { %s15534_s13 = sld [smem:[%s19940_s0 + %s15471_s10]]   ;;  %s15474_s22 = smov 5  }
   0x4   :  { %s15539_s17 = sld [smem:[%s19940_s0 + %s15472_s14]]   ;;  %s15475_s26 = smov 6  }
   0x5   :  { %s15544_s21 = sld [smem:[%s19940_s0 + %s15473_s18]]   ;;  %s15476_s30 = smov 7  }
   0x6   :  { %s15549_s25 = sld [smem:[%s19940_s0 + %s15474_s22]]   ;;  %s15477_s4 = smov 8  }
   0x7   :  { %s15554_s29 = sld [smem:[%s19940_s0 + %s15475_s26]]   ;;  %s15478_s10 = smov 9  }
   0x8   :  { %s15559_s3 = sld [smem:[%s19940_s0 + %s15476_s30]]   ;;  %s15479_s15 = smov 10  }
   0x9   :  { %20187 = sst [smem:[#allocation48_spill]] %s15534_s13  ;;  %s15480_s20 = smov 11  }
   0xa   :  { %20188 = sst [smem:[#allocation49_spill]] %s15539_s17  ;;  %s15481_s26 = smov 12  }
   0xb   :  { %20189 = sst [smem:[#allocation50_spill]] %s15544_s21  ;;  %s15482_s1 = smov 13  }
   0xc   :  { %20190 = sst [smem:[#allocation51_spill]] %s15549_s25  ;;  %s15483_s7 = smov 14  }
   0xd   :  { %20191 = sst [smem:[#allocation52_spill]] %s15554_s29  ;;  %s15485_s22 = smov 16  }
   0xe   :  { %s15564_s8 = sld [smem:[%s19940_s0 + %s15477_s4]]   ;;  %s15486_s28 = smov 17  }
   0xf   :  { %s15569_s14 = sld [smem:[%s19940_s0 + %s15478_s10]]   ;;  %s15508_s16 = smov 39  }
  0x10   :  { %s15574_s19 = sld [smem:[%s19940_s0 + %s15479_s15]]   ;;  %s15484_s15 = smov 15  }
  0x11   :  { %s15579_s24 = sld [smem:[%s19940_s0 + %s15480_s20]]  }
  0x12   :  { %s15584_s30 = sld [smem:[%s19940_s0 + %s15481_s26]]  }
  0x13   :  { %s15589_s6 = sld [smem:[%s19940_s0 + %s15482_s1]]  }
  0x14   :  { %20192 = sst [smem:[#allocation53_spill]] %s15564_s8 }
  0x15   :  { %20193 = sst [smem:[#allocation54_spill]] %s15569_s14 }
  0x16   :  { %20194 = sst [smem:[#allocation55_spill]] %s15574_s19 }
  0x17   :  { %s15594_s12 = sld [smem:[%s19940_s0 + %s15483_s7]]   ;;  %s15487_s7 = smov 18  }
  0x18   :  { %s15599_s20 = sld [smem:[%s19940_s0 + %s15484_s15]]   ;;  %s15488_s15 = smov 19  }
  0x19   :  { %s15604_s27 = sld [smem:[%s19940_s0 + %s15485_s22]]   ;;  %s15489_s22 = smov 20  }
  0x1a   :  { %s15609_s4 = sld [smem:[%s19940_s0 + %s15486_s28]]   ;;  %s15490_s28 = smov 21  }
  0x1b   :  { %s15629_s19 = sld [smem:[%s19940_s0 + %s15490_s28]]   ;;  %s15494_s28 = smov 25  }
  0x1d   :  { %20195 = sst [smem:[#allocation56_spill]] %s15594_s12 }
  0x1e   :  { %20196 = sst [smem:[#allocation57_spill]] %s15599_s20 }
  0x1f   :  { %20197 = sst [smem:[#allocation58_spill]] %s15604_s27 }
  0x20   :  { %s15614_s12 = sld [smem:[%s19940_s0 + %s15487_s7]]   ;;  %s15491_s7 = smov 22  }
  0x21   :  { %s15619_s20 = sld [smem:[%s19940_s0 + %s15488_s15]]   ;;  %s15492_s15 = smov 23  }
  0x22   :  { %s15624_s27 = sld [smem:[%s19940_s0 + %s15489_s22]]   ;;  %s15493_s22 = smov 24  }
  0x23   :  { %20199 = sst [smem:[#allocation60_spill]] %s15629_s19 }
  0x24   :  { %s15634_s14 = sld [smem:[%s19940_s0 + %s15491_s7]]   ;;  %s15495_s7 = smov 26  }
  0x25   :  { %s15639_s8 = sld [smem:[%s19940_s0 + %s15492_s15]]   ;;  %s15496_s15 = smov 27  }
  0x26   :  { %s15649_s19 = sld [smem:[%s19940_s0 + %s15494_s28]]   ;;  %s15498_s28 = smov 29  }
  0x27   :  { %s15659_s29 = sld [smem:[%s19940_s0 + %s15496_s15]]   ;;  %s15500_s15 = smov 31  }
  0x28   :  { %20198 = sst [smem:[#allocation59_spill]] %s15624_s27 }
  0x29   :  { %s15644_s27 = sld [smem:[%s19940_s0 + %s15493_s22]]   ;;  %s15497_s22 = smov 28  }
  0x2a   :  { %20200 = sst [smem:[#allocation61_spill]] %s15634_s14 }
  0x2b   :  { %s15654_s14 = sld [smem:[%s19940_s0 + %s15495_s7]]   ;;  %s15499_s7 = smov 30  }
  0x2c   :  { %s15664_s25 = sld [smem:[%s19940_s0 + %s15497_s22]]   ;;  %s15501_s22 = smov 32  }
  0x2d   :  { %20202 = sst [smem:[#allocation63_spill]] %s15659_s29 }
  0x2e   :  { %s15669_s21 = sld [smem:[%s19940_s0 + %s15498_s28]]   ;;  %s15502_s28 = smov 33  }
  0x2f   :  { %s15679_s29 = sld [smem:[%s19940_s0 + %s15500_s15]]   ;;  %s15504_s15 = smov 35  }
  0x30   :  { %s15689_s13 = sld [smem:[%s19940_s0 + %s15502_s28]]   ;;  %s15506_s28 = smov 37  }
  0x31   :  { %20201 = sst [smem:[#allocation62_spill]] %s15654_s14 }
  0x32   :  { %20203 = sst [smem:[#allocation64_spill]] %s15664_s25 }
  0x33   :  { %s15674_s14 = sld [smem:[%s19940_s0 + %s15499_s7]]   ;;  %s15503_s7 = smov 34  }
  0x34   :  { %s15684_s25 = sld [smem:[%s19940_s0 + %s15501_s22]]   ;;  %s15505_s22 = smov 36  }
  0x35   :  { %20204 = sst [smem:[#allocation65_spill]] %s15679_s29 }
  0x36   :  { %20206 = sst [smem:[#allocation67_spill]] %s15689_s13 }
  0x37   :  { %s15694_s17 = sld [smem:[%s19940_s0 + %s15503_s7]]   ;;  %s15507_s7 = smov 38  }
  0x38   :  { %s15699_s29 = sld [smem:[%s19940_s0 + %s15504_s15]]  }
  0x39   :  { %s15709_s13 = sld [smem:[%s19940_s0 + %s15506_s28]]  }
  0x3a   :  { %20205 = sst [smem:[#allocation66_spill]] %s15684_s25 }
  0x3b   :  { %s15704_s25 = sld [smem:[%s19940_s0 + %s15505_s22]]  }
  0x3d   :  { %20207 = sst [smem:[#allocation68_spill]] %s15694_s17 }
  0x3e   :  { %20208 = sst [smem:[#allocation69_spill]] %s15699_s29 }
  0x3f   :  { %s13030_s17 = sld [smem:[%s19940_s0 + %s15507_s7]]  }
  0x40   :  { %s15717_s29 = sld [smem:[%s19940_s0 + %s15508_s16]]  }
  0x45   :  { %v84_v0 = vstv %s13030_s17 }
  0x46   :  { %85 = vst [vmem:[#allocation20] sm:$0x1] %v84_v0 }
  0x47   :  { %86 = vsyncpa [#allocation22], 0  ;;  %v180_v1 = vld [vmem:[%s15559_s3] sm:$0xff]  ;;  %v182_v2 = vld [vmem:[%s15559_s3 + $0x8] sm:$0xff] }
  0x48   :  { %181 = vst [vmem:[#allocation2] sm:$0xff] %v180_v1  ;;  %183 = vst [vmem:[#allocation2 + $0x8] sm:$0xff] %v182_v2  ;;  %v184_v3 = vld [vmem:[%s15559_s3 + $0x10] sm:$0xff]  ;;  %v186_v4 = vld [vmem:[%s15559_s3 + $0x18] sm:$0xff] }
  0x49   :  { %v188_v5 = vld [vmem:[%s15559_s3 + $0x20] sm:$0xff]  ;;  %185 = vst [vmem:[#allocation2 + $0x10] sm:$0xff] %v184_v3  ;;  %187 = vst [vmem:[#allocation2 + $0x18] sm:$0xff] %v186_v4  ;;  %v190_v6 = vld [vmem:[%s15559_s3 + $0x28] sm:$0xff] }
  0x4a   :  { %189 = vst [vmem:[#allocation2 + $0x20] sm:$0xff] %v188_v5  ;;  %v192_v7 = vld [vmem:[%s15559_s3 + $0x30] sm:$0xff]  ;;  %v194_v8 = vld [vmem:[%s15559_s3 + $0x38] sm:$0xff]  ;;  %191 = vst [vmem:[#allocation2 + $0x28] sm:$0xff] %v190_v6 }
  0x4b   :  { %193 = vst [vmem:[#allocation2 + $0x30] sm:$0xff] %v192_v7  ;;  %195 = vst [vmem:[#allocation2 + $0x38] sm:$0xff] %v194_v8  ;;  %v196_v9 = vld [vmem:[%s15559_s3 + $0x40] sm:$0xff]  ;;  %v198_v10 = vld [vmem:[%s15559_s3 + $0x48] sm:$0xff] }
  0x4c   :  { %v200_v11 = vld [vmem:[%s15559_s3 + $0x50] sm:$0xff]  ;;  %197 = vst [vmem:[#allocation2 + $0x40] sm:$0xff] %v196_v9  ;;  %199 = vst [vmem:[#allocation2 + $0x48] sm:$0xff] %v198_v10  ;;  %v202_v12 = vld [vmem:[%s15559_s3 + $0x58] sm:$0xff] }
  0x4d   :  { %201 = vst [vmem:[#allocation2 + $0x50] sm:$0xff] %v200_v11  ;;  %v204_v13 = vld [vmem:[%s15559_s3 + $0x60] sm:$0xff]  ;;  %v206_v14 = vld [vmem:[%s15559_s3 + $0x68] sm:$0xff]  ;;  %203 = vst [vmem:[#allocation2 + $0x58] sm:$0xff] %v202_v12 }
  0x4e   :  { %205 = vst [vmem:[#allocation2 + $0x60] sm:$0xff] %v204_v13  ;;  %207 = vst [vmem:[#allocation2 + $0x68] sm:$0xff] %v206_v14  ;;  %v208_v15 = vld [vmem:[%s15559_s3 + $0x70] sm:$0xff]  ;;  %v210_v16 = vld [vmem:[%s15559_s3 + $0x78] sm:$0xff] }
  0x4f   :  { %v212_v17 = vld [vmem:[%s15559_s3 + $0x80] sm:$0xff]  ;;  %209 = vst [vmem:[#allocation2 + $0x70] sm:$0xff] %v208_v15  ;;  %211 = vst [vmem:[#allocation2 + $0x78] sm:$0xff] %v210_v16  ;;  %v214_v18 = vld [vmem:[%s15559_s3 + $0x88] sm:$0xff] }
  0x50   :  { %213 = vst [vmem:[#allocation2 + $0x80] sm:$0xff] %v212_v17  ;;  %v216_v19 = vld [vmem:[%s15559_s3 + $0x90] sm:$0xff]  ;;  %v218_v20 = vld [vmem:[%s15559_s3 + $0x98] sm:$0xff]  ;;  %215 = vst [vmem:[#allocation2 + $0x88] sm:$0xff] %v214_v18 }
  0x51   :  { %217 = vst [vmem:[#allocation2 + $0x90] sm:$0xff] %v216_v19  ;;  %219 = vst [vmem:[#allocation2 + $0x98] sm:$0xff] %v218_v20  ;;  %v220_v21 = vld [vmem:[%s15559_s3 + $0xa0] sm:$0xff]  ;;  %v222_v22 = vld [vmem:[%s15559_s3 + $0xa8] sm:$0xff] }
  0x52   :  { %v224_v23 = vld [vmem:[%s15559_s3 + $0xb0] sm:$0xff]  ;;  %221 = vst [vmem:[#allocation2 + $0xa0] sm:$0xff] %v220_v21  ;;  %223 = vst [vmem:[#allocation2 + $0xa8] sm:$0xff] %v222_v22  ;;  %v226_v24 = vld [vmem:[%s15559_s3 + $0xb8] sm:$0xff] }
  0x53   :  { %225 = vst [vmem:[#allocation2 + $0xb0] sm:$0xff] %v224_v23  ;;  %v228_v25 = vld [vmem:[%s15559_s3 + $0xc0] sm:$0xff]  ;;  %v230_v26 = vld [vmem:[%s15559_s3 + $0xc8] sm:$0xff]  ;;  %227 = vst [vmem:[#allocation2 + $0xb8] sm:$0xff] %v226_v24 }
  0x54   :  { %229 = vst [vmem:[#allocation2 + $0xc0] sm:$0xff] %v228_v25  ;;  %231 = vst [vmem:[#allocation2 + $0xc8] sm:$0xff] %v230_v26  ;;  %v232_v27 = vld [vmem:[%s15559_s3 + $0xd0] sm:$0xff]  ;;  %v234_v28 = vld [vmem:[%s15559_s3 + $0xd8] sm:$0xff] }
  0x55   :  { %v236_v29 = vld [vmem:[%s15559_s3 + $0xe0] sm:$0xff]  ;;  %233 = vst [vmem:[#allocation2 + $0xd0] sm:$0xff] %v232_v27  ;;  %235 = vst [vmem:[#allocation2 + $0xd8] sm:$0xff] %v234_v28  ;;  %v238_v30 = vld [vmem:[%s15559_s3 + $0xe8] sm:$0xff] }
  0x56   :  { %237 = vst [vmem:[#allocation2 + $0xe0] sm:$0xff] %v236_v29  ;;  %v240_v31 = vld [vmem:[%s15559_s3 + $0xf0] sm:$0xff]  ;;  %v242_v32 = vld [vmem:[%s15559_s3 + $0xf8] sm:$0xff]  ;;  %239 = vst [vmem:[#allocation2 + $0xe8] sm:$0xff] %v238_v30 }
  0x57   :  { %241 = vst [vmem:[#allocation2 + $0xf0] sm:$0xff] %v240_v31  ;;  %243 = vst [vmem:[#allocation2 + $0xf8] sm:$0xff] %v242_v32  ;;  %v244_v33 = vld [vmem:[%s15559_s3 + $0x100] sm:$0xff]  ;;  %v246_v34 = vld [vmem:[%s15559_s3 + $0x108] sm:$0xff] }
  0x58   :  { %v248_v35 = vld [vmem:[%s15559_s3 + $0x110] sm:$0xff]  ;;  %245 = vst [vmem:[#allocation2 + $0x100] sm:$0xff] %v244_v33  ;;  %247 = vst [vmem:[#allocation2 + $0x108] sm:$0xff] %v246_v34  ;;  %v250_v36 = vld [vmem:[%s15559_s3 + $0x118] sm:$0xff] }
  0x59   :  { %249 = vst [vmem:[#allocation2 + $0x110] sm:$0xff] %v248_v35  ;;  %v252_v37 = vld [vmem:[%s15559_s3 + $0x120] sm:$0xff]  ;;  %v254_v38 = vld [vmem:[%s15559_s3 + $0x128] sm:$0xff]  ;;  %251 = vst [vmem:[#allocation2 + $0x118] sm:$0xff] %v250_v36 }
  0x5a   :  { %253 = vst [vmem:[#allocation2 + $0x120] sm:$0xff] %v252_v37  ;;  %255 = vst [vmem:[#allocation2 + $0x128] sm:$0xff] %v254_v38  ;;  %v256_v39 = vld [vmem:[%s15559_s3 + $0x130] sm:$0xff]  ;;  %v258_v40 = vld [vmem:[%s15559_s3 + $0x138] sm:$0xff] }
  0x5b   :  { %v260_v41 = vld [vmem:[%s15559_s3 + $0x140] sm:$0xff]  ;;  %257 = vst [vmem:[#allocation2 + $0x130] sm:$0xff] %v256_v39  ;;  %259 = vst [vmem:[#allocation2 + $0x138] sm:$0xff] %v258_v40  ;;  %v262_v42 = vld [vmem:[%s15559_s3 + $0x148] sm:$0xff] }
  0x5c   :  { %261 = vst [vmem:[#allocation2 + $0x140] sm:$0xff] %v260_v41  ;;  %v264_v43 = vld [vmem:[%s15559_s3 + $0x150] sm:$0xff]  ;;  %v266_v44 = vld [vmem:[%s15559_s3 + $0x158] sm:$0xff]  ;;  %263 = vst [vmem:[#allocation2 + $0x148] sm:$0xff] %v262_v42 }
  0x5d   :  { %265 = vst [vmem:[#allocation2 + $0x150] sm:$0xff] %v264_v43  ;;  %267 = vst [vmem:[#allocation2 + $0x158] sm:$0xff] %v266_v44  ;;  %v268_v45 = vld [vmem:[%s15559_s3 + $0x160] sm:$0xff]  ;;  %v270_v46 = vld [vmem:[%s15559_s3 + $0x168] sm:$0xff] }
  0x5e   :  { %v272_v47 = vld [vmem:[%s15559_s3 + $0x170] sm:$0xff]  ;;  %269 = vst [vmem:[#allocation2 + $0x160] sm:$0xff] %v268_v45  ;;  %271 = vst [vmem:[#allocation2 + $0x168] sm:$0xff] %v270_v46  ;;  %v274_v48 = vld [vmem:[%s15559_s3 + $0x178] sm:$0xff] }
  0x5f   :  { %273 = vst [vmem:[#allocation2 + $0x170] sm:$0xff] %v272_v47  ;;  %v276_v49 = vld [vmem:[%s15559_s3 + $0x180] sm:$0xff]  ;;  %v278_v50 = vld [vmem:[%s15559_s3 + $0x188] sm:$0xff]  ;;  %275 = vst [vmem:[#allocation2 + $0x178] sm:$0xff] %v274_v48 }
  0x60   :  { %277 = vst [vmem:[#allocation2 + $0x180] sm:$0xff] %v276_v49  ;;  %279 = vst [vmem:[#allocation2 + $0x188] sm:$0xff] %v278_v50  ;;  %v280_v51 = vld [vmem:[%s15559_s3 + $0x190] sm:$0xff]  ;;  %v282_v52 = vld [vmem:[%s15559_s3 + $0x198] sm:$0xff] }
  0x61   :  { %v284_v53 = vld [vmem:[%s15559_s3 + $0x1a0] sm:$0xff]  ;;  %281 = vst [vmem:[#allocation2 + $0x190] sm:$0xff] %v280_v51  ;;  %283 = vst [vmem:[#allocation2 + $0x198] sm:$0xff] %v282_v52  ;;  %v286_v54 = vld [vmem:[%s15559_s3 + $0x1a8] sm:$0xff] }
  0x62   :  { %285 = vst [vmem:[#allocation2 + $0x1a0] sm:$0xff] %v284_v53  ;;  %v288_v55 = vld [vmem:[%s15559_s3 + $0x1b0] sm:$0xff]  ;;  %v290_v56 = vld [vmem:[%s15559_s3 + $0x1b8] sm:$0xff]  ;;  %287 = vst [vmem:[#allocation2 + $0x1a8] sm:$0xff] %v286_v54 }
  0x63   :  { %289 = vst [vmem:[#allocation2 + $0x1b0] sm:$0xff] %v288_v55  ;;  %291 = vst [vmem:[#allocation2 + $0x1b8] sm:$0xff] %v290_v56  ;;  %v292_v57 = vld [vmem:[%s15559_s3 + $0x1c0] sm:$0xff]  ;;  %v294_v58 = vld [vmem:[%s15559_s3 + $0x1c8] sm:$0xff] }
  0x64   :  { %v296_v59 = vld [vmem:[%s15559_s3 + $0x1d0] sm:$0xff]  ;;  %293 = vst [vmem:[#allocation2 + $0x1c0] sm:$0xff] %v292_v57  ;;  %295 = vst [vmem:[#allocation2 + $0x1c8] sm:$0xff] %v294_v58  ;;  %v298_v60 = vld [vmem:[%s15559_s3 + $0x1d8] sm:$0xff] }
  0x65   :  { %297 = vst [vmem:[#allocation2 + $0x1d0] sm:$0xff] %v296_v59  ;;  %v300_v61 = vld [vmem:[%s15559_s3 + $0x1e0] sm:$0xff]  ;;  %v302_v62 = vld [vmem:[%s15559_s3 + $0x1e8] sm:$0xff]  ;;  %299 = vst [vmem:[#allocation2 + $0x1d8] sm:$0xff] %v298_v60 }
  0x66   :  { %301 = vst [vmem:[#allocation2 + $0x1e0] sm:$0xff] %v300_v61  ;;  %303 = vst [vmem:[#allocation2 + $0x1e8] sm:$0xff] %v302_v62  ;;  %v304_v63 = vld [vmem:[%s15559_s3 + $0x1f0] sm:$0xff]  ;;  %v306_v0 = vld [vmem:[%s15559_s3 + $0x1f8] sm:$0xff] }
  0x67   :  { %v308_v1 = vld [vmem:[%s15559_s3 + $0x200] sm:$0xff]  ;;  %305 = vst [vmem:[#allocation2 + $0x1f0] sm:$0xff] %v304_v63  ;;  %307 = vst [vmem:[#allocation2 + $0x1f8] sm:$0xff] %v306_v0  ;;  %v310_v2 = vld [vmem:[%s15559_s3 + $0x208] sm:$0xff] }
  0x68   :  { %309 = vst [vmem:[#allocation2 + $0x200] sm:$0xff] %v308_v1  ;;  %v312_v3 = vld [vmem:[%s15559_s3 + $0x210] sm:$0xff]  ;;  %v314_v4 = vld [vmem:[%s15559_s3 + $0x218] sm:$0xff]  ;;  %311 = vst [vmem:[#allocation2 + $0x208] sm:$0xff] %v310_v2 }
  0x69   :  { %313 = vst [vmem:[#allocation2 + $0x210] sm:$0xff] %v312_v3  ;;  %315 = vst [vmem:[#allocation2 + $0x218] sm:$0xff] %v314_v4  ;;  %v316_v5 = vld [vmem:[%s15559_s3 + $0x220] sm:$0xff]  ;;  %v318_v6 = vld [vmem:[%s15559_s3 + $0x228] sm:$0xff] }
  0x6a   :  { %v320_v7 = vld [vmem:[%s15559_s3 + $0x230] sm:$0xff]  ;;  %317 = vst [vmem:[#allocation2 + $0x220] sm:$0xff] %v316_v5  ;;  %319 = vst [vmem:[#allocation2 + $0x228] sm:$0xff] %v318_v6  ;;  %v322_v8 = vld [vmem:[%s15559_s3 + $0x238] sm:$0xff] }
  0x6b   :  { %321 = vst [vmem:[#allocation2 + $0x230] sm:$0xff] %v320_v7  ;;  %v324_v9 = vld [vmem:[%s15559_s3 + $0x240] sm:$0xff]  ;;  %v326_v10 = vld [vmem:[%s15559_s3 + $0x248] sm:$0xff]  ;;  %323 = vst [vmem:[#allocation2 + $0x238] sm:$0xff] %v322_v8 }
  0x6c   :  { %325 = vst [vmem:[#allocation2 + $0x240] sm:$0xff] %v324_v9  ;;  %327 = vst [vmem:[#allocation2 + $0x248] sm:$0xff] %v326_v10  ;;  %v328_v11 = vld [vmem:[%s15559_s3 + $0x250] sm:$0xff]  ;;  %v330_v12 = vld [vmem:[%s15559_s3 + $0x258] sm:$0xff] }
  0x6d   :  { %v332_v13 = vld [vmem:[%s15559_s3 + $0x260] sm:$0xff]  ;;  %329 = vst [vmem:[#allocation2 + $0x250] sm:$0xff] %v328_v11  ;;  %331 = vst [vmem:[#allocation2 + $0x258] sm:$0xff] %v330_v12  ;;  %v334_v14 = vld [vmem:[%s15559_s3 + $0x268] sm:$0xff] }
  0x6e   :  { %333 = vst [vmem:[#allocation2 + $0x260] sm:$0xff] %v332_v13  ;;  %v336_v15 = vld [vmem:[%s15559_s3 + $0x270] sm:$0xff]  ;;  %v338_v16 = vld [vmem:[%s15559_s3 + $0x278] sm:$0xff]  ;;  %335 = vst [vmem:[#allocation2 + $0x268] sm:$0xff] %v334_v14 }
  0x6f   :  { %337 = vst [vmem:[#allocation2 + $0x270] sm:$0xff] %v336_v15  ;;  %339 = vst [vmem:[#allocation2 + $0x278] sm:$0xff] %v338_v16  ;;  %v340_v17 = vld [vmem:[%s15559_s3 + $0x280] sm:$0xff]  ;;  %v342_v18 = vld [vmem:[%s15559_s3 + $0x288] sm:$0xff] }
  0x70   :  { %v344_v19 = vld [vmem:[%s15559_s3 + $0x290] sm:$0xff]  ;;  %341 = vst [vmem:[#allocation2 + $0x280] sm:$0xff] %v340_v17  ;;  %343 = vst [vmem:[#allocation2 + $0x288] sm:$0xff] %v342_v18  ;;  %v346_v20 = vld [vmem:[%s15559_s3 + $0x298] sm:$0xff] }
  0x71   :  { %345 = vst [vmem:[#allocation2 + $0x290] sm:$0xff] %v344_v19  ;;  %v348_v21 = vld [vmem:[%s15559_s3 + $0x2a0] sm:$0xff]  ;;  %v13032_v22 = vld [vmem:[%s15559_s3 + $0x2a8] sm:$0xf]  ;;  %347 = vst [vmem:[#allocation2 + $0x298] sm:$0xff] %v346_v20 }
  0x72   :  { %349 = vst [vmem:[#allocation2 + $0x2a0] sm:$0xff] %v348_v21  ;;  %361 = vst [vmem:[#allocation2 + $0x2a8] sm:$0xf] %v13032_v22 }
  0x73   :  { %365 = vsyncadd [#allocation19], 10944  ;;  %v15806_v23 = vld [vmem:[%s15579_s24] sm:$0xff]  ;;  %v15809_v24 = vld [vmem:[%s15579_s24 + $0x8] sm:$0xff] }
  0x74   :  { %20209 = vst [vmem:[#allocation70_spill] sm:$0xff] %v15806_v23  ;;  %20210 = vst [vmem:[#allocation71_spill] sm:$0xff] %v15809_v24  ;;  %v15812_v25 = vld [vmem:[%s15579_s24 + $0x10] sm:$0xff]  ;;  %v15815_v26 = vld [vmem:[%s15579_s24 + $0x18] sm:$0xff] }
  0x75   :  { %20211 = vst [vmem:[#allocation72_spill] sm:$0xff] %v15812_v25  ;;  %20212 = vst [vmem:[#allocation73_spill] sm:$0xff] %v15815_v26  ;;  %v15818_v27 = vld [vmem:[%s15579_s24 + $0x20] sm:$0xff]  ;;  %v15821_v28 = vld [vmem:[%s15579_s24 + $0x28] sm:$0xff] }
  0x76   :  { %20213 = vst [vmem:[#allocation74_spill] sm:$0xff] %v15818_v27  ;;  %20214 = vst [vmem:[#allocation75_spill] sm:$0xff] %v15821_v28  ;;  %v15824_v29 = vld [vmem:[%s15579_s24 + $0x30] sm:$0xff]  ;;  %v15827_v30 = vld [vmem:[%s15579_s24 + $0x38] sm:$0xff] }
  0x77   :  { %20215 = vst [vmem:[#allocation76_spill] sm:$0xff] %v15824_v29  ;;  %20216 = vst [vmem:[#allocation77_spill] sm:$0xff] %v15827_v30  ;;  %v15830_v31 = vld [vmem:[%s15579_s24 + $0x40] sm:$0xff]  ;;  %v15833_v32 = vld [vmem:[%s15579_s24 + $0x48] sm:$0xff] }
  0x78   :  { %20217 = vst [vmem:[#allocation78_spill] sm:$0xff] %v15830_v31  ;;  %20218 = vst [vmem:[#allocation79_spill] sm:$0xff] %v15833_v32  ;;  %v15836_v33 = vld [vmem:[%s15579_s24 + $0x50] sm:$0xff]  ;;  %v15839_v34 = vld [vmem:[%s15579_s24 + $0x58] sm:$0xff] }
  0x79   :  { %20219 = vst [vmem:[#allocation80_spill] sm:$0xff] %v15836_v33  ;;  %20220 = vst [vmem:[#allocation81_spill] sm:$0xff] %v15839_v34  ;;  %v15842_v35 = vld [vmem:[%s15579_s24 + $0x60] sm:$0xff]  ;;  %v15845_v36 = vld [vmem:[%s15579_s24 + $0x68] sm:$0xff] }
  0x7a   :  { %20221 = vst [vmem:[#allocation82_spill] sm:$0xff] %v15842_v35  ;;  %20222 = vst [vmem:[#allocation83_spill] sm:$0xff] %v15845_v36  ;;  %v15848_v37 = vld [vmem:[%s15579_s24 + $0x70] sm:$0xff]  ;;  %v15851_v38 = vld [vmem:[%s15579_s24 + $0x78] sm:$0xff] }
  0x7b   :  { %20223 = vst [vmem:[#allocation84_spill] sm:$0xff] %v15848_v37  ;;  %20224 = vst [vmem:[#allocation85_spill] sm:$0xff] %v15851_v38  ;;  %v15854_v39 = vld [vmem:[%s15579_s24 + $0x80] sm:$0xff]  ;;  %v15857_v40 = vld [vmem:[%s15579_s24 + $0x88] sm:$0xff] }
  0x7c   :  { %20225 = vst [vmem:[#allocation86_spill] sm:$0xff] %v15854_v39  ;;  %20226 = vst [vmem:[#allocation87_spill] sm:$0xff] %v15857_v40  ;;  %v15860_v41 = vld [vmem:[%s15579_s24 + $0x90] sm:$0xff]  ;;  %v15863_v42 = vld [vmem:[%s15579_s24 + $0x98] sm:$0xff] }
  0x7d   :  { %20227 = vst [vmem:[#allocation88_spill] sm:$0xff] %v15860_v41  ;;  %20228 = vst [vmem:[#allocation89_spill] sm:$0xff] %v15863_v42  ;;  %v15866_v43 = vld [vmem:[%s15579_s24 + $0xa0] sm:$0xff]  ;;  %v15869_v44 = vld [vmem:[%s15579_s24 + $0xa8] sm:$0xff] }
  0x7e   :  { %20229 = vst [vmem:[#allocation90_spill] sm:$0xff] %v15866_v43  ;;  %20230 = vst [vmem:[#allocation91_spill] sm:$0xff] %v15869_v44  ;;  %v15872_v45 = vld [vmem:[%s15579_s24 + $0xb0] sm:$0xff]  ;;  %v15875_v46 = vld [vmem:[%s15579_s24 + $0xb8] sm:$0xff] }
  0x7f   :  { %20231 = vst [vmem:[#allocation92_spill] sm:$0xff] %v15872_v45  ;;  %20232 = vst [vmem:[#allocation93_spill] sm:$0xff] %v15875_v46  ;;  %v15878_v47 = vld [vmem:[%s15579_s24 + $0xc0] sm:$0xff]  ;;  %v15881_v48 = vld [vmem:[%s15579_s24 + $0xc8] sm:$0xff] }
  0x80   :  { %20233 = vst [vmem:[#allocation94_spill] sm:$0xff] %v15878_v47  ;;  %20234 = vst [vmem:[#allocation95_spill] sm:$0xff] %v15881_v48  ;;  %v15884_v49 = vld [vmem:[%s15579_s24 + $0xd0] sm:$0xff]  ;;  %v15887_v50 = vld [vmem:[%s15579_s24 + $0xd8] sm:$0xff] }
  0x81   :  { %20235 = vst [vmem:[#allocation96_spill] sm:$0xff] %v15884_v49  ;;  %20236 = vst [vmem:[#allocation97_spill] sm:$0xff] %v15887_v50  ;;  %v15890_v51 = vld [vmem:[%s15579_s24 + $0xe0] sm:$0xff]  ;;  %v15893_v52 = vld [vmem:[%s15579_s24 + $0xe8] sm:$0xff] }
  0x82   :  { %20237 = vst [vmem:[#allocation98_spill] sm:$0xff] %v15890_v51  ;;  %20238 = vst [vmem:[#allocation99_spill] sm:$0xff] %v15893_v52  ;;  %v15896_v53 = vld [vmem:[%s15579_s24 + $0xf0] sm:$0xff]  ;;  %v15899_v54 = vld [vmem:[%s15579_s24 + $0xf8] sm:$0xff] }
  0x83   :  { %20239 = vst [vmem:[#allocation100_spill] sm:$0xff] %v15896_v53  ;;  %20240 = vst [vmem:[#allocation101_spill] sm:$0xff] %v15899_v54  ;;  %v15902_v55 = vld [vmem:[%s15579_s24 + $0x100] sm:$0xff]  ;;  %v15905_v56 = vld [vmem:[%s15579_s24 + $0x108] sm:$0xff] }
  0x84   :  { %20241 = vst [vmem:[#allocation102_spill] sm:$0xff] %v15902_v55  ;;  %20242 = vst [vmem:[#allocation103_spill] sm:$0xff] %v15905_v56  ;;  %v15908_v57 = vld [vmem:[%s15579_s24 + $0x110] sm:$0xff]  ;;  %v15911_v58 = vld [vmem:[%s15579_s24 + $0x118] sm:$0xff] }
  0x85   :  { %20243 = vst [vmem:[#allocation104_spill] sm:$0xff] %v15908_v57  ;;  %20244 = vst [vmem:[#allocation105_spill] sm:$0xff] %v15911_v58 }
  0x86   :  { %479 = vsyncadd [#allocation19 + $0x1], 4608  ;;  %v15914_v59 = vld [vmem:[%s15584_s30] sm:$0xff]  ;;  %v15917_v60 = vld [vmem:[%s15584_s30 + $0x8] sm:$0xff] }
  0x87   :  { %20245 = vst [vmem:[#allocation106_spill] sm:$0xff] %v15914_v59  ;;  %20246 = vst [vmem:[#allocation107_spill] sm:$0xff] %v15917_v60  ;;  %v15920_v61 = vld [vmem:[%s15584_s30 + $0x10] sm:$0xff]  ;;  %v15923_v62 = vld [vmem:[%s15584_s30 + $0x18] sm:$0xff] }
  0x88   :  { %20247 = vst [vmem:[#allocation108_spill] sm:$0xff] %v15920_v61  ;;  %20248 = vst [vmem:[#allocation109_spill] sm:$0xff] %v15923_v62  ;;  %v15926_v63 = vld [vmem:[%s15584_s30 + $0x20] sm:$0xff]  ;;  %v15929_v0 = vld [vmem:[%s15584_s30 + $0x28] sm:$0xff] }
  0x89   :  { %20249 = vst [vmem:[#allocation110_spill] sm:$0xff] %v15926_v63  ;;  %20250 = vst [vmem:[#allocation111_spill] sm:$0xff] %v15929_v0  ;;  %v15932_v1 = vld [vmem:[%s15584_s30 + $0x30] sm:$0xff]  ;;  %v15935_v2 = vld [vmem:[%s15584_s30 + $0x38] sm:$0xff] }
  0x8a   :  { %20251 = vst [vmem:[#allocation112_spill] sm:$0xff] %v15932_v1  ;;  %20252 = vst [vmem:[#allocation113_spill] sm:$0xff] %v15935_v2  ;;  %v15938_v3 = vld [vmem:[%s15584_s30 + $0x40] sm:$0xff]  ;;  %v15941_v4 = vld [vmem:[%s15584_s30 + $0x48] sm:$0xff] }
  0x8b   :  { %20253 = vst [vmem:[#allocation114_spill] sm:$0xff] %v15938_v3  ;;  %20254 = vst [vmem:[#allocation115_spill] sm:$0xff] %v15941_v4  ;;  %v15944_v5 = vld [vmem:[%s15584_s30 + $0x50] sm:$0xff]  ;;  %v15947_v6 = vld [vmem:[%s15584_s30 + $0x58] sm:$0xff] }
  0x8c   :  { %20255 = vst [vmem:[#allocation116_spill] sm:$0xff] %v15944_v5  ;;  %20256 = vst [vmem:[#allocation117_spill] sm:$0xff] %v15947_v6  ;;  %v15950_v7 = vld [vmem:[%s15584_s30 + $0x60] sm:$0xff]  ;;  %v15953_v8 = vld [vmem:[%s15584_s30 + $0x68] sm:$0xff] }
  0x8d   :  { %20257 = vst [vmem:[#allocation118_spill] sm:$0xff] %v15950_v7  ;;  %20258 = vst [vmem:[#allocation119_spill] sm:$0xff] %v15953_v8  ;;  %v15956_v9 = vld [vmem:[%s15584_s30 + $0x70] sm:$0xff]  ;;  %v15959_v10 = vld [vmem:[%s15584_s30 + $0x78] sm:$0xff] }
  0x8e   :  { %20259 = vst [vmem:[#allocation120_spill] sm:$0xff] %v15956_v9  ;;  %20260 = vst [vmem:[#allocation121_spill] sm:$0xff] %v15959_v10  ;;  %v15962_v11 = vld [vmem:[%s15584_s30 + $0x80] sm:$0xff]  ;;  %v15965_v12 = vld [vmem:[%s15584_s30 + $0x88] sm:$0xff] }
  0x8f   :  { %20261 = vst [vmem:[#allocation122_spill] sm:$0xff] %v15962_v11  ;;  %20262 = vst [vmem:[#allocation123_spill] sm:$0xff] %v15965_v12  ;;  %v15968_v13 = vld [vmem:[%s15584_s30 + $0x90] sm:$0xff]  ;;  %v15971_v14 = vld [vmem:[%s15584_s30 + $0x98] sm:$0xff] }
  0x90   :  { %20263 = vst [vmem:[#allocation124_spill] sm:$0xff] %v15968_v13  ;;  %20264 = vst [vmem:[#allocation125_spill] sm:$0xff] %v15971_v14  ;;  %v15974_v15 = vld [vmem:[%s15584_s30 + $0xa0] sm:$0xff]  ;;  %v15977_v16 = vld [vmem:[%s15584_s30 + $0xa8] sm:$0xff] }
  0x91   :  { %20265 = vst [vmem:[#allocation126_spill] sm:$0xff] %v15974_v15  ;;  %20266 = vst [vmem:[#allocation127_spill] sm:$0xff] %v15977_v16  ;;  %v15980_v17 = vld [vmem:[%s15584_s30 + $0xb0] sm:$0xff]  ;;  %v15983_v18 = vld [vmem:[%s15584_s30 + $0xb8] sm:$0xff] }
  0x92   :  { %20267 = vst [vmem:[#allocation128_spill] sm:$0xff] %v15980_v17  ;;  %20268 = vst [vmem:[#allocation129_spill] sm:$0xff] %v15983_v18  ;;  %v15986_v19 = vld [vmem:[%s15584_s30 + $0xc0] sm:$0xff]  ;;  %v15989_v20 = vld [vmem:[%s15584_s30 + $0xc8] sm:$0xff] }
  0x93   :  { %20269 = vst [vmem:[#allocation130_spill] sm:$0xff] %v15986_v19  ;;  %20270 = vst [vmem:[#allocation131_spill] sm:$0xff] %v15989_v20  ;;  %v15992_v21 = vld [vmem:[%s15584_s30 + $0xd0] sm:$0xff]  ;;  %v15995_v22 = vld [vmem:[%s15584_s30 + $0xd8] sm:$0xff] }
  0x94   :  { %20271 = vst [vmem:[#allocation132_spill] sm:$0xff] %v15992_v21  ;;  %20272 = vst [vmem:[#allocation133_spill] sm:$0xff] %v15995_v22  ;;  %v15998_v11 = vld [vmem:[%s15584_s30 + $0xe0] sm:$0xff]  ;;  %v16001_v12 = vld [vmem:[%s15584_s30 + $0xe8] sm:$0xff] }
  0x95   :  { %20273 = vst [vmem:[#allocation134_spill] sm:$0xff] %v15998_v11  ;;  %20274 = vst [vmem:[#allocation135_spill] sm:$0xff] %v16001_v12  ;;  %v16004_v13 = vld [vmem:[%s15584_s30 + $0xf0] sm:$0xff]  ;;  %v16007_v14 = vld [vmem:[%s15584_s30 + $0xf8] sm:$0xff] }
  0x96   :  { %20275 = vst [vmem:[#allocation136_spill] sm:$0xff] %v16004_v13  ;;  %20276 = vst [vmem:[#allocation137_spill] sm:$0xff] %v16007_v14  ;;  %v16010_v15 = vld [vmem:[%s15584_s30 + $0x100] sm:$0xff]  ;;  %v16013_v16 = vld [vmem:[%s15584_s30 + $0x108] sm:$0xff] }
  0x97   :  { %20277 = vst [vmem:[#allocation138_spill] sm:$0xff] %v16010_v15  ;;  %20278 = vst [vmem:[#allocation139_spill] sm:$0xff] %v16013_v16  ;;  %v16016_v17 = vld [vmem:[%s15584_s30 + $0x110] sm:$0xff]  ;;  %v16019_v18 = vld [vmem:[%s15584_s30 + $0x118] sm:$0xff] }
  0x98   :  { %20279 = vst [vmem:[#allocation140_spill] sm:$0xff] %v16016_v17  ;;  %20280 = vst [vmem:[#allocation141_spill] sm:$0xff] %v16019_v18 }
  0x99   :  { %593 = vsyncadd [#allocation19 + $0x2], 4608  ;;  %v628_v19 = vld [vmem:[%s15589_s6] sm:$0xff]  ;;  %v630_v20 = vld [vmem:[%s15589_s6 + $0x8] sm:$0xff] }
  0x9a   :  { %629 = vst [vmem:[#allocation5] sm:$0xff] %v628_v19  ;;  %631 = vst [vmem:[#allocation5 + $0x8] sm:$0xff] %v630_v20  ;;  %v632_v21 = vld [vmem:[%s15589_s6 + $0x10] sm:$0xff]  ;;  %v634_v22 = vld [vmem:[%s15589_s6 + $0x18] sm:$0xff] }
  0x9b   :  { %v636_v11 = vld [vmem:[%s15589_s6 + $0x20] sm:$0xff]  ;;  %633 = vst [vmem:[#allocation5 + $0x10] sm:$0xff] %v632_v21  ;;  %635 = vst [vmem:[#allocation5 + $0x18] sm:$0xff] %v634_v22  ;;  %v638_v12 = vld [vmem:[%s15589_s6 + $0x28] sm:$0xff] }
  0x9c   :  { %637 = vst [vmem:[#allocation5 + $0x20] sm:$0xff] %v636_v11  ;;  %v640_v13 = vld [vmem:[%s15589_s6 + $0x30] sm:$0xff]  ;;  %v642_v14 = vld [vmem:[%s15589_s6 + $0x38] sm:$0xff]  ;;  %639 = vst [vmem:[#allocation5 + $0x28] sm:$0xff] %v638_v12 }
  0x9d   :  { %641 = vst [vmem:[#allocation5 + $0x30] sm:$0xff] %v640_v13  ;;  %643 = vst [vmem:[#allocation5 + $0x38] sm:$0xff] %v642_v14  ;;  %v644_v19 = vld [vmem:[%s15589_s6 + $0x40] sm:$0xff]  ;;  %v646_v20 = vld [vmem:[%s15589_s6 + $0x48] sm:$0xff] }
  0x9e   :  { %v648_v59 = vld [vmem:[%s15589_s6 + $0x50] sm:$0xff]  ;;  %645 = vst [vmem:[#allocation5 + $0x40] sm:$0xff] %v644_v19  ;;  %647 = vst [vmem:[#allocation5 + $0x48] sm:$0xff] %v646_v20  ;;  %v650_v21 = vld [vmem:[%s15589_s6 + $0x58] sm:$0xff] }
  0x9f   :  { %649 = vst [vmem:[#allocation5 + $0x50] sm:$0xff] %v648_v59  ;;  %v652_v11 = vld [vmem:[%s15589_s6 + $0x60] sm:$0xff]  ;;  %v654_v22 = vld [vmem:[%s15589_s6 + $0x68] sm:$0xff]  ;;  %651 = vst [vmem:[#allocation5 + $0x58] sm:$0xff] %v650_v21 }
  0xa0   :  { %653 = vst [vmem:[#allocation5 + $0x60] sm:$0xff] %v652_v11  ;;  %655 = vst [vmem:[#allocation5 + $0x68] sm:$0xff] %v654_v22  ;;  %v656_v12 = vld [vmem:[%s15589_s6 + $0x70] sm:$0xff]  ;;  %v658_v13 = vld [vmem:[%s15589_s6 + $0x78] sm:$0xff] }
  0xa1   :  { %v660_v14 = vld [vmem:[%s15589_s6 + $0x80] sm:$0xff]  ;;  %657 = vst [vmem:[#allocation5 + $0x70] sm:$0xff] %v656_v12  ;;  %659 = vst [vmem:[#allocation5 + $0x78] sm:$0xff] %v658_v13  ;;  %v662_v19 = vld [vmem:[%s15589_s6 + $0x88] sm:$0xff] }
  0xa2   :  { %661 = vst [vmem:[#allocation5 + $0x80] sm:$0xff] %v660_v14  ;;  %v664_v59 = vld [vmem:[%s15589_s6 + $0x90] sm:$0xff]  ;;  %v666_v20 = vld [vmem:[%s15589_s6 + $0x98] sm:$0xff]  ;;  %663 = vst [vmem:[#allocation5 + $0x88] sm:$0xff] %v662_v19 }
  0xa3   :  { %665 = vst [vmem:[#allocation5 + $0x90] sm:$0xff] %v664_v59  ;;  %667 = vst [vmem:[#allocation5 + $0x98] sm:$0xff] %v666_v20  ;;  %v668_v21 = vld [vmem:[%s15589_s6 + $0xa0] sm:$0xff]  ;;  %v670_v11 = vld [vmem:[%s15589_s6 + $0xa8] sm:$0xff] }
  0xa4   :  { %v672_v22 = vld [vmem:[%s15589_s6 + $0xb0] sm:$0xff]  ;;  %669 = vst [vmem:[#allocation5 + $0xa0] sm:$0xff] %v668_v21  ;;  %671 = vst [vmem:[#allocation5 + $0xa8] sm:$0xff] %v670_v11  ;;  %v674_v12 = vld [vmem:[%s15589_s6 + $0xb8] sm:$0xff] }
  0xa5   :  { %673 = vst [vmem:[#allocation5 + $0xb0] sm:$0xff] %v672_v22  ;;  %v676_v13 = vld [vmem:[%s15589_s6 + $0xc0] sm:$0xff]  ;;  %v678_v14 = vld [vmem:[%s15589_s6 + $0xc8] sm:$0xff]  ;;  %675 = vst [vmem:[#allocation5 + $0xb8] sm:$0xff] %v674_v12 }
  0xa6   :  { %677 = vst [vmem:[#allocation5 + $0xc0] sm:$0xff] %v676_v13  ;;  %679 = vst [vmem:[#allocation5 + $0xc8] sm:$0xff] %v678_v14  ;;  %v680_v19 = vld [vmem:[%s15589_s6 + $0xd0] sm:$0xff]  ;;  %v682_v59 = vld [vmem:[%s15589_s6 + $0xd8] sm:$0xff] }
  0xa7   :  { %v684_v20 = vld [vmem:[%s15589_s6 + $0xe0] sm:$0xff]  ;;  %681 = vst [vmem:[#allocation5 + $0xd0] sm:$0xff] %v680_v19  ;;  %683 = vst [vmem:[#allocation5 + $0xd8] sm:$0xff] %v682_v59  ;;  %v686_v21 = vld [vmem:[%s15589_s6 + $0xe8] sm:$0xff] }
  0xa8   :  { %685 = vst [vmem:[#allocation5 + $0xe0] sm:$0xff] %v684_v20  ;;  %v688_v11 = vld [vmem:[%s15589_s6 + $0xf0] sm:$0xff]  ;;  %v690_v22 = vld [vmem:[%s15589_s6 + $0xf8] sm:$0xff]  ;;  %687 = vst [vmem:[#allocation5 + $0xe8] sm:$0xff] %v686_v21 }
  0xa9   :  { %689 = vst [vmem:[#allocation5 + $0xf0] sm:$0xff] %v688_v11  ;;  %691 = vst [vmem:[#allocation5 + $0xf8] sm:$0xff] %v690_v22  ;;  %v692_v12 = vld [vmem:[%s15589_s6 + $0x100] sm:$0xff]  ;;  %v694_v13 = vld [vmem:[%s15589_s6 + $0x108] sm:$0xff] }
  0xaa   :  { %v696_v14 = vld [vmem:[%s15589_s6 + $0x110] sm:$0xff]  ;;  %693 = vst [vmem:[#allocation5 + $0x100] sm:$0xff] %v692_v12  ;;  %695 = vst [vmem:[#allocation5 + $0x108] sm:$0xff] %v694_v13  ;;  %v698_v19 = vld [vmem:[%s15589_s6 + $0x118] sm:$0xff] }
  0xab   :  { %697 = vst [vmem:[#allocation5 + $0x110] sm:$0xff] %v696_v14  ;;  %v700_v59 = vld [vmem:[%s15589_s6 + $0x120] sm:$0xff]  ;;  %v702_v20 = vld [vmem:[%s15589_s6 + $0x128] sm:$0xff]  ;;  %699 = vst [vmem:[#allocation5 + $0x118] sm:$0xff] %v698_v19 }
  0xac   :  { %701 = vst [vmem:[#allocation5 + $0x120] sm:$0xff] %v700_v59  ;;  %703 = vst [vmem:[#allocation5 + $0x128] sm:$0xff] %v702_v20  ;;  %v704_v21 = vld [vmem:[%s15589_s6 + $0x130] sm:$0xff]  ;;  %v706_v11 = vld [vmem:[%s15589_s6 + $0x138] sm:$0xff] }
  0xad   :  { %v708_v22 = vld [vmem:[%s15589_s6 + $0x140] sm:$0xff]  ;;  %705 = vst [vmem:[#allocation5 + $0x130] sm:$0xff] %v704_v21  ;;  %707 = vst [vmem:[#allocation5 + $0x138] sm:$0xff] %v706_v11  ;;  %v710_v12 = vld [vmem:[%s15589_s6 + $0x148] sm:$0xff] }
  0xae   :  { %709 = vst [vmem:[#allocation5 + $0x140] sm:$0xff] %v708_v22  ;;  %v712_v13 = vld [vmem:[%s15589_s6 + $0x150] sm:$0xff]  ;;  %v714_v14 = vld [vmem:[%s15589_s6 + $0x158] sm:$0xff]  ;;  %711 = vst [vmem:[#allocation5 + $0x148] sm:$0xff] %v710_v12 }
  0xaf   :  { %713 = vst [vmem:[#allocation5 + $0x150] sm:$0xff] %v712_v13  ;;  %715 = vst [vmem:[#allocation5 + $0x158] sm:$0xff] %v714_v14  ;;  %v716_v19 = vld [vmem:[%s15589_s6 + $0x160] sm:$0xff]  ;;  %v718_v59 = vld [vmem:[%s15589_s6 + $0x168] sm:$0xff] }
  0xb0   :  { %v720_v20 = vld [vmem:[%s15589_s6 + $0x170] sm:$0xff]  ;;  %717 = vst [vmem:[#allocation5 + $0x160] sm:$0xff] %v716_v19  ;;  %719 = vst [vmem:[#allocation5 + $0x168] sm:$0xff] %v718_v59  ;;  %v722_v21 = vld [vmem:[%s15589_s6 + $0x178] sm:$0xff] }
  0xb1   :  { %721 = vst [vmem:[#allocation5 + $0x170] sm:$0xff] %v720_v20  ;;  %v724_v11 = vld [vmem:[%s15589_s6 + $0x180] sm:$0xff]  ;;  %v726_v22 = vld [vmem:[%s15589_s6 + $0x188] sm:$0xff]  ;;  %723 = vst [vmem:[#allocation5 + $0x178] sm:$0xff] %v722_v21 }
  0xb2   :  { %725 = vst [vmem:[#allocation5 + $0x180] sm:$0xff] %v724_v11  ;;  %727 = vst [vmem:[#allocation5 + $0x188] sm:$0xff] %v726_v22  ;;  %v728_v12 = vld [vmem:[%s15589_s6 + $0x190] sm:$0xff]  ;;  %v730_v13 = vld [vmem:[%s15589_s6 + $0x198] sm:$0xff] }
  0xb3   :  { %v732_v14 = vld [vmem:[%s15589_s6 + $0x1a0] sm:$0xff]  ;;  %729 = vst [vmem:[#allocation5 + $0x190] sm:$0xff] %v728_v12  ;;  %731 = vst [vmem:[#allocation5 + $0x198] sm:$0xff] %v730_v13  ;;  %v734_v19 = vld [vmem:[%s15589_s6 + $0x1a8] sm:$0xff] }
  0xb4   :  { %733 = vst [vmem:[#allocation5 + $0x1a0] sm:$0xff] %v732_v14  ;;  %v736_v59 = vld [vmem:[%s15589_s6 + $0x1b0] sm:$0xff]  ;;  %v738_v20 = vld [vmem:[%s15589_s6 + $0x1b8] sm:$0xff]  ;;  %735 = vst [vmem:[#allocation5 + $0x1a8] sm:$0xff] %v734_v19 }
  0xb5   :  { %737 = vst [vmem:[#allocation5 + $0x1b0] sm:$0xff] %v736_v59  ;;  %739 = vst [vmem:[#allocation5 + $0x1b8] sm:$0xff] %v738_v20  ;;  %v740_v21 = vld [vmem:[%s15589_s6 + $0x1c0] sm:$0xff]  ;;  %v742_v11 = vld [vmem:[%s15589_s6 + $0x1c8] sm:$0xff] }
  0xb6   :  { %v744_v22 = vld [vmem:[%s15589_s6 + $0x1d0] sm:$0xff]  ;;  %741 = vst [vmem:[#allocation5 + $0x1c0] sm:$0xff] %v740_v21  ;;  %743 = vst [vmem:[#allocation5 + $0x1c8] sm:$0xff] %v742_v11  ;;  %v746_v12 = vld [vmem:[%s15589_s6 + $0x1d8] sm:$0xff] }
  0xb7   :  { %745 = vst [vmem:[#allocation5 + $0x1d0] sm:$0xff] %v744_v22  ;;  %v748_v13 = vld [vmem:[%s15589_s6 + $0x1e0] sm:$0xff]  ;;  %v750_v14 = vld [vmem:[%s15589_s6 + $0x1e8] sm:$0xff]  ;;  %747 = vst [vmem:[#allocation5 + $0x1d8] sm:$0xff] %v746_v12 }
  0xb8   :  { %749 = vst [vmem:[#allocation5 + $0x1e0] sm:$0xff] %v748_v13  ;;  %751 = vst [vmem:[#allocation5 + $0x1e8] sm:$0xff] %v750_v14  ;;  %v752_v19 = vld [vmem:[%s15589_s6 + $0x1f0] sm:$0xff]  ;;  %v754_v59 = vld [vmem:[%s15589_s6 + $0x1f8] sm:$0xff] }
  0xb9   :  { %v756_v20 = vld [vmem:[%s15589_s6 + $0x200] sm:$0xff]  ;;  %753 = vst [vmem:[#allocation5 + $0x1f0] sm:$0xff] %v752_v19  ;;  %755 = vst [vmem:[#allocation5 + $0x1f8] sm:$0xff] %v754_v59  ;;  %v758_v21 = vld [vmem:[%s15589_s6 + $0x208] sm:$0xff] }
  0xba   :  { %757 = vst [vmem:[#allocation5 + $0x200] sm:$0xff] %v756_v20  ;;  %v760_v11 = vld [vmem:[%s15589_s6 + $0x210] sm:$0xff]  ;;  %v762_v22 = vld [vmem:[%s15589_s6 + $0x218] sm:$0xff]  ;;  %759 = vst [vmem:[#allocation5 + $0x208] sm:$0xff] %v758_v21 }
  0xbb   :  { %761 = vst [vmem:[#allocation5 + $0x210] sm:$0xff] %v760_v11  ;;  %763 = vst [vmem:[#allocation5 + $0x218] sm:$0xff] %v762_v22  ;;  %v764_v12 = vld [vmem:[%s15589_s6 + $0x220] sm:$0xff]  ;;  %v766_v13 = vld [vmem:[%s15589_s6 + $0x228] sm:$0xff] }
  0xbc   :  { %v768_v14 = vld [vmem:[%s15589_s6 + $0x230] sm:$0xff]  ;;  %765 = vst [vmem:[#allocation5 + $0x220] sm:$0xff] %v764_v12  ;;  %767 = vst [vmem:[#allocation5 + $0x228] sm:$0xff] %v766_v13  ;;  %v770_v19 = vld [vmem:[%s15589_s6 + $0x238] sm:$0xff] }
  0xbd   :  { %769 = vst [vmem:[#allocation5 + $0x230] sm:$0xff] %v768_v14  ;;  %v772_v59 = vld [vmem:[%s15589_s6 + $0x240] sm:$0xff]  ;;  %v774_v20 = vld [vmem:[%s15589_s6 + $0x248] sm:$0xff]  ;;  %771 = vst [vmem:[#allocation5 + $0x238] sm:$0xff] %v770_v19 }
  0xbe   :  { %773 = vst [vmem:[#allocation5 + $0x240] sm:$0xff] %v772_v59  ;;  %775 = vst [vmem:[#allocation5 + $0x248] sm:$0xff] %v774_v20  ;;  %v776_v21 = vld [vmem:[%s15589_s6 + $0x250] sm:$0xff]  ;;  %v778_v11 = vld [vmem:[%s15589_s6 + $0x258] sm:$0xff] }
  0xbf   :  { %v780_v22 = vld [vmem:[%s15589_s6 + $0x260] sm:$0xff]  ;;  %777 = vst [vmem:[#allocation5 + $0x250] sm:$0xff] %v776_v21  ;;  %779 = vst [vmem:[#allocation5 + $0x258] sm:$0xff] %v778_v11  ;;  %v782_v12 = vld [vmem:[%s15589_s6 + $0x268] sm:$0xff] }
  0xc0   :  { %781 = vst [vmem:[#allocation5 + $0x260] sm:$0xff] %v780_v22  ;;  %v784_v13 = vld [vmem:[%s15589_s6 + $0x270] sm:$0xff]  ;;  %v786_v14 = vld [vmem:[%s15589_s6 + $0x278] sm:$0xff]  ;;  %783 = vst [vmem:[#allocation5 + $0x268] sm:$0xff] %v782_v12 }
  0xc1   :  { %785 = vst [vmem:[#allocation5 + $0x270] sm:$0xff] %v784_v13  ;;  %787 = vst [vmem:[#allocation5 + $0x278] sm:$0xff] %v786_v14  ;;  %v788_v19 = vld [vmem:[%s15589_s6 + $0x280] sm:$0xff]  ;;  %v790_v59 = vld [vmem:[%s15589_s6 + $0x288] sm:$0xff] }
  0xc2   :  { %v792_v20 = vld [vmem:[%s15589_s6 + $0x290] sm:$0xff]  ;;  %789 = vst [vmem:[#allocation5 + $0x280] sm:$0xff] %v788_v19  ;;  %791 = vst [vmem:[#allocation5 + $0x288] sm:$0xff] %v790_v59  ;;  %v794_v21 = vld [vmem:[%s15589_s6 + $0x298] sm:$0xff] }
  0xc3   :  { %793 = vst [vmem:[#allocation5 + $0x290] sm:$0xff] %v792_v20  ;;  %v796_v11 = vld [vmem:[%s15589_s6 + $0x2a0] sm:$0xff]  ;;  %v798_v60 = vld [vmem:[%s15589_s6 + $0x2a8] sm:$0xff]  ;;  %795 = vst [vmem:[#allocation5 + $0x298] sm:$0xff] %v794_v21 }
  0xc4   :  { %797 = vst [vmem:[#allocation5 + $0x2a0] sm:$0xff] %v796_v11  ;;  %799 = vst [vmem:[#allocation5 + $0x2a8] sm:$0xff] %v798_v60  ;;  %v800_v22 = vld [vmem:[%s15589_s6 + $0x2b0] sm:$0xff]  ;;  %v802_v61 = vld [vmem:[%s15589_s6 + $0x2b8] sm:$0xff] }
  0xc5   :  { %v804_v12 = vld [vmem:[%s15589_s6 + $0x2c0] sm:$0xff]  ;;  %801 = vst [vmem:[#allocation5 + $0x2b0] sm:$0xff] %v800_v22  ;;  %803 = vst [vmem:[#allocation5 + $0x2b8] sm:$0xff] %v802_v61  ;;  %v806_v13 = vld [vmem:[%s15589_s6 + $0x2c8] sm:$0xff] }
  0xc6   :  { %805 = vst [vmem:[#allocation5 + $0x2c0] sm:$0xff] %v804_v12  ;;  %807 = vst [vmem:[#allocation5 + $0x2c8] sm:$0xff] %v806_v13 }
  0xc7   :  { %815 = vsyncadd [#allocation19 + $0x3], 11520  ;;  %v16112_v60 = vld [vmem:[%s15609_s4] sm:$0xff]  ;;  %v16115_v61 = vld [vmem:[%s15609_s4 + $0x8] sm:$0xff] }
  0xc8   :  { %20281 = vst [vmem:[#allocation142_spill] sm:$0xff] %v16112_v60  ;;  %20282 = vst [vmem:[#allocation143_spill] sm:$0xff] %v16115_v61  ;;  %v16118_v14 = vld [vmem:[%s15609_s4 + $0x10] sm:$0xff]  ;;  %v16121_v19 = vld [vmem:[%s15609_s4 + $0x18] sm:$0xff] }
  0xc9   :  { %20283 = vst [vmem:[#allocation144_spill] sm:$0xff] %v16118_v14  ;;  %20284 = vst [vmem:[#allocation145_spill] sm:$0xff] %v16121_v19  ;;  %v16124_v59 = vld [vmem:[%s15609_s4 + $0x20] sm:$0xff]  ;;  %v16127_v20 = vld [vmem:[%s15609_s4 + $0x28] sm:$0xff] }
  0xca   :  { %20285 = vst [vmem:[#allocation146_spill] sm:$0xff] %v16124_v59  ;;  %20286 = vst [vmem:[#allocation147_spill] sm:$0xff] %v16127_v20  ;;  %v16130_v21 = vld [vmem:[%s15609_s4 + $0x30] sm:$0xff]  ;;  %v16133_v11 = vld [vmem:[%s15609_s4 + $0x38] sm:$0xff] }
  0xcb   :  { %20287 = vst [vmem:[#allocation148_spill] sm:$0xff] %v16130_v21  ;;  %20288 = vst [vmem:[#allocation149_spill] sm:$0xff] %v16133_v11  ;;  %v16136_v22 = vld [vmem:[%s15609_s4 + $0x40] sm:$0xff]  ;;  %v16139_v12 = vld [vmem:[%s15609_s4 + $0x48] sm:$0xff] }
  0xcc   :  { %20289 = vst [vmem:[#allocation150_spill] sm:$0xff] %v16136_v22  ;;  %20290 = vst [vmem:[#allocation151_spill] sm:$0xff] %v16139_v12  ;;  %v16142_v13 = vld [vmem:[%s15609_s4 + $0x50] sm:$0xff]  ;;  %v16145_v60 = vld [vmem:[%s15609_s4 + $0x58] sm:$0xff] }
  0xcd   :  { %20291 = vst [vmem:[#allocation152_spill] sm:$0xff] %v16142_v13  ;;  %20292 = vst [vmem:[#allocation153_spill] sm:$0xff] %v16145_v60  ;;  %v16148_v61 = vld [vmem:[%s15609_s4 + $0x60] sm:$0xff]  ;;  %v16151_v14 = vld [vmem:[%s15609_s4 + $0x68] sm:$0xff] }
  0xce   :  { %20293 = vst [vmem:[#allocation154_spill] sm:$0xff] %v16148_v61  ;;  %20294 = vst [vmem:[#allocation155_spill] sm:$0xff] %v16151_v14  ;;  %v16154_v19 = vld [vmem:[%s15609_s4 + $0x70] sm:$0xff]  ;;  %v16157_v59 = vld [vmem:[%s15609_s4 + $0x78] sm:$0xff] }
  0xcf   :  { %20295 = vst [vmem:[#allocation156_spill] sm:$0xff] %v16154_v19  ;;  %20296 = vst [vmem:[#allocation157_spill] sm:$0xff] %v16157_v59  ;;  %v16160_v20 = vld [vmem:[%s15609_s4 + $0x80] sm:$0xff]  ;;  %v16163_v21 = vld [vmem:[%s15609_s4 + $0x88] sm:$0xff] }
  0xd0   :  { %20297 = vst [vmem:[#allocation158_spill] sm:$0xff] %v16160_v20  ;;  %20298 = vst [vmem:[#allocation159_spill] sm:$0xff] %v16163_v21  ;;  %v16166_v11 = vld [vmem:[%s15609_s4 + $0x90] sm:$0xff]  ;;  %v16169_v22 = vld [vmem:[%s15609_s4 + $0x98] sm:$0xff] }
  0xd1   :  { %20299 = vst [vmem:[#allocation160_spill] sm:$0xff] %v16166_v11  ;;  %20300 = vst [vmem:[#allocation161_spill] sm:$0xff] %v16169_v22  ;;  %v16172_v12 = vld [vmem:[%s15609_s4 + $0xa0] sm:$0xff]  ;;  %v16175_v13 = vld [vmem:[%s15609_s4 + $0xa8] sm:$0xff] }
  0xd2   :  { %20301 = vst [vmem:[#allocation162_spill] sm:$0xff] %v16172_v12  ;;  %20302 = vst [vmem:[#allocation163_spill] sm:$0xff] %v16175_v13  ;;  %v16178_v60 = vld [vmem:[%s15609_s4 + $0xb0] sm:$0xff]  ;;  %v16181_v61 = vld [vmem:[%s15609_s4 + $0xb8] sm:$0xff] }
  0xd3   :  { %20303 = vst [vmem:[#allocation164_spill] sm:$0xff] %v16178_v60  ;;  %20304 = vst [vmem:[#allocation165_spill] sm:$0xff] %v16181_v61  ;;  %v16184_v14 = vld [vmem:[%s15609_s4 + $0xc0] sm:$0xff]  ;;  %v16187_v20 = vld [vmem:[%s15609_s4 + $0xc8] sm:$0xff] }
  0xd4   :  { %20305 = vst [vmem:[#allocation166_spill] sm:$0xff] %v16184_v14  ;;  %20306 = vst [vmem:[#allocation167_spill] sm:$0xff] %v16187_v20  ;;  %v16190_v21 = vld [vmem:[%s15609_s4 + $0xd0] sm:$0xff]  ;;  %v16193_v19 = vld [vmem:[%s15609_s4 + $0xd8] sm:$0xff] }
  0xd5   :  { %20307 = vst [vmem:[#allocation168_spill] sm:$0xff] %v16190_v21  ;;  %20308 = vst [vmem:[#allocation169_spill] sm:$0xff] %v16193_v19  ;;  %v16196_v11 = vld [vmem:[%s15609_s4 + $0xe0] sm:$0xff]  ;;  %v16199_v22 = vld [vmem:[%s15609_s4 + $0xe8] sm:$0xff] }
  0xd6   :  { %20309 = vst [vmem:[#allocation170_spill] sm:$0xff] %v16196_v11  ;;  %20310 = vst [vmem:[#allocation171_spill] sm:$0xff] %v16199_v22  ;;  %v16202_v59 = vld [vmem:[%s15609_s4 + $0xf0] sm:$0xff]  ;;  %v16205_v12 = vld [vmem:[%s15609_s4 + $0xf8] sm:$0xff] }
  0xd7   :  { %20311 = vst [vmem:[#allocation172_spill] sm:$0xff] %v16202_v59  ;;  %20312 = vst [vmem:[#allocation173_spill] sm:$0xff] %v16205_v12  ;;  %v16208_v13 = vld [vmem:[%s15609_s4 + $0x100] sm:$0xff]  ;;  %v16211_v60 = vld [vmem:[%s15609_s4 + $0x108] sm:$0xff] }
  0xd8   :  { %20313 = vst [vmem:[#allocation174_spill] sm:$0xff] %v16208_v13  ;;  %20314 = vst [vmem:[#allocation175_spill] sm:$0xff] %v16211_v60  ;;  %v16214_v61 = vld [vmem:[%s15609_s4 + $0x110] sm:$0xff]  ;;  %v16217_v14 = vld [vmem:[%s15609_s4 + $0x118] sm:$0xff] }
  0xd9   :  { %20315 = vst [vmem:[#allocation176_spill] sm:$0xff] %v16214_v61  ;;  %20316 = vst [vmem:[#allocation177_spill] sm:$0xff] %v16217_v14 }
  0xda   :  { %929 = vsyncadd [#allocation19 + $0x4], 4608  ;;  %v16220_v13 = vld [vmem:[%s15614_s12] sm:$0xff]  ;;  %v16223_v60 = vld [vmem:[%s15614_s12 + $0x8] sm:$0xff] }
  0xdb   :  { %20317 = vst [vmem:[#allocation178_spill] sm:$0xff] %v16220_v13  ;;  %20318 = vst [vmem:[#allocation179_spill] sm:$0xff] %v16223_v60  ;;  %v16226_v61 = vld [vmem:[%s15614_s12 + $0x10] sm:$0xff]  ;;  %v16229_v14 = vld [vmem:[%s15614_s12 + $0x18] sm:$0xff] }
  0xdc   :  { %20319 = vst [vmem:[#allocation180_spill] sm:$0xff] %v16226_v61  ;;  %20320 = vst [vmem:[#allocation181_spill] sm:$0xff] %v16229_v14  ;;  %v16232_v20 = vld [vmem:[%s15614_s12 + $0x20] sm:$0xff]  ;;  %v16235_v21 = vld [vmem:[%s15614_s12 + $0x28] sm:$0xff] }
  0xdd   :  { %20321 = vst [vmem:[#allocation182_spill] sm:$0xff] %v16232_v20  ;;  %20322 = vst [vmem:[#allocation183_spill] sm:$0xff] %v16235_v21  ;;  %v16238_v19 = vld [vmem:[%s15614_s12 + $0x30] sm:$0xff]  ;;  %v16241_v13 = vld [vmem:[%s15614_s12 + $0x38] sm:$0xff] }
  0xde   :  { %20323 = vst [vmem:[#allocation184_spill] sm:$0xff] %v16238_v19  ;;  %20324 = vst [vmem:[#allocation185_spill] sm:$0xff] %v16241_v13  ;;  %v16244_v60 = vld [vmem:[%s15614_s12 + $0x40] sm:$0xff]  ;;  %v16247_v61 = vld [vmem:[%s15614_s12 + $0x48] sm:$0xff] }
  0xdf   :  { %20325 = vst [vmem:[#allocation186_spill] sm:$0xff] %v16244_v60  ;;  %20326 = vst [vmem:[#allocation187_spill] sm:$0xff] %v16247_v61  ;;  %v16250_v14 = vld [vmem:[%s15614_s12 + $0x50] sm:$0xff]  ;;  %v16253_v20 = vld [vmem:[%s15614_s12 + $0x58] sm:$0xff] }
  0xe0   :  { %20327 = vst [vmem:[#allocation188_spill] sm:$0xff] %v16250_v14  ;;  %20328 = vst [vmem:[#allocation189_spill] sm:$0xff] %v16253_v20  ;;  %v16256_v21 = vld [vmem:[%s15614_s12 + $0x60] sm:$0xff]  ;;  %v16259_v19 = vld [vmem:[%s15614_s12 + $0x68] sm:$0xff] }
  0xe1   :  { %20329 = vst [vmem:[#allocation190_spill] sm:$0xff] %v16256_v21  ;;  %20330 = vst [vmem:[#allocation191_spill] sm:$0xff] %v16259_v19  ;;  %v16262_v13 = vld [vmem:[%s15614_s12 + $0x70] sm:$0xff]  ;;  %v16265_v60 = vld [vmem:[%s15614_s12 + $0x78] sm:$0xff] }
  0xe2   :  { %20331 = vst [vmem:[#allocation192_spill] sm:$0xff] %v16262_v13  ;;  %20332 = vst [vmem:[#allocation193_spill] sm:$0xff] %v16265_v60  ;;  %v16268_v61 = vld [vmem:[%s15614_s12 + $0x80] sm:$0xff]  ;;  %v16271_v14 = vld [vmem:[%s15614_s12 + $0x88] sm:$0xff] }
  0xe3   :  { %20333 = vst [vmem:[#allocation194_spill] sm:$0xff] %v16268_v61  ;;  %20334 = vst [vmem:[#allocation195_spill] sm:$0xff] %v16271_v14  ;;  %v16274_v20 = vld [vmem:[%s15614_s12 + $0x90] sm:$0xff]  ;;  %v16277_v21 = vld [vmem:[%s15614_s12 + $0x98] sm:$0xff] }
  0xe4   :  { %20335 = vst [vmem:[#allocation196_spill] sm:$0xff] %v16274_v20  ;;  %20336 = vst [vmem:[#allocation197_spill] sm:$0xff] %v16277_v21  ;;  %v16280_v19 = vld [vmem:[%s15614_s12 + $0xa0] sm:$0xff]  ;;  %v16283_v11 = vld [vmem:[%s15614_s12 + $0xa8] sm:$0xff] }
  0xe5   :  { %20337 = vst [vmem:[#allocation198_spill] sm:$0xff] %v16280_v19  ;;  %20338 = vst [vmem:[#allocation199_spill] sm:$0xff] %v16283_v11  ;;  %v16286_v13 = vld [vmem:[%s15614_s12 + $0xb0] sm:$0xff]  ;;  %v16289_v60 = vld [vmem:[%s15614_s12 + $0xb8] sm:$0xff] }
  0xe6   :  { %20339 = vst [vmem:[#allocation200_spill] sm:$0xff] %v16286_v13  ;;  %20340 = vst [vmem:[#allocation201_spill] sm:$0xff] %v16289_v60  ;;  %v16292_v22 = vld [vmem:[%s15614_s12 + $0xc0] sm:$0xff]  ;;  %v16295_v61 = vld [vmem:[%s15614_s12 + $0xc8] sm:$0xff] }
  0xe7   :  { %20341 = vst [vmem:[#allocation202_spill] sm:$0xff] %v16292_v22  ;;  %20342 = vst [vmem:[#allocation203_spill] sm:$0xff] %v16295_v61  ;;  %v16298_v14 = vld [vmem:[%s15614_s12 + $0xd0] sm:$0xff]  ;;  %v16301_v59 = vld [vmem:[%s15614_s12 + $0xd8] sm:$0xff] }
  0xe8   :  { %20343 = vst [vmem:[#allocation204_spill] sm:$0xff] %v16298_v14  ;;  %20344 = vst [vmem:[#allocation205_spill] sm:$0xff] %v16301_v59  ;;  %v16304_v20 = vld [vmem:[%s15614_s12 + $0xe0] sm:$0xff]  ;;  %v16307_v21 = vld [vmem:[%s15614_s12 + $0xe8] sm:$0xff] }
  0xe9   :  { %20345 = vst [vmem:[#allocation206_spill] sm:$0xff] %v16304_v20  ;;  %20346 = vst [vmem:[#allocation207_spill] sm:$0xff] %v16307_v21  ;;  %v16310_v12 = vld [vmem:[%s15614_s12 + $0xf0] sm:$0xff]  ;;  %v16313_v19 = vld [vmem:[%s15614_s12 + $0xf8] sm:$0xff] }
  0xea   :  { %20347 = vst [vmem:[#allocation208_spill] sm:$0xff] %v16310_v12  ;;  %20348 = vst [vmem:[#allocation209_spill] sm:$0xff] %v16313_v19  ;;  %v16316_v11 = vld [vmem:[%s15614_s12 + $0x100] sm:$0xff]  ;;  %v16319_v13 = vld [vmem:[%s15614_s12 + $0x108] sm:$0xff] }
  0xeb   :  { %20349 = vst [vmem:[#allocation210_spill] sm:$0xff] %v16316_v11  ;;  %20350 = vst [vmem:[#allocation211_spill] sm:$0xff] %v16319_v13  ;;  %v16322_v60 = vld [vmem:[%s15614_s12 + $0x110] sm:$0xff]  ;;  %v16325_v22 = vld [vmem:[%s15614_s12 + $0x118] sm:$0xff] }
  0xec   :  { %20351 = vst [vmem:[#allocation212_spill] sm:$0xff] %v16322_v60  ;;  %20352 = vst [vmem:[#allocation213_spill] sm:$0xff] %v16325_v22 }
  0xed   :  { %1043 = vsyncadd [#allocation19 + $0x5], 4608  ;;  %v16328_v61 = vld [vmem:[%s15619_s20] sm:$0xff]  ;;  %v16331_v14 = vld [vmem:[%s15619_s20 + $0x8] sm:$0xff] }
  0xee   :  { %20353 = vst [vmem:[#allocation214_spill] sm:$0xff] %v16328_v61  ;;  %20354 = vst [vmem:[#allocation215_spill] sm:$0xff] %v16331_v14  ;;  %v16334_v59 = vld [vmem:[%s15619_s20 + $0x10] sm:$0xff]  ;;  %v16337_v20 = vld [vmem:[%s15619_s20 + $0x18] sm:$0xff] }
  0xef   :  { %20355 = vst [vmem:[#allocation216_spill] sm:$0xff] %v16334_v59  ;;  %20356 = vst [vmem:[#allocation217_spill] sm:$0xff] %v16337_v20  ;;  %v16340_v21 = vld [vmem:[%s15619_s20 + $0x20] sm:$0xff]  ;;  %v16343_v12 = vld [vmem:[%s15619_s20 + $0x28] sm:$0xff] }
  0xf0   :  { %20357 = vst [vmem:[#allocation218_spill] sm:$0xff] %v16340_v21  ;;  %20358 = vst [vmem:[#allocation219_spill] sm:$0xff] %v16343_v12  ;;  %v16346_v19 = vld [vmem:[%s15619_s20 + $0x30] sm:$0xff]  ;;  %v16349_v61 = vld [vmem:[%s15619_s20 + $0x38] sm:$0xff] }
  0xf1   :  { %20359 = vst [vmem:[#allocation220_spill] sm:$0xff] %v16346_v19  ;;  %20360 = vst [vmem:[#allocation221_spill] sm:$0xff] %v16349_v61  ;;  %v16352_v14 = vld [vmem:[%s15619_s20 + $0x40] sm:$0xff]  ;;  %v16355_v59 = vld [vmem:[%s15619_s20 + $0x48] sm:$0xff] }
  0xf2   :  { %20361 = vst [vmem:[#allocation222_spill] sm:$0xff] %v16352_v14  ;;  %20362 = vst [vmem:[#allocation223_spill] sm:$0xff] %v16355_v59  ;;  %v16358_v20 = vld [vmem:[%s15619_s20 + $0x50] sm:$0xff]  ;;  %v16361_v21 = vld [vmem:[%s15619_s20 + $0x58] sm:$0xff] }
  0xf3   :  { %20363 = vst [vmem:[#allocation224_spill] sm:$0xff] %v16358_v20  ;;  %20364 = vst [vmem:[#allocation225_spill] sm:$0xff] %v16361_v21  ;;  %v16364_v12 = vld [vmem:[%s15619_s20 + $0x60] sm:$0xff]  ;;  %v16367_v19 = vld [vmem:[%s15619_s20 + $0x68] sm:$0xff] }
  0xf4   :  { %20365 = vst [vmem:[#allocation226_spill] sm:$0xff] %v16364_v12  ;;  %20366 = vst [vmem:[#allocation227_spill] sm:$0xff] %v16367_v19  ;;  %v16370_v61 = vld [vmem:[%s15619_s20 + $0x70] sm:$0xff]  ;;  %v16373_v14 = vld [vmem:[%s15619_s20 + $0x78] sm:$0xff] }
  0xf5   :  { %20367 = vst [vmem:[#allocation228_spill] sm:$0xff] %v16370_v61  ;;  %20368 = vst [vmem:[#allocation229_spill] sm:$0xff] %v16373_v14  ;;  %v16376_v59 = vld [vmem:[%s15619_s20 + $0x80] sm:$0xff]  ;;  %v16379_v20 = vld [vmem:[%s15619_s20 + $0x88] sm:$0xff] }
  0xf6   :  { %20369 = vst [vmem:[#allocation230_spill] sm:$0xff] %v16376_v59  ;;  %20370 = vst [vmem:[#allocation231_spill] sm:$0xff] %v16379_v20  ;;  %v16382_v21 = vld [vmem:[%s15619_s20 + $0x90] sm:$0xff]  ;;  %v16385_v12 = vld [vmem:[%s15619_s20 + $0x98] sm:$0xff] }
  0xf7   :  { %20371 = vst [vmem:[#allocation232_spill] sm:$0xff] %v16382_v21  ;;  %20372 = vst [vmem:[#allocation233_spill] sm:$0xff] %v16385_v12  ;;  %v16388_v19 = vld [vmem:[%s15619_s20 + $0xa0] sm:$0xff]  ;;  %v16391_v61 = vld [vmem:[%s15619_s20 + $0xa8] sm:$0xff] }
  0xf8   :  { %20373 = vst [vmem:[#allocation234_spill] sm:$0xff] %v16388_v19  ;;  %20374 = vst [vmem:[#allocation235_spill] sm:$0xff] %v16391_v61  ;;  %v16394_v14 = vld [vmem:[%s15619_s20 + $0xb0] sm:$0xff]  ;;  %v16397_v59 = vld [vmem:[%s15619_s20 + $0xb8] sm:$0xff] }
  0xf9   :  { %20375 = vst [vmem:[#allocation236_spill] sm:$0xff] %v16394_v14  ;;  %20376 = vst [vmem:[#allocation237_spill] sm:$0xff] %v16397_v59  ;;  %v16400_v20 = vld [vmem:[%s15619_s20 + $0xc0] sm:$0xff]  ;;  %v16403_v21 = vld [vmem:[%s15619_s20 + $0xc8] sm:$0xff] }
  0xfa   :  { %20377 = vst [vmem:[#allocation238_spill] sm:$0xff] %v16400_v20  ;;  %20378 = vst [vmem:[#allocation239_spill] sm:$0xff] %v16403_v21  ;;  %v16406_v12 = vld [vmem:[%s15619_s20 + $0xd0] sm:$0xff]  ;;  %v16409_v19 = vld [vmem:[%s15619_s20 + $0xd8] sm:$0xff] }
  0xfb   :  { %20379 = vst [vmem:[#allocation240_spill] sm:$0xff] %v16406_v12  ;;  %20380 = vst [vmem:[#allocation241_spill] sm:$0xff] %v16409_v19  ;;  %v16412_v61 = vld [vmem:[%s15619_s20 + $0xe0] sm:$0xff]  ;;  %v16415_v14 = vld [vmem:[%s15619_s20 + $0xe8] sm:$0xff] }
  0xfc   :  { %20381 = vst [vmem:[#allocation242_spill] sm:$0xff] %v16412_v61  ;;  %20382 = vst [vmem:[#allocation243_spill] sm:$0xff] %v16415_v14  ;;  %v16418_v59 = vld [vmem:[%s15619_s20 + $0xf0] sm:$0xff]  ;;  %v16421_v20 = vld [vmem:[%s15619_s20 + $0xf8] sm:$0xff] }
  0xfd   :  { %20383 = vst [vmem:[#allocation244_spill] sm:$0xff] %v16418_v59  ;;  %20384 = vst [vmem:[#allocation245_spill] sm:$0xff] %v16421_v20  ;;  %v16424_v21 = vld [vmem:[%s15619_s20 + $0x100] sm:$0xff]  ;;  %v16427_v12 = vld [vmem:[%s15619_s20 + $0x108] sm:$0xff] }
  0xfe   :  { %20385 = vst [vmem:[#allocation246_spill] sm:$0xff] %v16424_v21  ;;  %20386 = vst [vmem:[#allocation247_spill] sm:$0xff] %v16427_v12  ;;  %v16430_v19 = vld [vmem:[%s15619_s20 + $0x110] sm:$0xff]  ;;  %v16433_v61 = vld [vmem:[%s15619_s20 + $0x118] sm:$0xff] }
  0xff   :  { %20387 = vst [vmem:[#allocation248_spill] sm:$0xff] %v16430_v19  ;;  %20388 = vst [vmem:[#allocation249_spill] sm:$0xff] %v16433_v61  ;;  %v16436_v14 = vld [vmem:[%s15619_s20 + $0x120] sm:$0xff]  ;;  %v16439_v59 = vld [vmem:[%s15619_s20 + $0x128] sm:$0xff] }
 0x100   :  { %20389 = vst [vmem:[#allocation250_spill] sm:$0xff] %v16436_v14  ;;  %20390 = vst [vmem:[#allocation251_spill] sm:$0xff] %v16439_v59  ;;  %v16442_v20 = vld [vmem:[%s15619_s20 + $0x130] sm:$0xff]  ;;  %v16445_v21 = vld [vmem:[%s15619_s20 + $0x138] sm:$0xff] }
 0x101   :  { %20391 = vst [vmem:[#allocation252_spill] sm:$0xff] %v16442_v20  ;;  %20392 = vst [vmem:[#allocation253_spill] sm:$0xff] %v16445_v21  ;;  %v16448_v12 = vld [vmem:[%s15619_s20 + $0x140] sm:$0xff]  ;;  %v16451_v19 = vld [vmem:[%s15619_s20 + $0x148] sm:$0xff] }
 0x102   :  { %20393 = vst [vmem:[#allocation254_spill] sm:$0xff] %v16448_v12  ;;  %20394 = vst [vmem:[#allocation255_spill] sm:$0xff] %v16451_v19  ;;  %v16454_v61 = vld [vmem:[%s15619_s20 + $0x150] sm:$0xff]  ;;  %v16457_v14 = vld [vmem:[%s15619_s20 + $0x158] sm:$0xff] }
 0x103   :  { %20395 = vst [vmem:[#allocation256_spill] sm:$0xff] %v16454_v61  ;;  %20396 = vst [vmem:[#allocation257_spill] sm:$0xff] %v16457_v14  ;;  %v16460_v59 = vld [vmem:[%s15619_s20 + $0x160] sm:$0xff]  ;;  %v16463_v20 = vld [vmem:[%s15619_s20 + $0x168] sm:$0xff] }
 0x104   :  { %20397 = vst [vmem:[#allocation258_spill] sm:$0xff] %v16460_v59  ;;  %20398 = vst [vmem:[#allocation259_spill] sm:$0xff] %v16463_v20  ;;  %v16466_v21 = vld [vmem:[%s15619_s20 + $0x170] sm:$0xff]  ;;  %v16469_v12 = vld [vmem:[%s15619_s20 + $0x178] sm:$0xff] }
 0x105   :  { %20399 = vst [vmem:[#allocation260_spill] sm:$0xff] %v16466_v21  ;;  %20400 = vst [vmem:[#allocation261_spill] sm:$0xff] %v16469_v12  ;;  %v16472_v19 = vld [vmem:[%s15619_s20 + $0x180] sm:$0xff]  ;;  %v16475_v61 = vld [vmem:[%s15619_s20 + $0x188] sm:$0xff] }
 0x106   :  { %20401 = vst [vmem:[#allocation262_spill] sm:$0xff] %v16472_v19  ;;  %20402 = vst [vmem:[#allocation263_spill] sm:$0xff] %v16475_v61  ;;  %v16478_v14 = vld [vmem:[%s15619_s20 + $0x190] sm:$0xff]  ;;  %v16481_v11 = vld [vmem:[%s15619_s20 + $0x198] sm:$0xff] }
 0x107   :  { %20403 = vst [vmem:[#allocation264_spill] sm:$0xff] %v16478_v14  ;;  %20404 = vst [vmem:[#allocation265_spill] sm:$0xff] %v16481_v11  ;;  %v16484_v59 = vld [vmem:[%s15619_s20 + $0x1a0] sm:$0xff]  ;;  %v16487_v20 = vld [vmem:[%s15619_s20 + $0x1a8] sm:$0xff] }
 0x108   :  { %20405 = vst [vmem:[#allocation266_spill] sm:$0xff] %v16484_v59  ;;  %20406 = vst [vmem:[#allocation267_spill] sm:$0xff] %v16487_v20  ;;  %v16490_v13 = vld [vmem:[%s15619_s20 + $0x1b0] sm:$0xff]  ;;  %v16493_v21 = vld [vmem:[%s15619_s20 + $0x1b8] sm:$0xff] }
 0x109   :  { %20407 = vst [vmem:[#allocation268_spill] sm:$0xff] %v16490_v13  ;;  %20408 = vst [vmem:[#allocation269_spill] sm:$0xff] %v16493_v21  ;;  %v16496_v12 = vld [vmem:[%s15619_s20 + $0x1c0] sm:$0xff]  ;;  %v16499_v60 = vld [vmem:[%s15619_s20 + $0x1c8] sm:$0xff] }
 0x10a   :  { %20409 = vst [vmem:[#allocation270_spill] sm:$0xff] %v16496_v12  ;;  %20410 = vst [vmem:[#allocation271_spill] sm:$0xff] %v16499_v60  ;;  %v16502_v19 = vld [vmem:[%s15619_s20 + $0x1d0] sm:$0xff]  ;;  %v16505_v61 = vld [vmem:[%s15619_s20 + $0x1d8] sm:$0xff] }
 0x10b   :  { %20411 = vst [vmem:[#allocation272_spill] sm:$0xff] %v16502_v19  ;;  %20412 = vst [vmem:[#allocation273_spill] sm:$0xff] %v16505_v61  ;;  %v16508_v22 = vld [vmem:[%s15619_s20 + $0x1e0] sm:$0xff]  ;;  %v16511_v14 = vld [vmem:[%s15619_s20 + $0x1e8] sm:$0xff] }
 0x10c   :  { %20413 = vst [vmem:[#allocation274_spill] sm:$0xff] %v16508_v22  ;;  %20414 = vst [vmem:[#allocation275_spill] sm:$0xff] %v16511_v14  ;;  %v16514_v11 = vld [vmem:[%s15619_s20 + $0x1f0] sm:$0xff]  ;;  %v16517_v59 = vld [vmem:[%s15619_s20 + $0x1f8] sm:$0xff] }
 0x10d   :  { %20415 = vst [vmem:[#allocation276_spill] sm:$0xff] %v16514_v11  ;;  %20416 = vst [vmem:[#allocation277_spill] sm:$0xff] %v16517_v59  ;;  %v16520_v20 = vld [vmem:[%s15619_s20 + $0x200] sm:$0xff]  ;;  %v16523_v13 = vld [vmem:[%s15619_s20 + $0x208] sm:$0xff] }
 0x10e   :  { %20417 = vst [vmem:[#allocation278_spill] sm:$0xff] %v16520_v20  ;;  %20418 = vst [vmem:[#allocation279_spill] sm:$0xff] %v16523_v13 }
 0x10f   :  { %1217 = vsyncadd [#allocation19 + $0x6], 8448  ;;  %v1252_v22 = vld [vmem:[%s15639_s8] sm:$0xff]  ;;  %v1254_v14 = vld [vmem:[%s15639_s8 + $0x8] sm:$0xff] }
 0x110   :  { %1253 = vst [vmem:[#allocation9] sm:$0xff] %v1252_v22  ;;  %1255 = vst [vmem:[#allocation9 + $0x8] sm:$0xff] %v1254_v14  ;;  %v1256_v11 = vld [vmem:[%s15639_s8 + $0x10] sm:$0xff]  ;;  %v1258_v59 = vld [vmem:[%s15639_s8 + $0x18] sm:$0xff] }
 0x111   :  { %v1260_v21 = vld [vmem:[%s15639_s8 + $0x20] sm:$0xff]  ;;  %1257 = vst [vmem:[#allocation9 + $0x10] sm:$0xff] %v1256_v11  ;;  %1259 = vst [vmem:[#allocation9 + $0x18] sm:$0xff] %v1258_v59  ;;  %v1262_v20 = vld [vmem:[%s15639_s8 + $0x28] sm:$0xff] }
 0x112   :  { %1261 = vst [vmem:[#allocation9 + $0x20] sm:$0xff] %v1260_v21  ;;  %v1264_v13 = vld [vmem:[%s15639_s8 + $0x30] sm:$0xff]  ;;  %v1266_v12 = vld [vmem:[%s15639_s8 + $0x38] sm:$0xff]  ;;  %1263 = vst [vmem:[#allocation9 + $0x28] sm:$0xff] %v1262_v20 }
 0x113   :  { %1265 = vst [vmem:[#allocation9 + $0x30] sm:$0xff] %v1264_v13  ;;  %1267 = vst [vmem:[#allocation9 + $0x38] sm:$0xff] %v1266_v12  ;;  %v1268_v60 = vld [vmem:[%s15639_s8 + $0x40] sm:$0xff] }
 0x114   :  { %1269 = vst [vmem:[#allocation9 + $0x40] sm:$0xff] %v1268_v60 }
 0x115   :  { %1277 = vsyncadd [#allocation19 + $0x7], 1152  ;;  %v1312_v14 = vld [vmem:[%s15644_s27] sm:$0xff]  ;;  %v1314_v59 = vld [vmem:[%s15644_s27 + $0x8] sm:$0xff] }
 0x116   :  { %1313 = vst [vmem:[#allocation10] sm:$0xff] %v1312_v14  ;;  %1315 = vst [vmem:[#allocation10 + $0x8] sm:$0xff] %v1314_v59  ;;  %v1316_v21 = vld [vmem:[%s15644_s27 + $0x10] sm:$0xff]  ;;  %v1318_v20 = vld [vmem:[%s15644_s27 + $0x18] sm:$0xff] }
 0x117   :  { %v1320_v11 = vld [vmem:[%s15644_s27 + $0x20] sm:$0xff]  ;;  %1317 = vst [vmem:[#allocation10 + $0x10] sm:$0xff] %v1316_v21  ;;  %1319 = vst [vmem:[#allocation10 + $0x18] sm:$0xff] %v1318_v20  ;;  %v1322_v60 = vld [vmem:[%s15644_s27 + $0x28] sm:$0xff] }
 0x118   :  { %1321 = vst [vmem:[#allocation10 + $0x20] sm:$0xff] %v1320_v11  ;;  %v1324_v22 = vld [vmem:[%s15644_s27 + $0x30] sm:$0xff]  ;;  %v1326_v12 = vld [vmem:[%s15644_s27 + $0x38] sm:$0xff]  ;;  %1323 = vst [vmem:[#allocation10 + $0x28] sm:$0xff] %v1322_v60 }
 0x119   :  { %1325 = vst [vmem:[#allocation10 + $0x30] sm:$0xff] %v1324_v22  ;;  %1327 = vst [vmem:[#allocation10 + $0x38] sm:$0xff] %v1326_v12  ;;  %v1328_v13 = vld [vmem:[%s15644_s27 + $0x40] sm:$0xff] }
 0x11a   :  { %1329 = vst [vmem:[#allocation10 + $0x40] sm:$0xff] %v1328_v13 }
 0x11b   :  { %1337 = vsyncadd [#allocation19 + $0x8], 1152  ;;  %v1372_v14 = vld [vmem:[%s15649_s19] sm:$0xff]  ;;  %v1374_v59 = vld [vmem:[%s15649_s19 + $0x8] sm:$0xff] }
 0x11c   :  { %1373 = vst [vmem:[#allocation11] sm:$0xff] %v1372_v14  ;;  %1375 = vst [vmem:[#allocation11 + $0x8] sm:$0xff] %v1374_v59  ;;  %v1376_v21 = vld [vmem:[%s15649_s19 + $0x10] sm:$0xff]  ;;  %v1378_v20 = vld [vmem:[%s15649_s19 + $0x18] sm:$0xff] }
 0x11d   :  { %v1380_v11 = vld [vmem:[%s15649_s19 + $0x20] sm:$0xff]  ;;  %1377 = vst [vmem:[#allocation11 + $0x10] sm:$0xff] %v1376_v21  ;;  %1379 = vst [vmem:[#allocation11 + $0x18] sm:$0xff] %v1378_v20  ;;  %v1382_v60 = vld [vmem:[%s15649_s19 + $0x28] sm:$0xff] }
 0x11e   :  { %1381 = vst [vmem:[#allocation11 + $0x20] sm:$0xff] %v1380_v11  ;;  %v1384_v22 = vld [vmem:[%s15649_s19 + $0x30] sm:$0xff]  ;;  %v1386_v12 = vld [vmem:[%s15649_s19 + $0x38] sm:$0xff]  ;;  %1383 = vst [vmem:[#allocation11 + $0x28] sm:$0xff] %v1382_v60 }
 0x11f   :  { %1385 = vst [vmem:[#allocation11 + $0x30] sm:$0xff] %v1384_v22  ;;  %1387 = vst [vmem:[#allocation11 + $0x38] sm:$0xff] %v1386_v12  ;;  %v1388_v13 = vld [vmem:[%s15649_s19 + $0x40] sm:$0xff]  ;;  %v1390_v14 = vld [vmem:[%s15649_s19 + $0x48] sm:$0xff] }
 0x120   :  { %v1392_v59 = vld [vmem:[%s15649_s19 + $0x50] sm:$0xff]  ;;  %1389 = vst [vmem:[#allocation11 + $0x40] sm:$0xff] %v1388_v13  ;;  %1391 = vst [vmem:[#allocation11 + $0x48] sm:$0xff] %v1390_v14  ;;  %v1394_v21 = vld [vmem:[%s15649_s19 + $0x58] sm:$0xff] }
 0x121   :  { %1393 = vst [vmem:[#allocation11 + $0x50] sm:$0xff] %v1392_v59  ;;  %v1396_v20 = vld [vmem:[%s15649_s19 + $0x60] sm:$0xff]  ;;  %v1398_v11 = vld [vmem:[%s15649_s19 + $0x68] sm:$0xff]  ;;  %1395 = vst [vmem:[#allocation11 + $0x58] sm:$0xff] %v1394_v21 }
 0x122   :  { %1397 = vst [vmem:[#allocation11 + $0x60] sm:$0xff] %v1396_v20  ;;  %1399 = vst [vmem:[#allocation11 + $0x68] sm:$0xff] %v1398_v11  ;;  %v1400_v60 = vld [vmem:[%s15649_s19 + $0x70] sm:$0xff]  ;;  %v1402_v22 = vld [vmem:[%s15649_s19 + $0x78] sm:$0xff] }
 0x123   :  { %v1404_v19 = vld [vmem:[%s15649_s19 + $0x80] sm:$0xff]  ;;  %1401 = vst [vmem:[#allocation11 + $0x70] sm:$0xff] %v1400_v60  ;;  %1403 = vst [vmem:[#allocation11 + $0x78] sm:$0xff] %v1402_v22  ;;  %v1406_v12 = vld [vmem:[%s15649_s19 + $0x88] sm:$0xff] }
 0x124   :  { %1405 = vst [vmem:[#allocation11 + $0x80] sm:$0xff] %v1404_v19  ;;  %v1408_v61 = vld [vmem:[%s15649_s19 + $0x90] sm:$0xff]  ;;  %v1410_v13 = vld [vmem:[%s15649_s19 + $0x98] sm:$0xff]  ;;  %1407 = vst [vmem:[#allocation11 + $0x88] sm:$0xff] %v1406_v12 }
 0x125   :  { %1409 = vst [vmem:[#allocation11 + $0x90] sm:$0xff] %v1408_v61  ;;  %1411 = vst [vmem:[#allocation11 + $0x98] sm:$0xff] %v1410_v13  ;;  %v1412_v14 = vld [vmem:[%s15649_s19 + $0xa0] sm:$0xff] }
 0x126   :  { %1413 = vst [vmem:[#allocation11 + $0xa0] sm:$0xff] %v1412_v14 }
 0x127   :  { %1421 = vsyncadd [#allocation19 + $0x9], 2688  ;;  %v1456_v59 = vld [vmem:[%s15669_s21] sm:$0xff]  ;;  %v1458_v21 = vld [vmem:[%s15669_s21 + $0x8] sm:$0xff] }
 0x128   :  { %1457 = vst [vmem:[#allocation12] sm:$0xff] %v1456_v59  ;;  %1459 = vst [vmem:[#allocation12 + $0x8] sm:$0xff] %v1458_v21  ;;  %v1460_v20 = vld [vmem:[%s15669_s21 + $0x10] sm:$0xff]  ;;  %v1462_v19 = vld [vmem:[%s15669_s21 + $0x18] sm:$0xff] }
 0x129   :  { %v1464_v11 = vld [vmem:[%s15669_s21 + $0x20] sm:$0xff]  ;;  %1461 = vst [vmem:[#allocation12 + $0x10] sm:$0xff] %v1460_v20  ;;  %1463 = vst [vmem:[#allocation12 + $0x18] sm:$0xff] %v1462_v19 }
 0x12a   :  { %1465 = vst [vmem:[#allocation12 + $0x20] sm:$0xff] %v1464_v11 }
 0x12b   :  { %1473 = vsyncadd [#allocation19 + $0xa], 640  ;;  %v1508_v61 = vld [vmem:[%s15674_s14] sm:$0xff]  ;;  %v1510_v60 = vld [vmem:[%s15674_s14 + $0x8] sm:$0xff] }
 0x12c   :  { %1509 = vst [vmem:[#allocation13] sm:$0xff] %v1508_v61  ;;  %1511 = vst [vmem:[#allocation13 + $0x8] sm:$0xff] %v1510_v60  ;;  %v1512_v22 = vld [vmem:[%s15674_s14 + $0x10] sm:$0xff]  ;;  %v1514_v12 = vld [vmem:[%s15674_s14 + $0x18] sm:$0xff] }
 0x12d   :  { %v1516_v13 = vld [vmem:[%s15674_s14 + $0x20] sm:$0xff]  ;;  %1513 = vst [vmem:[#allocation13 + $0x10] sm:$0xff] %v1512_v22  ;;  %1515 = vst [vmem:[#allocation13 + $0x18] sm:$0xff] %v1514_v12 }
 0x12e   :  { %1517 = vst [vmem:[#allocation13 + $0x20] sm:$0xff] %v1516_v13 }
 0x12f   :  { %1525 = vsyncadd [#allocation19 + $0xb], 640  ;;  %v14758_v14 = vld [vmem:[%s15529_s9 + $0x268] ss:$12 sps:$4 sm:$0xff]   ;;  %v13105_v59 = vld [vmem:[%s15529_s9 + $0x36c] sm:$0xff]  ;;  %vm2359_vm0 = vcmask 1043456  }
 0x130   :  { %v14761_v21 = vld [vmem:[%s15529_s9 + $0x264] ss:$12 sps:$4 sm:$0xff]   ;;  %v20109_v20 = vmov 0   ;;  %v13162_v19 = vcombine.high %v13105_v59, %v13105_v59  ;;  %v13161_v11 = vcombine.low %v13105_v59, %v13105_v59  ;;  %2369 = vmatprep.subr.bf16.mxu0 %v14758_v14  ;;  %v14767_v12 = vld [vmem:[%s15529_s9 + $0x24c] ss:$12 sps:$4 sm:$0xff]   ;;  %vm2328_vm2 = vcmask 326656  }
 0x131   :  { %2532 = vmatprep.mubr.bf16.mxu1 %v20109_v20  ;;  %v14763_v61 = vld [vmem:[%s15529_s9 + $0x250] ss:$12 sps:$4 sm:$0xff]   ;;  %v14765_v60 = vld [vmem:[%s15529_s9 + $0x358] ss:$12 sps:$4 sm:$0xff]   ;;  %2370 = vmatpush1.bf16.msra.mxu0 %v14761_v21  ;;  %v14768_v13 = vld [vmem:[%s15529_s9 + $0x354] ss:$12 sps:$4 sm:$0xff]  }
 0x132   :  { %13164 = vmatprep.subr.msk.bf16.mxu1 %vm2359_vm0, %v13162_v19  ;;  %v2361_v22 = vsel %vm2359_vm0, %v13161_v11, 0  ;;  %2371 = vmatprep.subr.bf16.mxu0 %v14763_v61  ;;  %v14769_v20 = vld [vmem:[%s15529_s9 + $0x238] ss:$12 sps:$4 sm:$0xff]   ;;  %v14771_v59 = vld [vmem:[%s15529_s9 + $0x340] ss:$12 sps:$4 sm:$0xff]   ;;  %v1540_v3 = vld [vmem:[%s15524_s5 + $0x70] sm:$0xff] }
 0x133   :  { %2511 = vmatpush1.bf16.msra.mxu1 %v2361_v22  ;;  %v14773_v62 = vld [vmem:[%s15529_s9 + $0x234] ss:$12 sps:$4 sm:$0xff]   ;;  %v14774_v14 = vld [vmem:[%s15529_s9 + $0x33c] ss:$12 sps:$4 sm:$0xff]   ;;  %vm1774_vm1 = vsmask.f32 7424 }
 0x134   :  { %2512 = vmatprep.subr.bf16.mxu1 %v14765_v60  ;;  %v14775_v63 = vld [vmem:[%s15529_s9 + $0x220] ss:$12 sps:$4 sm:$0xff]   ;;  %v1537_v11 = vld [vmem:[%s15524_s5 + $0x58] sm:$0xff]  ;;  %v1689_v0 = vld [vmem:[%s15524_s5 + $0x10] sm:$0xfe]  ;;  %vm3785_vm3 = vcmask 1046528  }
 0x135   :  { %2372 = vmatpush1.bf16.msra.mxu0 %v14767_v12  ;;  %v1531_v19 = vld [vmem:[%s15524_s5 + $0x28] sm:$0xff]  ;;  %v1534_v21 = vld [vmem:[%s15524_s5 + $0x40] sm:$0xff]  ;;  %v1552_v15 = vld [vmem:[%s15524_s5 + $0xd0] sm:$0xff]  ;;  %s20540_s0 = sld [smem:[#allocation49_spill]]  ;;  %vm4957_vm4 = vcmask 146432   ;;  %vm4973_vm5 = vcmask 1040384  }
 0x136   :  { %2373 = vmatprep.subr.bf16.mxu0 %v14769_v20  ;;  %v16593_v22 = vpack.c.bf16 %v1537_v11, %v1534_v21  ;;  %v1695_v61 = vpack.c.bf16 %v1531_v19, %v1689_v0  ;;  %v14777_v60 = vld [vmem:[%s15529_s9 + $0x21c] ss:$12 sps:$4 sm:$0xff]   ;;  %v14780_v0 = vld [vmem:[%s15529_s9 + $0x204] ss:$12 sps:$4 sm:$0xff]   ;;  %v14795_v39 = vld [vmem:[%s15529_s9 + $0x30c] ss:$12 sps:$4 sm:$0xff]  }
 0x137   :  { %2513 = vmatpush1.bf16.msra.mxu1 %v14768_v13  ;;  %v14778_v20 = vld [vmem:[%s15529_s9 + $0x208] ss:$12 sps:$4 sm:$0xff]   ;;  %v14781_v19 = vld [vmem:[%s15529_s9 + $0x1f0] ss:$12 sps:$4 sm:$0xff]   ;;  %v1558_v16 = vld [vmem:[%s15524_s5 + $0x100] sm:$0xff]  ;;  %s20594_s17 = sld [smem:[#allocation51_spill]] }
 0x138   :  { %2514 = vmatprep.subr.bf16.mxu1 %v14771_v59  ;;  %v1800_v1 = vshrl.u32 %v1695_v61, 16  ;;  %v1802_v12 = vshll.u32 %v1695_v61, 16  ;;  %v1807_v2 = vshll.u32 %v16593_v22, 16  ;;  %v1543_v13 = vld [vmem:[%s15524_s5 + $0x88] sm:$0xff]  ;;  %v1827_v11 = vshrl.u32 %v16593_v22, 16  ;;  %v1549_v61 = vld [vmem:[%s15524_s5 + $0xb8] sm:$0xff] }
 0x139   :  { %2374 = vmatpush1.bf16.msra.mxu0 %v14773_v62  ;;  %v16600_v21 = vpack.c.bf16 %v1543_v13, %v1540_v3  ;;  %v14784_v13 = vld [vmem:[%s15529_s9 + $0x1d8] ss:$12 sps:$4 sm:$0xff]   ;;  %v14793_v5 = vld [vmem:[%s15529_s9 + $0x310] ss:$12 sps:$4 sm:$0xff]   ;;  %v1688_v8 = vld [vmem:[%s15524_s5 + $0x8] sm:$0xfe] }
 0x13a   :  { %2375 = vmatprep.subr.bf16.mxu0 %v14775_v63  ;;  %v1804_v4 = vrot.slane %v1802_v12, 1  ;;  %v1809_v59 = vrot.slane %v1807_v2, 1  ;;  %v1530_v7 = vld [vmem:[%s15524_s5 + $0x20] sm:$0xff]  ;;  %v14818_v9 = vld [vmem:[%s15529_s9 + $0x2fc] ss:$12 sps:$4 sm:$0xff]   ;;  %v1548_v49 = vld [vmem:[%s15524_s5 + $0xb0] sm:$0xff] }
 0x13b   :  { %2515 = vmatpush1.bf16.msra.mxu1 %v14774_v14  ;;  %v1831_v63 = vshll.u32 %v16600_v21, 16  ;;  %v1546_v14 = vld [vmem:[%s15524_s5 + $0xa0] sm:$0xff]  ;;  %v1694_v18 = vpack.c.bf16 %v1530_v7, %v1688_v8  ;;  %v14805_v42 = vld [vmem:[%s15529_s9 + $0x2b0] ss:$12 sps:$4 sm:$0xff]   ;;  %v1539_v56 = vld [vmem:[%s15524_s5 + $0x68] sm:$0xff]  ;;  %s20599_s21 = sld [smem:[#allocation52_spill]] }
 0x13c   :  { %v1805_v62 = vor.u32 %v1804_v4, %v1800_v1  ;;  %v20419_v1 = vmov 0   ;;  %v1829_v3 = vor.u32 %v1827_v11, %v1809_v59  ;;  %v16615_v12 = vpack.c.bf16 %v1549_v61, %v1546_v14  ;;  %v1555_v11 = vld [vmem:[%s15524_s5 + $0xe8] sm:$0xff]  ;;  %v14796_v7 = vld [vmem:[%s15529_s9 + $0x2f8] ss:$12 sps:$4 sm:$0xff]   ;;  %v14816_v8 = vld [vmem:[%s15529_s9 + $0x314] ss:$12 sps:$4 sm:$0xff]  }
 0x13d   :  { %2376 = vmatpush1.bf16.msra.mxu0 %v14777_v60  ;;  %v1833_v4 = vrot.slane %v1831_v63, 1  ;;  %v14783_v60 = vld [vmem:[%s15529_s9 + $0x1ec] ss:$12 sps:$4 sm:$0xff]   ;;  %v16629_v63 = vpack.c.bf16 %v1555_v11, %v1552_v15  ;;  %v14821_v10 = vld [vmem:[%s15529_s9 + $0x224] ss:$12 sps:$4 sm:$0xff]   ;;  %vm5626_vm6 = vcmask 261120  }
 0x13e   :  { %2377 = vmatprep.subr.bf16.mxu0 %v14778_v20  ;;  %v16609_v2 = vsel %vm1774_vm1, %v1805_v62, %v1809_v59  ;;  %v14786_v20 = vld [vmem:[%s15529_s9 + $0x1d4] ss:$12 sps:$4 sm:$0xff]   ;;  %v1855_v59 = vshll.u32 %v16615_v12, 16  ;;  %v1875_v6 = vshrl.u32 %v16615_v12, 16  ;;  %v1561_v11 = vld [vmem:[%s15524_s5 + $0x118] sm:$0xff]  ;;  %v1563_v28 = vld [vmem:[%s15524_s5 + $0x128] sm:$0xff] }
 0x13f   :  { %13165 = vmatmul.mubr.msk.bf16.vlgmr.msra.gmra.mxu1 %vm2328_vm2, %v16609_v2  ;;  %v16621_v62 = vsel %vm1774_vm1, %v1829_v3, %v1833_v4  ;;  %v14789_v3 = vld [vmem:[%s15529_s9 + $0x1bc] ss:$12 sps:$4 sm:$0xff]   ;;  %v1879_v15 = vshll.u32 %v16629_v63, 16  ;;  %v14804_v41 = vld [vmem:[%s15529_s9 + $0x2c4] ss:$12 sps:$4 sm:$0xff]   ;;  %vm6211_vm7 = vcmask 195584  }
 0x140   :  { %2542 = vmatprep.mubr.bf16.mxu1 %v20419_v1  ;;  %v1857_v61 = vrot.slane %v1855_v59, 1  ;;  %v1533_v59 = vld [vmem:[%s15524_s5 + $0x38] sm:$0xff]  ;;  %v1542_v44 = vld [vmem:[%s15524_s5 + $0x80] sm:$0xff]  ;;  %v1556_v27 = vld [vmem:[%s15524_s5 + $0xf0] sm:$0xff]  ;;  %vm6230_vm8 = vcmask 191488  }
 0x141   :  { %2378 = vmatpush1.bf16.msra.mxu0 %v14780_v0  ;;  %v1851_v0 = vshrl.u32 %v16600_v21, 16  ;;  %v14808_v57 = vld [vmem:[%s15529_s9 + $0x298] ss:$12 sps:$4 sm:$0xff]   ;;  %v14827_v47 = vld [vmem:[%s15529_s9 + $0x1dc] ss:$12 sps:$4 sm:$0xff]  }
 0x142   :  { %2379 = vmatprep.subr.bf16.mxu0 %v14781_v19  ;;  %v14787_v19 = vld [vmem:[%s15529_s9 + $0x1c0] ss:$12 sps:$4 sm:$0xff]   ;;  %v1541_v46 = vld [vmem:[%s15524_s5 + $0x78] sm:$0xff]  ;;  %v14828_v50 = vld [vmem:[%s15529_s9 + $0x284] ss:$12 sps:$4 sm:$0xff]  }
 0x143   :  { %v1853_v14 = vor.u32 %v1851_v0, %v1833_v4  ;;  %v14815_v0 = vld [vmem:[%s15529_s9 + $0x26c] ss:$12 sps:$4 sm:$0xff]   ;;  %v1538_v45 = vld [vmem:[%s15524_s5 + $0x60] sm:$0xff] }
 0x144   :  { %v1545_v48 = vld [vmem:[%s15524_s5 + $0x98] sm:$0xff]  ;;  %v16743_v51 = vpack.c.bf16 %v1541_v46, %v1538_v45  ;;  %v1571_v33 = vld [vmem:[%s15524_s5 + $0x168] sm:$0xff]  ;;  %v14836_v36 = vld [vmem:[%s15529_s9 + $0x94] ss:$12 sps:$4 sm:$0xff]  }
 0x145   :  { %2380 = vmatpush1.bf16.msra.mxu0 %v14783_v60  ;;  %v14790_v60 = vld [vmem:[%s15529_s9 + $0x328] ss:$12 sps:$4 sm:$0xff]   ;;  %v16643_v4 = vsel %vm1774_vm1, %v1853_v14, %v1857_v61  ;;  %v1877_v14 = vor.u32 %v1875_v6, %v1857_v61  ;;  %v14799_v61 = vld [vmem:[%s15529_s9 + $0x2e0] ss:$12 sps:$4 sm:$0xff]   ;;  %v16746_v53 = vpack.c.bf16 %v1548_v49, %v1545_v48 }
 0x146   :  { %2381 = vmatprep.subr.bf16.mxu0 %v14784_v13  ;;  %v14792_v13 = vld [vmem:[%s15529_s9 + $0x324] ss:$12 sps:$4 sm:$0xff]   ;;  %v1815_v49 = vshll.u32 %v16743_v51, 16 }
 0x147   :  { %13166 = vmatmul.mubr.msk.bf16.gmra.mxu1 %vm2328_vm2, %v16621_v62  ;;  %v1574_v38 = vld [vmem:[%s15524_s5 + $0x180] sm:$0xff] }
 0x148   :  { %2552 = vmatprep.mubr.bf16.mxu1 %v20419_v1 }
 0x149   :  { %2382 = vmatpush1.bf16.msra.mxu0 %v14786_v20  ;;  %v14813_v20 = vld [vmem:[%s15529_s9 + $0x32c] ss:$12 sps:$4 sm:$0xff]  }
 0x14a   :  { %2383 = vmatprep.subr.bf16.mxu0 %v14787_v19  ;;  %14118 = vmatprep.subr.bf16.mxu1 %v14813_v20  ;;  %v1536_v19 = vld [vmem:[%s15524_s5 + $0x50] sm:$0xff]  ;;  %v1788_v20 = vshrl.u32 %v1694_v18, 16 }
 0x14b   :  { %14119 = vmatpush3.bf16.msra.mxu1 %v14815_v0  ;;  %v16649_v17 = vpack.c.bf16 %v1536_v19, %v1533_v59  ;;  %v1790_v0 = vshll.u32 %v1694_v18, 16  ;;  %v14798_v19 = vld [vmem:[%s15529_s9 + $0x2f4] ss:$12 sps:$4 sm:$0xff]  }
 0x14c   :  { %14120 = vmatprep.subr.bf16.mxu1 %v14816_v8 }
 0x14d   :  { %2384 = vmatpush1.bf16.msra.mxu0 %v14789_v3  ;;  %v16654_v3 = vpack.c.bf16 %v1561_v11, %v1558_v16  ;;  %v1795_v59 = vshll.u32 %v16649_v17, 16  ;;  %v1792_v6 = vrot.slane %v1790_v0, 1  ;;  %v1564_v11 = vld [vmem:[%s15524_s5 + $0x130] sm:$0xff]  ;;  %v1567_v0 = vld [vmem:[%s15524_s5 + $0x148] sm:$0xff] }
 0x14e   :  { %2385 = vmatprep.subr.bf16.mxu0 %v14790_v60  ;;  %v1881_v60 = vrot.slane %v1879_v15, 1  ;;  %v14817_v15 = vld [vmem:[%s15529_s9 + $0x254] ss:$12 sps:$4 sm:$0xff]  }
 0x14f   :  { %13167 = vmatmul.mubr.msk.bf16.gmra.mxu1 %vm2328_vm2, %v16643_v4  ;;  %20420 = vst [vmem:[#allocation280_spill] sm:$0xff] %v16654_v3  ;;  %v16661_v16 = vrot.slane %v1795_v59, 1  ;;  %v1793_v40 = vor.u32 %v1792_v6, %v1788_v20  ;;  %v14801_v59 = vld [vmem:[%s15529_s9 + $0x2dc] ss:$12 sps:$4 sm:$0xff]   ;;  %v1570_v6 = vld [vmem:[%s15524_s5 + $0x160] sm:$0xff] }
 0x150   :  { %2562 = vmatprep.mubr.bf16.mxu1 %v20419_v1  ;;  %v16667_v18 = vsel %vm1774_vm1, %v1877_v14, %v1881_v60  ;;  %14121 = vmatpush3.bf16.msra.mxu1 %v14817_v15  ;;  %v14802_v20 = vld [vmem:[%s15529_s9 + $0x2c8] ss:$12 sps:$4 sm:$0xff]   ;;  %v1529_v15 = vld [vmem:[%s15524_s5 + $0x18] sm:$0xff] }
 0x151   :  { %2386 = vmatpush2.bf16.msra.mxu0 %v14792_v13  ;;  %v1903_v13 = vshll.u32 %v16654_v3, 16  ;;  %v16676_v8 = vsel %vm1774_vm1, %v1793_v40, %v16661_v16  ;;  %14122 = vmatprep.subr.bf16.mxu1 %v14818_v9  ;;  %v16684_v40 = vpack.c.bf16 %v1567_v0, %v1564_v11  ;;  %v14820_v9 = vld [vmem:[%s15529_s9 + $0x2e4] ss:$12 sps:$4 sm:$0xff]  }
 0x152   :  { %2387 = vmatprep.subr.bf16.mxu0 %v14793_v5  ;;  %v1899_v5 = vshrl.u32 %v16629_v63, 16  ;;  %2401 = vmatprep.mubr.bf16.mxu0 %v16676_v8  ;;  %v1532_v0 = vld [vmem:[%s15524_s5 + $0x30] sm:$0xff] }
 0x153   :  { %v1905_v14 = vrot.slane %v1903_v13, 1  ;;  %v1687_v13 = vld [vmem:[%s15524_s5] sm:$0xfe]  ;;  %v1927_v11 = vshll.u32 %v16684_v40, 16 }
 0x154   :  { %v1693_v55 = vpack.c.bf16 %v1529_v15, %v1687_v13  ;;  %v1947_v15 = vshrl.u32 %v16684_v40, 16  ;;  %v16716_v13 = vpack.c.bf16 %v1542_v44, %v1539_v56 }
 0x155   :  { %2388 = vmatpush2.bf16.msra.mxu0 %v14795_v39  ;;  %v14819_v39 = vld [vmem:[%s15529_s9 + $0x23c] ss:$12 sps:$4 sm:$0xff]  }
 0x156   :  { %2389 = vmatprep.subr.bf16.mxu0 %v14796_v7  ;;  %v1901_v7 = vor.u32 %v1899_v5, %v1881_v60  ;;  %14123 = vmatpush3.bf16.msra.mxu1 %v14819_v39  ;;  %v1573_v60 = vld [vmem:[%s15524_s5 + $0x178] sm:$0xff]  ;;  %v1535_v39 = vld [vmem:[%s15524_s5 + $0x48] sm:$0xff]  ;;  %v1776_v56 = vshrl.u32 %v1693_v55, 16 }
 0x157   :  { %13168 = vmatmul.mubr.msk.bf16.gmra.mxu1 %vm2328_vm2, %v16667_v18  ;;  %14124 = vmatprep.subr.bf16.mxu1 %v14820_v9  ;;  %v14823_v9 = vld [vmem:[%s15529_s9 + $0x20c] ss:$12 sps:$4 sm:$0xff]   ;;  %v16704_v43 = vpack.c.bf16 %v1573_v60, %v1570_v6  ;;  %v16712_v58 = vpack.c.bf16 %v1535_v39, %v1532_v0  ;;  %v1778_v6 = vshll.u32 %v1693_v55, 16  ;;  %v14810_v60 = vld [vmem:[%s15529_s9 + $0x294] ss:$12 sps:$4 sm:$0xff]  }
 0x158   :  { %2572 = vmatprep.mubr.bf16.mxu1 %v20419_v1  ;;  %v16696_v5 = vsel %vm1774_vm1, %v1901_v7, %v1905_v14  ;;  %v14824_v7 = vld [vmem:[%s15529_s9 + $0x2b4] ss:$12 sps:$4 sm:$0xff]  }
 0x159   :  { %2390 = vmatpush2.bf16.msra.mxu0 %v14798_v19  ;;  %v14822_v19 = vld [vmem:[%s15529_s9 + $0x2cc] ss:$12 sps:$4 sm:$0xff]   ;;  %20421 = vst [vmem:[#allocation281_spill] sm:$0xff] %v16704_v43  ;;  %v1951_v0 = vshll.u32 %v16704_v43, 16  ;;  %v1576_v39 = vld [vmem:[%s15524_s5 + $0x190] sm:$0xff] }
 0x15a   :  { %2391 = vmatprep.subr.bf16.mxu0 %v14799_v61  ;;  %v1923_v61 = vshrl.u32 %v16654_v3, 16  ;;  %14125 = vmatpush3.bf16.msra.mxu1 %v14821_v10 }
 0x15b   :  { %14126 = vmatprep.subr.bf16.mxu1 %v14822_v19  ;;  %v14825_v19 = vld [vmem:[%s15529_s9 + $0x1f4] ss:$12 sps:$4 sm:$0xff]  }
 0x15c   :  { %v1925_v10 = vor.u32 %v1923_v61, %v1905_v14  ;;  %v14811_v14 = vld [vmem:[%s15529_s9 + $0x280] ss:$12 sps:$4 sm:$0xff]  }
 0x15d   :  { %2392 = vmatpush2.bf16.msra.mxu0 %v14801_v59  ;;  %v14807_v59 = vld [vmem:[%s15529_s9 + $0x2ac] ss:$12 sps:$4 sm:$0xff]  }
 0x15e   :  { %2393 = vmatprep.subr.bf16.mxu0 %v14802_v20  ;;  %v1929_v20 = vrot.slane %v1927_v11, 1  ;;  %14127 = vmatpush3.bf16.msra.mxu1 %v14823_v9  ;;  %v1579_v61 = vld [vmem:[%s15524_s5 + $0x1a8] sm:$0xff]  ;;  %v1780_v11 = vrot.slane %v1778_v6, 1  ;;  %v1819_v9 = vshrl.u32 %v16649_v17, 16 }
 0x15f   :  { %13169 = vmatmul.mubr.msk.bf16.gmra.mxu1 %vm2328_vm2, %v16696_v5  ;;  %14128 = vmatprep.subr.bf16.mxu1 %v14824_v7  ;;  %v1823_v7 = vshll.u32 %v16716_v13, 16 }
 0x160   :  { %2582 = vmatprep.mubr.bf16.mxu1 %v20419_v1  ;;  %v16727_v44 = vsel %vm1774_vm1, %v1925_v10, %v1929_v20  ;;  %v1949_v55 = vor.u32 %v1947_v15, %v1929_v20  ;;  %v1953_v10 = vrot.slane %v1951_v0, 1  ;;  %v1781_v6 = vor.u32 %v1780_v11, %v1776_v56  ;;  %v14829_v20 = vld [vmem:[%s15529_s9 + $0x1c4] ss:$12 sps:$4 sm:$0xff]   ;;  %v14830_v15 = vld [vmem:[%s15529_s9 + $0x374] ss:$0 sps:$4 sm:$0xff]   ;;  %v1551_v56 = vld [vmem:[%s15524_s5 + $0xc8] sm:$0xff] }
 0x161   :  { %2394 = vmatpush2.bf16.msra.mxu0 %v14804_v41  ;;  %v14826_v41 = vld [vmem:[%s15529_s9 + $0x29c] ss:$12 sps:$4 sm:$0xff]   ;;  %v1825_v52 = vrot.slane %v1823_v7, 1  ;;  %v1971_v0 = vshrl.u32 %v16704_v43, 16  ;;  %v1554_v11 = vld [vmem:[%s15524_s5 + $0xe0] sm:$0xff] }
 0x162   :  { %2395 = vmatprep.subr.bf16.mxu0 %v14805_v42  ;;  %v1783_v42 = vshll.u32 %v16712_v58, 16  ;;  %14129 = vmatpush3.bf16.msra.mxu1 %v14825_v19  ;;  %v16754_v46 = vsel %vm1774_vm1, %v1949_v55, %v1953_v10  ;;  %v16782_v54 = vpack.c.bf16 %v1554_v11, %v1551_v56  ;;  %v1560_v56 = vld [vmem:[%s15524_s5 + $0x110] sm:$0xff]  ;;  %v14849_v11 = vld [vmem:[%s15529_s9 + $0x35c] ss:$12 sps:$4 sm:$0xff]  }
 0x163   :  { %14130 = vmatprep.subr.bf16.mxu1 %v14826_v41  ;;  %v1821_v41 = vor.u32 %v1819_v9, %v16661_v16  ;;  %v1692_v16 = vld [vmem:[%s15524_s5 + $0x1c0] sm:$0x7]  ;;  %v2367_v9 = vsel %vm2359_vm0, %v14830_v15, 0  ;;  %v1973_v7 = vor.u32 %v1971_v0, %v1953_v10 }
 0x164   :  { %v1785_v19 = vrot.slane %v1783_v42, 1  ;;  %v1544_v42 = vld [vmem:[%s15524_s5 + $0x90] sm:$0xff] }
 0x165   :  { %2396 = vmatpush2.bf16.msra.mxu0 %v14807_v59  ;;  %v14814_v59 = vld [vmem:[%s15529_s9 + $0x27c] ss:$12 sps:$4 sm:$0xff]  }
 0x166   :  { %2397 = vmatprep.subr.bf16.mxu0 %v14808_v57  ;;  %v16740_v57 = vpack.c.bf16 %v1579_v61, %v1576_v39  ;;  %14131 = vmatpush3.bf16.msra.mxu1 %v14827_v47  ;;  %v16757_v48 = vsel %vm1774_vm1, %v1781_v6, %v1785_v19  ;;  %v1811_v47 = vshrl.u32 %v16712_v58, 16  ;;  %v1843_v39 = vshrl.u32 %v16716_v13, 16  ;;  %v1547_v61 = vld [vmem:[%s15524_s5 + $0xa8] sm:$0xff] }
 0x167   :  { %13170 = vmatmul.mubr.msk.bf16.gmra.mxu1 %vm2328_vm2, %v16727_v44  ;;  %14132 = vmatprep.subr.bf16.mxu1 %v14828_v50  ;;  %v16763_v50 = vsel %vm1774_vm1, %v1821_v41, %v1825_v52  ;;  %v1817_v6 = vrot.slane %v1815_v49, 1  ;;  %v16778_v41 = vpack.c.bf16 %v1692_v16, %v1692_v16  ;;  %v1835_v49 = vshrl.u32 %v16743_v51, 16  ;;  %v1553_v16 = vld [vmem:[%s15524_s5 + $0xd8] sm:$0xff] }
 0x168   :  { %20422 = vst [vmem:[#allocation282_spill] sm:$0xff] %v16740_v57  ;;  %2592 = vmatprep.mubr.bf16.mxu1 %v20419_v1  ;;  %v1975_v45 = vshll.u32 %v16740_v57, 16  ;;  %v1995_v0 = vshrl.u32 %v16740_v57, 16 }
 0x169   :  { %2398 = vmatpush2.bf16.msra.mxu0 %v14810_v60  ;;  %v14833_v60 = vld [vmem:[%s15529_s9 + $0xac] ss:$12 sps:$4 sm:$0xff]  }
 0x16a   :  { %2399 = vmatprep.subr.bf16.mxu0 %v14811_v14  ;;  %v1847_v14 = vshll.u32 %v16746_v53, 16  ;;  %14133 = vmatpush3.bf16.msra.mxu1 %v14829_v20  ;;  %v1977_v55 = vrot.slane %v1975_v45, 1  ;;  %v16780_v20 = vpack.c.bf16 %v1547_v61, %v1544_v42  ;;  %v1550_v45 = vld [vmem:[%s15524_s5 + $0xc0] sm:$0xff]  ;;  %v1871_v42 = vshll.u32 %v16782_v54, 16  ;;  %v1557_v61 = vld [vmem:[%s15524_s5 + $0xf8] sm:$0xff] }
 0x16b   :  { %3182 = vmatprep.subr.bf16.mxu1 %v14833_v60  ;;  %v16809_v23 = vpack.c.bf16 %v1553_v16, %v1550_v45  ;;  %v16811_v26 = vpack.c.bf16 %v1560_v56, %v1557_v61  ;;  %v1565_v61 = vld [vmem:[%s15524_s5 + $0x138] sm:$0xff]  ;;  %v2009_v56 = vshrl.u32 %v16778_v41, 16 }
 0x16c   :  { %v1849_v60 = vrot.slane %v1847_v14, 1  ;;  %v16785_v10 = vsel %vm1774_vm1, %v1973_v7, %v1977_v55  ;;  %v1867_v14 = vshrl.u32 %v16746_v53, 16  ;;  %v1873_v25 = vrot.slane %v1871_v42, 1 }
 0x16d   :  { %2400 = vmatpush2.bf16.msra.mxu0 %v14814_v59  ;;  %v1813_v59 = vor.u32 %v1811_v47, %v1785_v19  ;;  %v1999_v47 = vshll.u32 %v16778_v41, 16  ;;  %v1859_v45 = vshrl.u32 %v16780_v20, 16  ;;  %v1895_v42 = vshll.u32 %v16811_v26, 16 }
 0x16e   :  { %14707 = vmatprep.subr.msk.bf16.mxu0 %vm2359_vm0, %v14830_v15  ;;  %v1845_v15 = vor.u32 %v1843_v39, %v1825_v52  ;;  %v1839_v52 = vshll.u32 %v16780_v20, 16  ;;  %v1869_v24 = vor.u32 %v1867_v14, %v1849_v60  ;;  %v1891_v14 = vshrl.u32 %v16782_v54, 16 }
 0x16f   :  { %13171 = vmatmul.mubr.msk.bf16.gmra.mxu1 %vm2328_vm2, %v16754_v46  ;;  %v16790_v19 = vsel %vm1774_vm1, %v1813_v59, %v1817_v6  ;;  %v2001_v7 = vrot.slane %v1999_v47, 1  ;;  %v1837_v59 = vor.u32 %v1835_v49, %v1817_v6  ;;  %v1566_v49 = vld [vmem:[%s15524_s5 + $0x140] sm:$0xff]  ;;  %v1897_v30 = vrot.slane %v1895_v42, 1 }
 0x170   :  { %2402 = vmatmul.mubr.bf16.vlgmr.msra.gmra.mxu0 %v16757_v48  ;;  %2602 = vmatprep.mubr.bf16.mxu1 %v20419_v1  ;;  %v16797_v39 = vsel %vm1774_vm1, %v1845_v15, %v1849_v60  ;;  %v1841_v15 = vrot.slane %v1839_v52, 1  ;;  %v1863_v60 = vshll.u32 %v16809_v23, 16  ;;  %v1562_v52 = vld [vmem:[%s15524_s5 + $0x120] sm:$0xff]  ;;  %v16828_v16 = vsel %vm1774_vm1, %v1869_v24, %v1873_v25 }
 0x171   :  { %2411 = vmatprep.mubr.bf16.mxu0 %v16763_v50  ;;  %14458 = vmatpush3.bf16.msra.mxu0 %v2367_v9  ;;  %v1997_v9 = vor.u32 %v1995_v0, %v1977_v55  ;;  %v14856_v55 = vld [vmem:[%s15529_s9 + $0x344] ss:$12 sps:$4 sm:$0xff]   ;;  %v1559_v0 = vld [vmem:[%s15524_s5 + $0x108] sm:$0xff]  ;;  %v1893_v29 = vor.u32 %v1891_v14, %v1873_v25  ;;  %v16845_v31 = vor.u32 %v2009_v56, %v2001_v7  ;;  %v1915_v25 = vshrl.u32 %v16811_v26, 16 }
 0x172   :  { %14459 = vmatprep.subr.bf16.mxu0 %v14849_v11  ;;  %v16821_v6 = vsel %vm1774_vm1, %v1837_v59, %v1841_v15  ;;  %v1861_v24 = vor.u32 %v1859_v45, %v1841_v15  ;;  %v16841_v59 = vpack.c.bf16 %v1566_v49, %v1563_v28  ;;  %v16860_v45 = vld [vmem:[%s15529_s9 + $0x1b0] sm:$0xff] }
 0x173   :  { %v16818_v47 = vsel %vm1774_vm1, %v1997_v9, %v2001_v7  ;;  %v1865_v9 = vrot.slane %v1863_v60, 1  ;;  %v16855_v28 = vsel %vm1774_vm1, %v1893_v29, %v1897_v30  ;;  %v1569_v7 = vld [vmem:[%s15524_s5 + $0x158] sm:$0xff]  ;;  %v1572_v60 = vld [vmem:[%s15524_s5 + $0x170] sm:$0xff]  ;;  %v13240_v49 = vcombine.high %v16860_v45, %v16860_v45 }
 0x174   :  { %v1919_v32 = vshll.u32 %v16841_v59, 16  ;;  %v1939_v56 = vshrl.u32 %v16841_v59, 16  ;;  %v1917_v34 = vor.u32 %v1915_v25, %v1897_v30  ;;  %v16874_v35 = vpack.c.bf16 %v1572_v60, %v1569_v7  ;;  %v1578_v25 = vld [vmem:[%s15524_s5 + $0x1a0] sm:$0xff]  ;;  %v14834_v7 = vld [vmem:[%s15529_s9 + $0x90] ss:$12 sps:$4 sm:$0xff]  }
 0x175   :  { %14460 = vmatpush3.bf16.msra.mxu0 %v14849_v11  ;;  %v16837_v11 = vpack.c.bf16 %v1559_v0, %v1556_v27  ;;  %v16849_v41 = vsel %vm1774_vm1, %v1861_v24, %v1865_v9  ;;  %v1883_v0 = vshrl.u32 %v16809_v23, 16  ;;  %v1568_v24 = vld [vmem:[%s15524_s5 + $0x150] sm:$0xff] }
 0x176   :  { %14461 = vmatprep.subr.bf16.mxu0 %v14856_v55  ;;  %v1921_v42 = vrot.slane %v1919_v32, 1  ;;  %v1943_v32 = vshll.u32 %v16874_v35, 16  ;;  %v1963_v37 = vshrl.u32 %v16874_v35, 16 }
 0x177   :  { %13172 = vmatmul.mubr.msk.bf16.gmra.mxu1 %vm2328_vm2, %v16785_v10  ;;  %v1887_v27 = vshll.u32 %v16837_v11, 16  ;;  %v1885_v14 = vor.u32 %v1883_v0, %v1865_v9  ;;  %v16886_v0 = vpack.c.bf16 %v1571_v33, %v1568_v24  ;;  %v14837_v24 = vld [vmem:[%s15529_s9 + $0x78] ss:$12 sps:$4 sm:$0xff]  }
 0x178   :  { %2412 = vmatmul.mubr.bf16.gmra.mxu0 %v16790_v19  ;;  %2612 = vmatprep.mubr.bf16.mxu1 %v20419_v1  ;;  %v16883_v9 = vsel %vm1774_vm1, %v1917_v34, %v1921_v42  ;;  %v1941_v33 = vor.u32 %v1939_v56, %v1921_v42  ;;  %v1945_v60 = vrot.slane %v1943_v32, 1  ;;  %v14842_v42 = vld [vmem:[%s15529_s9 + $0x64] ss:$12 sps:$4 sm:$0xff]   ;;  %v14840_v56 = vld [vmem:[%s15529_s9 + $0x60] ss:$12 sps:$4 sm:$0xff]  }
 0x179   :  { %2421 = vmatprep.mubr.bf16.mxu0 %v16797_v39  ;;  %14462 = vmatpush3.bf16.msra.mxu0 %v14856_v55  ;;  %v16843_v55 = vpack.c.bf16 %v1565_v61, %v1562_v52  ;;  %v1889_v29 = vrot.slane %v1887_v27, 1  ;;  %v1907_v52 = vshrl.u32 %v16837_v11, 16  ;;  %v14831_v27 = vld [vmem:[%s15529_s9 + $0xa8] ss:$12 sps:$4 sm:$0xff]  }
 0x17a   :  { %13242 = vmatprep.subr.msk.bf16.mxu0 %vm2359_vm0, %v13240_v49  ;;  %v1935_v49 = vshll.u32 %v16886_v0, 16 }
 0x17b   :  { %v1911_v15 = vshll.u32 %v16843_v55, 16  ;;  %v1931_v30 = vshrl.u32 %v16843_v55, 16  ;;  %v1909_v34 = vor.u32 %v1907_v52, %v1889_v29 }
 0x17c   :  { %v1937_v32 = vrot.slane %v1935_v49, 1  ;;  %v14848_v49 = vld [vmem:[%s15529_s9 + $0x34] ss:$12 sps:$4 sm:$0xff]  }
 0x17d   :  { %v1913_v61 = vrot.slane %v1911_v15, 1  ;;  %v1575_v15 = vld [vmem:[%s15524_s5 + $0x188] sm:$0xff] }
 0x17f   :  { %13173 = vmatmul.mubr.msk.bf16.gmra.mxu1 %vm2328_vm2, %v16818_v47  ;;  %v16905_v57 = vsel %vm1774_vm1, %v1909_v34, %v1913_v61  ;;  %v14845_v34 = vld [vmem:[%s15529_s9 + $0x4c] ss:$12 sps:$4 sm:$0xff]  }
 0x180   :  { %2422 = vmatmul.mubr.bf16.gmra.mxu0 %v16821_v6  ;;  %2622 = vmatprep.mubr.bf16.mxu1 %v20419_v1 }
 0x181   :  { %2431 = vmatprep.mubr.bf16.mxu0 %v16828_v16 }
 0x187   :  { %13174 = vmatmul.mubr.msk.bf16.gmra.mxu1 %vm2328_vm2, %v16845_v31 }
 0x188   :  { %2432 = vmatmul.mubr.bf16.gmra.mxu0 %v16849_v41  ;;  %2663 = vmatprep.mubr.bf16.mxu1 %v16676_v8  ;;  %v16879_v8 = vsel %vm1774_vm1, %v1885_v14, %v1889_v29  ;;  %v16897_v14 = vpack.c.bf16 %v1578_v25, %v1575_v15  ;;  %v16908_v29 = vsel %vm1774_vm1, %v1941_v33, %v1945_v60 }
 0x189   :  { %2441 = vmatprep.mubr.bf16.mxu0 %v16855_v28  ;;  %v1965_v25 = vor.u32 %v1963_v37, %v1945_v60 }
 0x18a   :  { %v1967_v52 = vshll.u32 %v16897_v14, 16  ;;  %v1987_v37 = vshrl.u32 %v16897_v14, 16 }
 0x18f   :  { %2664 = vmatmul.mubr.bf16.vlgmr.msra.gmra.mxu1 %v16757_v48  ;;  %v14839_v48 = vld [vmem:[%s15529_s9 + $0x7c] ss:$12 sps:$4 sm:$0xff]  }
 0x190   :  { %2442 = vmatmul.mubr.bf16.gmra.mxu0 %v16879_v8  ;;  %2671 = vmatprep.mubr.bf16.mxu1 %v16763_v50  ;;  %v1577_v50 = vld [vmem:[%s15524_s5 + $0x198] sm:$0xff] }
 0x191   :  { %2451 = vmatprep.mubr.bf16.mxu0 %v16883_v9  ;;  %3183 = vmatpush1.bf16.msra.mxu1 %v14831_v27  ;;  %v1933_v27 = vor.u32 %v1931_v30, %v1913_v61  ;;  %v16918_v15 = vpack.c.bf16 %v1577_v50, %v1574_v38  ;;  %v14843_v38 = vld [vmem:[%s15529_s9 + $0x48] ss:$12 sps:$4 sm:$0xff]  }
 0x192   :  { %3184 = vmatprep.subr.bf16.mxu1 %v14836_v36  ;;  %v1691_v36 = vld [vmem:[%s15524_s5 + $0x1b8] sm:$0x7] }
 0x193   :  { %20423 = vst [vmem:[#allocation283_spill] sm:$0xff] %v16918_v15  ;;  %v1697_v33 = vpack.c.bf16 %v1691_v36, %v1691_v36  ;;  %v1959_v43 = vshll.u32 %v16918_v15, 16 }
 0x195   :  { %3185 = vmatpush1.bf16.msra.mxu1 %v14834_v7  ;;  %v1969_v7 = vrot.slane %v1967_v52, 1  ;;  %v1991_v30 = vshll.u32 %v1697_v33, 16  ;;  %v1961_v50 = vrot.slane %v1959_v43, 1  ;;  %v14850_v43 = vld [vmem:[%s15529_s9 + $0x18] ss:$12 sps:$4 sm:$0xff]  }
 0x196   :  { %3186 = vmatprep.subr.bf16.mxu1 %v14839_v48  ;;  %v16923_v48 = vsel %vm1774_vm1, %v1933_v27, %v1937_v32  ;;  %v14852_v27 = vld [vmem:[%s15529_s9 + $0x1c] ss:$12 sps:$4 sm:$0xff]  }
 0x197   :  { %2672 = vmatmul.mubr.bf16.gmra.mxu1 %v16790_v19  ;;  %v1690_v19 = vld [vmem:[%s15524_s5 + $0x1b0] sm:$0x7]  ;;  %v16928_v61 = vsel %vm1774_vm1, %v1965_v25, %v1969_v7  ;;  %v1989_v52 = vor.u32 %v1987_v37, %v1969_v7  ;;  %v2006_v7 = vshrl.u32 %v1697_v33, 16  ;;  %v14859_v37 = vld [vmem:[%s15529_s9 + $0x16c] ss:$12 sps:$4 sm:$0xff]  }
 0x198   :  { %2452 = vmatmul.mubr.bf16.gmra.mxu0 %v16905_v57  ;;  %2679 = vmatprep.mubr.bf16.mxu1 %v16797_v39  ;;  %v1955_v39 = vshrl.u32 %v16886_v0, 16  ;;  %v1696_v60 = vpack.c.bf16 %v1690_v19, %v1690_v19  ;;  %v14855_v19 = vld [vmem:[%s15529_s9 + $0x4] ss:$12 sps:$4 sm:$0xff]   ;;  %v14857_v33 = vld [vmem:[%s15529_s9 + $0x168] ss:$12 sps:$4 sm:$0xff]  }
 0x199   :  { %2461 = vmatprep.mubr.bf16.mxu0 %v16908_v29  ;;  %3187 = vmatpush1.bf16.msra.mxu1 %v14837_v24 }
 0x19a   :  { %3188 = vmatprep.subr.bf16.mxu1 %v14842_v42  ;;  %v1957_v24 = vor.u32 %v1955_v39, %v1937_v32  ;;  %v1993_v42 = vrot.slane %v1991_v30, 1  ;;  %v1983_v36 = vshll.u32 %v1696_v60, 16 }
 0x19c   :  { %v16940_v25 = vsel %vm1774_vm1, %v1957_v24, %v1961_v50  ;;  %v1985_v32 = vrot.slane %v1983_v36, 1  ;;  %v14869_v36 = vld [vmem:[%s15529_s9 + $0x108] ss:$12 sps:$4 sm:$0xff]  }
 0x19d   :  { %3189 = vmatpush1.bf16.msra.mxu1 %v14840_v56  ;;  %v14846_v56 = vld [vmem:[%s15529_s9 + $0x30] ss:$12 sps:$4 sm:$0xff]  }
 0x19e   :  { %3190 = vmatprep.subr.bf16.mxu1 %v14845_v34  ;;  %v2003_v34 = vshrl.u32 %v1696_v60, 16  ;;  %v14862_v60 = vld [vmem:[%s15529_s9 + $0x154] ss:$12 sps:$4 sm:$0xff]  }
 0x19f   :  { %2680 = vmatmul.mubr.bf16.gmra.mxu1 %v16821_v6  ;;  %v1979_v6 = vshrl.u32 %v16918_v15, 16 }
 0x1a0   :  { %2462 = vmatmul.mubr.bf16.gmra.mxu0 %v16923_v48  ;;  %2687 = vmatprep.mubr.bf16.mxu1 %v16828_v16  ;;  %v16944_v16 = vsel %vm1774_vm1, %v1989_v52, %v1993_v42  ;;  %v2005_v24 = vor.u32 %v2003_v34, %v1985_v32  ;;  %v14868_v52 = vld [vmem:[%s15529_s9 + $0x124] ss:$12 sps:$4 sm:$0xff]  }
 0x1a1   :  { %2471 = vmatprep.mubr.bf16.mxu0 %v16928_v61  ;;  %3191 = vmatpush1.bf16.msra.mxu1 %v14843_v38  ;;  %v1981_v39 = vor.u32 %v1979_v6, %v1961_v50  ;;  %v14853_v38 = vld [vmem:[%s15529_s9] ss:$12 sps:$4 sm:$0xff]   ;;  %v14863_v50 = vld [vmem:[%s15529_s9 + $0x138] ss:$12 sps:$4 sm:$0xff]  }
 0x1a2   :  { %3192 = vmatprep.subr.bf16.mxu1 %v14848_v49  ;;  %v14865_v49 = vld [vmem:[%s15529_s9 + $0x13c] ss:$12 sps:$4 sm:$0xff]   ;;  %v14888_v6 = vld [vmem:[%s15529_s9 + $0x184] ss:$12 sps:$4 sm:$0xff]  }
 0x1a3   :  { %v16956_v30 = vsel %vm1774_vm1, %v1981_v39, %v1985_v32  ;;  %v14875_v32 = vld [vmem:[%s15529_s9 + $0xd8] ss:$12 sps:$4 sm:$0xff]   ;;  %v17040_v39 = vld [vmem:[%s15524_s5 + $0x28] sm:$0xff] }
 0x1a4   :  { %v14891_v34 = vld [vmem:[%s15529_s9 + $0x158] ss:$12 sps:$4 sm:$0xff]   ;;  %20424 = vst [vmem:[#allocation284_spill] sm:$0xff] %v17040_v39 }
 0x1a5   :  { %3193 = vmatpush1.bf16.msra.mxu1 %v14846_v56  ;;  %v14874_v56 = vld [vmem:[%s15529_s9 + $0xf4] ss:$12 sps:$4 sm:$0xff]  }
 0x1a6   :  { %3194 = vmatprep.subr.bf16.mxu1 %v14852_v27  ;;  %v14883_v27 = vld [vmem:[%s15529_s9 + $0x198] ss:$12 sps:$4 sm:$0xff]  }
 0x1a7   :  { %2688 = vmatmul.mubr.bf16.gmra.mxu1 %v16849_v41  ;;  %v16958_v41 = vor.u32 %v2006_v7, %v1993_v42  ;;  %v13239_v42 = vcombine.low %v16860_v45, %v16860_v45  ;;  %v14877_v45 = vld [vmem:[%s15529_s9 + $0xdc] ss:$12 sps:$4 sm:$0xff]   ;;  %v14892_v7 = vld [vmem:[%s15529_s9 + $0x1b8] ss:$0 sps:$4 sm:$0xff]  }
 0x1a8   :  { %2472 = vmatmul.mubr.bf16.gmra.mxu0 %v16940_v25  ;;  %2695 = vmatprep.mubr.bf16.mxu1 %v16855_v28  ;;  %v14860_v28 = vld [vmem:[%s15529_s9 + $0x150] ss:$12 sps:$4 sm:$0xff]  }
 0x1a9   :  { %2481 = vmatprep.mubr.bf16.mxu0 %v16944_v16  ;;  %3195 = vmatpush1.bf16.msra.mxu1 %v14850_v43  ;;  %v14880_v43 = vld [vmem:[%s15529_s9 + $0xc4] ss:$12 sps:$4 sm:$0xff]  }
 0x1aa   :  { %3196 = vmatprep.subr.bf16.mxu1 %v14855_v19  ;;  %v14894_v19 = vld [vmem:[%s15529_s9 + $0x140] ss:$12 sps:$4 sm:$0xff]  }
 0x1ad   :  { %3197 = vmatpush1.bf16.msra.mxu1 %v14853_v38 }
 0x1ae   :  { %3198 = vmatprep.subr.bf16.mxu1 %v14859_v37  ;;  %v14895_v37 = vld [vmem:[%s15529_s9 + $0x80] ss:$12 sps:$4 sm:$0xff]  }
 0x1af   :  { %2696 = vmatmul.mubr.bf16.gmra.mxu1 %v16879_v8  ;;  %v14866_v8 = vld [vmem:[%s15529_s9 + $0x120] ss:$12 sps:$4 sm:$0xff]  }
 0x1b0   :  { %2482 = vmatmul.mubr.bf16.gmra.mxu0 %v16956_v30  ;;  %2703 = vmatprep.mubr.bf16.mxu1 %v16883_v9  ;;  %v14871_v9 = vld [vmem:[%s15529_s9 + $0x10c] ss:$12 sps:$4 sm:$0xff]  }
 0x1b1   :  { %2491 = vmatprep.mubr.bf16.mxu0 %v16958_v41  ;;  %3199 = vmatpush2.bf16.msra.mxu1 %v14857_v33  ;;  %v14896_v33 = vld [vmem:[%s15529_s9 + $0x128] ss:$12 sps:$4 sm:$0xff]  }
 0x1b2   :  { %3200 = vmatprep.subr.bf16.mxu1 %v14862_v60  ;;  %v14898_v60 = vld [vmem:[%s15529_s9 + $0x110] ss:$12 sps:$4 sm:$0xff]  }
 0x1b5   :  { %3201 = vmatpush2.bf16.msra.mxu1 %v14860_v28  ;;  %v14907_v28 = vld [vmem:[%s15529_s9 + $0x188] ss:$12 sps:$4 sm:$0xff]  }
 0x1b6   :  { %3202 = vmatprep.subr.bf16.mxu1 %v14865_v49  ;;  %v14899_v49 = vld [vmem:[%s15529_s9 + $0x50] ss:$12 sps:$4 sm:$0xff]  }
 0x1b7   :  { %2704 = vmatmul.mubr.bf16.gmra.mxu1 %v16905_v57  ;;  %v14885_v57 = vld [vmem:[%s15529_s9 + $0x19c] ss:$12 sps:$4 sm:$0xff]  }
 0x1b8   :  { %2492 = vmatmul.mubr.bf16.gmra.mxu0 %v2005_v24  ;;  %2711 = vmatprep.mubr.bf16.mxu1 %v16908_v29  ;;  %v3174_v29 = vsel %vm2359_vm0, %v13239_v42, 0  ;;  %v14904_v42 = vld [vmem:[%s15529_s9 + $0xc8] ss:$12 sps:$4 sm:$0xff]  }
 0x1b9   :  { %14463 = vmatprep.mubr.msk.bf16.mxu0 %vm2328_vm2, %v16609_v2  ;;  %3203 = vmatpush2.bf16.msra.mxu1 %v14863_v50  ;;  %v14872_v2 = vld [vmem:[%s15529_s9 + $0xf0] ss:$12 sps:$4 sm:$0xff]  }
 0x1ba   :  { %3204 = vmatprep.subr.bf16.mxu1 %v14868_v52  ;;  %v14910_v50 = vld [vmem:[%s15529_s9 + $0x424] ss:$12 sps:$4 sm:$0xff]  }
 0x1bb   :  { %v14901_v52 = vld [vmem:[%s15529_s9 + $0x38] ss:$12 sps:$4 sm:$0xff]  }
 0x1bd   :  { %3205 = vmatpush2.bf16.msra.mxu1 %v14866_v8  ;;  %v14902_v8 = vld [vmem:[%s15529_s9 + $0xe0] ss:$12 sps:$4 sm:$0xff]  }
 0x1be   :  { %3206 = vmatprep.subr.bf16.mxu1 %v14871_v9  ;;  %v14903_v9 = vld [vmem:[%s15529_s9 + $0x20] ss:$12 sps:$4 sm:$0xff]  }
 0x1bf   :  { %2712 = vmatmul.mubr.bf16.gmra.mxu1 %v16923_v48  ;;  %v14886_v48 = vld [vmem:[%s15529_s9 + $0x180] ss:$12 sps:$4 sm:$0xff]  }
 0x1c0   :  { %14464 = vmatmul.mubr.msk.bf16.vlgmr.msra.gmra.mxu0 %vm2328_vm2, %v16621_v62  ;;  %2719 = vmatprep.mubr.bf16.mxu1 %v16928_v61  ;;  %v14878_v62 = vld [vmem:[%s15529_s9 + $0xc0] ss:$12 sps:$4 sm:$0xff]  }
 0x1c1   :  { %14467 = vmatprep.mubr.msk.bf16.mxu0 %vm2328_vm2, %v16643_v4  ;;  %3207 = vmatpush2.bf16.msra.mxu1 %v14869_v36  ;;  %v14889_v4 = vld [vmem:[%s15529_s9 + $0x170] ss:$12 sps:$4 sm:$0xff]   ;;  %v17073_v36 = vld [vmem:[%s15529_s9 + $0x528] sm:$0xff] }
 0x1c2   :  { %3324 = vmatpush1.bf16.msra.mxu0 %v3174_v29  ;;  %3208 = vmatprep.subr.bf16.mxu1 %v14874_v56  ;;  %v14905_v56 = vld [vmem:[%s15529_s9 + $0x8] ss:$12 sps:$4 sm:$0xff]  }
 0x1c3   :  { %3325 = vmatprep.subr.bf16.mxu0 %v14885_v57  ;;  %v13392_v57 = vcombine.high %v17073_v36, %v17073_v36 }
 0x1c5   :  { %3209 = vmatpush2.bf16.msra.mxu1 %v14872_v2 }
 0x1c6   :  { %3326 = vmatpush1.bf16.msra.mxu0 %v14883_v27  ;;  %3210 = vmatprep.subr.bf16.mxu1 %v14877_v45 }
 0x1c7   :  { %3327 = vmatprep.subr.bf16.mxu0 %v14888_v6  ;;  %2720 = vmatmul.mubr.bf16.gmra.mxu1 %v16940_v25 }
 0x1c8   :  { %14468 = vmatmul.mubr.msk.bf16.gmra.mxu0 %vm2328_vm2, %v16667_v18  ;;  %2727 = vmatprep.mubr.bf16.mxu1 %v16944_v16  ;;  %v1527_v18 = vld [vmem:[%s15524_s5 + $0x8] sm:$0xff]  ;;  %v14890_v16 = vld [vmem:[%s15529_s9 + $0xb0] ss:$12 sps:$4 sm:$0xff]  }
 0x1c9   :  { %14471 = vmatprep.mubr.msk.bf16.mxu0 %vm2328_vm2, %v16696_v5  ;;  %3211 = vmatpush2.bf16.msra.mxu1 %v14875_v32  ;;  %v17012_v5 = vld [vmem:[%s15524_s5 + $0x20] sm:$0xff] }
 0x1ca   :  { %3328 = vmatpush1.bf16.msra.mxu0 %v14886_v48  ;;  %3212 = vmatprep.subr.bf16.mxu1 %v14880_v43  ;;  %v17015_v61 = vpack.c.bf16 %v17012_v5, %v1527_v18 }
 0x1cb   :  { %14708 = vmatprep.subr.msk.bf16.mxu0 %vm2359_vm0, %v14892_v7 }
 0x1cd   :  { %3213 = vmatpush2.bf16.msra.mxu1 %v14878_v62 }
 0x1ce   :  { %14207 = vmatprep.subr.bf16.mxu1 %v14889_v4 }
 0x1cf   :  { %2728 = vmatmul.mubr.bf16.gmra.mxu1 %v16956_v30  ;;  %v14906_v30 = vld [vmem:[%s15529_s9 + $0x1a0] ss:$12 sps:$4 sm:$0xff]  }
 0x1d0   :  { %14472 = vmatmul.mubr.msk.bf16.gmra.mxu0 %vm2328_vm2, %v16727_v44  ;;  %2735 = vmatprep.mubr.bf16.mxu1 %v16958_v41  ;;  %v1526_v44 = vld [vmem:[%s15524_s5] sm:$0xff]  ;;  %v14897_v41 = vld [vmem:[%s15529_s9 + $0x68] ss:$12 sps:$4 sm:$0xff]  }
 0x1d1   :  { %14475 = vmatprep.mubr.msk.bf16.mxu0 %vm2328_vm2, %v16754_v46  ;;  %v17024_v46 = vld [vmem:[%s15524_s5 + $0x18] sm:$0xff] }
 0x1d2   :  { %v17027_v25 = vpack.c.bf16 %v17024_v46, %v1526_v44 }
 0x1d7   :  { %2736 = vmatmul.mubr.bf16.gmra.mxu1 %v2005_v24  ;;  %v14900_v24 = vld [vmem:[%s15529_s9 + $0xf8] ss:$12 sps:$4 sm:$0xff]  }
 0x1d8   :  { %14476 = vmatmul.mubr.msk.bf16.gmra.mxu0 %vm2328_vm2, %v16785_v10  ;;  %3214 = vmatprep.mubr.bf16.mxu1 %v17015_v61  ;;  %v1528_v10 = vld [vmem:[%s15524_s5 + $0x10] sm:$0xff] }
 0x1d9   :  { %14479 = vmatprep.mubr.msk.bf16.mxu0 %vm2328_vm2, %v16818_v47  ;;  %v14893_v47 = vld [vmem:[%s15529_s9 + $0x98] ss:$12 sps:$4 sm:$0xff]   ;;  %v17043_v38 = vpack.c.bf16 %v17040_v39, %v1528_v10 }
 0x1df   :  { %3215 = vmatmul.mubr.bf16.vlgmr.msra.gmra.mxu1 %v17027_v25 }
 0x1e0   :  { %14480 = vmatmul.mubr.msk.bf16.gmra.mxu0 %vm2328_vm2, %v16845_v31  ;;  %3224 = vmatprep.mubr.bf16.mxu1 %v16649_v17  ;;  %v3180_v31 = vsel %vm2359_vm0, %v14892_v7, 0 }
 0x1e1   :  { %3345 = vmatprep.mubr.bf16.mxu0 %v20419_v1  ;;  %14208 = vmatpush3.bf16.msra.mxu1 %v14890_v16 }
 0x1e2   :  { %14209 = vmatprep.subr.bf16.mxu1 %v14891_v34  ;;  %v1581_v34 = vld [vmem:[%s15524_s5 + $0x1b8] sm:$0x3] }
 0x1e5   :  { %14210 = vmatpush3.bf16.msra.mxu1 %v14893_v47  ;;  %v17130_v47 = vpack.c.bf16 %v1581_v34, %v1581_v34  ;;  %v14960_v34 = vld [vmem:[%s15529_s9 + $0x514] ss:$12 sps:$4 sm:$0xff]  }
 0x1e6   :  { %14211 = vmatprep.subr.bf16.mxu1 %v14894_v19 }
 0x1e7   :  { %3225 = vmatmul.mubr.bf16.gmra.mxu1 %v16712_v58  ;;  %20425 = vst [vmem:[#allocation285_spill] sm:$0xff] %v17130_v47 }
 0x1e8   :  { %13243 = vmatmul.mubr.msk.bf16.vlgmr.msra.gmra.mxu0 %vm2328_vm2, %v17043_v38  ;;  %3234 = vmatprep.mubr.bf16.mxu1 %v16716_v13 }
 0x1e9   :  { %3355 = vmatprep.mubr.bf16.mxu0 %v20419_v1  ;;  %14484 = vmatpush3.bf16.msra.mxu0 %v3180_v31  ;;  %v20426_v31 = vld [vmem:[#allocation281_spill] sm:$0xff] }
 0x1ea   :  { %14212 = vmatpush3.bf16.msra.mxu1 %v14895_v37  ;;  %14485 = vmatprep.subr.bf16.mxu0 %v14906_v30 }
 0x1eb   :  { %14213 = vmatprep.subr.bf16.mxu1 %v14896_v33  ;;  %v1580_v33 = vld [vmem:[%s15524_s5 + $0x1b0] sm:$0x3] }
 0x1ed   :  { %14486 = vmatpush3.bf16.msra.mxu0 %v14906_v30 }
 0x1ee   :  { %14214 = vmatpush3.bf16.msra.mxu1 %v14897_v41  ;;  %14487 = vmatprep.subr.bf16.mxu0 %v14907_v28 }
 0x1ef   :  { %14215 = vmatprep.subr.bf16.mxu1 %v14898_v60  ;;  %3235 = vmatmul.mubr.bf16.gmra.mxu1 %v16743_v51  ;;  %v17146_v60 = vpack.c.bf16 %v1580_v33, %v1580_v33 }
 0x1f0   :  { %13244 = vmatmul.mubr.msk.bf16.gmra.mxu0 %vm2328_vm2, %v16593_v22  ;;  %3244 = vmatprep.mubr.bf16.mxu1 %v16746_v53 }
 0x1f1   :  { %3365 = vmatprep.mubr.bf16.mxu0 %v20419_v1  ;;  %14488 = vmatpush3.bf16.msra.mxu0 %v14907_v28  ;;  %20427 = vst [vmem:[#allocation281_spill] sm:$0xff] %v17146_v60 }
 0x1f2   :  { %14216 = vmatpush3.bf16.msra.mxu1 %v14899_v49  ;;  %4198 = vmatprep.subr.bf16.mxu0 %v14910_v50  ;;  %v1582_v50 = vld [vmem:[%s15524_s5 + $0x1c0] sm:$0x3] }
 0x1f3   :  { %14217 = vmatprep.subr.bf16.mxu1 %v14900_v24  ;;  %v20428_v24 = vld [vmem:[#allocation282_spill] sm:$0xff] }
 0x1f6   :  { %14218 = vmatpush3.bf16.msra.mxu1 %v14901_v52 }
 0x1f7   :  { %14219 = vmatprep.subr.bf16.mxu1 %v14902_v8  ;;  %3245 = vmatmul.mubr.bf16.gmra.mxu1 %v16780_v20  ;;  %v13391_v8 = vcombine.low %v17073_v36, %v17073_v36 }
 0x1f8   :  { %13245 = vmatmul.mubr.msk.bf16.gmra.mxu0 %vm2328_vm2, %v16600_v21  ;;  %3254 = vmatprep.mubr.bf16.mxu1 %v16782_v54 }
 0x1f9   :  { %3375 = vmatprep.mubr.bf16.mxu0 %v20419_v1 }
 0x1fa   :  { %14220 = vmatpush3.bf16.msra.mxu1 %v14903_v9 }
 0x1fb   :  { %14221 = vmatprep.subr.bf16.mxu1 %v14904_v42  ;;  %v17164_v42 = vpack.c.bf16 %v1582_v50, %v1582_v50 }
 0x1fe   :  { %14222 = vmatpush3.bf16.msra.mxu1 %v14905_v56 }
 0x1ff   :  { %13394 = vmatprep.subr.msk.bf16.mxu1 %vm2359_vm0, %v13392_v57  ;;  %v2534_v29 = vpop.f32.mrf.mxu1  ;;  %3255 = vmatmul.mubr.bf16.gmra.mxu1 %v16809_v23  ;;  %v4190_v57 = vsel %vm2359_vm0, %v13391_v8, 0 }
 0x200   :  { %13246 = vmatmul.mubr.msk.bf16.gmra.mxu0 %vm2328_vm2, %v16615_v12  ;;  %3264 = vmatprep.mubr.bf16.mxu1 %v16811_v26 }
 0x201   :  { %3385 = vmatprep.mubr.bf16.mxu0 %v20419_v1  ;;  %v17086_v2 = vpop.f32.mrf.mxu1 }
 0x203   :  { %v17088_v27 = vpop.f32.mrf.mxu1 }
 0x205   :  { %v17090_v45 = vpop.f32.mrf.mxu1 }
 0x207   :  { %v17092_v6 = vpop.f32.mrf.mxu1  ;;  %3265 = vmatmul.mubr.bf16.gmra.mxu1 %v16837_v11 }
 0x208   :  { %13247 = vmatmul.mubr.msk.bf16.gmra.mxu0 %vm2328_vm2, %v16629_v63  ;;  %3274 = vmatprep.mubr.bf16.mxu1 %v16841_v59 }
 0x209   :  { %3395 = vmatprep.mubr.bf16.mxu0 %v20419_v1  ;;  %v17099_v32 = vpop.f32.mrf.mxu1 }
 0x20b   :  { %v17101_v48 = vpop.f32.mrf.mxu1 }
 0x20d   :  { %v17103_v43 = vpop.f32.mrf.mxu1 }
 0x20f   :  { %v17105_v7 = vpop.f32.mrf.mxu1  ;;  %3275 = vmatmul.mubr.bf16.gmra.mxu1 %v16843_v55 }
 0x210   :  { %13248 = vmatmul.mubr.msk.bf16.gmra.mxu0 %vm2328_vm2, %v16654_v3  ;;  %3284 = vmatprep.mubr.bf16.mxu1 %v16874_v35 }
 0x211   :  { %3405 = vmatprep.mubr.bf16.mxu0 %v20419_v1  ;;  %v17112_v62 = vpop.f32.mrf.mxu1 }
 0x213   :  { %v17114_v4 = vpop.f32.mrf.mxu1 }
 0x215   :  { %v17116_v18 = vpop.f32.mrf.mxu1 }
 0x217   :  { %v17118_v44 = vpop.f32.mrf.mxu1  ;;  %3285 = vmatmul.mubr.bf16.gmra.mxu1 %v16886_v0 }
 0x218   :  { %13249 = vmatmul.mubr.msk.bf16.gmra.mxu0 %vm2328_vm2, %v16684_v40  ;;  %3294 = vmatprep.mubr.bf16.mxu1 %v16897_v14 }
 0x219   :  { %3415 = vmatprep.mubr.bf16.mxu0 %v20419_v1  ;;  %v17125_v16 = vpop.f32.mrf.mxu1 }
 0x21b   :  { %v17128_v10 = vpop.f32.mrf.mxu1 }
 0x21d   :  { %v17132_v19 = vpop.f32.mrf.mxu1 }
 0x21f   :  { %v17134_v37 = vpop.f32.mrf.mxu1  ;;  %3295 = vmatmul.mubr.bf16.gmra.mxu1 %v16918_v15  ;;  %v14913_v15 = vld [vmem:[%s15529_s9 + $0x40c] ss:$12 sps:$4 sm:$0xff]  }
 0x220   :  { %13250 = vmatmul.mubr.msk.bf16.gmra.mxu0 %vm2328_vm2, %v20426_v31  ;;  %3304 = vmatprep.mubr.bf16.mxu1 %v17130_v47 }
 0x221   :  { %3425 = vmatprep.mubr.bf16.mxu0 %v20419_v1  ;;  %v17142_v30 = vpop.f32.mrf.mxu1 }
 0x223   :  { %v17144_v41 = vpop.f32.mrf.mxu1 }
 0x225   :  { %v17148_v28 = vpop.f32.mrf.mxu1 }
 0x227   :  { %v17150_v49 = vpop.f32.mrf.mxu1  ;;  %3305 = vmatmul.mubr.bf16.gmra.mxu1 %v17146_v60  ;;  %v14963_v60 = vld [vmem:[%s15529_s9 + $0x4fc] ss:$12 sps:$4 sm:$0xff]  }
 0x228   :  { %13251 = vmatmul.mubr.msk.bf16.gmra.mxu0 %vm2328_vm2, %v20428_v24  ;;  %3476 = vmatprep.mubr.bf16.mxu1 %v17015_v61 }
 0x229   :  { %3435 = vmatprep.mubr.bf16.mxu0 %v20419_v1  ;;  %v17158_v52 = vpop.f32.mrf.mxu1  ;;  %v14958_v1 = vld [vmem:[%s15529_s9 + $0x510] ss:$12 sps:$4 sm:$0xff]  }
 0x22b   :  { %v17162_v9 = vpop.f32.mrf.mxu1 }
 0x22d   :  { %v17166_v56 = vpop.f32.mrf.mxu1 }
 0x22f   :  { %v17170_v61 = vpop.f32.mrf.mxu1  ;;  %3477 = vmatmul.mubr.bf16.vlgmr.msra.gmra.mxu1 %v17027_v25 }
 0x230   :  { %v2403_v33 = vpop.f32.mrf.mxu0  ;;  %13252 = vmatmul.mubr.msk.bf16.gmra.mxu0 %vm2328_vm2, %v17164_v42  ;;  %3484 = vmatprep.mubr.bf16.mxu1 %v16649_v17 }
 0x231   :  { %v17175_v36 = vadd.f32 %v2534_v29, %v2403_v33  ;;  %14489 = vmatprep.mubr.msk.bf16.mxu0 %vm2328_vm2, %v17043_v38  ;;  %v17180_v50 = vpop.f32.mrf.mxu1  ;;  %4340 = vmatpush1.bf16.msra.mxu1 %v4190_v57 }
 0x232   :  { %v2405_v8 = vpop.f32.mrf.mxu0  ;;  %4341 = vmatprep.subr.bf16.mxu1 %v14960_v34 }
 0x233   :  { %20429 = vst [vmem:[#allocation282_spill] sm:$0xff] %v17175_v36  ;;  %v17184_v25 = vadd.f32 %v17086_v2, %v2405_v8  ;;  %v17187_v39 = vpop.f32.mrf.mxu1  ;;  %v14908_v36 = vld [vmem:[%s15529_s9 + $0x420] ss:$12 sps:$4 sm:$0xff]   ;;  %v14961_v2 = vld [vmem:[%s15529_s9 + $0x4f8] ss:$12 sps:$4 sm:$0xff]  }
 0x234   :  { %v2407_v29 = vpop.f32.mrf.mxu0 }
 0x235   :  { %20430 = vst [vmem:[#allocation286_spill] sm:$0xff] %v17184_v25  ;;  %v17190_v33 = vadd.f32 %v17088_v27, %v2407_v29  ;;  %v17193_v38 = vpop.f32.mrf.mxu1  ;;  %4342 = vmatpush1.bf16.msra.mxu1 %v14958_v1  ;;  %v14911_v1 = vld [vmem:[%s15529_s9 + $0x408] ss:$12 sps:$4 sm:$0xff]  }
 0x236   :  { %v2409_v47 = vpop.f32.mrf.mxu0  ;;  %4343 = vmatprep.subr.bf16.mxu1 %v14963_v60  ;;  %v14916_v60 = vld [vmem:[%s15529_s9 + $0x3f4] ss:$12 sps:$4 sm:$0xff]  }
 0x237   :  { %20431 = vst [vmem:[#allocation287_spill] sm:$0xff] %v17190_v33  ;;  %v17197_v57 = vadd.f32 %v17090_v45, %v2409_v47  ;;  %v17200_v34 = vpop.f32.mrf.mxu1  ;;  %3485 = vmatmul.mubr.bf16.gmra.mxu1 %v16712_v58  ;;  %v14919_v33 = vld [vmem:[%s15529_s9 + $0x3dc] ss:$12 sps:$4 sm:$0xff]  }
 0x238   :  { %v2413_v8 = vpop.f32.mrf.mxu0  ;;  %14490 = vmatmul.mubr.msk.bf16.vlgmr.msra.gmra.mxu0 %vm2328_vm2, %v16593_v22  ;;  %3492 = vmatprep.mubr.bf16.mxu1 %v16716_v13 }
 0x239   :  { %20432 = vst [vmem:[#allocation288_spill] sm:$0xff] %v17197_v57  ;;  %v17206_v27 = vadd.f32 %v17092_v6, %v2413_v8  ;;  %4199 = vmatpush1.bf16.msra.mxu0 %v14908_v36  ;;  %v17210_v45 = vpop.f32.mrf.mxu1  ;;  %14493 = vmatprep.mubr.msk.bf16.mxu0 %vm2328_vm2, %v16600_v21  ;;  %v14914_v8 = vld [vmem:[%s15529_s9 + $0x3f0] ss:$12 sps:$4 sm:$0xff]  }
 0x23a   :  { %v2415_v47 = vpop.f32.mrf.mxu0  ;;  %4200 = vmatprep.subr.bf16.mxu0 %v14913_v15  ;;  %4344 = vmatpush1.bf16.msra.mxu1 %v14961_v2 }
 0x23b   :  { %20433 = vst [vmem:[#allocation289_spill] sm:$0xff] %v17206_v27  ;;  %v17216_v29 = vadd.f32 %v17099_v32, %v2415_v47  ;;  %v17218_v57 = vpop.f32.mrf.mxu1 }
 0x23c   :  { %v2417_v6 = vpop.f32.mrf.mxu0 }
 0x23d   :  { %20434 = vst [vmem:[#allocation290_spill] sm:$0xff] %v17216_v29  ;;  %v17221_v36 = vadd.f32 %v17101_v48, %v2417_v6  ;;  %4201 = vmatpush1.bf16.msra.mxu0 %v14911_v1  ;;  %v17224_v27 = vpop.f32.mrf.mxu1  ;;  %v14917_v1 = vld [vmem:[%s15529_s9 + $0x3d8] ss:$12 sps:$4 sm:$0xff]  }
 0x23e   :  { %v2419_v15 = vpop.f32.mrf.mxu0  ;;  %4202 = vmatprep.subr.bf16.mxu0 %v14916_v60  ;;  %v14922_v6 = vld [vmem:[%s15529_s9 + $0x3c4] ss:$12 sps:$4 sm:$0xff]   ;;  %v14925_v29 = vld [vmem:[%s15529_s9 + $0x3ac] ss:$12 sps:$4 sm:$0xff]  }
 0x23f   :  { %20435 = vst [vmem:[#allocation291_spill] sm:$0xff] %v17221_v36  ;;  %v17228_v32 = vadd.f32 %v17103_v43, %v2419_v15  ;;  %v17230_v2 = vpop.f32.mrf.mxu1  ;;  %3493 = vmatmul.mubr.bf16.gmra.mxu1 %v16743_v51  ;;  %v17246_v15 = vld [vmem:[%s15529_s9 + $0x530] ss:$0 sps:$4 sm:$0xff]  }
 0x240   :  { %v2423_v47 = vpop.f32.mrf.mxu0  ;;  %14494 = vmatmul.mubr.msk.bf16.gmra.mxu0 %vm2328_vm2, %v16615_v12  ;;  %3500 = vmatprep.mubr.bf16.mxu1 %v16746_v53 }
 0x241   :  { %20436 = vst [vmem:[#allocation292_spill] sm:$0xff] %v17228_v32  ;;  %v17236_v48 = vadd.f32 %v17105_v7, %v2423_v47  ;;  %4203 = vmatpush1.bf16.msra.mxu0 %v14914_v8  ;;  %v17240_v60 = vpop.f32.mrf.mxu1  ;;  %14497 = vmatprep.mubr.msk.bf16.mxu0 %vm2328_vm2, %v16629_v63 }
 0x242   :  { %v2425_v43 = vpop.f32.mrf.mxu0  ;;  %4204 = vmatprep.subr.bf16.mxu0 %v14919_v33  ;;  %14709 = vmatprep.subr.msk.bf16.mxu1 %vm2359_vm0, %v17246_v15  ;;  %v14920_v33 = vld [vmem:[%s15529_s9 + $0x3c0] ss:$12 sps:$4 sm:$0xff]  }
 0x243   :  { %20437 = vst [vmem:[#allocation293_spill] sm:$0xff] %v17236_v48  ;;  %v17249_v32 = vadd.f32 %v17112_v62, %v2425_v43  ;;  %v17251_v7 = vpop.f32.mrf.mxu1 }
 0x244   :  { %v2427_v8 = vpop.f32.mrf.mxu0 }
 0x245   :  { %20438 = vst [vmem:[#allocation294_spill] sm:$0xff] %v17249_v32  ;;  %v17256_v47 = vadd.f32 %v17114_v4, %v2427_v8  ;;  %4205 = vmatpush1.bf16.msra.mxu0 %v14917_v1  ;;  %v17259_v48 = vpop.f32.mrf.mxu1  ;;  %v14923_v1 = vld [vmem:[%s15529_s9 + $0x3a8] ss:$12 sps:$4 sm:$0xff]  }
 0x246   :  { %v2429_v36 = vpop.f32.mrf.mxu0  ;;  %4206 = vmatprep.subr.bf16.mxu0 %v14922_v6  ;;  %v14928_v6 = vld [vmem:[%s15529_s9 + $0x394] ss:$12 sps:$4 sm:$0xff]  }
 0x247   :  { %20439 = vst [vmem:[#allocation295_spill] sm:$0xff] %v17256_v47  ;;  %v17263_v62 = vadd.f32 %v17116_v18, %v2429_v36  ;;  %v17265_v43 = vpop.f32.mrf.mxu1  ;;  %3501 = vmatmul.mubr.bf16.gmra.mxu1 %v16780_v20 }
 0x248   :  { %v2433_v32 = vpop.f32.mrf.mxu0  ;;  %14498 = vmatmul.mubr.msk.bf16.gmra.mxu0 %vm2328_vm2, %v16654_v3  ;;  %3508 = vmatprep.mubr.bf16.mxu1 %v16782_v54 }
 0x249   :  { %20440 = vst [vmem:[#allocation296_spill] sm:$0xff] %v17263_v62  ;;  %v17271_v4 = vadd.f32 %v17118_v44, %v2433_v32  ;;  %4207 = vmatpush1.bf16.msra.mxu0 %v14920_v33  ;;  %v17275_v18 = vpop.f32.mrf.mxu1  ;;  %14501 = vmatprep.mubr.msk.bf16.mxu0 %vm2328_vm2, %v16684_v40  ;;  %v3669_v44 = vld [vmem:[%s15524_s5 + $0x8] sm:$0xfc]  ;;  %v14926_v33 = vld [vmem:[%s15529_s9 + $0x390] ss:$12 sps:$4 sm:$0xff]  }
 0x24a   :  { %v2435_v36 = vpop.f32.mrf.mxu0  ;;  %4208 = vmatprep.subr.bf16.mxu0 %v14925_v29  ;;  %v14931_v29 = vld [vmem:[%s15529_s9 + $0x37c] ss:$12 sps:$4 sm:$0xff]  }
 0x24b   :  { %20441 = vst [vmem:[#allocation297_spill] sm:$0xff] %v17271_v4  ;;  %v17281_v8 = vadd.f32 %v17125_v16, %v2435_v36  ;;  %v2628_v62 = vpop.f32.mrf.mxu1  ;;  %v3675_v16 = vpack.c.bf16 %v17012_v5, %v3669_v44  ;;  %v14934_v5 = vld [vmem:[%s15529_s9 + $0x4e4] ss:$12 sps:$4 sm:$0xff]  }
 0x24c   :  { %v2437_v47 = vpop.f32.mrf.mxu0 }
 0x24d   :  { %v17285_v32 = vadd.f32 %v17128_v10, %v2437_v47  ;;  %4209 = vmatpush1.bf16.msra.mxu0 %v14923_v1  ;;  %v2629_v4 = vpop.f32.mrf.mxu1  ;;  %v14929_v47 = vld [vmem:[%s15529_s9 + $0x378] ss:$12 sps:$4 sm:$0xff]  }
 0x24e   :  { %v2439_v25 = vpop.f32.mrf.mxu0  ;;  %4210 = vmatprep.subr.bf16.mxu0 %v14928_v6  ;;  %v20175_v6 = vrot.slane %v16649_v17, 1 }
 0x24f   :  { %v17290_v3 = vadd.f32 %v17132_v19, %v2439_v25  ;;  %v14134_v36 = vpop.f32.mrf.mxu1  ;;  %3509 = vmatmul.mubr.bf16.gmra.mxu1 %v16809_v23 }
 0x250   :  { %v2443_v62 = vpop.f32.mrf.mxu0  ;;  %14502 = vmatmul.mubr.msk.bf16.gmra.mxu0 %vm2328_vm2, %v20426_v31  ;;  %3516 = vmatprep.mubr.bf16.mxu1 %v16811_v26 }
 0x251   :  { %20442 = vst [vmem:[#allocation298_spill] sm:$0xff] %v17290_v3  ;;  %v17297_v10 = vadd.f32 %v17134_v37, %v2443_v62  ;;  %4211 = vmatpush1.bf16.msra.mxu0 %v14926_v33  ;;  %v14135_v4 = vpop.f32.mrf.mxu1  ;;  %14505 = vmatprep.mubr.msk.bf16.mxu0 %vm2328_vm2, %v20428_v24  ;;  %v3789_v37 = vrot.slane %v3675_v16, 1 }
 0x252   :  { %v2445_v19 = vpop.f32.mrf.mxu0  ;;  %4212 = vmatprep.subr.bf16.mxu0 %v14931_v29  ;;  %v17304_v25 = vadd.f32 %v14135_v4, %v14134_v36  ;;  %v14932_v29 = vld [vmem:[%s15529_s9 + $0x4e0] ss:$12 sps:$4 sm:$0xff]  }
 0x253   :  { %20443 = vst [vmem:[#allocation299_spill] sm:$0xff] %v17297_v10  ;;  %v17307_v1 = vadd.f32 %v17142_v30, %v2445_v19  ;;  %v14137_v44 = vpop.f32.mrf.mxu1  ;;  %v14937_v36 = vld [vmem:[%s15529_s9 + $0x4cc] ss:$12 sps:$4 sm:$0xff]   ;;  %v17323_v16 = vsel %vm3785_vm3, %v3789_v37, %v20175_v6 }
 0x254   :  { %v2447_v33 = vpop.f32.mrf.mxu0 }
 0x255   :  { %v17311_v62 = vadd.f32 %v17144_v41, %v2447_v33  ;;  %4213 = vmatpush1.bf16.msra.mxu0 %v14929_v47  ;;  %v14138_v10 = vpop.f32.mrf.mxu1 }
 0x256   :  { %v2449_v3 = vpop.f32.mrf.mxu0  ;;  %4214 = vmatprep.subr.bf16.mxu0 %v14934_v5  ;;  %v17315_v4 = vadd.f32 %v14138_v10, %v14137_v44  ;;  %v14940_v5 = vld [vmem:[%s15529_s9 + $0x4b4] ss:$12 sps:$4 sm:$0xff]  }
 0x257   :  { %v17318_v30 = vadd.f32 %v17148_v28, %v2449_v3  ;;  %v14140_v41 = vpop.f32.mrf.mxu1  ;;  %3517 = vmatmul.mubr.bf16.gmra.mxu1 %v16837_v11  ;;  %v14935_v3 = vld [vmem:[%s15529_s9 + $0x4c8] ss:$12 sps:$4 sm:$0xff]  }
 0x258   :  { %v2453_v47 = vpop.f32.mrf.mxu0  ;;  %14506 = vmatmul.mubr.msk.bf16.gmra.mxu0 %vm2328_vm2, %v17164_v42  ;;  %3524 = vmatprep.mubr.bf16.mxu1 %v16841_v59 }
 0x259   :  { %v17329_v19 = vadd.f32 %v17150_v49, %v2453_v47  ;;  %4215 = vmatpush2.bf16.msra.mxu0 %v14932_v29  ;;  %v14141_v28 = vpop.f32.mrf.mxu1  ;;  %4230 = vmatprep.mubr.bf16.mxu0 %v17323_v16  ;;  %v14938_v29 = vld [vmem:[%s15529_s9 + $0x4b0] ss:$12 sps:$4 sm:$0xff]  }
 0x25a   :  { %v2455_v10 = vpop.f32.mrf.mxu0  ;;  %4216 = vmatprep.subr.bf16.mxu0 %v14937_v36  ;;  %v17335_v37 = vadd.f32 %v14141_v28, %v14140_v41  ;;  %v14943_v36 = vld [vmem:[%s15529_s9 + $0x49c] ss:$12 sps:$4 sm:$0xff]  }
 0x25b   :  { %20444 = vst [vmem:[#allocation300_spill] sm:$0xff] %v17329_v19  ;;  %v17338_v44 = vadd.f32 %v17158_v52, %v2455_v10  ;;  %v14143_v42 = vpop.f32.mrf.mxu1 }
 0x25c   :  { %v2457_v33 = vpop.f32.mrf.mxu0 }
 0x25d   :  { %v17341_v49 = vadd.f32 %v17162_v9, %v2457_v33  ;;  %4217 = vmatpush2.bf16.msra.mxu0 %v14935_v3  ;;  %v14144_v47 = vpop.f32.mrf.mxu1  ;;  %v14941_v3 = vld [vmem:[%s15529_s9 + $0x498] ss:$12 sps:$4 sm:$0xff]  }
 0x25e   :  { %v2459_v6 = vpop.f32.mrf.mxu0  ;;  %4218 = vmatprep.subr.bf16.mxu0 %v14940_v5  ;;  %v17345_v19 = vadd.f32 %v14144_v47, %v14143_v42  ;;  %v14946_v42 = vld [vmem:[%s15529_s9 + $0x484] ss:$12 sps:$4 sm:$0xff]  }
 0x25f   :  { %v17348_v41 = vadd.f32 %v17166_v56, %v2459_v6  ;;  %v14146_v52 = vpop.f32.mrf.mxu1  ;;  %3525 = vmatmul.mubr.bf16.gmra.mxu1 %v16843_v55 }
 0x260   :  { %v2463_v28 = vpop.f32.mrf.mxu0  ;;  %3532 = vmatprep.mubr.bf16.mxu1 %v16874_v35 }
 0x261   :  { %20445 = vst [vmem:[#allocation301_spill] sm:$0xff] %v17348_v41  ;;  %v17352_v9 = vadd.f32 %v17170_v61, %v2463_v28  ;;  %4219 = vmatpush2.bf16.msra.mxu0 %v14938_v29  ;;  %v14147_v10 = vpop.f32.mrf.mxu1  ;;  %v14944_v29 = vld [vmem:[%s15529_s9 + $0x480] ss:$12 sps:$4 sm:$0xff]  }
 0x262   :  { %v2465_v5 = vpop.f32.mrf.mxu0  ;;  %4220 = vmatprep.subr.bf16.mxu0 %v14943_v36  ;;  %v17357_v33 = vadd.f32 %v14147_v10, %v14146_v52  ;;  %v14949_v36 = vld [vmem:[%s15529_s9 + $0x46c] ss:$12 sps:$4 sm:$0xff]  }
 0x263   :  { %20446 = vst [vmem:[#allocation302_spill] sm:$0xff] %v17352_v9  ;;  %v17360_v56 = vadd.f32 %v17180_v50, %v2465_v5  ;;  %v14149_v6 = vpop.f32.mrf.mxu1 }
 0x264   :  { %v2467_v47 = vpop.f32.mrf.mxu0 }
 0x265   :  { %v17363_v61 = vadd.f32 %v17187_v39, %v2467_v47  ;;  %4221 = vmatpush2.bf16.msra.mxu0 %v14941_v3  ;;  %v14150_v28 = vpop.f32.mrf.mxu1  ;;  %v14947_v3 = vld [vmem:[%s15529_s9 + $0x468] ss:$12 sps:$4 sm:$0xff]   ;;  %v3668_v47 = vld [vmem:[%s15524_s5] sm:$0xfc] }
 0x266   :  { %v2469_v9 = vpop.f32.mrf.mxu0  ;;  %4222 = vmatprep.subr.bf16.mxu0 %v14946_v42  ;;  %v17367_v41 = vadd.f32 %v14150_v28, %v14149_v6  ;;  %v14952_v6 = vld [vmem:[%s15529_s9 + $0x454] ss:$12 sps:$4 sm:$0xff]  }
 0x267   :  { %20447 = vst [vmem:[#allocation303_spill] sm:$0xff] %v17363_v61  ;;  %v17370_v52 = vadd.f32 %v17193_v38, %v2469_v9  ;;  %v14152_v50 = vpop.f32.mrf.mxu1  ;;  %3533 = vmatmul.mubr.bf16.gmra.mxu1 %v16886_v0  ;;  %v14957_v61 = vld [vmem:[%s15529_s9 + $0x43c] ss:$12 sps:$4 sm:$0xff]  }
 0x268   :  { %v2473_v10 = vpop.f32.mrf.mxu0  ;;  %3540 = vmatprep.mubr.bf16.mxu1 %v16897_v14 }
 0x269   :  { %20448 = vst [vmem:[#allocation304_spill] sm:$0xff] %v17370_v52  ;;  %v17374_v39 = vadd.f32 %v17200_v34, %v2473_v10  ;;  %4223 = vmatpush2.bf16.msra.mxu0 %v14944_v29  ;;  %v14153_v5 = vpop.f32.mrf.mxu1  ;;  %v14950_v29 = vld [vmem:[%s15529_s9 + $0x450] ss:$12 sps:$4 sm:$0xff]   ;;  %v3674_v10 = vpack.c.bf16 %v17024_v46, %v3668_v47 }
 0x26a   :  { %v2475_v42 = vpop.f32.mrf.mxu0  ;;  %4224 = vmatprep.subr.bf16.mxu0 %v14949_v36  ;;  %v17380_v38 = vadd.f32 %v14153_v5, %v14152_v50  ;;  %v20455_v46 = vld [vmem:[#allocation285_spill] sm:$0xff] }
 0x26b   :  { %20449 = vst [vmem:[#allocation305_spill] sm:$0xff] %v17374_v39  ;;  %v17383_v9 = vadd.f32 %v17210_v45, %v2475_v42  ;;  %v14155_v28 = vpop.f32.mrf.mxu1  ;;  %v20453_v42 = vld [vmem:[#allocation283_spill] sm:$0xff]  ;;  %v3786_v47 = vrot.slane %v3674_v10, 1 }
 0x26c   :  { %v2477_v52 = vpop.f32.mrf.mxu0 }
 0x26d   :  { %20450 = vst [vmem:[#allocation306_spill] sm:$0xff] %v17383_v9  ;;  %v17386_v34 = vadd.f32 %v17218_v57, %v2477_v52  ;;  %4225 = vmatpush2.bf16.msra.mxu0 %v14947_v3  ;;  %v14156_v39 = vpop.f32.mrf.mxu1  ;;  %v14955_v3 = vld [vmem:[%s15529_s9 + $0x438] ss:$12 sps:$4 sm:$0xff]   ;;  %v20457_v9 = vrot.slane %v16649_v17, 1 }
 0x26e   :  { %v2479_v36 = vpop.f32.mrf.mxu0  ;;  %4226 = vmatprep.subr.bf16.mxu0 %v14952_v6  ;;  %v17391_v50 = vadd.f32 %v14156_v39, %v14155_v28  ;;  %v3787_v6 = vrot.slane %v16712_v58, 1  ;;  %v3670_v39 = vld [vmem:[%s15524_s5 + $0x10] sm:$0xfc] }
 0x26f   :  { %20451 = vst [vmem:[#allocation307_spill] sm:$0xff] %v17386_v34  ;;  %v17394_v45 = vadd.f32 %v17224_v27, %v2479_v36  ;;  %v14158_v5 = vpop.f32.mrf.mxu1  ;;  %3541 = vmatmul.mubr.bf16.gmra.mxu1 %v20453_v42  ;;  %v3797_v27 = vrot.slane %v16716_v13, 1  ;;  %v14964_v36 = vld [vmem:[%s15529_s9 + $0x4e8] ss:$12 sps:$4 sm:$0xff]  }
 0x270   :  { %v2483_v57 = vpop.f32.mrf.mxu0  ;;  %3548 = vmatprep.mubr.bf16.mxu1 %v20455_v46  ;;  %v20456_v46 = vld [vmem:[#allocation284_spill] sm:$0xff] }
 0x271   :  { %20452 = vst [vmem:[#allocation308_spill] sm:$0xff] %v17394_v45  ;;  %v17398_v52 = vadd.f32 %v17230_v2, %v2483_v57  ;;  %4227 = vmatpush2.bf16.msra.mxu0 %v14950_v29  ;;  %v14159_v28 = vpop.f32.mrf.mxu1  ;;  %v3676_v10 = vpack.c.bf16 %v20456_v46, %v3670_v39 }
 0x272   :  { %v2485_v34 = vpop.f32.mrf.mxu0  ;;  %4228 = vmatprep.subr.bf16.mxu0 %v14957_v61  ;;  %v17406_v45 = vadd.f32 %v14159_v28, %v14158_v5  ;;  %v17421_v5 = vsel %vm3785_vm3, %v20457_v9, %v3797_v27  ;;  %v20459_v28 = vld [vmem:[#allocation281_spill] sm:$0xff]  ;;  %v20461_v9 = vmov 0  }
 0x273   :  { %20454 = vst [vmem:[#allocation283_spill] sm:$0xff] %v17398_v52  ;;  %v17409_v2 = vadd.f32 %v17240_v60, %v2485_v34  ;;  %v14161_v29 = vpop.f32.mrf.mxu1  ;;  %v17416_v52 = vsel %vm3785_vm3, %v3786_v47, %v3787_v6  ;;  %v14965_v60 = vld [vmem:[%s15529_s9 + $0x428] ss:$12 sps:$4 sm:$0xff]  }
 0x274   :  { %v2487_v57 = vpop.f32.mrf.mxu0 }
 0x275   :  { %v17413_v58 = vadd.f32 %v17251_v7, %v2487_v57  ;;  %4229 = vmatpush2.bf16.msra.mxu0 %v14955_v3  ;;  %v14162_v61 = vpop.f32.mrf.mxu1  ;;  %v14966_v7 = vld [vmem:[%s15529_s9 + $0x4d0] ss:$12 sps:$4 sm:$0xff]  }
 0x276   :  { %v2489_v13 = vpop.f32.mrf.mxu0  ;;  %14296 = vmatprep.subr.bf16.mxu0 %v14964_v36  ;;  %v17424_v34 = vadd.f32 %v14162_v61, %v14161_v29  ;;  %v3792_v36 = vrot.slane %v3676_v10, 1  ;;  %v3793_v29 = vrot.slane %v16593_v22, 1  ;;  %v3803_v61 = vrot.slane %v16746_v53, 1  ;;  %v14968_v22 = vld [vmem:[%s15529_s9 + $0x4b8] ss:$12 sps:$4 sm:$0xff]  }
 0x277   :  { %v17427_v39 = vadd.f32 %v17259_v48, %v2489_v13  ;;  %v14164_v3 = vpop.f32.mrf.mxu1  ;;  %3549 = vmatmul.mubr.bf16.gmra.mxu1 %v20459_v28  ;;  %v3795_v48 = vrot.slane %v16743_v51, 1  ;;  %v14967_v13 = vld [vmem:[%s15529_s9 + $0x410] ss:$12 sps:$4 sm:$0xff]  }
 0x278   :  { %4231 = vmatmul.mubr.bf16.vlgmr.msra.gmra.mxu0 %v17416_v52  ;;  %v2493_v47 = vpop.f32.mrf.mxu0  ;;  %4361 = vmatprep.mubr.bf16.mxu1 %v20461_v9  ;;  %v17448_v51 = vsel %vm3785_vm3, %v3792_v36, %v3793_v29  ;;  %v14981_v36 = vld [vmem:[%s15529_s9 + $0x518] ss:$12 sps:$4 sm:$0xff]  }
 0x279   :  { %20458 = vst [vmem:[#allocation285_spill] sm:$0xff] %v17427_v39  ;;  %v17433_v17 = vadd.f32 %v17265_v43, %v2493_v47  ;;  %4240 = vmatprep.mubr.bf16.mxu0 %v17421_v5  ;;  %v14165_v57 = vpop.f32.mrf.mxu1  ;;  %14297 = vmatpush3.bf16.msra.mxu0 %v14965_v60  ;;  %v17451_v39 = vsel %vm3785_vm3, %v3787_v6, %v3795_v48 }
 0x27a   :  { %v2495_v46 = vpop.f32.mrf.mxu0  ;;  %v17441_v28 = vadd.f32 %v14165_v57, %v14164_v3  ;;  %14298 = vmatprep.subr.bf16.mxu0 %v14966_v7  ;;  %v14969_v3 = vld [vmem:[%s15529_s9 + $0x3f8] ss:$12 sps:$4 sm:$0xff]   ;;  %v14970_v7 = vld [vmem:[%s15529_s9 + $0x4a0] ss:$12 sps:$4 sm:$0xff]   ;;  %v4196_v57 = vsel %vm2359_vm0, %v17246_v15, 0  ;;  %v3801_v15 = vrot.slane %v16780_v20, 1 }
 0x27b   :  { %20460 = vst [vmem:[#allocation284_spill] sm:$0xff] %v17433_v17  ;;  %v17444_v43 = vadd.f32 %v17275_v18, %v2495_v46  ;;  %v14167_v10 = vpop.f32.mrf.mxu1  ;;  %v17454_v17 = vsel %vm3785_vm3, %v3797_v27, %v3803_v61 }
 0x27c   :  { %v2497_v47 = vpop.f32.mrf.mxu0 }
 0x27d   :  { %20462 = vst [vmem:[#allocation281_spill] sm:$0xff] %v17444_v43  ;;  %v14168_v53 = vpop.f32.mrf.mxu1  ;;  %14299 = vmatpush3.bf16.msra.mxu0 %v14967_v13  ;;  %v3799_v13 = vrot.slane %v16600_v21, 1  ;;  %v3809_v47 = vrot.slane %v16782_v54, 1  ;;  %v14982_v21 = vld [vmem:[%s15529_s9 + $0x500] ss:$12 sps:$4 sm:$0xff]  }
 0x27e   :  { %v2498_v60 = vpop.f32.mrf.mxu0  ;;  %v17457_v18 = vadd.f32 %v14168_v53, %v14167_v10  ;;  %14300 = vmatprep.subr.bf16.mxu0 %v14968_v22  ;;  %v14971_v53 = vld [vmem:[%s15529_s9 + $0x3e0] ss:$12 sps:$4 sm:$0xff]  }
 0x27f   :  { %v14170_v46 = vpop.f32.mrf.mxu1  ;;  %13395 = vmatmul.mubr.msk.bf16.vlgmr.msra.gmra.mxu1 %vm2328_vm2, %v17448_v51  ;;  %v17486_v54 = vsel %vm3785_vm3, %v3793_v29, %v3799_v13 }
 0x280   :  { %4241 = vmatmul.mubr.bf16.gmra.mxu0 %v17451_v39  ;;  %v14465_v6 = vpop.f32.mrf.mxu0  ;;  %4371 = vmatprep.mubr.bf16.mxu1 %v20461_v9 }
 0x281   :  { %v17467_v27 = vadd.f32 %v14465_v6, %v17335_v37  ;;  %4250 = vmatprep.mubr.bf16.mxu0 %v17454_v17  ;;  %v14171_v22 = vpop.f32.mrf.mxu1  ;;  %14301 = vmatpush3.bf16.msra.mxu0 %v14969_v3  ;;  %v14972_v6 = vld [vmem:[%s15529_s9 + $0x488] ss:$12 sps:$4 sm:$0xff]   ;;  %v17489_v3 = vsel %vm3785_vm3, %v3795_v48, %v3801_v15 }
 0x282   :  { %v2777_v10 = vpop.f32.mrf.mxu0  ;;  %14510 = vmatpush3.bf16.msra.mxu1 %v4196_v57  ;;  %v17475_v60 = vadd.f32 %v14171_v22, %v14170_v46  ;;  %14302 = vmatprep.subr.bf16.mxu0 %v14970_v7  ;;  %v14973_v7 = vld [vmem:[%s15529_s9 + $0x3c8] ss:$12 sps:$4 sm:$0xff]  }
 0x283   :  { %20463 = vst [vmem:[#allocation309_spill] sm:$0xff] %v17467_v27  ;;  %v17478_v37 = vadd.f32 %v17304_v25, %v2777_v10  ;;  %14511 = vmatprep.subr.bf16.mxu1 %v14981_v36  ;;  %v14173_v27 = vpop.f32.mrf.mxu1  ;;  %v17492_v25 = vsel %vm3785_vm3, %v3803_v61, %v3809_v47 }
 0x284   :  { %v14466_v20 = vpop.f32.mrf.mxu0 }
 0x285   :  { %v17483_v43 = vadd.f32 %v14466_v20, %v17345_v19  ;;  %v14174_v57 = vpop.f32.mrf.mxu1  ;;  %14303 = vmatpush3.bf16.msra.mxu0 %v14971_v53  ;;  %v14974_v19 = vld [vmem:[%s15529_s9 + $0x470] ss:$12 sps:$4 sm:$0xff]  }
 0x286   :  { %v2780_v46 = vpop.f32.mrf.mxu0  ;;  %14512 = vmatpush3.bf16.msra.mxu1 %v14981_v36  ;;  %v17495_v22 = vadd.f32 %v14174_v57, %v14173_v27  ;;  %14304 = vmatprep.subr.bf16.mxu0 %v14972_v6  ;;  %v3807_v36 = vrot.slane %v16809_v23, 1  ;;  %v3815_v6 = vrot.slane %v16811_v26, 1  ;;  %v14975_v20 = vld [vmem:[%s15529_s9 + $0x3b0] ss:$12 sps:$4 sm:$0xff]  }
 0x287   :  { %v17498_v10 = vadd.f32 %v17315_v4, %v2780_v46  ;;  %14513 = vmatprep.subr.bf16.mxu1 %v14982_v21  ;;  %v14176_v29 = vpop.f32.mrf.mxu1  ;;  %13396 = vmatmul.mubr.msk.bf16.gmra.mxu1 %vm2328_vm2, %v17486_v54  ;;  %v3805_v4 = vrot.slane %v16615_v12, 1  ;;  %v14976_v46 = vld [vmem:[%s15529_s9 + $0x458] ss:$12 sps:$4 sm:$0xff]  }
 0x288   :  { %4251 = vmatmul.mubr.bf16.gmra.mxu0 %v17489_v3  ;;  %v14469_v48 = vpop.f32.mrf.mxu0  ;;  %4381 = vmatprep.mubr.bf16.mxu1 %v20461_v9  ;;  %v17524_v26 = vsel %vm3785_vm3, %v3801_v15, %v3807_v36 }
 0x289   :  { %v17505_v61 = vadd.f32 %v14469_v48, %v17380_v38  ;;  %4260 = vmatprep.mubr.bf16.mxu0 %v17492_v25  ;;  %v14177_v27 = vpop.f32.mrf.mxu1  ;;  %14305 = vmatpush3.bf16.msra.mxu0 %v14973_v7  ;;  %v17521_v23 = vsel %vm3785_vm3, %v3799_v13, %v3805_v4 }
 0x28a   :  { %v2793_v53 = vpop.f32.mrf.mxu0  ;;  %14514 = vmatpush3.bf16.msra.mxu1 %v14982_v21  ;;  %v14178_v57 = vadd.f32 %v14177_v27, %v14176_v29  ;;  %14306 = vmatprep.subr.bf16.mxu0 %v14974_v19  ;;  %v17527_v29 = vsel %vm3785_vm3, %v3809_v47, %v3815_v6  ;;  %v3811_v47 = vrot.slane %v16629_v63, 1 }
 0x28b   :  { %20464 = vst [vmem:[#allocation310_spill] sm:$0xff] %v17505_v61  ;;  %v17514_v38 = vadd.f32 %v17357_v33, %v2793_v53  ;;  %v14179_v12 = vpop.f32.mrf.mxu1  ;;  %v14977_v33 = vld [vmem:[%s15529_s9 + $0x398] ss:$12 sps:$4 sm:$0xff]  }
 0x28c   :  { %v14470_v48 = vpop.f32.mrf.mxu0  ;;  %v17553_v63 = vsel %vm3785_vm3, %v3805_v4, %v3811_v47 }
 0x28d   :  { %20465 = vst [vmem:[#allocation311_spill] sm:$0xff] %v17514_v38  ;;  %v17518_v61 = vadd.f32 %v14470_v48, %v17391_v50  ;;  %v14180_v7 = vpop.f32.mrf.mxu1  ;;  %14307 = vmatpush3.bf16.msra.mxu0 %v14975_v20  ;;  %v14979_v50 = vld [vmem:[%s15529_s9 + $0x440] ss:$12 sps:$4 sm:$0xff]  }
 0x28e   :  { %v2796_v21 = vpop.f32.mrf.mxu0  ;;  %v14181_v19 = vadd.f32 %v14180_v7, %v14179_v12  ;;  %14308 = vmatprep.subr.bf16.mxu0 %v14976_v46  ;;  %v3821_v12 = vrot.slane %v16841_v59, 1  ;;  %v14980_v48 = vld [vmem:[%s15529_s9 + $0x380] ss:$12 sps:$4 sm:$0xff]   ;;  %s20591_s9 = sld [smem:[#allocation50_spill]] }
 0x28f   :  { %20466 = vst [vmem:[#allocation312_spill] sm:$0xff] %v17518_v61  ;;  %v17531_v27 = vadd.f32 %v17367_v41, %v2796_v21  ;;  %v14182_v53 = vpop.f32.mrf.mxu1  ;;  %13397 = vmatmul.mubr.msk.bf16.gmra.mxu1 %vm2328_vm2, %v17521_v23  ;;  %v3813_v41 = vrot.slane %v16837_v11, 1  ;;  %v20497_v38 = vld [vmem:[#allocation296_spill] sm:$0xff] }
 0x290   :  { %4261 = vmatmul.mubr.bf16.gmra.mxu0 %v17524_v26  ;;  %v14473_v13 = vpop.f32.mrf.mxu0  ;;  %4391 = vmatprep.mubr.bf16.mxu1 %v20461_v9 }
 0x291   :  { %20467 = vst [vmem:[#allocation313_spill] sm:$0xff] %v17531_v27  ;;  %v17538_v15 = vadd.f32 %v14473_v13, %v17441_v28  ;;  %4270 = vmatprep.mubr.bf16.mxu0 %v17527_v29  ;;  %v14183_v20 = vpop.f32.mrf.mxu1  ;;  %14309 = vmatpush3.bf16.msra.mxu0 %v14977_v33  ;;  %v17556_v11 = vsel %vm3785_vm3, %v3807_v36, %v3813_v41 }
 0x292   :  { %v2809_v46 = vpop.f32.mrf.mxu0  ;;  %v14184_v7 = vadd.f32 %v14183_v20, %v14182_v53  ;;  %14310 = vmatprep.subr.bf16.mxu0 %v14979_v50  ;;  %v17559_v33 = vsel %vm3785_vm3, %v3815_v6, %v3821_v12  ;;  %v20473_v6 = vld [vmem:[#allocation280_spill] sm:$0xff] }
 0x293   :  { %20468 = vst [vmem:[#allocation314_spill] sm:$0xff] %v17538_v15  ;;  %v17547_v21 = vadd.f32 %v17406_v45, %v2809_v46  ;;  %v14185_v28 = vpop.f32.mrf.mxu1  ;;  %v3817_v53 = vrot.slane %v20473_v6, 1  ;;  %v3827_v46 = vrot.slane %v16874_v35, 1 }
 0x294   :  { %v14474_v13 = vpop.f32.mrf.mxu0 }
 0x295   :  { %20469 = vst [vmem:[#allocation315_spill] sm:$0xff] %v17547_v21  ;;  %v17550_v15 = vadd.f32 %v14474_v13, %v17457_v18  ;;  %v14186_v61 = vpop.f32.mrf.mxu1  ;;  %14311 = vmatpush3.bf16.msra.mxu0 %v14980_v48 }
 0x296   :  { %v2812_v59 = vpop.f32.mrf.mxu0  ;;  %v14187_v45 = vadd.f32 %v14186_v61, %v14185_v28  ;;  %5066 = vmatprep.subr.bf16.mxu0 %v20461_v9 }
 0x297   :  { %20470 = vst [vmem:[#allocation316_spill] sm:$0xff] %v17550_v15  ;;  %v17562_v50 = vadd.f32 %v17424_v34, %v2812_v59  ;;  %v14188_v18 = vpop.f32.mrf.mxu1  ;;  %13398 = vmatmul.mubr.msk.bf16.gmra.mxu1 %vm2328_vm2, %v17553_v63  ;;  %v3819_v34 = vrot.slane %v16843_v55, 1  ;;  %v17587_v15 = vsel %vm3785_vm3, %v3821_v12, %v3827_v46  ;;  %v3823_v12 = vrot.slane %v16684_v40, 1 }
 0x298   :  { %4271 = vmatmul.mubr.bf16.gmra.mxu0 %v17556_v11  ;;  %v14477_v4 = vpop.f32.mrf.mxu0  ;;  %4401 = vmatprep.mubr.bf16.mxu1 %v20461_v9 }
 0x299   :  { %20471 = vst [vmem:[#allocation317_spill] sm:$0xff] %v17562_v50  ;;  %v17568_v36 = vadd.f32 %v14477_v4, %v14178_v57  ;;  %4280 = vmatprep.mubr.bf16.mxu0 %v17559_v33  ;;  %v14189_v61 = vpop.f32.mrf.mxu1  ;;  %v17581_v4 = vsel %vm3785_vm3, %v3811_v47, %v3817_v53  ;;  %v17584_v6 = vsel %vm3785_vm3, %v3813_v41, %v3819_v34  ;;  %v20477_v47 = vld [vmem:[#allocation282_spill] sm:$0xff] }
 0x29a   :  { %v2825_v20 = vpop.f32.mrf.mxu0  ;;  %v14190_v48 = vadd.f32 %v14189_v61, %v14188_v18 }
 0x29b   :  { %20472 = vst [vmem:[#allocation318_spill] sm:$0xff] %v17568_v36  ;;  %v17576_v28 = vadd.f32 %v17475_v60, %v2825_v20  ;;  %v14191_v13 = vpop.f32.mrf.mxu1  ;;  %v3833_v20 = vrot.slane %v16897_v14, 1 }
 0x29c   :  { %v14478_v59 = vpop.f32.mrf.mxu0  ;;  %v20479_v13 = vld [vmem:[#allocation286_spill] sm:$0xff] }
 0x29d   :  { %20474 = vst [vmem:[#allocation280_spill] sm:$0xff] %v17576_v28  ;;  %v17578_v57 = vadd.f32 %v14478_v59, %v14181_v19  ;;  %v14192_v36 = vpop.f32.mrf.mxu1  ;;  %v17615_v28 = vsel %vm3785_vm3, %v3827_v46, %v3833_v20 }
 0x29e   :  { %v2828_v55 = vpop.f32.mrf.mxu0 }
 0x29f   :  { %20475 = vst [vmem:[#allocation319_spill] sm:$0xff] %v17578_v57  ;;  %v17590_v35 = vadd.f32 %v17495_v22, %v2828_v55  ;;  %v3216_v60 = vpop.f32.mrf.mxu1  ;;  %13399 = vmatmul.mubr.msk.bf16.gmra.mxu1 %vm2328_vm2, %v17581_v4  ;;  %v3825_v22 = vrot.slane %v16886_v0, 1  ;;  %v3672_v57 = vld [vmem:[%s15524_s5 + $0x1b8] sm:$0xf] }
 0x2a0   :  { %4281 = vmatmul.mubr.bf16.gmra.mxu0 %v17584_v6  ;;  %v14481_v19 = vpop.f32.mrf.mxu0  ;;  %v3217_v18 = vadd.f32 %v3216_v60, %v20477_v47  ;;  %4411 = vmatprep.mubr.bf16.mxu1 %v20461_v9  ;;  %v3678_v14 = vpack.c.bf16 %v3672_v57, %v3672_v57 }
 0x2a1   :  { %20476 = vst [vmem:[#allocation320_spill] sm:$0xff] %v17590_v35  ;;  %v17596_v41 = vadd.f32 %v14481_v19, %v14190_v48  ;;  %4290 = vmatprep.mubr.bf16.mxu0 %v17587_v15  ;;  %v3218_v36 = vpop.f32.mrf.mxu1  ;;  %v20481_v19 = vld [vmem:[#allocation287_spill] sm:$0xff]  ;;  %v17612_v40 = vsel %vm3785_vm3, %v3819_v34, %v3825_v22  ;;  %v3829_v34 = vrot.slane %v20426_v31, 1 }
 0x2a2   :  { %v2841_v61 = vpop.f32.mrf.mxu0  ;;  %v3219_v59 = vadd.f32 %v3218_v36, %v20479_v13  ;;  %v20482_v36 = vld [vmem:[#allocation288_spill] sm:$0xff] }
 0x2a3   :  { %20478 = vst [vmem:[#allocation282_spill] sm:$0xff] %v17596_v41  ;;  %v17604_v55 = vadd.f32 %v14184_v7, %v2841_v61  ;;  %v3220_v60 = vpop.f32.mrf.mxu1  ;;  %v17609_v41 = vsel %vm3785_vm3, %v3817_v53, %v3823_v12 }
 0x2a4   :  { %v14482_v48 = vpop.f32.mrf.mxu0  ;;  %v3221_v47 = vadd.f32 %v3220_v60, %v20481_v19  ;;  %v20484_v60 = vld [vmem:[#allocation289_spill] sm:$0xff] }
 0x2a5   :  { %20480 = vst [vmem:[#allocation286_spill] sm:$0xff] %v17604_v55  ;;  %v3222_v0 = vpop.f32.mrf.mxu1 }
 0x2a6   :  { %v2844_v35 = vpop.f32.mrf.mxu0  ;;  %v3223_v7 = vadd.f32 %v3222_v0, %v20482_v36  ;;  %v3671_v0 = vld [vmem:[%s15524_s5 + $0x1b0] sm:$0xf]  ;;  %v20486_v36 = vld [vmem:[#allocation290_spill] sm:$0xff] }
 0x2a7   :  { %v17618_v61 = vadd.f32 %v14187_v45, %v2844_v35  ;;  %v3226_v13 = vpop.f32.mrf.mxu1  ;;  %13400 = vmatmul.mubr.msk.bf16.gmra.mxu1 %vm2328_vm2, %v17609_v41  ;;  %v3831_v45 = vrot.slane %v20453_v42, 1  ;;  %v17630_v35 = vrot.slane %v3678_v14, 1 }
 0x2a8   :  { %4291 = vmatmul.mubr.bf16.gmra.mxu0 %v17612_v40  ;;  %v3347_v53 = vpop.f32.mrf.mxu0  ;;  %v3227_v48 = vadd.f32 %v3226_v13, %v20484_v60  ;;  %4421 = vmatprep.mubr.bf16.mxu1 %v20461_v9  ;;  %v20488_v13 = vld [vmem:[#allocation291_spill] sm:$0xff] }
 0x2a9   :  { %20483 = vst [vmem:[#allocation287_spill] sm:$0xff] %v17618_v61  ;;  %v17625_v19 = vadd.f32 %v3347_v53, %v3217_v18  ;;  %4300 = vmatprep.mubr.bf16.mxu0 %v17615_v28  ;;  %v3228_v46 = vpop.f32.mrf.mxu1  ;;  %v17637_v18 = vsel %vm3785_vm3, %v3823_v12, %v3829_v34  ;;  %v17643_v42 = vsel %vm3785_vm3, %v3825_v22, %v3831_v45  ;;  %v3835_v22 = vrot.slane %v20428_v24, 1 }
 0x2aa   :  { %v3349_v57 = vpop.f32.mrf.mxu0  ;;  %v3229_v61 = vadd.f32 %v3228_v46, %v20486_v36  ;;  %v20490_v46 = vld [vmem:[#allocation292_spill] sm:$0xff] }
 0x2ab   :  { %20485 = vst [vmem:[#allocation288_spill] sm:$0xff] %v17625_v19  ;;  %v17634_v55 = vadd.f32 %v3349_v57, %v3219_v59  ;;  %v3230_v31 = vpop.f32.mrf.mxu1  ;;  %v3677_v19 = vpack.c.bf16 %v3671_v0, %v3671_v0  ;;  %v17647_v59 = vsel %vm3785_vm3, %v3833_v20, %v17630_v35  ;;  %v17668_v24 = vsel %vm3785_vm3, %v3829_v34, %v3835_v22 }
 0x2ac   :  { %v3351_v50 = vpop.f32.mrf.mxu0  ;;  %v3231_v53 = vadd.f32 %v3230_v31, %v20488_v13  ;;  %v3673_v13 = vld [vmem:[%s15524_s5 + $0x1c0] sm:$0xf]  ;;  %s20551_s5 = sld [smem:[#allocation48_spill]] }
 0x2ad   :  { %20487 = vst [vmem:[#allocation289_spill] sm:$0xff] %v17634_v55  ;;  %v17640_v60 = vadd.f32 %v3351_v50, %v3221_v47  ;;  %v3232_v14 = vpop.f32.mrf.mxu1  ;;  %v20492_v47 = vld [vmem:[#allocation293_spill] sm:$0xff]  ;;  %v17661_v20 = vrot.slane %v3677_v19, 1 }
 0x2ae   :  { %v3353_v21 = vpop.f32.mrf.mxu0  ;;  %v3233_v57 = vadd.f32 %v3232_v14, %v20490_v46  ;;  %v20494_v14 = vld [vmem:[#allocation294_spill] sm:$0xff] }
 0x2af   :  { %20489 = vst [vmem:[#allocation290_spill] sm:$0xff] %v17640_v60  ;;  %v17650_v36 = vadd.f32 %v3353_v21, %v3223_v7  ;;  %v3236_v12 = vpop.f32.mrf.mxu1  ;;  %13401 = vmatmul.mubr.msk.bf16.gmra.mxu1 %vm2328_vm2, %v17637_v18  ;;  %v17675_v19 = vsel %vm3785_vm3, %v3831_v45, %v17661_v20 }
 0x2b0   :  { %4301 = vmatmul.mubr.bf16.gmra.mxu0 %v17643_v42  ;;  %v3357_v50 = vpop.f32.mrf.mxu0  ;;  %v3237_v0 = vadd.f32 %v3236_v12, %v20492_v47  ;;  %4431 = vmatprep.mubr.bf16.mxu1 %v20461_v9  ;;  %v3679_v47 = vpack.c.bf16 %v3673_v13, %v3673_v13 }
 0x2b1   :  { %20491 = vst [vmem:[#allocation291_spill] sm:$0xff] %v17650_v36  ;;  %v17657_v31 = vadd.f32 %v3357_v50, %v3227_v48  ;;  %4310 = vmatprep.mubr.bf16.mxu0 %v17647_v59  ;;  %v3238_v21 = vpop.f32.mrf.mxu1  ;;  %v20495_v48 = vld [vmem:[#allocation295_spill] sm:$0xff] }
 0x2b2   :  { %v3359_v7 = vpop.f32.mrf.mxu0  ;;  %v3239_v46 = vadd.f32 %v3238_v21, %v20494_v14  ;;  %v17687_v45 = vrot.slane %v3679_v47, 1 }
 0x2b3   :  { %20493 = vst [vmem:[#allocation292_spill] sm:$0xff] %v17657_v31  ;;  %v17665_v36 = vadd.f32 %v3359_v7, %v3229_v61  ;;  %v3240_v60 = vpop.f32.mrf.mxu1 }
 0x2b4   :  { %v3361_v55 = vpop.f32.mrf.mxu0  ;;  %v3241_v12 = vadd.f32 %v3240_v60, %v20495_v48 }
 0x2b5   :  { %v17671_v50 = vadd.f32 %v3361_v55, %v3231_v53  ;;  %v3242_v31 = vpop.f32.mrf.mxu1  ;;  %v20499_v55 = vld [vmem:[#allocation297_spill] sm:$0xff] }
 0x2b6   :  { %v3363_v27 = vpop.f32.mrf.mxu0  ;;  %v3243_v21 = vadd.f32 %v3242_v31, %v20497_v38 }
 0x2b7   :  { %20496 = vst [vmem:[#allocation293_spill] sm:$0xff] %v17671_v50  ;;  %v17678_v61 = vadd.f32 %v3363_v27, %v3233_v57  ;;  %v3246_v7 = vpop.f32.mrf.mxu1  ;;  %13402 = vmatmul.mubr.msk.bf16.gmra.mxu1 %vm2328_vm2, %v17668_v24 }
 0x2b8   :  { %4311 = vmatmul.mubr.bf16.gmra.mxu0 %v17675_v19  ;;  %v3367_v34 = vpop.f32.mrf.mxu0  ;;  %v3247_v53 = vadd.f32 %v3246_v7, %v20499_v55  ;;  %4441 = vmatprep.mubr.bf16.mxu1 %v20461_v9 }
 0x2b9   :  { %20498 = vst [vmem:[#allocation294_spill] sm:$0xff] %v17678_v61  ;;  %v17684_v60 = vadd.f32 %v3367_v34, %v3237_v0  ;;  %4320 = vmatprep.mubr.bf16.mxu0 %v17630_v35  ;;  %v3248_v38 = vpop.f32.mrf.mxu1  ;;  %v17698_v0 = vsel %vm3785_vm3, %v3835_v22, %v17687_v45  ;;  %v20501_v34 = vld [vmem:[#allocation298_spill] sm:$0xff] }
 0x2ba   :  { %v3369_v27 = vpop.f32.mrf.mxu0  ;;  %v3249_v57 = vadd.f32 %v3248_v38, %v17281_v8 }
 0x2bb   :  { %20500 = vst [vmem:[#allocation295_spill] sm:$0xff] %v17684_v60  ;;  %v17691_v31 = vadd.f32 %v3369_v27, %v3239_v46  ;;  %v3250_v13 = vpop.f32.mrf.mxu1 }
 0x2bc   :  { %v3371_v14 = vpop.f32.mrf.mxu0  ;;  %v3251_v48 = vadd.f32 %v3250_v13, %v17285_v32  ;;  %v20502_v32 = vld [vmem:[#allocation299_spill] sm:$0xff] }
 0x2bd   :  { %v17694_v61 = vadd.f32 %v3371_v14, %v3241_v12  ;;  %v3252_v47 = vpop.f32.mrf.mxu1 }
 0x2be   :  { %v3373_v7 = vpop.f32.mrf.mxu0  ;;  %v3253_v55 = vadd.f32 %v3252_v47, %v20501_v34 }
 0x2bf   :  { %v17701_v60 = vadd.f32 %v3373_v7, %v3243_v21  ;;  %v3256_v50 = vpop.f32.mrf.mxu1  ;;  %13403 = vmatmul.mubr.msk.bf16.gmra.mxu1 %vm2328_vm2, %v17698_v0 }
 0x2c0   :  { %4321 = vmatmul.mubr.bf16.gmra.mxu0 %v17661_v20  ;;  %v3377_v8 = vpop.f32.mrf.mxu0  ;;  %v3257_v46 = vadd.f32 %v3256_v50, %v20502_v32  ;;  %4451 = vmatprep.mubr.bf16.mxu1 %v20461_v9 }
 0x2c1   :  { %v17707_v12 = vadd.f32 %v3377_v8, %v3247_v53  ;;  %4492 = vmatprep.mubr.bf16.mxu0 %v17323_v16  ;;  %v3258_v22 = vpop.f32.mrf.mxu1  ;;  %v20503_v16 = vld [vmem:[#allocation300_spill] sm:$0xff] }
 0x2c2   :  { %v3379_v38 = vpop.f32.mrf.mxu0  ;;  %v3259_v21 = vadd.f32 %v3258_v22, %v17307_v1 }
 0x2c3   :  { %v17712_v27 = vadd.f32 %v3379_v38, %v3249_v57  ;;  %v3260_v13 = vpop.f32.mrf.mxu1 }
 0x2c4   :  { %v3381_v14 = vpop.f32.mrf.mxu0  ;;  %v3261_v47 = vadd.f32 %v3260_v13, %v17311_v62 }
 0x2c5   :  { %v17715_v7 = vadd.f32 %v3381_v14, %v3251_v48  ;;  %v3262_v34 = vpop.f32.mrf.mxu1 }
 0x2c6   :  { %v3383_v50 = vpop.f32.mrf.mxu0  ;;  %v3263_v53 = vadd.f32 %v3262_v34, %v17318_v30 }
 0x2c7   :  { %v17718_v8 = vadd.f32 %v3383_v50, %v3253_v55  ;;  %v3266_v32 = vpop.f32.mrf.mxu1  ;;  %13404 = vmatmul.mubr.msk.bf16.gmra.mxu1 %vm2328_vm2, %v17687_v45  ;;  %v20504_v50 = vld [vmem:[#allocation301_spill] sm:$0xff] }
 0x2c8   :  { %4493 = vmatmul.mubr.bf16.vlgmr.msra.gmra.mxu0 %v17416_v52  ;;  %v3387_v1 = vpop.f32.mrf.mxu0  ;;  %v3267_v57 = vadd.f32 %v3266_v32, %v20503_v16  ;;  %14515 = vmatprep.mubr.msk.bf16.mxu1 %vm2328_vm2, %v17448_v51 }
 0x2c9   :  { %v17724_v22 = vadd.f32 %v3387_v1, %v3257_v46  ;;  %4500 = vmatprep.mubr.bf16.mxu0 %v17421_v5  ;;  %v3268_v62 = vpop.f32.mrf.mxu1  ;;  %v20505_v5 = vld [vmem:[#allocation302_spill] sm:$0xff] }
 0x2ca   :  { %v3389_v30 = vpop.f32.mrf.mxu0  ;;  %v3269_v48 = vadd.f32 %v3268_v62, %v17338_v44 }
 0x2cb   :  { %v17730_v55 = vadd.f32 %v3389_v30, %v3259_v21  ;;  %v3270_v38 = vpop.f32.mrf.mxu1 }
 0x2cc   :  { %v3391_v13 = vpop.f32.mrf.mxu0  ;;  %v3271_v52 = vadd.f32 %v3270_v38, %v17341_v49  ;;  %v20506_v38 = vld [vmem:[#allocation303_spill] sm:$0xff] }
 0x2cd   :  { %v17733_v14 = vadd.f32 %v3391_v13, %v3261_v47  ;;  %v3272_v34 = vpop.f32.mrf.mxu1 }
 0x2ce   :  { %v3393_v46 = vpop.f32.mrf.mxu0  ;;  %v3273_v32 = vadd.f32 %v3272_v34, %v20504_v50 }
 0x2cf   :  { %v17736_v1 = vadd.f32 %v3393_v46, %v3263_v53  ;;  %v3276_v51 = vpop.f32.mrf.mxu1  ;;  %14516 = vmatmul.mubr.msk.bf16.vlgmr.msra.gmra.mxu1 %vm2328_vm2, %v17486_v54  ;;  %v20507_v46 = vld [vmem:[#allocation304_spill] sm:$0xff] }
 0x2d0   :  { %4501 = vmatmul.mubr.bf16.gmra.mxu0 %v17451_v39  ;;  %v3397_v44 = vpop.f32.mrf.mxu0  ;;  %v3277_v21 = vadd.f32 %v3276_v51, %v20505_v5  ;;  %14519 = vmatprep.mubr.msk.bf16.mxu1 %vm2328_vm2, %v17521_v23 }
 0x2d1   :  { %v17742_v16 = vadd.f32 %v3397_v44, %v3267_v57  ;;  %4508 = vmatprep.mubr.bf16.mxu0 %v17454_v17  ;;  %v3278_v49 = vpop.f32.mrf.mxu1 }
 0x2d2   :  { %v3399_v47 = vpop.f32.mrf.mxu0  ;;  %v3279_v53 = vadd.f32 %v3278_v49, %v17360_v56  ;;  %v20508_v56 = vld [vmem:[#allocation305_spill] sm:$0xff] }
 0x2d3   :  { %v17748_v62 = vadd.f32 %v3399_v47, %v3269_v48  ;;  %v3280_v30 = vpop.f32.mrf.mxu1 }
 0x2d4   :  { %v3401_v54 = vpop.f32.mrf.mxu0  ;;  %v3281_v39 = vadd.f32 %v3280_v30, %v20506_v38 }
 0x2d5   :  { %v17751_v13 = vadd.f32 %v3401_v54, %v3271_v52  ;;  %v3282_v34 = vpop.f32.mrf.mxu1  ;;  %v20510_v54 = vld [vmem:[#allocation307_spill] sm:$0xff] }
 0x2d6   :  { %v3403_v57 = vpop.f32.mrf.mxu0  ;;  %v3283_v50 = vadd.f32 %v3282_v34, %v20507_v46 }
 0x2d7   :  { %v17754_v17 = vadd.f32 %v3403_v57, %v3273_v32  ;;  %v3286_v51 = vpop.f32.mrf.mxu1  ;;  %14520 = vmatmul.mubr.msk.bf16.gmra.mxu1 %vm2328_vm2, %v17553_v63  ;;  %v20509_v32 = vld [vmem:[#allocation306_spill] sm:$0xff] }
 0x2d8   :  { %4509 = vmatmul.mubr.bf16.gmra.mxu0 %v17489_v3  ;;  %v3407_v23 = vpop.f32.mrf.mxu0  ;;  %v3287_v48 = vadd.f32 %v3286_v51, %v20508_v56  ;;  %14523 = vmatprep.mubr.msk.bf16.mxu1 %vm2328_vm2, %v17581_v4 }
 0x2d9   :  { %v17760_v44 = vadd.f32 %v3407_v23, %v3277_v21  ;;  %4516 = vmatprep.mubr.bf16.mxu0 %v17492_v25  ;;  %v3288_v52 = vpop.f32.mrf.mxu1 }
 0x2da   :  { %v3409_v5 = vpop.f32.mrf.mxu0  ;;  %v3289_v49 = vadd.f32 %v3288_v52, %v20509_v32 }
 0x2db   :  { %v17766_v47 = vadd.f32 %v3409_v5, %v3279_v53  ;;  %v3290_v3 = vpop.f32.mrf.mxu1  ;;  %v20511_v53 = vld [vmem:[#allocation283_spill] sm:$0xff] }
 0x2dc   :  { %v3411_v30 = vpop.f32.mrf.mxu0  ;;  %v3291_v38 = vadd.f32 %v3290_v3, %v20510_v54  ;;  %v20513_v54 = vld [vmem:[#allocation281_spill] sm:$0xff] }
 0x2dd   :  { %v17769_v63 = vadd.f32 %v3411_v30, %v3281_v39  ;;  %v17771_v34 = vpop.f32.mrf.mxu1 }
 0x2de   :  { %v3413_v21 = vpop.f32.mrf.mxu0 }
 0x2df   :  { %v17773_v57 = vadd.f32 %v3413_v21, %v3283_v50  ;;  %v3296_v25 = vpop.f32.mrf.mxu1  ;;  %14524 = vmatmul.mubr.msk.bf16.gmra.mxu1 %vm2328_vm2, %v17609_v41 }
 0x2e0   :  { %4517 = vmatmul.mubr.bf16.gmra.mxu0 %v17524_v26  ;;  %v3417_v4 = vpop.f32.mrf.mxu0  ;;  %v3297_v46 = vadd.f32 %v3296_v25, %v20511_v53  ;;  %14527 = vmatprep.mubr.msk.bf16.mxu1 %vm2328_vm2, %v17637_v18 }
 0x2e1   :  { %v17779_v51 = vadd.f32 %v3417_v4, %v3287_v48  ;;  %4524 = vmatprep.mubr.bf16.mxu0 %v17527_v29  ;;  %v3298_v39 = vpop.f32.mrf.mxu1 }
 0x2e2   :  { %v3419_v23 = vpop.f32.mrf.mxu0  ;;  %v3299_v50 = vadd.f32 %v3298_v39, %v17409_v2  ;;  %v20512_v2 = vld [vmem:[#allocation284_spill] sm:$0xff] }
 0x2e3   :  { %v17785_v56 = vadd.f32 %v3419_v23, %v3289_v49  ;;  %v3300_v26 = vpop.f32.mrf.mxu1 }
 0x2e4   :  { %v3421_v52 = vpop.f32.mrf.mxu0  ;;  %v3301_v5 = vadd.f32 %v3300_v26, %v17413_v58 }
 0x2e5   :  { %v17788_v41 = vadd.f32 %v3421_v52, %v3291_v38  ;;  %v17790_v32 = vpop.f32.mrf.mxu1 }
 0x2e6   :  { %v17792_v48 = vpop.f32.mrf.mxu0 }
 0x2e7   :  { %v3306_v29 = vpop.f32.mrf.mxu1  ;;  %14528 = vmatmul.mubr.msk.bf16.gmra.mxu1 %vm2328_vm2, %v17668_v24 }
 0x2e8   :  { %4525 = vmatmul.mubr.bf16.gmra.mxu0 %v17556_v11  ;;  %v3427_v18 = vpop.f32.mrf.mxu0  ;;  %v3307_v49 = vadd.f32 %v3306_v29, %v20512_v2  ;;  %14531 = vmatprep.mubr.msk.bf16.mxu1 %vm2328_vm2, %v17698_v0 }
 0x2e9   :  { %v17798_v3 = vadd.f32 %v3427_v18, %v3297_v46  ;;  %4532 = vmatprep.mubr.bf16.mxu0 %v17559_v33  ;;  %v3308_v58 = vpop.f32.mrf.mxu1 }
 0x2ea   :  { %v3429_v30 = vpop.f32.mrf.mxu0  ;;  %v3309_v38 = vadd.f32 %v3308_v58, %v20513_v54 }
 0x2eb   :  { %v17804_v21 = vadd.f32 %v3429_v30, %v3299_v50  ;;  %v3310_v11 = vpop.f32.mrf.mxu1 }
 0x2ec   :  { %v3431_v25 = vpop.f32.mrf.mxu0 }
 0x2ed   :  { %v17806_v4 = vadd.f32 %v3431_v25, %v3301_v5  ;;  %v3311_v24 = vpop.f32.mrf.mxu1 }
 0x2ee   :  { %v17808_v53 = vpop.f32.mrf.mxu0 }
 0x2ef   :  { %v14223_v46 = vpop.f32.mrf.mxu1  ;;  %14532 = vmatmul.mubr.msk.bf16.gmra.mxu1 %vm2328_vm2, %v17687_v45 }
 0x2f0   :  { %4533 = vmatmul.mubr.bf16.gmra.mxu0 %v17584_v6  ;;  %v3437_v33 = vpop.f32.mrf.mxu0 }
 0x2f1   :  { %v17813_v0 = vadd.f32 %v3437_v33, %v3307_v49  ;;  %4540 = vmatprep.mubr.bf16.mxu0 %v17587_v15  ;;  %v14224_v39 = vpop.f32.mrf.mxu1 }
 0x2f2   :  { %v3439_v23 = vpop.f32.mrf.mxu0  ;;  %v14225_v50 = vadd.f32 %v14224_v39, %v14223_v46 }
 0x2f3   :  { %20514 = vst [vmem:[#allocation296_spill] sm:$0xff] %v17813_v0  ;;  %v17816_v26 = vadd.f32 %v3439_v23, %v3309_v38  ;;  %v14226_v52 = vpop.f32.mrf.mxu1 }
 0x2f4   :  { %v3441_v5 = vpop.f32.mrf.mxu0  ;;  %v3479_v29 = vadd.f32 %v14225_v50, %v17478_v37  ;;  %v20517_v37 = vld [vmem:[#allocation309_spill] sm:$0xff] }
 0x2f5   :  { %20515 = vst [vmem:[#allocation297_spill] sm:$0xff] %v17816_v26  ;;  %v14227_v18 = vpop.f32.mrf.mxu1  ;;  %v20564_v26 = vld [vmem:[#allocation292_spill] sm:$0xff] }
 0x2f6   :  { %v3442_v2 = vpop.f32.mrf.mxu0  ;;  %v14228_v6 = vadd.f32 %v14227_v18, %v14226_v52 }
 0x2f7   :  { %v14229_v58 = vpop.f32.mrf.mxu1 }
 0x2f8   :  { %4541 = vmatmul.mubr.bf16.gmra.mxu0 %v17612_v40  ;;  %v14491_v45 = vpop.f32.mrf.mxu0  ;;  %v17821_v49 = vadd.f32 %v14228_v6, %v17498_v10  ;;  %v20521_v6 = vld [vmem:[#allocation311_spill] sm:$0xff] }
 0x2f9   :  { %4548 = vmatprep.mubr.bf16.mxu0 %v17615_v28  ;;  %v14230_v15 = vpop.f32.mrf.mxu1 }
 0x2fa   :  { %20516 = vst [vmem:[#allocation298_spill] sm:$0xff] %v17821_v49  ;;  %v3590_v30 = vpop.f32.mrf.mxu0  ;;  %v14231_v54 = vadd.f32 %v14230_v15, %v14229_v58 }
 0x2fb   :  { %v17824_v38 = vadd.f32 %v3590_v30, %v3479_v29  ;;  %v14232_v11 = vpop.f32.mrf.mxu1 }
 0x2fc   :  { %v14492_v25 = vpop.f32.mrf.mxu0  ;;  %v3487_v24 = vadd.f32 %v14231_v54, %v20517_v37 }
 0x2fd   :  { %v14233_v46 = vpop.f32.mrf.mxu1 }
 0x2fe   :  { %v17827_v33 = vpop.f32.mrf.mxu0  ;;  %v17829_v39 = vadd.f32 %v14491_v45, %v3487_v24  ;;  %v14234_v40 = vadd.f32 %v14233_v46, %v14232_v11 }
 0x2ff   :  { %20518 = vst [vmem:[#allocation299_spill] sm:$0xff] %v17827_v33  ;;  %v14235_v23 = vpop.f32.mrf.mxu1 }
 0x300   :  { %20519 = vst [vmem:[#allocation300_spill] sm:$0xff] %v17829_v39  ;;  %4549 = vmatmul.mubr.bf16.gmra.mxu0 %v17643_v42  ;;  %v14495_v10 = vpop.f32.mrf.mxu0  ;;  %v3490_v28 = vadd.f32 %v14234_v40, %v17483_v43 }
 0x301   :  { %4556 = vmatprep.mubr.bf16.mxu0 %v17647_v59  ;;  %v14236_v50 = vpop.f32.mrf.mxu1  ;;  %v20524_v59 = vld [vmem:[#allocation313_spill] sm:$0xff] }
 0x302   :  { %v3606_v52 = vpop.f32.mrf.mxu0  ;;  %v17834_v5 = vadd.f32 %v14492_v25, %v3490_v28  ;;  %v14237_v29 = vadd.f32 %v14236_v50, %v14235_v23  ;;  %v20526_v23 = vld [vmem:[#allocation310_spill] sm:$0xff] }
 0x303   :  { %v14238_v18 = vpop.f32.mrf.mxu1 }
 0x304   :  { %20520 = vst [vmem:[#allocation301_spill] sm:$0xff] %v17834_v5  ;;  %v14496_v2 = vpop.f32.mrf.mxu0  ;;  %v3495_v58 = vadd.f32 %v14237_v29, %v20521_v6 }
 0x305   :  { %v14239_v45 = vpop.f32.mrf.mxu1 }
 0x306   :  { %v17837_v15 = vpop.f32.mrf.mxu0  ;;  %v14240_v30 = vadd.f32 %v14239_v45, %v14238_v18  ;;  %v17839_v54 = vadd.f32 %v3606_v52, %v3495_v58  ;;  %v20529_v58 = vld [vmem:[#allocation312_spill] sm:$0xff] }
 0x307   :  { %20522 = vst [vmem:[#allocation302_spill] sm:$0xff] %v17837_v15  ;;  %v14241_v42 = vpop.f32.mrf.mxu1 }
 0x308   :  { %20523 = vst [vmem:[#allocation303_spill] sm:$0xff] %v17839_v54  ;;  %4557 = vmatmul.mubr.bf16.gmra.mxu0 %v17675_v19  ;;  %v14499_v43 = vpop.f32.mrf.mxu0  ;;  %v17843_v11 = vadd.f32 %v14240_v30, %v20524_v59 }
 0x309   :  { %4564 = vmatprep.mubr.bf16.mxu0 %v17630_v35  ;;  %v14242_v25 = vpop.f32.mrf.mxu1 }
 0x30a   :  { %20525 = vst [vmem:[#allocation304_spill] sm:$0xff] %v17843_v11  ;;  %v3622_v37 = vpop.f32.mrf.mxu0  ;;  %v14243_v24 = vadd.f32 %v14242_v25, %v14241_v42 }
 0x30b   :  { %v14244_v46 = vpop.f32.mrf.mxu1 }
 0x30c   :  { %v14500_v40 = vpop.f32.mrf.mxu0  ;;  %v3503_v28 = vadd.f32 %v14243_v24, %v20526_v23  ;;  %v20531_v24 = vld [vmem:[#allocation315_spill] sm:$0xff] }
 0x30d   :  { %v14245_v50 = vpop.f32.mrf.mxu1 }
 0x30e   :  { %v17847_v29 = vpop.f32.mrf.mxu0  ;;  %v17849_v52 = vadd.f32 %v14495_v10, %v3503_v28  ;;  %v14246_v18 = vadd.f32 %v14245_v50, %v14244_v46  ;;  %v20534_v50 = vld [vmem:[#allocation317_spill] sm:$0xff] }
 0x30f   :  { %20527 = vst [vmem:[#allocation305_spill] sm:$0xff] %v17847_v29  ;;  %v14247_v19 = vpop.f32.mrf.mxu1 }
 0x310   :  { %20528 = vst [vmem:[#allocation306_spill] sm:$0xff] %v17849_v52  ;;  %4565 = vmatmul.mubr.bf16.gmra.mxu0 %v17661_v20  ;;  %v14503_v6 = vpop.f32.mrf.mxu0  ;;  %v3506_v45 = vadd.f32 %v14246_v18, %v20529_v58 }
 0x311   :  { %v14248_v35 = vpop.f32.mrf.mxu1 }
 0x312   :  { %v3638_v30 = vpop.f32.mrf.mxu0  ;;  %v17853_v59 = vadd.f32 %v14496_v2, %v3506_v45  ;;  %v14249_v42 = vadd.f32 %v14248_v35, %v14247_v19  ;;  %v20536_v35 = vld [vmem:[#allocation314_spill] sm:$0xff] }
 0x313   :  { %v14250_v25 = vpop.f32.mrf.mxu1 }
 0x314   :  { %20530 = vst [vmem:[#allocation307_spill] sm:$0xff] %v17853_v59  ;;  %v14504_v9 = vpop.f32.mrf.mxu0  ;;  %v3511_v23 = vadd.f32 %v14249_v42, %v20531_v24 }
 0x315   :  { %v14251_v15 = vpop.f32.mrf.mxu1 }
 0x316   :  { %v17856_v29 = vpop.f32.mrf.mxu0  ;;  %v14252_v10 = vadd.f32 %v14251_v15, %v14250_v25  ;;  %v17858_v46 = vadd.f32 %v3622_v37, %v3511_v23  ;;  %v20538_v15 = vld [vmem:[#allocation316_spill] sm:$0xff] }
 0x317   :  { %20532 = vst [vmem:[#allocation283_spill] sm:$0xff] %v17856_v29  ;;  %v14253_v28 = vpop.f32.mrf.mxu1 }
 0x318   :  { %20533 = vst [vmem:[#allocation284_spill] sm:$0xff] %v17858_v46  ;;  %v14507_v20 = vpop.f32.mrf.mxu0  ;;  %v17861_v52 = vadd.f32 %v14252_v10, %v20534_v50 }
 0x319   :  { %v14254_v18 = vpop.f32.mrf.mxu1 }
 0x31a   :  { %20535 = vst [vmem:[#allocation281_spill] sm:$0xff] %v17861_v52  ;;  %v3654_v58 = vpop.f32.mrf.mxu0  ;;  %v14255_v2 = vadd.f32 %v14254_v18, %v14253_v28  ;;  %v20541_v52 = vld [vmem:[#allocation280_spill] sm:$0xff] }
 0x31b   :  { %v14256_v45 = vpop.f32.mrf.mxu1 }
 0x31c   :  { %v14508_v19 = vpop.f32.mrf.mxu0  ;;  %v3519_v59 = vadd.f32 %v14255_v2, %v20536_v35  ;;  %v20543_v35 = vld [vmem:[#allocation320_spill] sm:$0xff] }
 0x31d   :  { %v14257_v11 = vpop.f32.mrf.mxu1 }
 0x31e   :  { %v17864_v42 = vadd.f32 %v14499_v43, %v3519_v59  ;;  %v14258_v24 = vadd.f32 %v14257_v11, %v14256_v45 }
 0x31f   :  { %v14259_v29 = vpop.f32.mrf.mxu1 }
 0x320   :  { %20537 = vst [vmem:[#allocation309_spill] sm:$0xff] %v17864_v42  ;;  %v3522_v37 = vadd.f32 %v14258_v24, %v20538_v15  ;;  %v20545_v24 = vld [vmem:[#allocation318_spill] sm:$0xff] }
 0x321   :  { %v14260_v25 = vpop.f32.mrf.mxu1 }
 0x322   :  { %v17867_v23 = vadd.f32 %v14500_v40, %v3522_v37  ;;  %v14261_v10 = vadd.f32 %v14260_v25, %v14259_v29  ;;  %v14985_v25 = vld [vmem:[%s20540_s0 + $0x4] ss:$8 sps:$4 sm:$0xff]  }
 0x323   :  { %v14262_v50 = vpop.f32.mrf.mxu1  ;;  %13426 = vmatprep.mubr.msk.bf16.mxu1 %vm4957_vm4, %v14985_v25  ;;  %13431 = vmatprep.mubr.msk.bf16.mxu0 %vm4957_vm4, %v14985_v25 }
 0x324   :  { %20539 = vst [vmem:[#allocation311_spill] sm:$0xff] %v17867_v23  ;;  %v3527_v46 = vadd.f32 %v14261_v10, %v20541_v52  ;;  %v20547_v52 = vld [vmem:[#allocation319_spill] sm:$0xff] }
 0x325   :  { %v14263_v28 = vpop.f32.mrf.mxu1 }
 0x326   :  { %v14264_v18 = vadd.f32 %v14263_v28, %v14262_v50  ;;  %v17870_v19 = vadd.f32 %v3638_v30, %v3527_v46 }
 0x327   :  { %v14265_v2 = vpop.f32.mrf.mxu1 }
 0x328   :  { %20542 = vst [vmem:[#allocation313_spill] sm:$0xff] %v17870_v19  ;;  %v17873_v43 = vadd.f32 %v14264_v18, %v20543_v35  ;;  %v20549_v18 = vld [vmem:[#allocation286_spill] sm:$0xff]  ;;  %v17885_v35 = vpop.f32.mrf.mxu0 }
 0x329   :  { %v14266_v11 = vpop.f32.mrf.mxu1  ;;  %20550 = vst [vmem:[#allocation317_spill] sm:$0xff] %v17885_v35 }
 0x32a   :  { %20544 = vst [vmem:[#allocation310_spill] sm:$0xff] %v17873_v43  ;;  %v14267_v59 = vadd.f32 %v14266_v11, %v14265_v2  ;;  %v4743_v11 = vlaneseq  ;;  %v20562_v43 = vld [vmem:[#allocation290_spill] sm:$0xff] }
 0x32b   :  { %v14268_v45 = vpop.f32.mrf.mxu1 }
 0x32c   :  { %v3535_v15 = vadd.f32 %v14267_v59, %v20545_v24 }
 0x32d   :  { %v14269_v40 = vpop.f32.mrf.mxu1 }
 0x32e   :  { %v17876_v37 = vadd.f32 %v14503_v6, %v3535_v15  ;;  %v14270_v29 = vadd.f32 %v14269_v40, %v14268_v45  ;;  %v20553_v40 = vld [vmem:[#allocation287_spill] sm:$0xff] }
 0x32f   :  { %v14271_v23 = vpop.f32.mrf.mxu1 }
 0x330   :  { %20546 = vst [vmem:[#allocation312_spill] sm:$0xff] %v17876_v37  ;;  %v3538_v10 = vadd.f32 %v14270_v29, %v20547_v52  ;;  %v17892_v52 = vshrl.u32 %v4743_v11, 7 }
 0x331   :  { %v14272_v30 = vpop.f32.mrf.mxu1 }
 0x332   :  { %v17882_v46 = vadd.f32 %v14504_v9, %v3538_v10  ;;  %v14273_v50 = vadd.f32 %v14272_v30, %v14271_v23  ;;  %20555 = vst [vmem:[#allocation280_spill] sm:$0xff] %v17892_v52 }
 0x333   :  { %v14274_v28 = vpop.f32.mrf.mxu1 }
 0x334   :  { %20548 = vst [vmem:[#allocation315_spill] sm:$0xff] %v17882_v46  ;;  %v3543_v2 = vadd.f32 %v14273_v50, %v20549_v18  ;;  %v20556_v50 = vld [vmem:[#allocation282_spill] sm:$0xff] }
 0x335   :  { %v14275_v6 = vpop.f32.mrf.mxu1 }
 0x336   :  { %v14276_v59 = vadd.f32 %v14275_v6, %v14274_v28  ;;  %v17887_v45 = vadd.f32 %v3654_v58, %v3543_v2  ;;  %v17896_v28 = vsub.s32 0, %v17892_v52  ;;  %v17901_v6 = vld [vmem:[%s20551_s5] sm:$0x7] }
 0x337   :  { %v14277_v24 = vpop.f32.mrf.mxu1 }
 0x338   :  { %20552 = vst [vmem:[#allocation314_spill] sm:$0xff] %v17887_v45  ;;  %v4232_v15 = vpop.f32.mrf.mxu0  ;;  %v17890_v29 = vadd.f32 %v14276_v59, %v20553_v40  ;;  %20557 = vst [vmem:[#allocation320_spill] sm:$0xff] %v17896_v28  ;;  %v17905_v11 = vrot.slane %v17901_v6, %v17896_v28 }
 0x339   :  { %v14278_v25 = vpop.f32.mrf.mxu1 }
 0x33a   :  { %20554 = vst [vmem:[#allocation316_spill] sm:$0xff] %v17890_v29  ;;  %v4234_v9 = vpop.f32.mrf.mxu0  ;;  %v14279_v23 = vadd.f32 %v14278_v25, %v14277_v24  ;;  %v17908_v25 = vsub.s32 1, %v17892_v52 }
 0x33b   :  { %v14280_v10 = vpop.f32.mrf.mxu1 }
 0x33c   :  { %v4236_v30 = vpop.f32.mrf.mxu0  ;;  %v3551_v18 = vadd.f32 %v14279_v23, %v20556_v50  ;;  %20559 = vst [vmem:[#allocation319_spill] sm:$0xff] %v17908_v25  ;;  %v20560_v23 = vld [vmem:[#allocation288_spill] sm:$0xff] }
 0x33d   :  { %v14281_v35 = vpop.f32.mrf.mxu1 }
 0x33e   :  { %v4238_v58 = vpop.f32.mrf.mxu0  ;;  %v17898_v2 = vadd.f32 %v14507_v20, %v3551_v18  ;;  %v20561_v18 = vld [vmem:[#allocation289_spill] sm:$0xff] }
 0x33f   :  { %v4363_v59 = vpop.f32.mrf.mxu1 }
 0x340   :  { %20558 = vst [vmem:[#allocation318_spill] sm:$0xff] %v17898_v2  ;;  %v4242_v40 = vpop.f32.mrf.mxu0  ;;  %v4364_v29 = vadd.f32 %v4363_v59, %v4232_v15  ;;  %v17915_v15 = vrot.slane %v17901_v6, %v17908_v25 }
 0x341   :  { %v4365_v24 = vpop.f32.mrf.mxu1 }
 0x342   :  { %v4244_v35 = vpop.f32.mrf.mxu0  ;;  %v4684_v10 = vadd.f32 %v4364_v29, %v20560_v23  ;;  %v4366_v50 = vadd.f32 %v4365_v24, %v4234_v9  ;;  %v20563_v9 = vld [vmem:[#allocation291_spill] sm:$0xff] }
 0x343   :  { %v4367_v45 = vpop.f32.mrf.mxu1 }
 0x344   :  { %v4246_v20 = vpop.f32.mrf.mxu0  ;;  %v4685_v2 = vadd.f32 %v4366_v50, %v20561_v18  ;;  %v4368_v46 = vadd.f32 %v4367_v45, %v4236_v30  ;;  %v4758_v37 = vadd.f32 %v17905_v11, %v4684_v10 }
 0x345   :  { %v4369_v59 = vpop.f32.mrf.mxu1 }
 0x346   :  { %v4248_v28 = vpop.f32.mrf.mxu0  ;;  %v4687_v19 = vadd.f32 %v4368_v46, %v20562_v43  ;;  %v4370_v42 = vadd.f32 %v4369_v59, %v4238_v58  ;;  %v4815_v50 = vmax.f32 %v4758_v37, 0.0  ;;  %v4759_v45 = vadd.f32 %v17915_v15, %v4685_v2 }
 0x347   :  { %v4373_v54 = vpop.f32.mrf.mxu1 }
 0x348   :  { %v4252_v5 = vpop.f32.mrf.mxu0  ;;  %v4761_v29 = vadd.f32 %v17905_v11, %v4687_v19  ;;  %v4688_v24 = vadd.f32 %v4370_v42, %v20563_v9  ;;  %v4374_v23 = vadd.f32 %v4373_v54, %v4242_v40  ;;  %v4816_v42 = vmax.f32 %v4759_v45, 0.0  ;;  %v20565_v9 = vld [vmem:[#allocation293_spill] sm:$0xff] }
 0x349   :  { %v4375_v30 = vpop.f32.mrf.mxu1 }
 0x34a   :  { %v4254_v10 = vpop.f32.mrf.mxu0  ;;  %v4818_v18 = vmax.f32 %v4761_v29, 0.0  ;;  %v4762_v25 = vadd.f32 %v17915_v15, %v4688_v24  ;;  %v4690_v0 = vadd.f32 %v4374_v23, %v20564_v26  ;;  %v4376_v39 = vadd.f32 %v4375_v30, %v4244_v35  ;;  %v20566_v23 = vld [vmem:[#allocation294_spill] sm:$0xff] }
 0x34b   :  { %v4377_v43 = vpop.f32.mrf.mxu1 }
 0x34c   :  { %v4256_v46 = vpop.f32.mrf.mxu0  ;;  %v17923_v58 = vpack.c.bf16 %v4818_v18, %v4815_v50  ;;  %v4691_v19 = vadd.f32 %v4376_v39, %v17665_v36  ;;  %v4378_v59 = vadd.f32 %v4377_v43, %v4246_v20  ;;  %v4764_v54 = vadd.f32 %v17905_v11, %v4690_v0  ;;  %v20567_v18 = vld [vmem:[#allocation295_spill] sm:$0xff] }
 0x34d   :  { %v4379_v37 = vpop.f32.mrf.mxu1  ;;  %v4819_v40 = vmax.f32 %v4762_v25, 0.0 }
 0x34e   :  { %v4258_v2 = vpop.f32.mrf.mxu0  ;;  %v4693_v29 = vadd.f32 %v4378_v59, %v20565_v9  ;;  %v4380_v33 = vadd.f32 %v4379_v37, %v4248_v28  ;;  %v4821_v36 = vmax.f32 %v4764_v54, 0.0  ;;  %v4765_v39 = vadd.f32 %v17915_v15, %v4691_v19 }
 0x34f   :  { %v4383_v24 = vpop.f32.mrf.mxu1  ;;  %v17928_v26 = vpack.c.bf16 %v4819_v40, %v4816_v42 }
 0x350   :  { %v4262_v49 = vpop.f32.mrf.mxu0  ;;  %v4767_v35 = vadd.f32 %v17905_v11, %v4693_v29  ;;  %v4694_v50 = vadd.f32 %v4380_v33, %v20566_v23  ;;  %v4384_v30 = vadd.f32 %v4383_v24, %v4252_v5  ;;  %v4822_v33 = vmax.f32 %v4765_v39, 0.0 }
 0x351   :  { %v4385_v20 = vpop.f32.mrf.mxu1 }
 0x352   :  { %v4264_v0 = vpop.f32.mrf.mxu0  ;;  %v4824_v45 = vmax.f32 %v4767_v35, 0.0  ;;  %v4768_v25 = vadd.f32 %v17915_v15, %v4694_v50  ;;  %v4696_v43 = vadd.f32 %v4384_v30, %v20567_v18  ;;  %v4386_v28 = vadd.f32 %v4385_v20, %v4254_v10 }
 0x353   :  { %v4387_v59 = vpop.f32.mrf.mxu1 }
 0x354   :  { %v4266_v37 = vpop.f32.mrf.mxu0  ;;  %v17935_v42 = vpack.c.bf16 %v4824_v45, %v4821_v36  ;;  %v4697_v40 = vadd.f32 %v4386_v28, %v17691_v31  ;;  %v4388_v9 = vadd.f32 %v4387_v59, %v4256_v46  ;;  %v4770_v5 = vadd.f32 %v17905_v11, %v4696_v43 }
 0x355   :  { %v4389_v54 = vpop.f32.mrf.mxu1  ;;  %v4825_v29 = vmax.f32 %v4768_v25, 0.0 }
 0x356   :  { %v4268_v19 = vpop.f32.mrf.mxu0  ;;  %v4699_v24 = vadd.f32 %v4388_v9, %v17694_v61  ;;  %v4390_v35 = vadd.f32 %v4389_v54, %v4258_v2  ;;  %v4827_v31 = vmax.f32 %v4770_v5, 0.0  ;;  %v4771_v46 = vadd.f32 %v17915_v15, %v4697_v40 }
 0x357   :  { %v4393_v23 = vpop.f32.mrf.mxu1  ;;  %v17940_v30 = vpack.c.bf16 %v4825_v29, %v4822_v33 }
 0x358   :  { %v4272_v50 = vpop.f32.mrf.mxu0  ;;  %v4773_v10 = vadd.f32 %v17905_v11, %v4699_v24  ;;  %v4700_v36 = vadd.f32 %v4390_v35, %v17701_v60  ;;  %v4394_v20 = vadd.f32 %v4393_v23, %v4262_v49  ;;  %v4828_v33 = vmax.f32 %v4771_v46, 0.0 }
 0x359   :  { %v4395_v39 = vpop.f32.mrf.mxu1 }
 0x35a   :  { %v4274_v45 = vpop.f32.mrf.mxu0  ;;  %v4830_v18 = vmax.f32 %v4773_v10, 0.0  ;;  %v4774_v25 = vadd.f32 %v17915_v15, %v4700_v36  ;;  %v4702_v61 = vadd.f32 %v4394_v20, %v17707_v12  ;;  %v4396_v2 = vadd.f32 %v4395_v39, %v4264_v0 }
 0x35b   :  { %v4397_v43 = vpop.f32.mrf.mxu1 }
 0x35c   :  { %v4276_v28 = vpop.f32.mrf.mxu0  ;;  %v17947_v59 = vpack.c.bf16 %v4830_v18, %v4827_v31  ;;  %v4398_v9 = vadd.f32 %v4397_v43, %v4266_v37  ;;  %v4776_v60 = vadd.f32 %v17905_v11, %v4702_v61  ;;  %v4703_v49 = vadd.f32 %v4396_v2, %v17712_v27 }
 0x35d   :  { %v4399_v5 = vpop.f32.mrf.mxu1  ;;  %v4831_v54 = vmax.f32 %v4774_v25, 0.0 }
 0x35e   :  { %v4278_v40 = vpop.f32.mrf.mxu0  ;;  %v4705_v29 = vadd.f32 %v4398_v9, %v17715_v7  ;;  %v4400_v24 = vadd.f32 %v4399_v5, %v4268_v19  ;;  %v4833_v36 = vmax.f32 %v4776_v60, 0.0  ;;  %v4777_v20 = vadd.f32 %v17915_v15, %v4703_v49 }
 0x35f   :  { %v4403_v35 = vpop.f32.mrf.mxu1  ;;  %v17952_v12 = vpack.c.bf16 %v4831_v54, %v4828_v33 }
 0x360   :  { %v4282_v23 = vpop.f32.mrf.mxu0  ;;  %v4779_v0 = vadd.f32 %v17905_v11, %v4705_v29  ;;  %v4706_v10 = vadd.f32 %v4400_v24, %v17718_v8  ;;  %v4404_v37 = vadd.f32 %v4403_v35, %v4272_v50  ;;  %v4834_v43 = vmax.f32 %v4777_v20, 0.0 }
 0x361   :  { %v4405_v31 = vpop.f32.mrf.mxu1 }
 0x362   :  { %v4284_v27 = vpop.f32.mrf.mxu0  ;;  %v4836_v46 = vmax.f32 %v4779_v0, 0.0  ;;  %v4780_v39 = vadd.f32 %v17915_v15, %v4706_v10  ;;  %v4708_v7 = vadd.f32 %v4404_v37, %v17724_v22  ;;  %v4406_v19 = vadd.f32 %v4405_v31, %v4274_v45 }
 0x363   :  { %v4407_v18 = vpop.f32.mrf.mxu1 }
 0x364   :  { %v4286_v25 = vpop.f32.mrf.mxu0  ;;  %v17959_v61 = vpack.c.bf16 %v4836_v46, %v4833_v36  ;;  %v4408_v2 = vadd.f32 %v4407_v18, %v4276_v28  ;;  %v4782_v8 = vadd.f32 %v17905_v11, %v4708_v7  ;;  %v4709_v50 = vadd.f32 %v4406_v19, %v17730_v55 }
 0x365   :  { %v4409_v9 = vpop.f32.mrf.mxu1  ;;  %v4837_v60 = vmax.f32 %v4780_v39, 0.0 }
 0x366   :  { %v4288_v33 = vpop.f32.mrf.mxu0  ;;  %v4711_v49 = vadd.f32 %v4408_v2, %v17733_v14  ;;  %v4410_v5 = vadd.f32 %v4409_v9, %v4278_v40  ;;  %v4839_v35 = vmax.f32 %v4782_v8, 0.0  ;;  %v4783_v0 = vadd.f32 %v17915_v15, %v4709_v50 }
 0x367   :  { %v4413_v54 = vpop.f32.mrf.mxu1  ;;  %v17964_v22 = vpack.c.bf16 %v4837_v60, %v4834_v43 }
 0x368   :  { %v4292_v29 = vpop.f32.mrf.mxu0  ;;  %v4785_v45 = vadd.f32 %v17905_v11, %v4711_v49  ;;  %v4712_v24 = vadd.f32 %v4410_v5, %v17736_v1  ;;  %v4414_v28 = vadd.f32 %v4413_v54, %v4282_v23  ;;  %v4840_v7 = vmax.f32 %v4783_v0, 0.0 }
 0x369   :  { %v4415_v10 = vpop.f32.mrf.mxu1 }
 0x36a   :  { %v4294_v55 = vpop.f32.mrf.mxu0  ;;  %v4842_v37 = vmax.f32 %v4785_v45, 0.0  ;;  %v4786_v36 = vadd.f32 %v17915_v15, %v4712_v24  ;;  %v4714_v14 = vadd.f32 %v4414_v28, %v17742_v16  ;;  %v4416_v40 = vadd.f32 %v4415_v10, %v4284_v27 }
 0x36b   :  { %v4417_v20 = vpop.f32.mrf.mxu1 }
 0x36c   :  { %v4296_v31 = vpop.f32.mrf.mxu0  ;;  %v17971_v46 = vpack.c.bf16 %v4842_v37, %v4839_v35  ;;  %v4418_v39 = vadd.f32 %v4417_v20, %v4286_v25  ;;  %v4788_v1 = vadd.f32 %v17905_v11, %v4714_v14  ;;  %v4715_v23 = vadd.f32 %v4416_v40, %v17748_v62 }
 0x36d   :  { %v4419_v19 = vpop.f32.mrf.mxu1  ;;  %v4843_v2 = vmax.f32 %v4786_v36, 0.0 }
 0x36e   :  { %v4298_v18 = vpop.f32.mrf.mxu0  ;;  %v4717_v43 = vadd.f32 %v4418_v39, %v17751_v13  ;;  %v4420_v8 = vadd.f32 %v4419_v19, %v4288_v33  ;;  %v4845_v49 = vmax.f32 %v4788_v1, 0.0  ;;  %v4789_v5 = vadd.f32 %v17915_v15, %v4715_v23 }
 0x36f   :  { %v4423_v50 = vpop.f32.mrf.mxu1  ;;  %v17976_v16 = vpack.c.bf16 %v4843_v2, %v4840_v7 }
 0x370   :  { %v4302_v9 = vpop.f32.mrf.mxu0  ;;  %v4791_v27 = vadd.f32 %v17905_v11, %v4717_v43  ;;  %v4718_v60 = vadd.f32 %v4420_v8, %v17754_v17  ;;  %v4424_v25 = vadd.f32 %v4423_v50, %v4292_v29  ;;  %v4846_v37 = vmax.f32 %v4789_v5, 0.0 }
 0x371   :  { %v4425_v54 = vpop.f32.mrf.mxu1 }
 0x372   :  { %v4304_v62 = vpop.f32.mrf.mxu0  ;;  %v4848_v45 = vmax.f32 %v4791_v27, 0.0  ;;  %v4792_v24 = vadd.f32 %v17915_v15, %v4718_v60  ;;  %v4720_v13 = vadd.f32 %v4424_v25, %v17760_v44  ;;  %v4426_v33 = vadd.f32 %v4425_v54, %v4294_v55  ;;  %v20568_v25 = vld [vmem:[#allocation308_spill] sm:$0xff] }
 0x373   :  { %v4427_v28 = vpop.f32.mrf.mxu1 }
 0x374   :  { %v4306_v35 = vpop.f32.mrf.mxu0  ;;  %v17983_v0 = vpack.c.bf16 %v4848_v45, %v4845_v49  ;;  %v4428_v10 = vadd.f32 %v4427_v28, %v4296_v31  ;;  %v4794_v17 = vadd.f32 %v17905_v11, %v4720_v13  ;;  %v4721_v29 = vadd.f32 %v4426_v33, %v17766_v47 }
 0x375   :  { %v4429_v36 = vpop.f32.mrf.mxu1  ;;  %v4849_v40 = vmax.f32 %v4792_v24, 0.0  ;;  %v3293_v49 = vadd.f32 %v17771_v34, %v20568_v25 }
 0x376   :  { %v4308_v14 = vpop.f32.mrf.mxu0  ;;  %v4723_v20 = vadd.f32 %v4428_v10, %v17769_v63  ;;  %v4430_v39 = vadd.f32 %v4429_v36, %v4298_v18  ;;  %v4851_v19 = vmax.f32 %v4794_v17, 0.0  ;;  %v4795_v2 = vadd.f32 %v17915_v15, %v4721_v29 }
 0x377   :  { %v4433_v7 = vpop.f32.mrf.mxu1  ;;  %v17988_v44 = vpack.c.bf16 %v4849_v40, %v4846_v37  ;;  %v3424_v33 = vadd.f32 %v17792_v48, %v3293_v49 }
 0x378   :  { %v4312_v1 = vpop.f32.mrf.mxu0  ;;  %v4797_v55 = vadd.f32 %v17905_v11, %v4723_v20  ;;  %v4724_v23 = vadd.f32 %v4430_v39, %v17773_v57  ;;  %v4434_v31 = vadd.f32 %v4433_v7, %v4302_v9  ;;  %v4852_v54 = vmax.f32 %v4795_v2, 0.0 }
 0x379   :  { %v4435_v43 = vpop.f32.mrf.mxu1 }
 0x37a   :  { %v4314_v47 = vpop.f32.mrf.mxu0  ;;  %v4854_v8 = vmax.f32 %v4797_v55, 0.0  ;;  %v4798_v50 = vadd.f32 %v17915_v15, %v4724_v23  ;;  %v4726_v63 = vadd.f32 %v4434_v31, %v17779_v51  ;;  %v4436_v18 = vadd.f32 %v4435_v43, %v4304_v62  ;;  %v20569_v55 = vld [vmem:[#allocation285_spill] sm:$0xff] }
 0x37b   :  { %v4437_v27 = vpop.f32.mrf.mxu1 }
 0x37c   :  { %v4316_v60 = vpop.f32.mrf.mxu0  ;;  %v17997_v5 = vpack.c.bf16 %v4854_v8, %v4851_v19  ;;  %v4727_v57 = vadd.f32 %v4436_v18, %v17785_v56  ;;  %v4438_v9 = vadd.f32 %v4437_v27, %v4306_v35  ;;  %v4855_v13 = vmax.f32 %v4798_v50, 0.0 }
 0x37d   :  { %v4439_v45 = vpop.f32.mrf.mxu1  ;;  %v4800_v28 = vadd.f32 %v17905_v11, %v4726_v63 }
 0x37e   :  { %v4318_v24 = vpop.f32.mrf.mxu0  ;;  %v4729_v51 = vadd.f32 %v4438_v9, %v17788_v41  ;;  %v4440_v62 = vadd.f32 %v4439_v45, %v4308_v14  ;;  %v18003_v17 = vpack.c.bf16 %v4855_v13, %v4852_v54  ;;  %v4801_v34 = vadd.f32 %v17915_v15, %v4727_v57 }
 0x37f   :  { %v4443_v10 = vpop.f32.mrf.mxu1  ;;  %v4857_v20 = vmax.f32 %v4800_v28, 0.0  ;;  %v3303_v41 = vadd.f32 %v17790_v32, %v20569_v55 }
 0x380   :  { %v4322_v37 = vpop.f32.mrf.mxu0  ;;  %v4803_v56 = vadd.f32 %v17905_v11, %v4729_v51  ;;  %v4730_v35 = vadd.f32 %v4440_v62, %v3424_v33  ;;  %v4444_v29 = vadd.f32 %v4443_v10, %v4312_v1  ;;  %v4858_v19 = vmax.f32 %v4801_v34, 0.0 }
 0x381   :  { %v4445_v36 = vpop.f32.mrf.mxu1  ;;  %v3434_v18 = vadd.f32 %v17808_v53, %v3303_v41 }
 0x382   :  { %v4324_v40 = vpop.f32.mrf.mxu0  ;;  %v4860_v39 = vmax.f32 %v4803_v56, 0.0  ;;  %v4804_v48 = vadd.f32 %v17915_v15, %v4730_v35  ;;  %v4446_v7 = vadd.f32 %v4445_v36, %v4314_v47  ;;  %v4732_v14 = vadd.f32 %v4444_v29, %v17798_v3 }
 0x383   :  { %v4447_v23 = vpop.f32.mrf.mxu1  ;;  %v18032_v36 = vsub.s32 2, %v17892_v52 }
 0x384   :  { %v4326_v31 = vpop.f32.mrf.mxu0  ;;  %v18011_v2 = vpack.c.bf16 %v4860_v39, %v4857_v20  ;;  %v4861_v43 = vmax.f32 %v4804_v48, 0.0  ;;  %v4733_v1 = vadd.f32 %v4446_v7, %v17804_v21  ;;  %v4448_v8 = vadd.f32 %v4447_v23, %v4316_v60 }
 0x385   :  { %v4449_v50 = vpop.f32.mrf.mxu1  ;;  %v4806_v32 = vadd.f32 %v17905_v11, %v4732_v14  ;;  %20570 = vst [vmem:[#allocation286_spill] sm:$0xff] %v18032_v36 }
 0x386   :  { %v4327_v63 = vpop.f32.mrf.mxu0  ;;  %v4450_v27 = vadd.f32 %v4449_v50, %v4318_v24  ;;  %v18015_v47 = vpack.c.bf16 %v4861_v43, %v4858_v19  ;;  %v4735_v3 = vadd.f32 %v4448_v8, %v17806_v4  ;;  %v4807_v57 = vadd.f32 %v17915_v15, %v4733_v1 }
 0x387   :  { %v4453_v25 = vpop.f32.mrf.mxu1  ;;  %v4863_v24 = vmax.f32 %v4806_v32, 0.0  ;;  %v18039_v43 = vrot.slane %v17901_v6, %v18032_v36  ;;  %v20571_v63 = vld [vmem:[#allocation298_spill] sm:$0xff]  ;;  %v20573_v32 = vld [vmem:[#allocation300_spill] sm:$0xff] }
 0x388   :  { %v14312_v49 = vpop.f32.mrf.mxu0  ;;  %v4736_v9 = vadd.f32 %v4450_v27, %v3434_v18  ;;  %4983 = vmatprep.subr.bf16.mxu1 %v18015_v47  ;;  %v4809_v21 = vadd.f32 %v17905_v11, %v4735_v3  ;;  %v4864_v28 = vmax.f32 %v4807_v57, 0.0  ;;  %v4454_v55 = vadd.f32 %v4453_v25, %v4322_v37  ;;  %v20572_v18 = vld [vmem:[#allocation299_spill] sm:$0xff]  ;;  %v20574_v25 = vld [vmem:[#allocation296_spill] sm:$0xff] }
 0x389   :  { %v4455_v60 = vpop.f32.mrf.mxu1  ;;  %4984 = vmatpush1.bf16.msra.mxu1 %v18011_v2  ;;  %v3594_v27 = vadd.f32 %v20572_v18, %v20571_v63 }
 0x38a   :  { %v14313_v53 = vpop.f32.mrf.mxu0  ;;  %v4810_v54 = vadd.f32 %v17915_v15, %v4736_v9  ;;  %4985 = vmatprep.subr.bf16.mxu1 %v18003_v17  ;;  %v4866_v4 = vmax.f32 %v4809_v21, 0.0  ;;  %v4456_v41 = vadd.f32 %v4455_v60, %v4324_v40 }
 0x38b   :  { %v14314_v45 = vadd.f32 %v14313_v53, %v14312_v49  ;;  %v4457_v13 = vpop.f32.mrf.mxu1  ;;  %v20575_v49 = vld [vmem:[#allocation297_spill] sm:$0xff] }
 0x38c   :  { %v14315_v33 = vpop.f32.mrf.mxu0  ;;  %v4867_v51 = vmax.f32 %v4810_v54, 0.0  ;;  %v18025_v62 = vpack.c.bf16 %v4866_v4, %v4863_v24  ;;  %v4739_v57 = vadd.f32 %v4456_v41, %v20575_v49  ;;  %v20576_v13 = vld [vmem:[#allocation301_spill] sm:$0xff] }
 0x38d   :  { %v4458_v10 = vpop.f32.mrf.mxu1  ;;  %4986 = vmatpush1.bf16.msra.mxu1 %v17997_v5 }
 0x38e   :  { %v14316_v34 = vpop.f32.mrf.mxu0  ;;  %4987 = vmatprep.subr.bf16.mxu1 %v17988_v44  ;;  %v18029_v56 = vpack.c.bf16 %v4867_v51, %v4864_v28  ;;  %v4813_v10 = vadd.f32 %v17915_v15, %v4739_v57  ;;  %v20578_v15 = vld [vmem:[#allocation304_spill] sm:$0xff] }
 0x38f   :  { %v14517_v35 = vpop.f32.mrf.mxu1  ;;  %v14317_v31 = vadd.f32 %v14316_v34, %v14315_v33 }
 0x390   :  { %v14318_v29 = vpop.f32.mrf.mxu0 }
 0x391   :  { %v4606_v20 = vpop.f32.mrf.mxu1  ;;  %4988 = vmatpush1.bf16.msra.mxu1 %v17983_v0 }
 0x392   :  { %v14319_v39 = vpop.f32.mrf.mxu0  ;;  %v4607_v48 = vadd.f32 %v14314_v45, %v4606_v20  ;;  %4989 = vmatprep.subr.bf16.mxu1 %v17976_v16 }
 0x393   :  { %v14320_v7 = vadd.f32 %v14319_v39, %v14318_v29  ;;  %v14518_v14 = vpop.f32.mrf.mxu1 }
 0x394   :  { %v14321_v23 = vpop.f32.mrf.mxu0  ;;  %v4686_v19 = vadd.f32 %v4607_v48, %v17824_v38  ;;  %v4738_v38 = vadd.f32 %v4454_v55, %v20574_v25 }
 0x395   :  { %v4615_v1 = vadd.f32 %v14517_v35, %v14320_v7  ;;  %v4609_v8 = vpop.f32.mrf.mxu1  ;;  %4990 = vmatpush1.bf16.msra.mxu1 %v17971_v46 }
 0x396   :  { %v14322_v50 = vpop.f32.mrf.mxu0  ;;  %v4610_v40 = vadd.f32 %v14317_v31, %v4609_v8  ;;  %4991 = vmatprep.subr.bf16.mxu1 %v17964_v22  ;;  %v4760_v21 = vadd.f32 %v18039_v43, %v4686_v19  ;;  %v4812_v51 = vadd.f32 %v17905_v11, %v4738_v38  ;;  %v20577_v31 = vld [vmem:[#allocation303_spill] sm:$0xff] }
 0x397   :  { %v4692_v37 = vadd.f32 %v4615_v1, %v20573_v32  ;;  %v14323_v3 = vadd.f32 %v14322_v50, %v14321_v23  ;;  %v14521_v9 = vpop.f32.mrf.mxu1  ;;  %v20579_v1 = vld [vmem:[#allocation302_spill] sm:$0xff] }
 0x398   :  { %v14324_v6 = vpop.f32.mrf.mxu0  ;;  %v4689_v60 = vadd.f32 %v4610_v40, %v3594_v27  ;;  %v4817_v29 = vmax.f32 %v4760_v21, 0.0  ;;  %v3610_v8 = vadd.f32 %v20579_v1, %v20578_v15  ;;  %v4869_v18 = vmax.f32 %v4812_v51, 0.0  ;;  %v18095_v15 = vld [vmem:[%s20540_s0] ss:$8 sps:$4 sm:$0xff]  }
 0x399   :  { %v4618_v53 = vadd.f32 %v14518_v14, %v14323_v3  ;;  %v4766_v54 = vadd.f32 %v18039_v43, %v4692_v37  ;;  %4992 = vmatpush1.bf16.msra.mxu1 %v17959_v61  ;;  %v4622_v24 = vpop.f32.mrf.mxu1  ;;  %v4870_v27 = vmax.f32 %v4813_v10, 0.0 }
 0x39a   :  { %v14325_v45 = vpop.f32.mrf.mxu0  ;;  %v4763_v4 = vadd.f32 %v18039_v43, %v4689_v60  ;;  %4993 = vmatprep.subr.bf16.mxu1 %v17952_v12 }
 0x39b   :  { %v4695_v33 = vadd.f32 %v4618_v53, %v20576_v13  ;;  %v14326_v28 = vadd.f32 %v14325_v45, %v14324_v6  ;;  %v14522_v35 = vpop.f32.mrf.mxu1  ;;  %v4823_v7 = vmax.f32 %v4766_v54, 0.0  ;;  %v18073_v21 = vpack.c.bf16 %v4870_v27, %v4870_v27 }
 0x39c   :  { %v14327_v34 = vpop.f32.mrf.mxu0  ;;  %v4820_v20 = vmax.f32 %v4763_v4, 0.0  ;;  %v4899_v54 = vpack.c.bf16 %v4869_v18, %v4869_v18 }
 0x39d   :  { %v4769_v39 = vadd.f32 %v18039_v43, %v4695_v33  ;;  %v4623_v48 = vadd.f32 %v14326_v28, %v4622_v24  ;;  %4994 = vmatpush1.bf16.msra.mxu1 %v17947_v59  ;;  %v4625_v41 = vpop.f32.mrf.mxu1  ;;  %v20580_v33 = vld [vmem:[#allocation306_spill] sm:$0xff] }
 0x39e   :  { %v14328_v55 = vpop.f32.mrf.mxu0  ;;  %v18058_v14 = vpack.c.bf16 %v4820_v20, %v4817_v29  ;;  %4995 = vmatprep.subr.bf16.mxu1 %v17940_v30  ;;  %v18085_v20 = vsel %vm4973_vm5, %v4899_v54, 0 }
 0x39f   :  { %v4826_v23 = vmax.f32 %v4769_v39, 0.0  ;;  %v4698_v19 = vadd.f32 %v4623_v48, %v20577_v31  ;;  %v14329_v11 = vadd.f32 %v14328_v55, %v14327_v34  ;;  %v18064_v63 = vpop.f32.mrf.mxu1  ;;  %v20581_v55 = vld [vmem:[#allocation307_spill] sm:$0xff] }
 0x3a0   :  { %v14330_v50 = vpop.f32.mrf.mxu0 }
 0x3a1   :  { %v4626_v32 = vadd.f32 %v14329_v11, %v4625_v41  ;;  %v18066_v37 = vpack.c.bf16 %v4826_v23, %v4823_v7  ;;  %4996 = vmatpush1.bf16.msra.mxu1 %v17935_v42  ;;  %v4638_v3 = vpop.f32.mrf.mxu1  ;;  %v4772_v25 = vadd.f32 %v18039_v43, %v4698_v19 }
 0x3a2   :  { %v14331_v40 = vpop.f32.mrf.mxu0  ;;  %4997 = vmatprep.subr.bf16.mxu1 %v17928_v26 }
 0x3a3   :  { %v4701_v38 = vadd.f32 %v4626_v32, %v3610_v8  ;;  %v14332_v49 = vadd.f32 %v14331_v40, %v14330_v50  ;;  %v18071_v6 = vpop.f32.mrf.mxu1  ;;  %v4829_v4 = vmax.f32 %v4772_v25, 0.0  ;;  %v18099_v8 = vld [vmem:[%s20540_s0 + $0x14] ss:$8 sps:$4 sm:$0xff]   ;;  %v20582_v32 = vld [vmem:[#allocation284_spill] sm:$0xff] }
 0x3a4   :  { %v14333_v57 = vpop.f32.mrf.mxu0 }
 0x3a5   :  { %v4775_v60 = vadd.f32 %v18039_v43, %v4701_v38  ;;  %v4631_v53 = vadd.f32 %v14521_v9, %v14332_v49  ;;  %4998 = vmatpush1.bf16.msra.mxu1 %v17923_v58  ;;  %v4641_v24 = vpop.f32.mrf.mxu1 }
 0x3a6   :  { %v14334_v45 = vpop.f32.mrf.mxu0  ;;  %13425 = vmatprep.subr.msk.bf16.mxu1 %vm4973_vm5, %v18073_v21 }
 0x3a7   :  { %v4832_v13 = vmax.f32 %v4775_v60, 0.0  ;;  %v4704_v28 = vadd.f32 %v4631_v53, %v20580_v33  ;;  %v14335_v51 = vadd.f32 %v14334_v45, %v14333_v57  ;;  %v18080_v34 = vpop.f32.mrf.mxu1  ;;  %v20583_v57 = vld [vmem:[#allocation281_spill] sm:$0xff] }
 0x3a8   :  { %v14336_v10 = vpop.f32.mrf.mxu0 }
 0x3a9   :  { %v18082_v29 = vpack.c.bf16 %v4832_v13, %v4829_v4  ;;  %v4634_v9 = vadd.f32 %v14522_v35, %v14335_v51  ;;  %5012 = vmatpush2.bf16.msra.mxu1 %v18085_v20  ;;  %v4654_v48 = vpop.f32.mrf.mxu1  ;;  %v4778_v7 = vadd.f32 %v18039_v43, %v4704_v28 }
 0x3aa   :  { %v14337_v39 = vpop.f32.mrf.mxu0  ;;  %5013 = vmatprep.subr.bf16.mxu1 %v18029_v56 }
 0x3ab   :  { %v4707_v41 = vadd.f32 %v4634_v9, %v20581_v55  ;;  %v14338_v23 = vadd.f32 %v14337_v39, %v14336_v10  ;;  %v18091_v19 = vpop.f32.mrf.mxu1  ;;  %v4835_v18 = vmax.f32 %v4778_v7, 0.0  ;;  %v18120_v9 = vld [vmem:[%s20540_s0 + $0x10] ss:$8 sps:$4 sm:$0xff]   ;;  %v18124_v39 = vld [vmem:[%s20540_s0 + $0x24] ss:$8 sps:$4 sm:$0xff]  }
 0x3ac   :  { %v14339_v31 = vpop.f32.mrf.mxu0 }
 0x3ad   :  { %v4781_v35 = vadd.f32 %v18039_v43, %v4707_v41  ;;  %v4639_v11 = vadd.f32 %v14338_v23, %v4638_v3  ;;  %5014 = vmatpush2.bf16.msra.mxu1 %v18025_v62  ;;  %v4657_v50 = vpop.f32.mrf.mxu1  ;;  %v20584_v3 = vld [vmem:[#allocation305_spill] sm:$0xff] }
 0x3ae   :  { %v14340_v1 = vpop.f32.mrf.mxu0  ;;  %5209 = vmatprep.subr.bf16.mxu1 %v18015_v47  ;;  %v3626_v60 = vadd.f32 %v20584_v3, %v20583_v57  ;;  %v20585_v41 = vld [vmem:[#allocation309_spill] sm:$0xff] }
 0x3af   :  { %v4838_v27 = vmax.f32 %v4781_v35, 0.0  ;;  %v4710_v40 = vadd.f32 %v4639_v11, %v20582_v32  ;;  %v14341_v25 = vadd.f32 %v14340_v1, %v14339_v31  ;;  %v18103_v49 = vpop.f32.mrf.mxu1  ;;  %v20586_v1 = vld [vmem:[#allocation311_spill] sm:$0xff]  ;;  %v20587_v3 = vld [vmem:[#allocation313_spill] sm:$0xff] }
 0x3b0   :  { %v14342_v38 = vpop.f32.mrf.mxu0  ;;  %5016 = vmatmul.mubr.bf16.vlgmr.msra.gmra.mxu1 %v18095_v15 }
 0x3b1   :  { %v4642_v53 = vadd.f32 %v14341_v25, %v4641_v24  ;;  %v18108_v54 = vpack.c.bf16 %v4838_v27, %v4835_v18  ;;  %5210 = vmatpush1.bf16.msra.mxu1 %v18011_v2  ;;  %13427 = vmatprep.mubr.msk.bf16.mxu1 %vm4957_vm4, %v18099_v8  ;;  %v18113_v47 = vpop.f32.mrf.mxu1  ;;  %v4784_v4 = vadd.f32 %v18039_v43, %v4710_v40  ;;  %v18144_v25 = vld [vmem:[%s20540_s0 + $0x34] ss:$8 sps:$4 sm:$0xff]  }
 0x3b2   :  { %v14343_v45 = vpop.f32.mrf.mxu0  ;;  %5211 = vmatprep.subr.bf16.mxu1 %v18003_v17 }
 0x3b3   :  { %v4713_v13 = vadd.f32 %v4642_v53, %v3626_v60  ;;  %v14344_v33 = vadd.f32 %v14343_v45, %v14342_v38  ;;  %v14534_v51 = vpop.f32.mrf.mxu1  ;;  %v4841_v7 = vmax.f32 %v4784_v4, 0.0  ;;  %v20588_v45 = vld [vmem:[#allocation310_spill] sm:$0xff]  ;;  %v20589_v4 = vld [vmem:[#allocation283_spill] sm:$0xff] }
 0x3b4   :  { %v14345_v28 = vpop.f32.mrf.mxu0 }
 0x3b5   :  { %v4787_v24 = vadd.f32 %v18039_v43, %v4713_v13  ;;  %v4647_v10 = vadd.f32 %v18064_v63, %v14344_v33  ;;  %5212 = vmatpush1.bf16.msra.mxu1 %v17997_v5  ;;  %v3642_v13 = vadd.f32 %v20589_v4, %v20588_v45 }
 0x3b6   :  { %v14346_v2 = vpop.f32.mrf.mxu0  ;;  %5213 = vmatprep.subr.bf16.mxu1 %v17988_v44 }
 0x3b7   :  { %v4844_v55 = vmax.f32 %v4787_v24, 0.0  ;;  %v4716_v23 = vadd.f32 %v4647_v10, %v20585_v41  ;;  %v14347_v17 = vadd.f32 %v14346_v2, %v14345_v28 }
 0x3b8   :  { %v14348_v31 = vpop.f32.mrf.mxu0  ;;  %5026 = vmatmul.mubr.bf16.gmra.mxu1 %v18120_v9 }
 0x3b9   :  { %v18128_v35 = vpack.c.bf16 %v4844_v55, %v4841_v7  ;;  %v4650_v63 = vadd.f32 %v18071_v6, %v14347_v17  ;;  %5214 = vmatpush1.bf16.msra.mxu1 %v17983_v0  ;;  %13428 = vmatprep.mubr.msk.bf16.mxu1 %vm4957_vm4, %v18124_v39  ;;  %v4790_v11 = vadd.f32 %v18039_v43, %v4716_v23  ;;  %v18140_v6 = vld [vmem:[%s20540_s0 + $0x20] ss:$8 sps:$4 sm:$0xff]   ;;  %v18165_v7 = vld [vmem:[%s20540_s0 + $0x44] ss:$8 sps:$4 sm:$0x3f]  }
 0x3ba   :  { %v14349_v5 = vpop.f32.mrf.mxu0  ;;  %5215 = vmatprep.subr.bf16.mxu1 %v17976_v16  ;;  %v20590_v23 = vld [vmem:[#allocation312_spill] sm:$0xff] }
 0x3bb   :  { %v4719_v44 = vadd.f32 %v4650_v63, %v20586_v1  ;;  %v14350_v18 = vadd.f32 %v14349_v5, %v14348_v31  ;;  %v4847_v38 = vmax.f32 %v4790_v11, 0.0  ;;  %v20592_v11 = vld [vmem:[#allocation315_spill] sm:$0xff] }
 0x3bc   :  { %v14351_v27 = vpop.f32.mrf.mxu0 }
 0x3bd   :  { %v4793_v32 = vadd.f32 %v18039_v43, %v4719_v44  ;;  %v4655_v40 = vadd.f32 %v14350_v18, %v4654_v48  ;;  %5216 = vmatpush1.bf16.msra.mxu1 %v17971_v46 }
 0x3be   :  { %v14352_v0 = vpop.f32.mrf.mxu0  ;;  %5217 = vmatprep.subr.bf16.mxu1 %v17964_v22 }
 0x3bf   :  { %v4850_v57 = vmax.f32 %v4793_v32, 0.0  ;;  %v4722_v60 = vadd.f32 %v4655_v40, %v20587_v3  ;;  %v14353_v53 = vadd.f32 %v14352_v0, %v14351_v27  ;;  %v18182_v27 = vld [vmem:[%s20540_s0 + $0x40] ss:$8 sps:$4 sm:$0x3f]   ;;  %v4673_v32 = vpop.f32.mrf.mxu1  ;;  %v18186_v40 = vld [vmem:[%s20591_s9 + $0x4] ss:$8 sps:$4 sm:$0xff]  }
 0x3c0   :  { %v14354_v16 = vpop.f32.mrf.mxu0  ;;  %5036 = vmatmul.mubr.bf16.gmra.mxu1 %v18140_v6 }
 0x3c1   :  { %v4658_v48 = vadd.f32 %v14353_v53, %v4657_v50  ;;  %v18151_v46 = vpack.c.bf16 %v4850_v57, %v4847_v38  ;;  %5218 = vmatpush1.bf16.msra.mxu1 %v17959_v61  ;;  %13429 = vmatprep.mubr.msk.bf16.mxu1 %vm4957_vm4, %v18144_v25  ;;  %v4796_v22 = vadd.f32 %v18039_v43, %v4722_v60  ;;  %v18161_v50 = vld [vmem:[%s20540_s0 + $0x30] ss:$8 sps:$4 sm:$0xff]  }
 0x3c2   :  { %v14355_v33 = vpop.f32.mrf.mxu0  ;;  %5219 = vmatprep.subr.bf16.mxu1 %v17952_v12  ;;  %v20593_v57 = vld [vmem:[#allocation314_spill] sm:$0xff]  ;;  %v20596_v53 = vld [vmem:[#allocation317_spill] sm:$0xff] }
 0x3c3   :  { %v4725_v28 = vadd.f32 %v4658_v48, %v3642_v13  ;;  %v14356_v51 = vadd.f32 %v14355_v33, %v14354_v16  ;;  %v4853_v55 = vmax.f32 %v4796_v22, 0.0  ;;  %v15015_v48 = vld [vmem:[%s20594_s17 + $0x74] ss:$8 sps:$4 sm:$0xff]   ;;  %v20597_v33 = vmov 0  }
 0x3c4   :  { %v14357_v24 = vpop.f32.mrf.mxu0 }
 0x3c5   :  { %v4799_v10 = vadd.f32 %v18039_v43, %v4725_v28  ;;  %v4663_v2 = vadd.f32 %v18080_v34, %v14356_v51  ;;  %5220 = vmatpush1.bf16.msra.mxu1 %v17947_v59  ;;  %v18206_v51 = vld [vmem:[%s20591_s9] ss:$8 sps:$4 sm:$0xff]  }
 0x3c6   :  { %v14358_v61 = vpop.f32.mrf.mxu0  ;;  %5221 = vmatprep.subr.bf16.mxu1 %v17940_v30 }
 0x3c7   :  { %v4856_v41 = vmax.f32 %v4799_v10, 0.0  ;;  %v4728_v17 = vadd.f32 %v4663_v2, %v20590_v23  ;;  %v14359_v12 = vadd.f32 %v14358_v61, %v14357_v24  ;;  %v15013_v10 = vld [vmem:[%s20594_s17 + $0x70] ss:$8 sps:$4 sm:$0xff]   ;;  %v15018_v61 = vld [vmem:[%s20594_s17 + $0x64] ss:$8 sps:$4 sm:$0xff]  }
 0x3c8   :  { %v14360_v31 = vpop.f32.mrf.mxu0  ;;  %5046 = vmatmul.mubr.bf16.gmra.mxu1 %v18161_v50  ;;  %v15021_v23 = vld [vmem:[%s20594_s17 + $0x54] ss:$8 sps:$4 sm:$0xff]  }
 0x3c9   :  { %v18169_v63 = vpack.c.bf16 %v4856_v41, %v4853_v55  ;;  %v4666_v34 = vadd.f32 %v18091_v19, %v14359_v12  ;;  %5222 = vmatpush1.bf16.msra.mxu1 %v17935_v42  ;;  %13430 = vmatprep.mubr.msk.bf16.mxu1 %vm4957_vm4, %v18165_v7  ;;  %v4802_v5 = vadd.f32 %v18039_v43, %v4728_v17  ;;  %v15016_v41 = vld [vmem:[%s20594_s17 + $0x60] ss:$8 sps:$4 sm:$0xff]   ;;  %v18226_v17 = vld [vmem:[%s20591_s9 + $0x10] ss:$8 sps:$4 sm:$0xff]  }
 0x3ca   :  { %v14361_v59 = vpop.f32.mrf.mxu0  ;;  %5223 = vmatprep.subr.bf16.mxu1 %v17928_v26 }
 0x3cb   :  { %v4731_v30 = vadd.f32 %v4666_v34, %v20592_v11  ;;  %v14362_v1 = vadd.f32 %v14361_v59, %v14360_v31  ;;  %v4859_v0 = vmax.f32 %v4802_v5, 0.0  ;;  %v18230_v31 = vld [vmem:[%s20591_s9 + $0x24] ss:$8 sps:$4 sm:$0xff]   ;;  %v15019_v34 = vld [vmem:[%s20594_s17 + $0x50] ss:$8 sps:$4 sm:$0xff]  }
 0x3cc   :  { %v14363_v44 = vpop.f32.mrf.mxu0  ;;  %v15024_v59 = vld [vmem:[%s20594_s17 + $0x44] ss:$8 sps:$4 sm:$0xff]   ;;  %v20598_v5 = vld [vmem:[#allocation318_spill] sm:$0xff] }
 0x3cd   :  { %v4805_v18 = vadd.f32 %v18039_v43, %v4731_v30  ;;  %v4671_v19 = vadd.f32 %v14362_v1, %v18113_v47  ;;  %5224 = vmatpush1.bf16.msra.mxu1 %v17923_v58  ;;  %v20595_v47 = vld [vmem:[#allocation316_spill] sm:$0xff] }
 0x3ce   :  { %v14364_v42 = vpop.f32.mrf.mxu0  ;;  %13446 = vmatprep.subr.msk.bf16.mxu1 %vm4973_vm5, %v18073_v21  ;;  %v3658_v58 = vadd.f32 %v20596_v53, %v20595_v47  ;;  %v18244_v30 = vld [vmem:[%s20591_s9 + $0x20] ss:$8 sps:$4 sm:$0xff]   ;;  %v15033_v47 = vld [vmem:[%s20594_s17 + $0x14] ss:$8 sps:$4 sm:$0xff]  }
 0x3cf   :  { %v4862_v38 = vmax.f32 %v4805_v18, 0.0  ;;  %v4734_v3 = vadd.f32 %v4671_v19, %v20593_v57  ;;  %v14365_v26 = vadd.f32 %v14364_v42, %v14363_v44  ;;  %v18248_v44 = vld [vmem:[%s20591_s9 + $0x34] ss:$8 sps:$4 sm:$0xff]   ;;  %v18261_v42 = vld [vmem:[%s20591_s9 + $0x44] ss:$8 sps:$4 sm:$0x3f]  }
 0x3d0   :  { %v14366_v60 = vpop.f32.mrf.mxu0  ;;  %5056 = vmatmul.mubr.bf16.gmra.mxu1 %v18182_v27  ;;  %v18276_v57 = vld [vmem:[%s20591_s9 + $0x40] ss:$8 sps:$4 sm:$0x3f]  }
 0x3d1   :  { %v4674_v16 = vadd.f32 %v14365_v26, %v4673_v32  ;;  %v18194_v45 = vpack.c.bf16 %v4862_v38, %v4859_v0  ;;  %5238 = vmatpush2.bf16.msra.mxu1 %v18085_v20  ;;  %13447 = vmatprep.mubr.msk.bf16.mxu1 %vm4957_vm4, %v18186_v40  ;;  %v4808_v21 = vadd.f32 %v18039_v43, %v4734_v3  ;;  %v18210_v20 = vld [vmem:[%s20591_s9 + $0x14] ss:$8 sps:$4 sm:$0xff]   ;;  %v15025_v0 = vld [vmem:[%s20594_s17 + $0x30] ss:$8 sps:$4 sm:$0xff]   ;;  %v15028_v3 = vld [vmem:[%s20594_s17 + $0x20] ss:$8 sps:$4 sm:$0xff]  }
 0x3d2   :  { %v14367_v4 = vpop.f32.mrf.mxu0  ;;  %5239 = vmatprep.subr.bf16.mxu1 %v18029_v56  ;;  %v15027_v38 = vld [vmem:[%s20594_s17 + $0x34] ss:$8 sps:$4 sm:$0xff]   ;;  %v15030_v26 = vld [vmem:[%s20594_s17 + $0x24] ss:$8 sps:$4 sm:$0xff]   ;;  %v15034_v53 = vld [vmem:[%s20594_s17] ss:$8 sps:$4 sm:$0xff]  }
 0x3d3   :  { %v4737_v13 = vadd.f32 %v4674_v16, %v3658_v58  ;;  %5067 = vmatpush1.bf16.msra.mxu0 %v18194_v45  ;;  %v4865_v2 = vmax.f32 %v4808_v21, 0.0  ;;  %v15039_v58 = vld [vmem:[%s20594_s17 + $0xf4] ss:$8 sps:$4 sm:$0xff]   ;;  %v15058_v16 = vld [vmem:[%s20594_s17 + $0x80] ss:$8 sps:$4 sm:$0xff]  }
 0x3d4   :  { %5068 = vmatprep.subr.bf16.mxu0 %v20597_v33  ;;  %v14369_v22 = vpop.f32.mrf.mxu0  ;;  %v15112_v21 = vld [vmem:[%s20594_s17 + $0x100] ss:$8 sps:$4 sm:$0xff]  }
 0x3d5   :  { %v4811_v28 = vadd.f32 %v18039_v43, %v4737_v13  ;;  %5240 = vmatpush2.bf16.msra.mxu1 %v18025_v62  ;;  %v14368_v62 = vadd.f32 %v14367_v4, %v14366_v60  ;;  %v15031_v60 = vld [vmem:[%s20594_s17 + $0x10] ss:$8 sps:$4 sm:$0xff]   ;;  %v15114_v4 = vld [vmem:[%s20594_s17 + $0x104] ss:$8 sps:$4 sm:$0xff]  }
 0x3d6   :  { %v14370_v24 = vpop.f32.mrf.mxu0  ;;  %5642 = vmatprep.subr.bf16.mxu1 %v15015_v48 }
 0x3d7   :  { %v4868_v56 = vmax.f32 %v4811_v28, 0.0  ;;  %5069 = vmatpush1.bf16.msra.mxu0 %v18169_v63  ;;  %v4679_v12 = vadd.f32 %v18103_v49, %v14368_v62  ;;  %v15022_v49 = vld [vmem:[%s20594_s17 + $0x40] ss:$8 sps:$4 sm:$0xff]  }
 0x3d8   :  { %5070 = vmatprep.subr.bf16.mxu0 %v20597_v33  ;;  %5242 = vmatmul.mubr.bf16.vlgmr.msra.gmra.mxu1 %v18206_v51 }
 0x3d9   :  { %v18216_v55 = vpack.c.bf16 %v4868_v56, %v4865_v2  ;;  %13448 = vmatprep.mubr.msk.bf16.mxu1 %vm4957_vm4, %v18210_v20  ;;  %5643 = vmatpush1.bf16.msra.mxu1 %v15013_v10  ;;  %v4740_v11 = vadd.f32 %v4679_v12, %v20598_v5 }
 0x3da   :  { %5644 = vmatprep.subr.bf16.mxu1 %v15018_v61 }
 0x3db   :  { %5071 = vmatpush1.bf16.msra.mxu0 %v18151_v46  ;;  %v4814_v1 = vadd.f32 %v18039_v43, %v4740_v11  ;;  %v18258_v43 = vld [vmem:[%s20591_s9 + $0x30] ss:$8 sps:$4 sm:$0xff]  }
 0x3dc   :  { %5072 = vmatprep.subr.bf16.mxu0 %v20597_v33 }
 0x3dd   :  { %5645 = vmatpush1.bf16.msra.mxu1 %v15016_v41  ;;  %v4871_v18 = vmax.f32 %v4814_v1, 0.0 }
 0x3de   :  { %5646 = vmatprep.subr.bf16.mxu1 %v15021_v23  ;;  %v15117_v23 = vld [vmem:[%s20599_s21 + $0x114] ss:$8 sps:$4 sm:$0xff]  }
 0x3df   :  { %5073 = vmatpush1.bf16.msra.mxu0 %v18128_v35  ;;  %v4901_v19 = vpack.c.bf16 %v4871_v18, %v4871_v18 }
 0x3e0   :  { %5074 = vmatprep.subr.bf16.mxu0 %v20597_v33  ;;  %5252 = vmatmul.mubr.bf16.gmra.mxu1 %v18226_v17 }
 0x3e1   :  { %13449 = vmatprep.mubr.msk.bf16.mxu1 %vm4957_vm4, %v18230_v31  ;;  %5647 = vmatpush1.bf16.msra.mxu1 %v15019_v34  ;;  %v18267_v32 = vsel %vm4973_vm5, %v4901_v19, 0 }
 0x3e2   :  { %5648 = vmatprep.subr.bf16.mxu1 %v15024_v59 }
 0x3e3   :  { %5075 = vmatpush1.bf16.msra.mxu0 %v18108_v54 }
 0x3e4   :  { %5076 = vmatprep.subr.bf16.mxu0 %v20597_v33 }
 0x3e5   :  { %5649 = vmatpush1.bf16.msra.mxu1 %v15022_v49 }
 0x3e6   :  { %5650 = vmatprep.subr.bf16.mxu1 %v15027_v38  ;;  %v15061_v38 = vld [vmem:[%s20599_s21 + $0x70] ss:$8 sps:$4 sm:$0xff]  }
 0x3e7   :  { %5077 = vmatpush1.bf16.msra.mxu0 %v18082_v29 }
 0x3e8   :  { %5078 = vmatprep.subr.bf16.mxu0 %v20597_v33  ;;  %5262 = vmatmul.mubr.bf16.gmra.mxu1 %v18244_v30 }
 0x3e9   :  { %13450 = vmatprep.mubr.msk.bf16.mxu1 %vm4957_vm4, %v18248_v44  ;;  %5651 = vmatpush1.bf16.msra.mxu1 %v15025_v0 }
 0x3ea   :  { %5652 = vmatprep.subr.bf16.mxu1 %v15030_v26 }
 0x3eb   :  { %5079 = vmatpush1.bf16.msra.mxu0 %v18066_v37 }
 0x3ec   :  { %5080 = vmatprep.subr.bf16.mxu0 %v20597_v33 }
 0x3ed   :  { %5653 = vmatpush1.bf16.msra.mxu1 %v15028_v3 }
 0x3ee   :  { %5654 = vmatprep.subr.bf16.mxu1 %v15033_v47  ;;  %v15064_v47 = vld [vmem:[%s20599_s21 + $0x60] ss:$8 sps:$4 sm:$0xff]  }
 0x3ef   :  { %5081 = vmatpush1.bf16.msra.mxu0 %v18058_v14 }
 0x3f0   :  { %5094 = vmatprep.subr.bf16.mxu0 %v20597_v33  ;;  %5272 = vmatmul.mubr.bf16.gmra.mxu1 %v18258_v43 }
 0x3f1   :  { %13451 = vmatprep.mubr.msk.bf16.mxu1 %vm4957_vm4, %v18261_v42  ;;  %5655 = vmatpush1.bf16.msra.mxu1 %v15031_v60 }
 0x3f3   :  { %5095 = vmatpush2.bf16.msra.mxu0 %v18267_v32 }
 0x3f4   :  { %5096 = vmatprep.subr.bf16.mxu0 %v20597_v33 }
 0x3f7   :  { %5097 = vmatpush2.bf16.msra.mxu0 %v18216_v55 }
 0x3f8   :  { %5292 = vmatprep.subr.bf16.mxu0 %v20597_v33  ;;  %5282 = vmatmul.mubr.bf16.gmra.mxu1 %v18276_v57 }
 0x3fa   :  { %5099 = vmatmul.mubr.bf16.vlgmr.msra.gmra.mxu0 %v18095_v15  ;;  %v15036_v15 = vld [vmem:[%s20594_s17 + $0x4] ss:$8 sps:$4 sm:$0xff]  }
 0x3fb   :  { %5293 = vmatpush1.bf16.msra.mxu0 %v18194_v45  ;;  %13432 = vmatprep.mubr.msk.bf16.mxu0 %vm4957_vm4, %v18099_v8  ;;  %v15037_v8 = vld [vmem:[%s20594_s17 + $0xf0] ss:$8 sps:$4 sm:$0xff]  }
 0x3fc   :  { %5294 = vmatprep.subr.bf16.mxu0 %v20597_v33  ;;  %5656 = vmatprep.subr.bf16.mxu1 %v15036_v15  ;;  %v15109_v45 = vld [vmem:[%s20594_s17 + $0x110] ss:$8 sps:$4 sm:$0xff]  }
 0x3fd   :  { %5657 = vmatpush1.bf16.msra.mxu1 %v15034_v53 }
 0x3fe   :  { %5658 = vmatprep.subr.bf16.mxu1 %v15039_v58 }
 0x3ff   :  { %5295 = vmatpush1.bf16.msra.mxu0 %v18169_v63  ;;  %v15040_v63 = vld [vmem:[%s20594_s17 + $0xe0] ss:$8 sps:$4 sm:$0xff]  }
 0x400   :  { %5296 = vmatprep.subr.bf16.mxu0 %v20597_v33 }
 0x401   :  { %5659 = vmatpush2.bf16.msra.mxu1 %v15037_v8  ;;  %v15069_v8 = vld [vmem:[%s20599_s21 + $0x54] ss:$8 sps:$4 sm:$0xff]  }
 0x402   :  { %5107 = vmatmul.mubr.bf16.gmra.mxu0 %v18120_v9  ;;  %v15042_v9 = vld [vmem:[%s20594_s17 + $0xe4] ss:$8 sps:$4 sm:$0xff]  }
 0x403   :  { %5297 = vmatpush1.bf16.msra.mxu0 %v18151_v46  ;;  %13433 = vmatprep.mubr.msk.bf16.mxu0 %vm4957_vm4, %v18124_v39  ;;  %v15043_v39 = vld [vmem:[%s20594_s17 + $0xd0] ss:$8 sps:$4 sm:$0xff]   ;;  %v15045_v46 = vld [vmem:[%s20594_s17 + $0xd4] ss:$8 sps:$4 sm:$0xff]  }
 0x404   :  { %5298 = vmatprep.subr.bf16.mxu0 %v20597_v33  ;;  %5660 = vmatprep.subr.bf16.mxu1 %v15042_v9 }
 0x405   :  { %5661 = vmatpush2.bf16.msra.mxu1 %v15040_v63 }
 0x406   :  { %5662 = vmatprep.subr.bf16.mxu1 %v15045_v46  ;;  %v15067_v46 = vld [vmem:[%s20599_s21 + $0x50] ss:$8 sps:$4 sm:$0xff]  }
 0x407   :  { %5299 = vmatpush1.bf16.msra.mxu0 %v18128_v35  ;;  %v15046_v35 = vld [vmem:[%s20594_s17 + $0xc0] ss:$8 sps:$4 sm:$0xff]  }
 0x408   :  { %5300 = vmatprep.subr.bf16.mxu0 %v20597_v33 }
 0x409   :  { %5663 = vmatpush2.bf16.msra.mxu1 %v15043_v39 }
 0x40a   :  { %5115 = vmatmul.mubr.bf16.gmra.mxu0 %v18140_v6  ;;  %v15048_v6 = vld [vmem:[%s20594_s17 + $0xc4] ss:$8 sps:$4 sm:$0xff]  }
 0x40b   :  { %5301 = vmatpush1.bf16.msra.mxu0 %v18108_v54  ;;  %13434 = vmatprep.mubr.msk.bf16.mxu0 %vm4957_vm4, %v18144_v25  ;;  %v15049_v54 = vld [vmem:[%s20594_s17 + $0xb0] ss:$8 sps:$4 sm:$0xff]   ;;  %v15051_v25 = vld [vmem:[%s20594_s17 + $0xb4] ss:$8 sps:$4 sm:$0xff]  }
 0x40c   :  { %5302 = vmatprep.subr.bf16.mxu0 %v20597_v33  ;;  %5664 = vmatprep.subr.bf16.mxu1 %v15048_v6  ;;  %v15072_v6 = vld [vmem:[%s20599_s21 + $0x44] ss:$8 sps:$4 sm:$0xff]  }
 0x40d   :  { %5665 = vmatpush2.bf16.msra.mxu1 %v15046_v35 }
 0x40e   :  { %5666 = vmatprep.subr.bf16.mxu1 %v15051_v25 }
 0x40f   :  { %5303 = vmatpush1.bf16.msra.mxu0 %v18082_v29  ;;  %v15052_v29 = vld [vmem:[%s20594_s17 + $0xa0] ss:$8 sps:$4 sm:$0xff]  }
 0x410   :  { %5304 = vmatprep.subr.bf16.mxu0 %v20597_v33 }
 0x411   :  { %5667 = vmatpush2.bf16.msra.mxu1 %v15049_v54 }
 0x412   :  { %5123 = vmatmul.mubr.bf16.gmra.mxu0 %v18161_v50  ;;  %v15054_v50 = vld [vmem:[%s20594_s17 + $0xa4] ss:$8 sps:$4 sm:$0xff]  }
 0x413   :  { %5305 = vmatpush1.bf16.msra.mxu0 %v18066_v37  ;;  %13435 = vmatprep.mubr.msk.bf16.mxu0 %vm4957_vm4, %v18165_v7  ;;  %v15057_v37 = vld [vmem:[%s20594_s17 + $0x94] ss:$8 sps:$4 sm:$0xff]   ;;  %v15055_v7 = vld [vmem:[%s20594_s17 + $0x90] ss:$8 sps:$4 sm:$0xff]  }
 0x414   :  { %5306 = vmatprep.subr.bf16.mxu0 %v20597_v33  ;;  %5668 = vmatprep.subr.bf16.mxu1 %v15054_v50  ;;  %v15070_v50 = vld [vmem:[%s20599_s21 + $0x40] ss:$8 sps:$4 sm:$0xff]  }
 0x415   :  { %5669 = vmatpush2.bf16.msra.mxu1 %v15052_v29 }
 0x416   :  { %5670 = vmatprep.subr.bf16.mxu1 %v15057_v37 }
 0x417   :  { %5307 = vmatpush1.bf16.msra.mxu0 %v18058_v14  ;;  %v15060_v14 = vld [vmem:[%s20594_s17 + $0x84] ss:$8 sps:$4 sm:$0xff]  }
 0x418   :  { %5320 = vmatprep.subr.bf16.mxu0 %v20597_v33 }
 0x419   :  { %5671 = vmatpush2.bf16.msra.mxu1 %v15055_v7 }
 0x41a   :  { %5131 = vmatmul.mubr.bf16.gmra.mxu0 %v18182_v27  ;;  %5672 = vmatprep.subr.bf16.mxu1 %v15060_v14  ;;  %v15063_v27 = vld [vmem:[%s20599_s21 + $0x74] ss:$8 sps:$4 sm:$0xff]  }
 0x41b   :  { %5321 = vmatpush2.bf16.msra.mxu0 %v18267_v32  ;;  %13452 = vmatprep.mubr.msk.bf16.mxu0 %vm4957_vm4, %v18186_v40  ;;  %v15111_v40 = vld [vmem:[%s20594_s17 + $0x114] ss:$8 sps:$4 sm:$0xff]  }
 0x41c   :  { %5322 = vmatprep.subr.bf16.mxu0 %v20597_v33  ;;  %v15075_v14 = vld [vmem:[%s20599_s21 + $0x34] ss:$8 sps:$4 sm:$0xff]  }
 0x41d   :  { %5673 = vmatpush2.bf16.msra.mxu1 %v15058_v16 }
 0x41e   :  { %6024 = vmatprep.subr.bf16.mxu1 %v15063_v27 }
 0x41f   :  { %5323 = vmatpush2.bf16.msra.mxu0 %v18216_v55 }
 0x420   :  { %5737 = vmatprep.subr.bf16.mxu0 %v15111_v40 }
 0x422   :  { %5325 = vmatmul.mubr.bf16.vlgmr.msra.gmra.mxu0 %v18206_v51 }
 0x423   :  { %13453 = vmatprep.mubr.msk.bf16.mxu0 %vm4957_vm4, %v18210_v20  ;;  %5738 = vmatpush1.bf16.msra.mxu0 %v15109_v45 }
 0x424   :  { %5739 = vmatprep.subr.bf16.mxu0 %v15114_v4  ;;  %v15073_v4 = vld [vmem:[%s20599_s21 + $0x30] ss:$8 sps:$4 sm:$0xff]  }
 0x427   :  { %5740 = vmatpush1.bf16.msra.mxu0 %v15112_v21 }
 0x428   :  { %6119 = vmatprep.subr.bf16.mxu0 %v15117_v23 }
 0x42a   :  { %5333 = vmatmul.mubr.bf16.gmra.mxu0 %v18226_v17 }
 0x42b   :  { %13454 = vmatprep.mubr.msk.bf16.mxu0 %vm4957_vm4, %v18230_v31 }
 0x432   :  { %5341 = vmatmul.mubr.bf16.gmra.mxu0 %v18244_v30 }
 0x433   :  { %13455 = vmatprep.mubr.msk.bf16.mxu0 %vm4957_vm4, %v18248_v44 }
 0x43a   :  { %5349 = vmatmul.mubr.bf16.gmra.mxu0 %v18258_v43 }
 0x43b   :  { %13456 = vmatprep.mubr.msk.bf16.mxu0 %vm4957_vm4, %v18261_v42 }
 0x442   :  { %5357 = vmatmul.mubr.bf16.gmra.mxu0 %v18276_v57  ;;  %v15066_v57 = vld [vmem:[%s20599_s21 + $0x64] ss:$8 sps:$4 sm:$0xff]  }
 0x443   :  { %5757 = vmatprep.mubr.bf16.mxu0 %v20597_v33 }
 0x470   :  { %v5017_v13 = vpop.f32.mrf.mxu1 }
 0x472   :  { %v5019_v48 = vpop.f32.mrf.mxu1 }
 0x474   :  { %v5021_v22 = vpop.f32.mrf.mxu1 }
 0x476   :  { %v5023_v28 = vpop.f32.mrf.mxu1 }
 0x478   :  { %v5027_v51 = vpop.f32.mrf.mxu1 }
 0x47a   :  { %v5029_v20 = vpop.f32.mrf.mxu1 }
 0x47c   :  { %v5031_v24 = vpop.f32.mrf.mxu1 }
 0x47e   :  { %v5033_v10 = vpop.f32.mrf.mxu1 }
 0x480   :  { %v5037_v2 = vpop.f32.mrf.mxu1 }
 0x482   :  { %v18356_v56 = vpop.f32.mrf.mxu1 }
 0x484   :  { %v5041_v61 = vpop.f32.mrf.mxu1 }
 0x486   :  { %v5043_v55 = vpop.f32.mrf.mxu1 }
 0x488   :  { %v18358_v62 = vpop.f32.mrf.mxu1 }
 0x48a   :  { %v18360_v41 = vpop.f32.mrf.mxu1 }
 0x48c   :  { %v18363_v17 = vpop.f32.mrf.mxu1 }
 0x48e   :  { %v18365_v12 = vpop.f32.mrf.mxu1 }
 0x490   :  { %v18367_v31 = vpop.f32.mrf.mxu1 }
 0x492   :  { %v18369_v34 = vpop.f32.mrf.mxu1 }
 0x494   :  { %v18371_v59 = vpop.f32.mrf.mxu1 }
 0x496   :  { %v18373_v5 = vpop.f32.mrf.mxu1 }
 0x498   :  { %v5243_v11 = vpop.f32.mrf.mxu1 }
 0x499   :  { %v5365_v30 = vmax.f32 %v5017_v13, %v5243_v11  ;;  %v15078_v13 = vld [vmem:[%s20599_s21 + $0x24] ss:$8 sps:$4 sm:$0xff]  }
 0x49a   :  { %v5245_v49 = vpop.f32.mrf.mxu1 }
 0x49b   :  { %v5366_v44 = vmax.f32 %v5019_v48, %v5245_v49 }
 0x49c   :  { %v5247_v1 = vpop.f32.mrf.mxu1 }
 0x49d   :  { %v5368_v18 = vmax.f32 %v5021_v22, %v5247_v1  ;;  %v15082_v1 = vld [vmem:[%s20599_s21] ss:$8 sps:$4 sm:$0xff]  }
 0x49e   :  { %v5249_v43 = vpop.f32.mrf.mxu1 }
 0x49f   :  { %v5369_v19 = vmax.f32 %v5023_v28, %v5249_v43  ;;  %v18375_v42 = vpack.c.bf16 %v5368_v18, %v5365_v30 }
 0x4a0   :  { %v5253_v32 = vpop.f32.mrf.mxu1 }
 0x4a1   :  { %v18377_v0 = vpack.c.bf16 %v5369_v19, %v5366_v44  ;;  %v5371_v26 = vmax.f32 %v5027_v51, %v5253_v32  ;;  %v15076_v51 = vld [vmem:[%s20599_s21 + $0x20] ss:$8 sps:$4 sm:$0xff]   ;;  %v15087_v19 = vld [vmem:[%s20599_s21 + $0xf4] ss:$8 sps:$4 sm:$0xff]  }
 0x4a2   :  { %v5255_v3 = vpop.f32.mrf.mxu1 }
 0x4a3   :  { %5674 = vmatprep.mubr.bf16.mxu1 %v18377_v0  ;;  %v5372_v53 = vmax.f32 %v5029_v20, %v5255_v3  ;;  %v15085_v3 = vld [vmem:[%s20599_s21 + $0xf0] ss:$8 sps:$4 sm:$0xff]  }
 0x4a4   :  { %5675 = vmatmul.mubr.bf16.vlgmr.msra.gmra.mxu1 %v18375_v42  ;;  %v5257_v60 = vpop.f32.mrf.mxu1 }
 0x4a5   :  { %6025 = vmatpush1.bf16.msra.mxu1 %v15061_v38  ;;  %v5374_v15 = vmax.f32 %v5031_v24, %v5257_v60 }
 0x4a6   :  { %6026 = vmatprep.subr.bf16.mxu1 %v15066_v57  ;;  %v5259_v58 = vpop.f32.mrf.mxu1 }
 0x4a7   :  { %v5375_v63 = vmax.f32 %v5033_v10, %v5259_v58  ;;  %v18385_v9 = vpack.c.bf16 %v5374_v15, %v5371_v26  ;;  %v15081_v10 = vld [vmem:[%s20599_s21 + $0x14] ss:$8 sps:$4 sm:$0xff]  }
 0x4a8   :  { %v5263_v39 = vpop.f32.mrf.mxu1 }
 0x4a9   :  { %6027 = vmatpush1.bf16.msra.mxu1 %v15064_v47  ;;  %v18388_v35 = vpack.c.bf16 %v5375_v63, %v5372_v53  ;;  %v5377_v25 = vmax.f32 %v5037_v2, %v5263_v39  ;;  %v15093_v53 = vld [vmem:[%s20599_s21 + $0xd4] ss:$8 sps:$4 sm:$0xff]   ;;  %v15096_v63 = vld [vmem:[%s20599_s21 + $0xc4] ss:$8 sps:$4 sm:$0xff]  }
 0x4aa   :  { %6028 = vmatprep.subr.bf16.mxu1 %v15069_v8  ;;  %v5265_v54 = vpop.f32.mrf.mxu1  ;;  %v15091_v8 = vld [vmem:[%s20599_s21 + $0xd0] ss:$8 sps:$4 sm:$0xff]  }
 0x4ab   :  { %5684 = vmatprep.mubr.bf16.mxu1 %v18388_v35  ;;  %v5378_v37 = vmax.f32 %v18356_v56, %v5265_v54 }
 0x4ac   :  { %v5267_v29 = vpop.f32.mrf.mxu1  ;;  %5685 = vmatmul.mubr.bf16.gmra.mxu1 %v18385_v9 }
 0x4ad   :  { %6029 = vmatpush1.bf16.msra.mxu1 %v15067_v46  ;;  %v5380_v7 = vmax.f32 %v5041_v61, %v5267_v29  ;;  %v15094_v46 = vld [vmem:[%s20599_s21 + $0xc0] ss:$8 sps:$4 sm:$0xff]  }
 0x4ae   :  { %6030 = vmatprep.subr.bf16.mxu1 %v15072_v6  ;;  %v5269_v16 = vpop.f32.mrf.mxu1 }
 0x4af   :  { %v5381_v27 = vmax.f32 %v5043_v55, %v5269_v16  ;;  %v18396_v40 = vpack.c.bf16 %v5380_v7, %v5377_v25  ;;  %v15097_v25 = vld [vmem:[%s20599_s21 + $0xb0] ss:$8 sps:$4 sm:$0xff]   ;;  %v15100_v7 = vld [vmem:[%s20599_s21 + $0xa0] ss:$8 sps:$4 sm:$0xff]   ;;  %v15105_v16 = vld [vmem:[%s20599_s21 + $0x94] ss:$8 sps:$4 sm:$0xff]  }
 0x4b0   :  { %v5273_v45 = vpop.f32.mrf.mxu1 }
 0x4b1   :  { %6031 = vmatpush1.bf16.msra.mxu1 %v15070_v50  ;;  %v18399_v21 = vpack.c.bf16 %v5381_v27, %v5378_v37  ;;  %v5383_v22 = vmax.f32 %v18358_v62, %v5273_v45  ;;  %v15079_v62 = vld [vmem:[%s20599_s21 + $0x10] ss:$8 sps:$4 sm:$0xff]   ;;  %v15102_v50 = vld [vmem:[%s20599_s21 + $0xa4] ss:$8 sps:$4 sm:$0xff]  }
 0x4b2   :  { %6032 = vmatprep.subr.bf16.mxu1 %v15075_v14  ;;  %v5275_v48 = vpop.f32.mrf.mxu1  ;;  %v15103_v45 = vld [vmem:[%s20599_s21 + $0x90] ss:$8 sps:$4 sm:$0xff]  }
 0x4b3   :  { %5694 = vmatprep.mubr.bf16.mxu1 %v18399_v21  ;;  %v5384_v20 = vmax.f32 %v18360_v41, %v5275_v48  ;;  %v15084_v41 = vld [vmem:[%s20599_s21 + $0x4] ss:$8 sps:$4 sm:$0xff]  }
 0x4b4   :  { %v5277_v28 = vpop.f32.mrf.mxu1  ;;  %5695 = vmatmul.mubr.bf16.gmra.mxu1 %v18396_v40 }
 0x4b5   :  { %6033 = vmatpush1.bf16.msra.mxu1 %v15073_v4  ;;  %v5386_v24 = vmax.f32 %v18363_v17, %v5277_v28 }
 0x4b6   :  { %6034 = vmatprep.subr.bf16.mxu1 %v15078_v13  ;;  %v5279_v2 = vpop.f32.mrf.mxu1  ;;  %v15108_v13 = vld [vmem:[%s20599_s21 + $0x84] ss:$8 sps:$4 sm:$0xff]  }
 0x4b7   :  { %v5387_v56 = vmax.f32 %v18365_v12, %v5279_v2  ;;  %v18410_v61 = vpack.c.bf16 %v5386_v24, %v5383_v22  ;;  %v15106_v22 = vld [vmem:[%s20599_s21 + $0x80] ss:$8 sps:$4 sm:$0xff]  }
 0x4b8   :  { %v5283_v55 = vpop.f32.mrf.mxu1 }
 0x4b9   :  { %6035 = vmatpush1.bf16.msra.mxu1 %v15076_v51  ;;  %v18415_v11 = vpack.c.bf16 %v5387_v56, %v5384_v20  ;;  %v5389_v12 = vmax.f32 %v18367_v31, %v5283_v55 }
 0x4ba   :  { %v18413_v23 = vpop.f32.mrf.mxu0  ;;  %6036 = vmatprep.subr.bf16.mxu1 %v15081_v10  ;;  %v5285_v49 = vpop.f32.mrf.mxu1 }
 0x4bb   :  { %5704 = vmatprep.mubr.bf16.mxu1 %v18415_v11  ;;  %v5390_v18 = vmax.f32 %v18369_v34, %v5285_v49  ;;  %v15090_v34 = vld [vmem:[%s20599_s21 + $0xe4] ss:$8 sps:$4 sm:$0xff]  }
 0x4bc   :  { %v5102_v17 = vpop.f32.mrf.mxu0  ;;  %v5287_v30 = vpop.f32.mrf.mxu1  ;;  %5705 = vmatmul.mubr.bf16.gmra.mxu1 %v18410_v61  ;;  %v15120_v49 = vld [vmem:[%s20599_s21 + $0x104] ss:$8 sps:$4 sm:$0xff]  }
 0x4bd   :  { %6037 = vmatpush1.bf16.msra.mxu1 %v15079_v62  ;;  %v5392_v43 = vmax.f32 %v18371_v59, %v5287_v30  ;;  %v15115_v62 = vld [vmem:[%s20599_s21 + $0x110] ss:$8 sps:$4 sm:$0xff]  }
 0x4be   :  { %v18422_v44 = vpop.f32.mrf.mxu0  ;;  %6038 = vmatprep.subr.bf16.mxu1 %v15084_v41  ;;  %v5289_v32 = vpop.f32.mrf.mxu1 }
 0x4bf   :  { %v5393_v57 = vmax.f32 %v18373_v5, %v5289_v32  ;;  %v18428_v31 = vpack.c.bf16 %v5392_v43, %v5389_v12  ;;  %v15088_v5 = vld [vmem:[%s20599_s21 + $0xe0] ss:$8 sps:$4 sm:$0xff]  }
 0x4c0   :  { %v5105_v38 = vpop.f32.mrf.mxu0 }
 0x4c1   :  { %6039 = vmatpush1.bf16.msra.mxu1 %v15082_v1  ;;  %v18433_v60 = vpack.c.bf16 %v5393_v57, %v5390_v18 }
 0x4c2   :  { %v18431_v26 = vpop.f32.mrf.mxu0  ;;  %6040 = vmatprep.subr.bf16.mxu1 %v15087_v19 }
 0x4c3   :  { %5714 = vmatprep.mubr.bf16.mxu1 %v18433_v60 }
 0x4c4   :  { %v5110_v59 = vpop.f32.mrf.mxu0  ;;  %5715 = vmatmul.mubr.bf16.gmra.mxu1 %v18428_v31 }
 0x4c5   :  { %6041 = vmatpush2.bf16.msra.mxu1 %v15085_v3  ;;  %6056 = vmatprep.mubr.bf16.mxu1 %v18377_v0  ;;  %v15099_v0 = vld [vmem:[%s20599_s21 + $0xb4] ss:$8 sps:$4 sm:$0xff]  }
 0x4c6   :  { %v18439_v47 = vpop.f32.mrf.mxu0  ;;  %6042 = vmatprep.subr.bf16.mxu1 %v15090_v34 }
 0x4c8   :  { %v5113_v15 = vpop.f32.mrf.mxu0 }
 0x4c9   :  { %6043 = vmatpush2.bf16.msra.mxu1 %v15088_v5 }
 0x4ca   :  { %v18444_v58 = vpop.f32.mrf.mxu0  ;;  %6044 = vmatprep.subr.bf16.mxu1 %v15093_v53 }
 0x4cc   :  { %v5118_v39 = vpop.f32.mrf.mxu0 }
 0x4cd   :  { %6045 = vmatpush2.bf16.msra.mxu1 %v15091_v8 }
 0x4ce   :  { %v18448_v6 = vpop.f32.mrf.mxu0  ;;  %6046 = vmatprep.subr.bf16.mxu1 %v15096_v63 }
 0x4d0   :  { %v5121_v54 = vpop.f32.mrf.mxu0 }
 0x4d1   :  { %6047 = vmatpush2.bf16.msra.mxu1 %v15094_v46 }
 0x4d2   :  { %v18452_v29 = vpop.f32.mrf.mxu0  ;;  %6048 = vmatprep.subr.bf16.mxu1 %v15099_v0 }
 0x4d4   :  { %v5126_v37 = vpop.f32.mrf.mxu0 }
 0x4d5   :  { %6049 = vmatpush2.bf16.msra.mxu1 %v15097_v25 }
 0x4d6   :  { %v18456_v14 = vpop.f32.mrf.mxu0  ;;  %6050 = vmatprep.subr.bf16.mxu1 %v15102_v50 }
 0x4d8   :  { %v5129_v27 = vpop.f32.mrf.mxu0 }
 0x4d9   :  { %6051 = vmatpush2.bf16.msra.mxu1 %v15100_v7 }
 0x4da   :  { %v18460_v4 = vpop.f32.mrf.mxu0  ;;  %6052 = vmatprep.subr.bf16.mxu1 %v15105_v16 }
 0x4dc   :  { %v5134_v48 = vpop.f32.mrf.mxu0 }
 0x4dd   :  { %6053 = vmatpush2.bf16.msra.mxu1 %v15103_v45 }
 0x4de   :  { %v18464_v28 = vpop.f32.mrf.mxu0  ;;  %6054 = vmatprep.subr.bf16.mxu1 %v15108_v13 }
 0x4e0   :  { %v5137_v51 = vpop.f32.mrf.mxu0 }
 0x4e1   :  { %6055 = vmatpush2.bf16.msra.mxu1 %v15106_v22 }
 0x4e2   :  { %v5326_v20 = vpop.f32.mrf.mxu0 }
 0x4e3   :  { %v5367_v2 = vmax.f32 %v18413_v23, %v5326_v20 }
 0x4e4   :  { %v5328_v24 = vpop.f32.mrf.mxu0  ;;  %6057 = vmatmul.mubr.bf16.vlgmr.msra.gmra.mxu1 %v18375_v42  ;;  %v15118_v42 = vld [vmem:[%s20599_s21 + $0x100] ss:$8 sps:$4 sm:$0xff]  }
 0x4e5   :  { %6066 = vmatprep.mubr.bf16.mxu1 %v18388_v35 }
 0x4e6   :  { %v5329_v10 = vpop.f32.mrf.mxu0 }
 0x4e7   :  { %v5370_v56 = vmax.f32 %v18422_v44, %v5329_v10 }
 0x4e8   :  { %v5331_v55 = vpop.f32.mrf.mxu0 }
 0x4e9   :  { %v5397_v41 = vpack.c.bf16 %v5370_v56, %v5367_v2 }
 0x4ea   :  { %v5334_v17 = vpop.f32.mrf.mxu0 }
 0x4eb   :  { %13493 = vmatmul.mubr.msk.bf16.vlgmr.msra.gmra.mxu0 %vm5626_vm6, %v5397_v41  ;;  %v5373_v23 = vmax.f32 %v18431_v26, %v5334_v17 }
 0x4ec   :  { %v5336_v12 = vpop.f32.mrf.mxu0  ;;  %5767 = vmatprep.mubr.bf16.mxu0 %v20597_v33  ;;  %6120 = vmatpush1.bf16.msra.mxu0 %v15115_v62 }
 0x4ed   :  { %6067 = vmatmul.mubr.bf16.gmra.mxu1 %v18385_v9  ;;  %6121 = vmatprep.subr.bf16.mxu0 %v15120_v49 }
 0x4ee   :  { %6076 = vmatprep.mubr.bf16.mxu1 %v18399_v21  ;;  %v5337_v35 = vpop.f32.mrf.mxu0 }
 0x4ef   :  { %v5376_v30 = vmax.f32 %v18439_v47, %v5337_v35 }
 0x4f0   :  { %v5339_v1 = vpop.f32.mrf.mxu0  ;;  %6122 = vmatpush1.bf16.msra.mxu0 %v15118_v42 }
 0x4f1   :  { %v5400_v44 = vpack.c.bf16 %v5376_v30, %v5373_v23 }
 0x4f2   :  { %v5342_v18 = vpop.f32.mrf.mxu0 }
 0x4f3   :  { %13494 = vmatmul.mubr.msk.bf16.gmra.mxu0 %vm5626_vm6, %v5400_v44  ;;  %v5379_v21 = vmax.f32 %v18444_v58, %v5342_v18 }
 0x4f4   :  { %v5344_v43 = vpop.f32.mrf.mxu0  ;;  %5777 = vmatprep.mubr.bf16.mxu0 %v20597_v33 }
 0x4f5   :  { %6077 = vmatmul.mubr.bf16.gmra.mxu1 %v18396_v40 }
 0x4f6   :  { %6086 = vmatprep.mubr.bf16.mxu1 %v18415_v11  ;;  %v5345_v9 = vpop.f32.mrf.mxu0 }
 0x4f7   :  { %v5382_v19 = vmax.f32 %v18448_v6, %v5345_v9 }
 0x4f8   :  { %v5347_v32 = vpop.f32.mrf.mxu0 }
 0x4f9   :  { %v5403_v38 = vpack.c.bf16 %v5382_v19, %v5379_v21 }
 0x4fa   :  { %v5350_v57 = vpop.f32.mrf.mxu0 }
 0x4fb   :  { %13495 = vmatmul.mubr.msk.bf16.gmra.mxu0 %vm5626_vm6, %v5403_v38  ;;  %v5385_v11 = vmax.f32 %v18452_v29, %v5350_v57 }
 0x4fc   :  { %v5352_v3 = vpop.f32.mrf.mxu0  ;;  %5787 = vmatprep.mubr.bf16.mxu0 %v20597_v33 }
 0x4fd   :  { %6087 = vmatmul.mubr.bf16.gmra.mxu1 %v18410_v61 }
 0x4fe   :  { %6096 = vmatprep.mubr.bf16.mxu1 %v18433_v60  ;;  %v5353_v40 = vpop.f32.mrf.mxu0 }
 0x4ff   :  { %v5388_v26 = vmax.f32 %v18456_v14, %v5353_v40 }
 0x500   :  { %v5355_v34 = vpop.f32.mrf.mxu0 }
 0x501   :  { %v5406_v59 = vpack.c.bf16 %v5388_v26, %v5385_v11 }
 0x502   :  { %v5358_v5 = vpop.f32.mrf.mxu0 }
 0x503   :  { %13496 = vmatmul.mubr.msk.bf16.gmra.mxu0 %vm5626_vm6, %v5406_v59  ;;  %v5391_v61 = vmax.f32 %v18460_v4, %v5358_v5 }
 0x504   :  { %v5360_v47 = vpop.f32.mrf.mxu0  ;;  %5797 = vmatprep.mubr.bf16.mxu0 %v20597_v33 }
 0x505   :  { %6097 = vmatmul.mubr.bf16.gmra.mxu1 %v18428_v31 }
 0x506   :  { %v5361_v53 = vpop.f32.mrf.mxu0 }
 0x507   :  { %v5394_v60 = vmax.f32 %v18464_v28, %v5361_v53 }
 0x508   :  { %v5363_v15 = vpop.f32.mrf.mxu0 }
 0x509   :  { %v5409_v8 = vpack.c.bf16 %v5394_v60, %v5391_v61 }
 0x50b   :  { %13497 = vmatmul.mubr.msk.bf16.gmra.mxu0 %vm5626_vm6, %v5409_v8 }
 0x50c   :  { %6139 = vmatprep.mubr.bf16.mxu0 %v20597_v33 }
 0x513   :  { %13534 = vmatmul.mubr.msk.bf16.vlgmr.msra.gmra.mxu0 %vm5626_vm6, %v5397_v41 }
 0x514   :  { %6149 = vmatprep.mubr.bf16.mxu0 %v20597_v33 }
 0x51b   :  { %13535 = vmatmul.mubr.msk.bf16.gmra.mxu0 %vm5626_vm6, %v5400_v44 }
 0x51c   :  { %6159 = vmatprep.mubr.bf16.mxu0 %v20597_v33 }
 0x523   :  { %13536 = vmatmul.mubr.msk.bf16.gmra.mxu0 %vm5626_vm6, %v5403_v38 }
 0x524   :  { %6169 = vmatprep.mubr.bf16.mxu0 %v20597_v33 }
 0x52b   :  { %13537 = vmatmul.mubr.msk.bf16.gmra.mxu0 %vm5626_vm6, %v5406_v59 }
 0x52c   :  { %6179 = vmatprep.mubr.bf16.mxu0 %v20597_v33 }
 0x533   :  { %13538 = vmatmul.mubr.msk.bf16.gmra.mxu0 %vm5626_vm6, %v5409_v8 }
 0x564   :  { %v5676_v31 = vpop.f32.mrf.mxu1 }
 0x566   :  { %v5678_v58 = vpop.f32.mrf.mxu1 }
 0x568   :  { %v5680_v63 = vpop.f32.mrf.mxu1 }
 0x56a   :  { %v18507_v39 = vpop.f32.mrf.mxu1 }
 0x56c   :  { %v18509_v46 = vpop.f32.mrf.mxu1 }
 0x56e   :  { %v18511_v6 = vpop.f32.mrf.mxu1 }
 0x570   :  { %v18513_v0 = vpop.f32.mrf.mxu1 }
 0x572   :  { %v18515_v54 = vpop.f32.mrf.mxu1 }
 0x574   :  { %v18517_v25 = vpop.f32.mrf.mxu1 }
 0x576   :  { %v18519_v29 = vpop.f32.mrf.mxu1 }
 0x578   :  { %v18521_v50 = vpop.f32.mrf.mxu1 }
 0x57a   :  { %v18523_v37 = vpop.f32.mrf.mxu1 }
 0x57c   :  { %v18525_v7 = vpop.f32.mrf.mxu1 }
 0x57e   :  { %v18527_v14 = vpop.f32.mrf.mxu1 }
 0x580   :  { %v18529_v16 = vpop.f32.mrf.mxu1 }
 0x582   :  { %v18531_v27 = vpop.f32.mrf.mxu1 }
 0x584   :  { %v18533_v45 = vpop.f32.mrf.mxu1 }
 0x586   :  { %v18535_v4 = vpop.f32.mrf.mxu1 }
 0x588   :  { %v18537_v13 = vpop.f32.mrf.mxu1 }
 0x58a   :  { %v18539_v48 = vpop.f32.mrf.mxu1 }
 0x58b   :  { %20600 = vst [vmem:[#allocation287_spill] sm:$0xff] %v18539_v48 }
 0x5a4   :  { %v6058_v28 = vpop.f32.mrf.mxu1 }
 0x5a6   :  { %v6060_v24 = vpop.f32.mrf.mxu1 }
 0x5a8   :  { %v6062_v56 = vpop.f32.mrf.mxu1 }
 0x5aa   :  { %v6064_v41 = vpop.f32.mrf.mxu1 }
 0x5ab   :  { %v5759_v22 = vpop.f32.mrf.mxu0 }
 0x5ac   :  { %v5760_v26 = vadd.f32 %v5759_v22, %v5676_v31 }
 0x5ad   :  { %v5761_v51 = vpop.f32.mrf.mxu0  ;;  %v6068_v12 = vpop.f32.mrf.mxu1 }
 0x5ae   :  { %v5762_v47 = vadd.f32 %v5761_v51, %v5678_v58 }
 0x5af   :  { %v5763_v20 = vpop.f32.mrf.mxu0  ;;  %v6070_v23 = vpop.f32.mrf.mxu1 }
 0x5b0   :  { %v5764_v15 = vadd.f32 %v5763_v20, %v5680_v63 }
 0x5b1   :  { %v5765_v10 = vpop.f32.mrf.mxu0  ;;  %v6072_v44 = vpop.f32.mrf.mxu1 }
 0x5b2   :  { %v5766_v48 = vadd.f32 %v5765_v10, %v18507_v39 }
 0x5b3   :  { %v5769_v2 = vpop.f32.mrf.mxu0  ;;  %v6074_v9 = vpop.f32.mrf.mxu1 }
 0x5b5   :  { %v5771_v55 = vpop.f32.mrf.mxu0  ;;  %v6078_v32 = vpop.f32.mrf.mxu1 }
 0x5b6   :  { %v5772_v63 = vadd.f32 %v5771_v55, %v18511_v6 }
 0x5b7   :  { %v5773_v62 = vpop.f32.mrf.mxu0  ;;  %v6080_v3 = vpop.f32.mrf.mxu1 }
 0x5b8   :  { %v5774_v39 = vadd.f32 %v5773_v62, %v18513_v0 }
 0x5b9   :  { %v5775_v49 = vpop.f32.mrf.mxu0  ;;  %v6082_v59 = vpop.f32.mrf.mxu1 }
 0x5bb   :  { %v5779_v17 = vpop.f32.mrf.mxu0  ;;  %v6084_v36 = vpop.f32.mrf.mxu1 }
 0x5bc   :  { %v5780_v6 = vadd.f32 %v5779_v17, %v18517_v25 }
 0x5bd   :  { %v18541_v42 = vpop.f32.mrf.mxu0 }
 0x5be   :  { %v5782_v0 = vadd.f32 %v18541_v42, %v18519_v29 }
 0x5bf   :  { %v18543_v35 = vpop.f32.mrf.mxu0 }
 0x5c1   :  { %v18545_v30 = vpop.f32.mrf.mxu0 }
 0x5c3   :  { %v18547_v1 = vpop.f32.mrf.mxu0 }
 0x5c5   :  { %v18549_v18 = vpop.f32.mrf.mxu0 }
 0x5c7   :  { %v18551_v43 = vpop.f32.mrf.mxu0 }
 0x5c9   :  { %v18553_v21 = vpop.f32.mrf.mxu0 }
 0x5cb   :  { %v18555_v19 = vpop.f32.mrf.mxu0 }
 0x5cd   :  { %v18557_v38 = vpop.f32.mrf.mxu0 }
 0x5cf   :  { %v18559_v57 = vpop.f32.mrf.mxu0 }
 0x5d1   :  { %v18561_v40 = vpop.f32.mrf.mxu0 }
 0x5d2   :  { %20601 = vst [vmem:[#allocation282_spill] sm:$0xff] %v18561_v40 }
 0x5d3   :  { %v6141_v11 = vpop.f32.mrf.mxu0 }
 0x5d4   :  { %v6142_v34 = vadd.f32 %v6141_v11, %v6058_v28  ;;  %v5770_v28 = vadd.f32 %v5769_v2, %v18509_v46  ;;  %v5776_v46 = vadd.f32 %v5775_v49, %v18515_v54  ;;  %v5784_v49 = vadd.f32 %v18543_v35, %v18521_v50 }
 0x5d5   :  { %v6143_v5 = vpop.f32.mrf.mxu0 }
 0x5d6   :  { %v6190_v53 = vmax.f32 %v5760_v26, %v6142_v34  ;;  %v6144_v61 = vadd.f32 %v6143_v5, %v6060_v24  ;;  %v6088_v24 = vpop.f32.mrf.mxu1 }
 0x5d7   :  { %v6145_v60 = vpop.f32.mrf.mxu0 }
 0x5d8   :  { %6210 = vst [vmem:[#allocation14] sm:$0xff] %v6190_v53  ;;  %v6191_v8 = vmax.f32 %v5762_v47, %v6144_v61  ;;  %v6146_v52 = vadd.f32 %v6145_v60, %v6062_v56  ;;  %v6090_v10 = vpop.f32.mrf.mxu1 }
 0x5d9   :  { %v6147_v33 = vpop.f32.mrf.mxu0 }
 0x5da   :  { %6212 = vst.msk [vmem:[#allocation14 + $0x8] sm:$0xff] %vm6211_vm7, %v6191_v8  ;;  %v6192_v40 = vmax.f32 %v5764_v15, %v6146_v52  ;;  %v6148_v31 = vadd.f32 %v6147_v33, %v6064_v41 }
 0x5db   :  { %v6151_v22 = vpop.f32.mrf.mxu0 }
 0x5dc   :  { %6213 = vst [vmem:[#allocation14 + $0x10] sm:$0xff] %v6192_v40  ;;  %v6193_v58 = vmax.f32 %v5766_v48, %v6148_v31  ;;  %v6152_v51 = vadd.f32 %v6151_v22, %v6068_v12  ;;  %v6092_v40 = vpop.f32.mrf.mxu1  ;;  %v5796_v31 = vadd.f32 %v18553_v21, %v18531_v27 }
 0x5dd   :  { %v6153_v11 = vpop.f32.mrf.mxu0 }
 0x5de   :  { %6214 = vst.msk [vmem:[#allocation14 + $0x18] sm:$0xff] %vm6211_vm7, %v6193_v58  ;;  %v6194_v20 = vmax.f32 %v5770_v28, %v6152_v51  ;;  %v6154_v56 = vadd.f32 %v6153_v11, %v6070_v23  ;;  %v6094_v25 = vpop.f32.mrf.mxu1  ;;  %v5800_v28 = vadd.f32 %v18555_v19, %v18533_v45 }
 0x5df   :  { %v6155_v26 = vpop.f32.mrf.mxu0 }
 0x5e0   :  { %6215 = vst [vmem:[#allocation14 + $0x20] sm:$0xff] %v6194_v20  ;;  %v6195_v52 = vmax.f32 %v5772_v63, %v6154_v56  ;;  %v6156_v33 = vadd.f32 %v6155_v26, %v6072_v44  ;;  %v6098_v50 = vpop.f32.mrf.mxu1  ;;  %v5804_v63 = vadd.f32 %v18559_v57, %v18537_v13  ;;  %v20602_v26 = vld [vmem:[#allocation287_spill] sm:$0xff] }
 0x5e1   :  { %v6157_v41 = vpop.f32.mrf.mxu0 }
 0x5e2   :  { %6216 = vst.msk [vmem:[#allocation14 + $0x28] sm:$0xff] %vm6211_vm7, %v6195_v52  ;;  %v6196_v48 = vmax.f32 %v5774_v39, %v6156_v33  ;;  %v6158_v2 = vadd.f32 %v6157_v41, %v6074_v9  ;;  %v20603_v39 = vld [vmem:[#allocation282_spill] sm:$0xff] }
 0x5e3   :  { %v6161_v12 = vpop.f32.mrf.mxu0  ;;  %v5806_v52 = vadd.f32 %v20603_v39, %v20602_v26 }
 0x5e4   :  { %6217 = vst [vmem:[#allocation14 + $0x30] sm:$0xff] %v6196_v48  ;;  %v6197_v55 = vmax.f32 %v5776_v46, %v6158_v2  ;;  %v6162_v23 = vadd.f32 %v6161_v12, %v6078_v32  ;;  %v5786_v32 = vadd.f32 %v18545_v30, %v18523_v37 }
 0x5e5   :  { %v6163_v34 = vpop.f32.mrf.mxu0 }
 0x5e6   :  { %6218 = vst.msk [vmem:[#allocation14 + $0x38] sm:$0xff] %vm6211_vm7, %v6197_v55  ;;  %v6198_v62 = vmax.f32 %v5780_v6, %v6162_v23  ;;  %v6164_v44 = vadd.f32 %v6163_v34, %v6080_v3  ;;  %v5790_v3 = vadd.f32 %v18547_v1, %v18525_v7  ;;  %v6100_v7 = vpop.f32.mrf.mxu1 }
 0x5e7   :  { %v6165_v54 = vpop.f32.mrf.mxu0 }
 0x5e8   :  { %6219 = vst [vmem:[#allocation14 + $0x40] sm:$0xff] %v6198_v62  ;;  %v6199_v9 = vmax.f32 %v5782_v0, %v6164_v44  ;;  %v6166_v5 = vadd.f32 %v6165_v54, %v6082_v59  ;;  %v5792_v59 = vadd.f32 %v18549_v18, %v18527_v14 }
 0x5e9   :  { %v6167_v17 = vpop.f32.mrf.mxu0 }
 0x5ea   :  { %6220 = vst.msk [vmem:[#allocation14 + $0x48] sm:$0xff] %vm6211_vm7, %v6199_v9  ;;  %v6200_v47 = vmax.f32 %v5784_v49, %v6166_v5  ;;  %v6168_v29 = vadd.f32 %v6167_v17, %v6084_v36  ;;  %v5794_v36 = vadd.f32 %v18551_v43, %v18529_v16  ;;  %v6102_v16 = vpop.f32.mrf.mxu1 }
 0x5eb   :  { %v6171_v42 = vpop.f32.mrf.mxu0 }
 0x5ec   :  { %6221 = vst [vmem:[#allocation14 + $0x50] sm:$0xff] %v6200_v47  ;;  %v6201_v53 = vmax.f32 %v5786_v32, %v6168_v29  ;;  %v6172_v61 = vadd.f32 %v6171_v42, %v6088_v24  ;;  %v5802_v24 = vadd.f32 %v18557_v38, %v18535_v4  ;;  %v6104_v45 = vpop.f32.mrf.mxu1 }
 0x5ed   :  { %v6173_v35 = vpop.f32.mrf.mxu0 }
 0x5ee   :  { %6222 = vst.msk [vmem:[#allocation14 + $0x58] sm:$0xff] %vm6211_vm7, %v6201_v53  ;;  %v6202_v60 = vmax.f32 %v5790_v3, %v6172_v61  ;;  %v6174_v37 = vadd.f32 %v6173_v35, %v6090_v10 }
 0x5ef   :  { %v6175_v30 = vpop.f32.mrf.mxu0 }
 0x5f0   :  { %6223 = vst [vmem:[#allocation14 + $0x60] sm:$0xff] %v6202_v60  ;;  %v6203_v15 = vmax.f32 %v5792_v59, %v6174_v37  ;;  %v6176_v8 = vadd.f32 %v6175_v30, %v6092_v40 }
 0x5f1   :  { %v6177_v1 = vpop.f32.mrf.mxu0 }
 0x5f2   :  { %6224 = vst.msk [vmem:[#allocation14 + $0x68] sm:$0xff] %vm6211_vm7, %v6203_v15  ;;  %v6204_v22 = vmax.f32 %v5794_v36, %v6176_v8  ;;  %v6178_v14 = vadd.f32 %v6177_v1, %v6094_v25 }
 0x5f3   :  { %v6181_v18 = vpop.f32.mrf.mxu0 }
 0x5f4   :  { %6225 = vst [vmem:[#allocation14 + $0x70] sm:$0xff] %v6204_v22  ;;  %v6205_v58 = vmax.f32 %v5796_v31, %v6178_v14  ;;  %v6182_v51 = vadd.f32 %v6181_v18, %v6098_v50 }
 0x5f5   :  { %v6183_v43 = vpop.f32.mrf.mxu0 }
 0x5f6   :  { %6226 = vst.msk [vmem:[#allocation14 + $0x78] sm:$0xff] %vm6211_vm7, %v6205_v58  ;;  %v6206_v11 = vmax.f32 %v5800_v28, %v6182_v51  ;;  %v6184_v27 = vadd.f32 %v6183_v43, %v6100_v7 }
 0x5f7   :  { %v6185_v21 = vpop.f32.mrf.mxu0 }
 0x5f8   :  { %6227 = vst [vmem:[#allocation14 + $0x80] sm:$0xff] %v6206_v11  ;;  %v6207_v20 = vmax.f32 %v5802_v24, %v6184_v27  ;;  %v6186_v56 = vadd.f32 %v6185_v21, %v6102_v16 }
 0x5f9   :  { %v6187_v19 = vpop.f32.mrf.mxu0 }
 0x5fa   :  { %6228 = vst.msk [vmem:[#allocation14 + $0x88] sm:$0xff] %vm6211_vm7, %v6207_v20  ;;  %v6208_v33 = vmax.f32 %v5804_v63, %v6186_v56  ;;  %v6188_v4 = vadd.f32 %v6187_v19, %v6104_v45 }
 0x5fc   :  { %6229 = vst [vmem:[#allocation14 + $0x90] sm:$0xf] %v6208_v33  ;;  %v6209_v38 = vmax.f32 %v5806_v52, %v6188_v4 }
 0x5fe   :  { %6231 = vst.msk [vmem:[#allocation14 + $0x98] sm:$0xf] %vm6230_vm8, %v6209_v38 }
 0x5ff   :  { %15444 = dma.done.wait [#allocation19], 10944 }
 0x600   :  { %15445 = vsyncadd [#allocation19], 4294956352 }
 0x601   :  { %15446 = dma.done.wait [#allocation19 + $0x1], 4608 }
 0x602   :  { %15447 = vsyncadd [#allocation19 + $0x1], 4294962688 }
 0x603   :  { %15448 = dma.done.wait [#allocation19 + $0x2], 4608 }
 0x604   :  { %15449 = vsyncadd [#allocation19 + $0x2], 4294962688  ;;  %v20604_v13 = vmov 0   ;;  %v15124_v57 = vld [vmem:[#allocation2 + $0x190] ss:$12 sps:$4 sm:$0xff]   ;;  %v18608_v53 = vld [vmem:[#allocation14 + $0x10] sm:$0xff] }
 0x605   :  { %6700 = vmatprep.subr.bf16.mxu1 %v20604_v13  ;;  %v15126_v10 = vld [vmem:[#allocation2 + $0x194] ss:$12 sps:$4 sm:$0xff]   ;;  %6617 = vmatprep.subr.bf16.mxu0 %v15124_v57  ;;  %v15127_v41 = vld [vmem:[#allocation2 + $0x18c] ss:$12 sps:$4 sm:$0xff]   ;;  %v15130_v48 = vld [vmem:[#allocation2 + $0x17c] ss:$12 sps:$4 sm:$0xff]  }
 0x606   :  { %6701 = vmatpush1.bf16.msra.mxu1 %v15126_v10  ;;  %v15128_v46 = vld [vmem:[#allocation2 + $0x178] ss:$12 sps:$4 sm:$0xff]   ;;  %6618 = vmatpush1.bf16.msra.mxu0 %v15127_v41  ;;  %v15131_v2 = vld [vmem:[#allocation2 + $0x174] ss:$12 sps:$4 sm:$0xff]   ;;  %v15135_v55 = vld [vmem:[#allocation2 + $0x15c] ss:$12 sps:$4 sm:$0xff]  }
 0x607   :  { %6702 = vmatprep.subr.bf16.mxu1 %v20604_v13  ;;  %6619 = vmatprep.subr.bf16.mxu0 %v15128_v46  ;;  %v15132_v12 = vld [vmem:[#allocation2 + $0x160] ss:$12 sps:$4 sm:$0xff]   ;;  %v15134_v6 = vld [vmem:[#allocation2 + $0x164] ss:$12 sps:$4 sm:$0xff]   ;;  %v15136_v23 = vld [vmem:[#allocation2 + $0x148] ss:$12 sps:$4 sm:$0xff]  }
 0x608   :  { %v15138_v40 = vld [vmem:[#allocation2 + $0x14c] ss:$12 sps:$4 sm:$0xff]   ;;  %v15139_v34 = vld [vmem:[#allocation2 + $0x144] ss:$12 sps:$4 sm:$0xff]   ;;  %v15142_v62 = vld [vmem:[#allocation2 + $0x134] ss:$12 sps:$4 sm:$0xff]  }
 0x609   :  { %v15140_v0 = vld [vmem:[#allocation2 + $0x130] ss:$12 sps:$4 sm:$0xff]   ;;  %v15143_v44 = vld [vmem:[#allocation2 + $0x12c] ss:$12 sps:$4 sm:$0xff]   ;;  %v15147_v9 = vld [vmem:[#allocation2 + $0x114] ss:$12 sps:$4 sm:$0xff]  }
 0x60a   :  { %6703 = vmatpush1.bf16.msra.mxu1 %v15130_v48  ;;  %6620 = vmatpush1.bf16.msra.mxu0 %v15131_v2  ;;  %v15144_v54 = vld [vmem:[#allocation2 + $0x118] ss:$12 sps:$4 sm:$0xff]   ;;  %v15146_v49 = vld [vmem:[#allocation2 + $0x11c] ss:$12 sps:$4 sm:$0xff]   ;;  %v15148_v5 = vld [vmem:[#allocation2 + $0x100] ss:$12 sps:$4 sm:$0xff]  }
 0x60b   :  { %6704 = vmatprep.subr.bf16.mxu1 %v20604_v13  ;;  %6621 = vmatprep.subr.bf16.mxu0 %v15132_v12  ;;  %v15150_v25 = vld [vmem:[#allocation2 + $0x104] ss:$12 sps:$4 sm:$0xff]   ;;  %v15151_v17 = vld [vmem:[#allocation2 + $0xfc] ss:$12 sps:$4 sm:$0xff]   ;;  %v6249_v59 = vld [vmem:[#allocation14 + $0x30] sm:$0xff]  ;;  %vm15511_vm9 = vmmov 0  }
 0x60c   :  { %v18606_v32 = vld [vmem:[#allocation14 + $0x18] sm:$0xff]  ;;  %v6248_v47 = vld [vmem:[#allocation14 + $0x28] sm:$0xff]  ;;  %v15152_v29 = vld [vmem:[#allocation2 + $0xe8] ss:$12 sps:$4 sm:$0xff]   ;;  %s20605_s3 = sld [smem:[#allocation53_spill]]  ;;  %vm7664_vm10 = vcmask 1044480  }
 0x60d   :  { %v6250_v42 = vld [vmem:[#allocation14 + $0x38] sm:$0xff]  ;;  %v6312_v3 = vld [vmem:[#allocation14 + $0x8] sm:$0xfe]  ;;  %v6247_v35 = vld [vmem:[#allocation14 + $0x20] sm:$0xff]  ;;  %s20610_s8 = sld [smem:[#allocation54_spill]]  ;;  %vm7654_vm11 = vcmask 605184  }
 0x60e   :  { %6705 = vmatpush1.bf16.msra.mxu1 %v15134_v6  ;;  %6622 = vmatpush1.bf16.msra.mxu0 %v15135_v55  ;;  %v18611_v61 = vpack.c.bf16 %v6250_v42, %v6248_v47  ;;  %v6316_v50 = vpack.c.bf16 %v18606_v32, %v6312_v3  ;;  %v6311_v60 = vld [vmem:[#allocation14] sm:$0xfe]  ;;  %v15154_v37 = vld [vmem:[#allocation2 + $0xec] ss:$12 sps:$4 sm:$0xff]   ;;  %v6356_v36 = vld [vmem:[#allocation2 + $0x1bc] sm:$0xff]  ;;  %v18616_v31 = vpack.c.bf16 %v6249_v59, %v6247_v35  ;;  %s20611_s14 = sld [smem:[#allocation55_spill]] }
 0x60f   :  { %6706 = vmatprep.subr.bf16.mxu1 %v20604_v13  ;;  %6623 = vmatprep.subr.bf16.mxu0 %v15136_v23  ;;  %v6315_v30 = vpack.c.bf16 %v18608_v53, %v6311_v60  ;;  %v15155_v1 = vld [vmem:[#allocation2 + $0xe4] ss:$12 sps:$4 sm:$0xff]   ;;  %v13567_v58 = vcombine.high %v6356_v36, %v6356_v36  ;;  %v13566_v51 = vcombine.low %v6356_v36, %v6356_v36  ;;  %v6254_v21 = vld [vmem:[#allocation14 + $0x58] sm:$0xff]  ;;  %v6253_v19 = vld [vmem:[#allocation14 + $0x50] sm:$0xff] }
 0x610   :  { %v6371_v15 = vshrl.u32 %v6316_v50, 16  ;;  %v6373_v8 = vshll.u32 %v6316_v50, 16  ;;  %v6378_v7 = vshll.u32 %v18611_v61, 16  ;;  %v15157_v14 = vld [vmem:[#allocation2 + $0x1c4] ss:$0 sps:$4 sm:$0xff]   ;;  %v6366_v11 = vshll.u32 %v18616_v31, 16 }
 0x611   :  { %v6361_v22 = vshll.u32 %v6315_v30, 16  ;;  %v6359_v43 = vshrl.u32 %v6315_v30, 16  ;;  %v6252_v27 = vld [vmem:[#allocation14 + $0x48] sm:$0xff]  ;;  %v6251_v63 = vld [vmem:[#allocation14 + $0x40] sm:$0xff]  ;;  %v6615_v20 = vsel %vm2359_vm0, %v15157_v14, 0  ;;  %v6609_v26 = vsel %vm2359_vm0, %v13566_v51, 0 }
 0x612   :  { %6707 = vmatpush1.bf16.msra.mxu1 %v15138_v40  ;;  %6624 = vmatpush1.bf16.msra.mxu0 %v15139_v34  ;;  %v6375_v18 = vrot.slane %v6373_v8, 1  ;;  %v6380_v28 = vrot.slane %v6378_v7, 1  ;;  %v18623_v45 = vpack.c.bf16 %v6254_v21, %v6252_v27  ;;  %v15159_v39 = vld [vmem:[#allocation2 + $0x1a8] ss:$12 sps:$4 sm:$0xff]   ;;  %v6390_v52 = vshrl.u32 %v18611_v61, 16  ;;  %v6256_v46 = vld [vmem:[#allocation14 + $0x68] sm:$0xff] }
 0x613   :  { %6708 = vmatprep.subr.bf16.mxu1 %v20604_v13  ;;  %6625 = vmatprep.subr.bf16.mxu0 %v15140_v0  ;;  %v6363_v24 = vrot.slane %v6361_v22, 1  ;;  %v15161_v4 = vld [vmem:[#allocation2 + $0x1ac] ss:$12 sps:$4 sm:$0xff]   ;;  %v15162_v38 = vld [vmem:[#allocation2 + $0x1a4] ss:$12 sps:$4 sm:$0xff]   ;;  %v6368_v10 = vrot.slane %v6366_v11, 1  ;;  %v18631_v41 = vpack.c.bf16 %v6253_v19, %v6251_v63 }
 0x614   :  { %v6376_v16 = vor.u32 %v6375_v18, %v6371_v15  ;;  %v6394_v33 = vshll.u32 %v18623_v45, 16  ;;  %v15165_v48 = vld [vmem:[#allocation2 + $0xac] ss:$12 sps:$4 sm:$0xff]   ;;  %v6258_v2 = vld [vmem:[#allocation14 + $0x78] sm:$0xff]  ;;  %v7163_v12 = vrot.slane %v18611_v61, 1  ;;  %v6392_v23 = vor.u32 %v6390_v52, %v6380_v28 }
 0x615   :  { %v6364_v57 = vor.u32 %v6363_v24, %v6359_v43  ;;  %v15163_v6 = vld [vmem:[#allocation2 + $0xa8] ss:$12 sps:$4 sm:$0xff]   ;;  %v15166_v55 = vld [vmem:[#allocation2 + $0xb0] ss:$12 sps:$4 sm:$0xff]   ;;  %v18635_v34 = vpack.c.bf16 %v6258_v2, %v6256_v46  ;;  %v7167_v0 = vrot.slane %v18623_v45, 1  ;;  %v6406_v47 = vshrl.u32 %v18623_v45, 16 }
 0x616   :  { %6709 = vmatpush1.bf16.msra.mxu1 %v15142_v62  ;;  %6626 = vmatpush1.bf16.msra.mxu0 %v15143_v44  ;;  %v6381_v56 = vsel %vm1774_vm1, %v6376_v16, %v6380_v28  ;;  %v6396_v40 = vrot.slane %v6394_v33, 1  ;;  %v6382_v44 = vshrl.u32 %v18616_v31, 16  ;;  %v15170_v42 = vld [vmem:[#allocation2 + $0x98] ss:$12 sps:$4 sm:$0xff]   ;;  %v18652_v59 = vld [vmem:[#allocation14 + $0x88] sm:$0xff]  ;;  %v7160_v30 = vrot.slane %v18616_v31, 1 }
 0x617   :  { %6710 = vmatprep.subr.bf16.mxu1 %v20604_v13  ;;  %6627 = vmatprep.subr.bf16.mxu0 %v15144_v54  ;;  %v6369_v62 = vsel %vm1774_vm1, %v6364_v57, %v6368_v10  ;;  %v6386_v54 = vshll.u32 %v18631_v41, 16  ;;  %v6314_v60 = vld [vmem:[#allocation14 + $0x98] sm:$0x7]  ;;  %v7165_v36 = vrot.slane %v18631_v41, 1  ;;  %v7171_v8 = vrot.slane %v18635_v34, 1  ;;  %v18679_v24 = vld [vmem:[#allocation14 + $0x80] sm:$0xff] }
 0x618   :  { %13575 = vmatprep.mubr.msk.bf16.mxu1 %vm6211_vm7, %v6381_v56  ;;  %13570 = vmatprep.mubr.msk.bf16.mxu0 %vm6211_vm7, %v6381_v56  ;;  %v6384_v3 = vor.u32 %v6382_v44, %v6368_v10  ;;  %v15173_v15 = vld [vmem:[#allocation2 + $0x7c] ss:$12 sps:$4 sm:$0xff]   ;;  %v15171_v7 = vld [vmem:[#allocation2 + $0x78] ss:$12 sps:$4 sm:$0xff]   ;;  %v18661_v14 = vpack.c.bf16 %v6314_v60, %v18652_v59  ;;  %v6398_v51 = vshrl.u32 %v18631_v41, 16  ;;  %v6422_v63 = vshrl.u32 %v18635_v34, 16 }
 0x619   :  { %v6388_v50 = vrot.slane %v6386_v54, 1  ;;  %v18668_v18 = vsel %vm3785_vm3, %v7160_v30, %v7165_v36  ;;  %v18676_v43 = vsel %vm3785_vm3, %v7167_v0, %v7171_v8  ;;  %v6313_v11 = vld [vmem:[#allocation14 + $0x90] sm:$0x7]  ;;  %v15177_v27 = vld [vmem:[#allocation2 + $0x64] ss:$12 sps:$4 sm:$0xff]  }
 0x61a   :  { %6711 = vmatpush1.bf16.msra.mxu1 %v15146_v49  ;;  %6628 = vmatpush1.bf16.msra.mxu0 %v15147_v9  ;;  %v6255_v49 = vld [vmem:[#allocation14 + $0x60] sm:$0xff]  ;;  %v6257_v9 = vld [vmem:[#allocation14 + $0x70] sm:$0xff]  ;;  %v15175_v52 = vld [vmem:[#allocation2 + $0x60] ss:$12 sps:$4 sm:$0xff]   ;;  %v6433_v54 = vshrl.u32 %v18661_v14, 16 }
 0x61b   :  { %6712 = vmatprep.subr.bf16.mxu1 %v20604_v13  ;;  %6629 = vmatprep.subr.bf16.mxu0 %v15148_v5  ;;  %v18645_v5 = vsel %vm3785_vm3, %v7163_v12, %v7167_v0  ;;  %v18650_v35 = vpack.c.bf16 %v6257_v9, %v6255_v49  ;;  %v6389_v28 = vsel %vm1774_vm1, %v6384_v3, %v6388_v50  ;;  %v15178_v56 = vld [vmem:[#allocation2 + $0x68] ss:$12 sps:$4 sm:$0xff]   ;;  %v15181_v33 = vld [vmem:[#allocation2 + $0x4c] ss:$12 sps:$4 sm:$0xff]   ;;  %v15196_v60 = vld [vmem:[#allocation2 + $0xe0] ss:$0 sps:$4 sm:$0xff]  }
 0x61c   :  { %v6400_v19 = vor.u32 %v6398_v51, %v6388_v50  ;;  %v15179_v2 = vld [vmem:[#allocation2 + $0x48] ss:$12 sps:$4 sm:$0xff]   ;;  %v15190_v9 = vld [vmem:[#allocation2 + $0x20] ss:$12 sps:$4 sm:$0xff]   ;;  %v6309_v3 = vld [vmem:[#allocation2 + $0xd8] sm:$0xff] }
 0x61d   :  { %v6402_v16 = vshll.u32 %v18650_v35, 16  ;;  %v6414_v46 = vshrl.u32 %v18650_v35, 16  ;;  %v15189_v44 = vld [vmem:[#allocation2 + $0x1c] ss:$12 sps:$4 sm:$0xff]  }
 0x61e   :  { %6713 = vmatpush1.bf16.msra.mxu1 %v15150_v25  ;;  %6630 = vmatpush1.bf16.msra.mxu0 %v15151_v17  ;;  %v15169_v25 = vld [vmem:[#allocation2 + $0x94] ss:$12 sps:$4 sm:$0xff]   ;;  %v6397_v17 = vsel %vm1774_vm1, %v6392_v23, %v6396_v40  ;;  %v15186_v23 = vld [vmem:[#allocation2 + $0x38] ss:$12 sps:$4 sm:$0xff]  }
 0x61f   :  { %6714 = vmatprep.subr.bf16.mxu1 %v20604_v13  ;;  %6631 = vmatprep.subr.bf16.mxu0 %v15152_v29  ;;  %v6410_v29 = vshll.u32 %v18635_v34, 16  ;;  %v15194_v50 = vld [vmem:[#allocation2 + $0x8] ss:$12 sps:$4 sm:$0xff]  }
 0x620   :  { %v15201_v51 = vld [vmem:[#allocation2 + $0xc8] ss:$12 sps:$4 sm:$0xff]  }
 0x621   :  { %v6412_v22 = vrot.slane %v6410_v29, 1  ;;  %v15191_v29 = vld [vmem:[#allocation2] ss:$12 sps:$4 sm:$0xff]  }
 0x622   :  { %6715 = vmatpush1.bf16.msra.mxu1 %v15154_v37  ;;  %6632 = vmatpush1.bf16.msra.mxu0 %v15155_v1  ;;  %v15167_v37 = vld [vmem:[#allocation2 + $0x90] ss:$12 sps:$4 sm:$0xff]   ;;  %v6408_v1 = vor.u32 %v6406_v47, %v6396_v40 }
 0x623   :  { %6728 = vmatprep.subr.bf16.mxu1 %v20604_v13  ;;  %13569 = vmatprep.subr.msk.bf16.mxu0 %vm2359_vm0, %v13567_v58  ;;  %v15174_v58 = vld [vmem:[#allocation2 + $0x80] ss:$12 sps:$4 sm:$0xff]  }
 0x624   :  { %v6413_v21 = vsel %vm1774_vm1, %v6408_v1, %v6412_v22  ;;  %v6244_v1 = vld [vmem:[#allocation14 + $0x8] sm:$0xff] }
 0x626   :  { %6729 = vmatpush2.bf16.msra.mxu1 %v6615_v20  ;;  %6646 = vmatpush2.bf16.msra.mxu0 %v6609_v26  ;;  %v6426_v20 = vshll.u32 %v18661_v14, 16  ;;  %v6404_v26 = vrot.slane %v6402_v16, 1  ;;  %v6243_v16 = vld [vmem:[#allocation14] sm:$0xff] }
 0x627   :  { %6730 = vmatprep.subr.bf16.mxu1 %v20604_v13  ;;  %6647 = vmatprep.subr.bf16.mxu0 %v15159_v39  ;;  %v6317_v39 = vpack.c.bf16 %v6313_v11, %v18679_v24  ;;  %v15198_v11 = vld [vmem:[#allocation2 + $0xc0] ss:$12 sps:$4 sm:$0xff]  }
 0x628   :  { %v6428_v57 = vrot.slane %v6426_v20, 1  ;;  %v6405_v10 = vsel %vm1774_vm1, %v6400_v19, %v6404_v26  ;;  %v6416_v40 = vor.u32 %v6414_v46, %v6404_v26  ;;  %v7105_v20 = vld [vmem:[#allocation14 + $0x98] sm:$0xf]  ;;  %v15205_v26 = vld [vmem:[#allocation2 + $0x278] ss:$12 sps:$4 sm:$0xff]  }
 0x629   :  { %v15202_v19 = vld [vmem:[#allocation2 + $0x270] ss:$12 sps:$4 sm:$0xff]  }
 0x62a   :  { %6731 = vmatpush2.bf16.msra.mxu1 %v15161_v4  ;;  %6648 = vmatpush2.bf16.msra.mxu0 %v15162_v38  ;;  %v15182_v4 = vld [vmem:[#allocation2 + $0x50] ss:$12 sps:$4 sm:$0xff]   ;;  %v6424_v38 = vor.u32 %v6422_v63, %v6412_v22  ;;  %v6435_v47 = vor.u32 %v6433_v54, %v6428_v57  ;;  %v6944_v22 = vsel %vm2359_vm0, %v15196_v60, 0  ;;  %v7102_v63 = vld [vmem:[#allocation14] sm:$0xfc] }
 0x62b   :  { %7029 = vmatprep.subr.bf16.mxu1 %v20604_v13  ;;  %6946 = vmatprep.subr.bf16.mxu0 %v15165_v48  ;;  %v6418_v48 = vshll.u32 %v6317_v39, 16  ;;  %v6262_v54 = vld [vmem:[#allocation14 + $0x98] sm:$0x3] }
 0x62d   :  { %6733 = vmatmul.mubr.bf16.vlgmr.msra.gmra.mxu1 %v6369_v62  ;;  %6650 = vmatmul.mubr.bf16.vlgmr.msra.gmra.mxu0 %v6369_v62  ;;  %v6420_v0 = vrot.slane %v6418_v48, 1  ;;  %v15183_v62 = vld [vmem:[#allocation2 + $0x30] ss:$12 sps:$4 sm:$0xff]   ;;  %v15209_v48 = vld [vmem:[#allocation2 + $0x260] ss:$12 sps:$4 sm:$0xff]  }
 0x62e   :  { %7030 = vmatpush1.bf16.msra.mxu1 %v15166_v55  ;;  %6947 = vmatpush1.bf16.msra.mxu0 %v15163_v6  ;;  %v15185_v6 = vld [vmem:[#allocation2 + $0x34] ss:$12 sps:$4 sm:$0xff]   ;;  %v6429_v55 = vsel %vm1774_vm1, %v6424_v38, %v6428_v57 }
 0x62f   :  { %7031 = vmatprep.subr.bf16.mxu1 %v20604_v13  ;;  %6948 = vmatprep.subr.bf16.mxu0 %v15169_v25  ;;  %v6421_v49 = vsel %vm1774_vm1, %v6416_v40, %v6420_v0  ;;  %v15187_v25 = vld [vmem:[#allocation2 + $0x18] ss:$12 sps:$4 sm:$0xff]  }
 0x630   :  { %13576 = vmatprep.mubr.msk.bf16.mxu1 %vm6211_vm7, %v6397_v17  ;;  %13571 = vmatprep.mubr.msk.bf16.mxu0 %vm6211_vm7, %v6397_v17  ;;  %v15193_v17 = vld [vmem:[#allocation2 + $0x4] ss:$12 sps:$4 sm:$0xff]  }
 0x631   :  { %v15221_v40 = vld [vmem:[#allocation2 + $0x218] ss:$12 sps:$4 sm:$0xff]  }
 0x632   :  { %7032 = vmatpush1.bf16.msra.mxu1 %v15170_v42  ;;  %6949 = vmatpush1.bf16.msra.mxu0 %v15167_v37  ;;  %v6430_v42 = vshrl.u32 %v6317_v39, 16  ;;  %v13608_v37 = vcombine.high %v6309_v3, %v6309_v3 }
 0x633   :  { %7033 = vmatprep.subr.bf16.mxu1 %v20604_v13  ;;  %6950 = vmatprep.subr.bf16.mxu0 %v15173_v15  ;;  %v13607_v15 = vcombine.low %v6309_v3, %v6309_v3  ;;  %v15235_v3 = vld [vmem:[#allocation2 + $0x2a8] ss:$0 sps:$4 sm:$0xff]  }
 0x635   :  { %6741 = vmatmul.mubr.bf16.gmra.mxu1 %v6389_v28  ;;  %6660 = vmatmul.mubr.bf16.gmra.mxu0 %v6389_v28  ;;  %v6938_v14 = vsel %vm2359_vm0, %v13607_v15, 0  ;;  %v15200_v28 = vld [vmem:[#allocation2 + $0xc4] ss:$12 sps:$4 sm:$0xff]  }
 0x636   :  { %7034 = vmatpush1.bf16.msra.mxu1 %v15174_v58  ;;  %6951 = vmatpush1.bf16.msra.mxu0 %v15171_v7  ;;  %v6432_v7 = vor.u32 %v6430_v42, %v6420_v0  ;;  %v6264_v58 = vpack.c.bf16 %v18606_v32, %v6244_v1  ;;  %v15224_v0 = vld [vmem:[#allocation2 + $0x1fc] ss:$12 sps:$4 sm:$0xff]   ;;  %v6261_v42 = vld [vmem:[#allocation14 + $0x90] sm:$0x3] }
 0x637   :  { %7035 = vmatprep.subr.bf16.mxu1 %v20604_v13  ;;  %6952 = vmatprep.subr.bf16.mxu0 %v15177_v27  ;;  %v15204_v27 = vld [vmem:[#allocation2 + $0x274] ss:$12 sps:$4 sm:$0xff]   ;;  %v15240_v1 = vld [vmem:[#allocation2 + $0x290] ss:$12 sps:$4 sm:$0xff]  }
 0x638   :  { %13577 = vmatprep.mubr.msk.bf16.mxu1 %vm6211_vm7, %v6413_v21  ;;  %13572 = vmatprep.mubr.msk.bf16.mxu0 %vm6211_vm7, %v6413_v21  ;;  %v7103_v21 = vld [vmem:[#allocation14 + $0x8] sm:$0xfc] }
 0x639   :  { %v7107_v39 = vpack.c.bf16 %v18606_v32, %v7103_v21 }
 0x63a   :  { %7036 = vmatpush1.bf16.msra.mxu1 %v15178_v56  ;;  %6953 = vmatpush1.bf16.msra.mxu0 %v15175_v52  ;;  %v6263_v56 = vpack.c.bf16 %v18608_v53, %v6243_v16  ;;  %v7106_v52 = vpack.c.bf16 %v18608_v53, %v7102_v63 }
 0x63b   :  { %7037 = vmatprep.subr.bf16.mxu1 %v20604_v13  ;;  %6954 = vmatprep.subr.bf16.mxu0 %v15181_v33  ;;  %v7109_v33 = vpack.c.bf16 %v7105_v20, %v18652_v59 }
 0x63c   :  { %v7159_v38 = vrot.slane %v7106_v52, 1 }
 0x63d   :  { %6749 = vmatmul.mubr.bf16.gmra.mxu1 %v6405_v10  ;;  %6670 = vmatmul.mubr.bf16.gmra.mxu0 %v6405_v10  ;;  %v18714_v57 = vrot.slane %v7109_v33, 1  ;;  %v15208_v10 = vld [vmem:[#allocation2 + $0x25c] ss:$12 sps:$4 sm:$0xff]  }
 0x63e   :  { %7038 = vmatpush1.bf16.msra.mxu1 %v15182_v4  ;;  %6955 = vmatpush1.bf16.msra.mxu0 %v15179_v2  ;;  %v7162_v4 = vrot.slane %v7107_v39, 1  ;;  %v18724_v32 = vsel %vm3785_vm3, %v7159_v38, %v7160_v30  ;;  %v15206_v2 = vld [vmem:[#allocation2 + $0x258] ss:$12 sps:$4 sm:$0xff]   ;;  %v15213_v30 = vld [vmem:[#allocation2 + $0x248] ss:$12 sps:$4 sm:$0xff]  }
 0x63f   :  { %7039 = vmatprep.subr.bf16.mxu1 %v20604_v13  ;;  %6956 = vmatprep.subr.bf16.mxu0 %v15185_v6  ;;  %v18730_v53 = vsel %vm3785_vm3, %v7171_v8, %v18714_v57  ;;  %v15210_v8 = vld [vmem:[#allocation2 + $0x240] ss:$12 sps:$4 sm:$0xff]  }
 0x640   :  { %13578 = vmatprep.mubr.msk.bf16.mxu1 %vm6211_vm7, %v6429_v55  ;;  %13573 = vmatprep.mubr.msk.bf16.mxu0 %vm6211_vm7, %v6429_v55  ;;  %v18719_v46 = vsel %vm3785_vm3, %v7162_v4, %v7163_v12  ;;  %v15212_v12 = vld [vmem:[#allocation2 + $0x244] ss:$12 sps:$4 sm:$0xff]   ;;  %v15216_v6 = vld [vmem:[#allocation2 + $0x22c] ss:$12 sps:$4 sm:$0xff]  }
 0x641   :  { %v15217_v55 = vld [vmem:[#allocation2 + $0x230] ss:$12 sps:$4 sm:$0xff]  }
 0x642   :  { %7040 = vmatpush1.bf16.msra.mxu1 %v15186_v23  ;;  %6957 = vmatpush1.bf16.msra.mxu0 %v15183_v62  ;;  %v15214_v23 = vld [vmem:[#allocation2 + $0x228] ss:$12 sps:$4 sm:$0xff]   ;;  %v15225_v62 = vld [vmem:[#allocation2 + $0x200] ss:$12 sps:$4 sm:$0xff]  }
 0x643   :  { %7041 = vmatprep.subr.bf16.mxu1 %v20604_v13  ;;  %6958 = vmatprep.subr.bf16.mxu0 %v15189_v44  ;;  %v15222_v44 = vld [vmem:[#allocation2 + $0x1f8] ss:$12 sps:$4 sm:$0xff]  }
 0x645   :  { %6757 = vmatmul.mubr.bf16.gmra.mxu1 %v6421_v49  ;;  %6680 = vmatmul.mubr.bf16.gmra.mxu0 %v6421_v49  ;;  %v15229_v49 = vld [vmem:[#allocation2 + $0x1e8] ss:$12 sps:$4 sm:$0xff]  }
 0x646   :  { %7042 = vmatpush1.bf16.msra.mxu1 %v15190_v9  ;;  %6959 = vmatpush1.bf16.msra.mxu0 %v15187_v25  ;;  %v15226_v9 = vld [vmem:[#allocation2 + $0x1e0] ss:$12 sps:$4 sm:$0xff]  }
 0x647   :  { %7043 = vmatprep.subr.bf16.mxu1 %v20604_v13  ;;  %6960 = vmatprep.subr.bf16.mxu0 %v15193_v17  ;;  %v15232_v25 = vld [vmem:[#allocation2 + $0x1cc] ss:$12 sps:$4 sm:$0xff]   ;;  %v6272_v17 = vpack.c.bf16 %v6262_v54, %v18652_v59  ;;  %v6271_v59 = vpack.c.bf16 %v6261_v42, %v18679_v24 }
 0x648   :  { %13579 = vmatprep.mubr.msk.bf16.mxu1 %vm6211_vm7, %v6435_v47  ;;  %13574 = vmatprep.mubr.msk.bf16.mxu0 %vm6211_vm7, %v6435_v47  ;;  %v7147_v47 = vld [vmem:[#allocation2 + $0x2a0] sm:$0xff] }
 0x649   :  { %v13648_v60 = vcombine.low %v7147_v47, %v7147_v47 }
 0x64a   :  { %7044 = vmatpush1.bf16.msra.mxu1 %v15194_v50  ;;  %6961 = vmatpush1.bf16.msra.mxu0 %v15191_v29  ;;  %v15233_v29 = vld [vmem:[#allocation2 + $0x1d0] ss:$12 sps:$4 sm:$0xff]   ;;  %v13649_v50 = vcombine.high %v7147_v47, %v7147_v47 }
 0x64b   :  { %7057 = vmatprep.subr.bf16.mxu1 %v20604_v13  ;;  %13610 = vmatprep.subr.msk.bf16.mxu0 %vm2359_vm0, %v13608_v37  ;;  %v7356_v37 = vsel %vm2359_vm0, %v15235_v3, 0  ;;  %v7350_v15 = vsel %vm2359_vm0, %v13648_v60, 0 }
 0x64d   :  { %6765 = vmatmul.mubr.bf16.gmra.mxu1 %v6432_v7  ;;  %6690 = vmatmul.mubr.bf16.gmra.mxu0 %v6432_v7  ;;  %v15239_v7 = vld [vmem:[#allocation2 + $0x28c] ss:$12 sps:$4 sm:$0xff]  }
 0x64e   :  { %7058 = vmatpush2.bf16.msra.mxu1 %v6944_v22  ;;  %6975 = vmatpush2.bf16.msra.mxu0 %v6938_v14  ;;  %v15237_v22 = vld [vmem:[#allocation2 + $0x288] ss:$12 sps:$4 sm:$0xff]   ;;  %v7169_v14 = vrot.slane %v18650_v35, 1 }
 0x64f   :  { %7059 = vmatprep.subr.bf16.mxu1 %v20604_v13  ;;  %6976 = vmatprep.subr.bf16.mxu0 %v15200_v28  ;;  %v7104_v28 = vld [vmem:[#allocation14 + $0x90] sm:$0xf] }
 0x650   :  { %13616 = vmatprep.mubr.msk.bf16.mxu1 %vm6211_vm7, %v6264_v58  ;;  %13611 = vmatprep.mubr.msk.bf16.mxu0 %vm6211_vm7, %v6264_v58  ;;  %v7170_v58 = vsel %vm3785_vm3, %v7165_v36, %v7169_v14 }
 0x652   :  { %7060 = vmatpush2.bf16.msra.mxu1 %v15201_v51  ;;  %6977 = vmatpush2.bf16.msra.mxu0 %v15198_v11  ;;  %v7108_v51 = vpack.c.bf16 %v7104_v28, %v18679_v24 }
 0x653   :  { %7441 = vmatprep.subr.bf16.mxu1 %v20604_v13  ;;  %7358 = vmatprep.subr.bf16.mxu0 %v15204_v27 }
 0x655   :  { %7062 = vmatmul.mubr.bf16.vlgmr.msra.gmra.mxu1 %v6263_v56  ;;  %6979 = vmatmul.mubr.bf16.vlgmr.msra.gmra.mxu0 %v6263_v56 }
 0x656   :  { %7442 = vmatpush1.bf16.msra.mxu1 %v15205_v26  ;;  %7359 = vmatpush1.bf16.msra.mxu0 %v15202_v19 }
 0x657   :  { %7443 = vmatprep.subr.bf16.mxu1 %v20604_v13  ;;  %7360 = vmatprep.subr.bf16.mxu0 %v15208_v10 }
 0x658   :  { %13617 = vmatprep.mubr.msk.bf16.mxu1 %vm6211_vm7, %v18611_v61  ;;  %13612 = vmatprep.mubr.msk.bf16.mxu0 %vm6211_vm7, %v18611_v61  ;;  %v15220_v61 = vld [vmem:[#allocation2 + $0x214] ss:$12 sps:$4 sm:$0xff]  }
 0x65a   :  { %7444 = vmatpush1.bf16.msra.mxu1 %v15209_v48  ;;  %7361 = vmatpush1.bf16.msra.mxu0 %v15206_v2 }
 0x65b   :  { %7445 = vmatprep.subr.bf16.mxu1 %v20604_v13  ;;  %7362 = vmatprep.subr.bf16.mxu0 %v15212_v12 }
 0x65d   :  { %7070 = vmatmul.mubr.bf16.gmra.mxu1 %v18616_v31  ;;  %6989 = vmatmul.mubr.bf16.gmra.mxu0 %v18616_v31  ;;  %v15218_v31 = vld [vmem:[#allocation2 + $0x210] ss:$12 sps:$4 sm:$0xff]  }
 0x65e   :  { %7446 = vmatpush1.bf16.msra.mxu1 %v15213_v30  ;;  %7363 = vmatpush1.bf16.msra.mxu0 %v15210_v8 }
 0x65f   :  { %7447 = vmatprep.subr.bf16.mxu1 %v20604_v13  ;;  %7364 = vmatprep.subr.bf16.mxu0 %v15216_v6 }
 0x660   :  { %13618 = vmatprep.mubr.msk.bf16.mxu1 %vm6211_vm7, %v18623_v45  ;;  %13613 = vmatprep.mubr.msk.bf16.mxu0 %vm6211_vm7, %v18623_v45  ;;  %v15228_v45 = vld [vmem:[#allocation2 + $0x1e4] ss:$12 sps:$4 sm:$0xff]  }
 0x662   :  { %7448 = vmatpush1.bf16.msra.mxu1 %v15217_v55  ;;  %7365 = vmatpush1.bf16.msra.mxu0 %v15214_v23 }
 0x663   :  { %7449 = vmatprep.subr.bf16.mxu1 %v20604_v13  ;;  %7366 = vmatprep.subr.bf16.mxu0 %v15220_v61 }
 0x665   :  { %7078 = vmatmul.mubr.bf16.gmra.mxu1 %v18631_v41  ;;  %6999 = vmatmul.mubr.bf16.gmra.mxu0 %v18631_v41  ;;  %v20185_v41 = vmov 0.0  }
 0x666   :  { %7450 = vmatpush1.bf16.msra.mxu1 %v15221_v40  ;;  %7367 = vmatpush1.bf16.msra.mxu0 %v15218_v31 }
 0x667   :  { %7451 = vmatprep.subr.bf16.mxu1 %v20604_v13  ;;  %7368 = vmatprep.subr.bf16.mxu0 %v15224_v0 }
 0x668   :  { %13619 = vmatprep.mubr.msk.bf16.mxu1 %vm6211_vm7, %v18635_v34  ;;  %13614 = vmatprep.mubr.msk.bf16.mxu0 %vm6211_vm7, %v18635_v34  ;;  %v15230_v34 = vld [vmem:[#allocation2 + $0x1c8] ss:$12 sps:$4 sm:$0xff]  }
 0x66a   :  { %7452 = vmatpush1.bf16.msra.mxu1 %v15225_v62  ;;  %7369 = vmatpush1.bf16.msra.mxu0 %v15222_v44 }
 0x66b   :  { %7453 = vmatprep.subr.bf16.mxu1 %v20604_v13  ;;  %7370 = vmatprep.subr.bf16.mxu0 %v15228_v45 }
 0x66d   :  { %7086 = vmatmul.mubr.bf16.gmra.mxu1 %v18650_v35  ;;  %7009 = vmatmul.mubr.bf16.gmra.mxu0 %v18650_v35 }
 0x66e   :  { %7454 = vmatpush1.bf16.msra.mxu1 %v15229_v49  ;;  %7371 = vmatpush1.bf16.msra.mxu0 %v15226_v9 }
 0x66f   :  { %7455 = vmatprep.subr.bf16.mxu1 %v20604_v13  ;;  %7372 = vmatprep.subr.bf16.mxu0 %v15232_v25 }
 0x670   :  { %13620 = vmatprep.mubr.msk.bf16.mxu1 %vm6211_vm7, %v6272_v17  ;;  %13615 = vmatprep.mubr.msk.bf16.mxu0 %vm6211_vm7, %v6272_v17 }
 0x672   :  { %7456 = vmatpush1.bf16.msra.mxu1 %v15233_v29  ;;  %7373 = vmatpush1.bf16.msra.mxu0 %v15230_v34 }
 0x673   :  { %7469 = vmatprep.subr.bf16.mxu1 %v20604_v13  ;;  %13651 = vmatprep.subr.msk.bf16.mxu0 %vm2359_vm0, %v13649_v50 }
 0x675   :  { %7094 = vmatmul.mubr.bf16.gmra.mxu1 %v6271_v59  ;;  %7019 = vmatmul.mubr.bf16.gmra.mxu0 %v6271_v59 }
 0x676   :  { %7470 = vmatpush2.bf16.msra.mxu1 %v7356_v37  ;;  %7387 = vmatpush2.bf16.msra.mxu0 %v7350_v15 }
 0x677   :  { %7471 = vmatprep.subr.bf16.mxu1 %v20604_v13  ;;  %7388 = vmatprep.subr.bf16.mxu0 %v15239_v7 }
 0x678   :  { %13657 = vmatprep.mubr.msk.bf16.mxu1 %vm6211_vm7, %v18719_v46  ;;  %13652 = vmatprep.mubr.msk.bf16.mxu0 %vm6211_vm7, %v18719_v46 }
 0x67a   :  { %7472 = vmatpush2.bf16.msra.mxu1 %v15240_v1  ;;  %7389 = vmatpush2.bf16.msra.mxu0 %v15237_v22 }
 0x67b   :  { %14535 = vmatprep.subr.bf16.mxu1 %v20185_v41 }
 0x67d   :  { %7474 = vmatmul.mubr.bf16.vlgmr.msra.gmra.mxu1 %v18724_v32  ;;  %7391 = vmatmul.mubr.bf16.vlgmr.msra.gmra.mxu0 %v18724_v32 }
 0x67e   :  { %13658 = vmatprep.mubr.msk.bf16.mxu1 %vm6211_vm7, %v18645_v5  ;;  %13653 = vmatprep.mubr.msk.bf16.mxu0 %vm6211_vm7, %v18645_v5  ;;  %v7173_v5 = vrot.slane %v7108_v51, 1 }
 0x680   :  { %v7174_v35 = vsel %vm3785_vm3, %v7169_v14, %v7173_v5 }
 0x685   :  { %7482 = vmatmul.mubr.bf16.gmra.mxu1 %v18668_v18  ;;  %7401 = vmatmul.mubr.bf16.gmra.mxu0 %v18668_v18 }
 0x686   :  { %13659 = vmatprep.mubr.msk.bf16.mxu1 %vm6211_vm7, %v18676_v43  ;;  %13654 = vmatprep.mubr.msk.bf16.mxu0 %vm6211_vm7, %v18676_v43 }
 0x68d   :  { %7490 = vmatmul.mubr.bf16.gmra.mxu1 %v7170_v58  ;;  %7411 = vmatmul.mubr.bf16.gmra.mxu0 %v7170_v58 }
 0x68e   :  { %13660 = vmatprep.mubr.msk.bf16.mxu1 %vm6211_vm7, %v18730_v53  ;;  %13655 = vmatprep.mubr.msk.bf16.mxu0 %vm6211_vm7, %v18730_v53 }
 0x695   :  { %7498 = vmatmul.mubr.bf16.gmra.mxu1 %v7174_v35  ;;  %7421 = vmatmul.mubr.bf16.gmra.mxu0 %v7174_v35 }
 0x696   :  { %13661 = vmatprep.mubr.msk.bf16.mxu1 %vm6211_vm7, %v18714_v57  ;;  %13656 = vmatprep.mubr.msk.bf16.mxu0 %vm6211_vm7, %v18714_v57 }
 0x69d   :  { %7506 = vmatmul.mubr.bf16.gmra.mxu1 %v7173_v5  ;;  %7431 = vmatmul.mubr.bf16.gmra.mxu0 %v7173_v5 }
 0x69e   :  { %7706 = vmatprep.mubr.bf16.mxu0 %v20604_v13  ;;  %14545 = vmatprep.mubr.msk.bf16.mxu1 %vm15511_vm9, %v20185_v41 }
 0x6ed   :  { %v6734_v36 = vpop.f32.mrf.mxu1  ;;  %v6651_v18 = vpop.f32.mrf.mxu0 }
 0x6ef   :  { %v6736_v43 = vpop.f32.mrf.mxu1  ;;  %v6653_v24 = vpop.f32.mrf.mxu0 }
 0x6f1   :  { %v6737_v16 = vpop.f32.mrf.mxu1  ;;  %v6655_v11 = vpop.f32.mrf.mxu0 }
 0x6f3   :  { %v6739_v27 = vpop.f32.mrf.mxu1  ;;  %v6657_v21 = vpop.f32.mrf.mxu0 }
 0x6f5   :  { %v6742_v63 = vpop.f32.mrf.mxu1  ;;  %v6661_v20 = vpop.f32.mrf.mxu0 }
 0x6f7   :  { %v6744_v56 = vpop.f32.mrf.mxu1  ;;  %v6663_v19 = vpop.f32.mrf.mxu0 }
 0x6f9   :  { %v6745_v26 = vpop.f32.mrf.mxu1  ;;  %v6665_v39 = vpop.f32.mrf.mxu0 }
 0x6fb   :  { %v6747_v52 = vpop.f32.mrf.mxu1  ;;  %v6667_v33 = vpop.f32.mrf.mxu0 }
 0x6fd   :  { %v6750_v4 = vpop.f32.mrf.mxu1  ;;  %v6671_v38 = vpop.f32.mrf.mxu0 }
 0x6ff   :  { %v6752_v57 = vpop.f32.mrf.mxu1  ;;  %v6673_v10 = vpop.f32.mrf.mxu0 }
 0x701   :  { %v18800_v46 = vpop.f32.mrf.mxu1  ;;  %v6675_v32 = vpop.f32.mrf.mxu0 }
 0x703   :  { %v6755_v53 = vpop.f32.mrf.mxu1  ;;  %v18802_v48 = vpop.f32.mrf.mxu0 }
 0x705   :  { %v18804_v2 = vpop.f32.mrf.mxu1  ;;  %v18806_v12 = vpop.f32.mrf.mxu0 }
 0x707   :  { %v6760_v30 = vpop.f32.mrf.mxu1  ;;  %v18808_v8 = vpop.f32.mrf.mxu0 }
 0x709   :  { %v18810_v6 = vpop.f32.mrf.mxu1  ;;  %v18812_v55 = vpop.f32.mrf.mxu0 }
 0x70b   :  { %v6763_v23 = vpop.f32.mrf.mxu1  ;;  %v18814_v61 = vpop.f32.mrf.mxu0 }
 0x70d   :  { %v18816_v40 = vpop.f32.mrf.mxu1  ;;  %v18818_v31 = vpop.f32.mrf.mxu0 }
 0x70f   :  { %v6768_v0 = vpop.f32.mrf.mxu1  ;;  %v18820_v62 = vpop.f32.mrf.mxu0 }
 0x711   :  { %v18822_v44 = vpop.f32.mrf.mxu1  ;;  %v18824_v45 = vpop.f32.mrf.mxu0 }
 0x713   :  { %v6771_v54 = vpop.f32.mrf.mxu1  ;;  %v18826_v49 = vpop.f32.mrf.mxu0 }
 0x715   :  { %v7063_v9 = vpop.f32.mrf.mxu1  ;;  %v6980_v17 = vpop.f32.mrf.mxu0 }
 0x716   :  { %v7064_v25 = vadd.f32 %v7063_v9, %v6734_v36  ;;  %v6981_v47 = vadd.f32 %v6980_v17, %v6651_v18 }
 0x717   :  { %v7065_v29 = vpop.f32.mrf.mxu1  ;;  %v6982_v42 = vpop.f32.mrf.mxu0 }
 0x718   :  { %v6983_v34 = vadd.f32 %v6982_v42, %v6653_v24 }
 0x719   :  { %v7066_v3 = vpop.f32.mrf.mxu1  ;;  %v6984_v60 = vpop.f32.mrf.mxu0 }
 0x71a   :  { %v7067_v50 = vadd.f32 %v7066_v3, %v6737_v16  ;;  %v6985_v59 = vadd.f32 %v6984_v60, %v6655_v11 }
 0x71b   :  { %v7068_v37 = vpop.f32.mrf.mxu1  ;;  %v6986_v15 = vpop.f32.mrf.mxu0 }
 0x71c   :  { %v18828_v7 = vadd.f32 %v6986_v15, %v6657_v21  ;;  %v7544_v15 = vld [vmem:[%s20605_s3] sm:$0x7] }
 0x71d   :  { %v7071_v1 = vpop.f32.mrf.mxu1  ;;  %v6990_v14 = vpop.f32.mrf.mxu0 }
 0x71e   :  { %v18830_v22 = vadd.f32 %v7071_v1, %v6742_v63  ;;  %v18832_v28 = vadd.f32 %v6990_v14, %v6661_v20 }
 0x71f   :  { %v7073_v58 = vpop.f32.mrf.mxu1  ;;  %v6992_v51 = vpop.f32.mrf.mxu0 }
 0x720   :  { %v18834_v5 = vadd.f32 %v6992_v51, %v6663_v19  ;;  %v20606_v51 = vld [vmem:[#allocation286_spill] sm:$0xff] }
 0x721   :  { %v7074_v35 = vpop.f32.mrf.mxu1  ;;  %v6994_v18 = vpop.f32.mrf.mxu0 }
 0x722   :  { %v18836_v36 = vadd.f32 %v7074_v35, %v6745_v26  ;;  %v18838_v43 = vadd.f32 %v6994_v18, %v6665_v39  ;;  %v18880_v35 = vrot.slane %v7544_v15, %v20606_v51 }
 0x723   :  { %v7076_v24 = vpop.f32.mrf.mxu1  ;;  %v6996_v16 = vpop.f32.mrf.mxu0 }
 0x724   :  { %v18840_v11 = vadd.f32 %v6996_v16, %v6667_v33  ;;  %v20607_v16 = vld [vmem:[#allocation320_spill] sm:$0xff] }
 0x725   :  { %v7079_v27 = vpop.f32.mrf.mxu1  ;;  %v7000_v63 = vpop.f32.mrf.mxu0 }
 0x726   :  { %v18842_v21 = vadd.f32 %v7079_v27, %v6750_v4  ;;  %v18844_v20 = vadd.f32 %v7000_v63, %v6671_v38  ;;  %v18883_v27 = vrot.slane %v7544_v15, %v20607_v16 }
 0x727   :  { %v7081_v56 = vpop.f32.mrf.mxu1  ;;  %v7002_v52 = vpop.f32.mrf.mxu0 }
 0x728   :  { %v18846_v19 = vadd.f32 %v7002_v52, %v6673_v10 }
 0x729   :  { %v18848_v57 = vpop.f32.mrf.mxu1  ;;  %v7004_v26 = vpop.f32.mrf.mxu0 }
 0x72a   :  { %v18850_v53 = vadd.f32 %v7004_v26, %v6675_v32  ;;  %v20608_v26 = vld [vmem:[#allocation319_spill] sm:$0xff] }
 0x72b   :  { %v7084_v39 = vpop.f32.mrf.mxu1  ;;  %v18852_v30 = vpop.f32.mrf.mxu0 }
 0x72c   :  { %v18886_v39 = vrot.slane %v7544_v15, %v20608_v26 }
 0x72d   :  { %v18854_v33 = vpop.f32.mrf.mxu1  ;;  %v18856_v4 = vpop.f32.mrf.mxu0 }
 0x72f   :  { %v7089_v23 = vpop.f32.mrf.mxu1  ;;  %v18858_v38 = vpop.f32.mrf.mxu0 }
 0x731   :  { %v18860_v0 = vpop.f32.mrf.mxu1  ;;  %v18862_v10 = vpop.f32.mrf.mxu0 }
 0x733   :  { %v7092_v54 = vpop.f32.mrf.mxu1  ;;  %v18864_v9 = vpop.f32.mrf.mxu0 }
 0x735   :  { %v18866_v32 = vpop.f32.mrf.mxu1  ;;  %v18868_v17 = vpop.f32.mrf.mxu0 }
 0x737   :  { %v7097_v29 = vpop.f32.mrf.mxu1  ;;  %v18870_v42 = vpop.f32.mrf.mxu0 }
 0x739   :  { %v18872_v3 = vpop.f32.mrf.mxu1  ;;  %v18874_v60 = vpop.f32.mrf.mxu0 }
 0x73b   :  { %v7100_v37 = vpop.f32.mrf.mxu1  ;;  %v18877_v1 = vpop.f32.mrf.mxu0 }
 0x73d   :  { %v7475_v14 = vpop.f32.mrf.mxu1  ;;  %v7392_v18 = vpop.f32.mrf.mxu0 }
 0x73e   :  { %v7516_v58 = vadd.f32 %v7475_v14, %v7064_v25  ;;  %v7514_v24 = vadd.f32 %v7392_v18, %v6981_v47 }
 0x73f   :  { %v7477_v63 = vpop.f32.mrf.mxu1  ;;  %v7394_v56 = vpop.f32.mrf.mxu0 }
 0x740   :  { %v7515_v52 = vadd.f32 %v7394_v56, %v6983_v34  ;;  %v7563_v54 = vadd.f32 %v18880_v35, %v7516_v58  ;;  %v7561_v25 = vadd.f32 %v18883_v27, %v7514_v24 }
 0x741   :  { %v7478_v23 = vpop.f32.mrf.mxu1  ;;  %v7396_v37 = vpop.f32.mrf.mxu0 }
 0x742   :  { %v7519_v29 = vadd.f32 %v7478_v23, %v7067_v50  ;;  %v7517_v14 = vadd.f32 %v7396_v37, %v6985_v59  ;;  %v7562_v16 = vadd.f32 %v18886_v39, %v7515_v52  ;;  %v7593_v56 = vmax.f32 %v7563_v54, 0.0 }
 0x743   :  { %v7480_v41 = vpop.f32.mrf.mxu1  ;;  %v7398_v18 = vpop.f32.mrf.mxu0  ;;  %v7591_v23 = vmax.f32 %v7561_v25, 0.0 }
 0x744   :  { %v7566_v47 = vadd.f32 %v18880_v35, %v7519_v29  ;;  %v7564_v63 = vadd.f32 %v18883_v27, %v7517_v14  ;;  %v7518_v34 = vadd.f32 %v7398_v18, %v18828_v7  ;;  %v7592_v37 = vmax.f32 %v7562_v16, 0.0 }
 0x745   :  { %v7483_v15 = vpop.f32.mrf.mxu1  ;;  %v7402_v50 = vpop.f32.mrf.mxu0 }
 0x746   :  { %v7596_v26 = vmax.f32 %v7566_v47, 0.0  ;;  %v7522_v58 = vadd.f32 %v7483_v15, %v18830_v22  ;;  %v7594_v51 = vmax.f32 %v7564_v63, 0.0  ;;  %v7565_v59 = vadd.f32 %v18886_v39, %v7518_v34 }
 0x747   :  { %v7520_v41 = vadd.f32 %v7402_v50, %v18832_v28  ;;  %v7485_v24 = vpop.f32.mrf.mxu1  ;;  %v7404_v52 = vpop.f32.mrf.mxu0 }
 0x748   :  { %v18897_v29 = vpack.c.bf16 %v7596_v26, %v7593_v56  ;;  %v18899_v14 = vpack.c.bf16 %v7594_v51, %v7591_v23  ;;  %v7595_v7 = vmax.f32 %v7565_v59, 0.0  ;;  %v7521_v54 = vadd.f32 %v7404_v52, %v18834_v5 }
 0x749   :  { %v7486_v47 = vpop.f32.mrf.mxu1  ;;  %v7569_v22 = vadd.f32 %v18880_v35, %v7522_v58  ;;  %v7406_v18 = vpop.f32.mrf.mxu0  ;;  %v7567_v63 = vadd.f32 %v18883_v27, %v7520_v41 }
 0x74a   :  { %v7525_v25 = vadd.f32 %v7486_v47, %v18836_v36  ;;  %v7523_v28 = vadd.f32 %v7406_v18, %v18838_v43  ;;  %v18906_v26 = vpack.c.bf16 %v7595_v7, %v7592_v37  ;;  %v7568_v15 = vadd.f32 %v18886_v39, %v7521_v54 }
 0x74b   :  { %v7488_v34 = vpop.f32.mrf.mxu1  ;;  %v7408_v51 = vpop.f32.mrf.mxu0  ;;  %v7599_v50 = vmax.f32 %v7569_v22, 0.0  ;;  %v7597_v41 = vmax.f32 %v7567_v63, 0.0  ;;  %v7083_v7 = vadd.f32 %v18848_v57, %v18800_v46 }
 0x74c   :  { %v7572_v16 = vadd.f32 %v18880_v35, %v7525_v25  ;;  %v7570_v5 = vadd.f32 %v18883_v27, %v7523_v28  ;;  %v7524_v56 = vadd.f32 %v7408_v51, %v18840_v11  ;;  %v7598_v11 = vmax.f32 %v7568_v15, 0.0 }
 0x74d   :  { %v7491_v58 = vpop.f32.mrf.mxu1  ;;  %v7412_v59 = vpop.f32.mrf.mxu0  ;;  %v7088_v15 = vadd.f32 %v18854_v33, %v18804_v2 }
 0x74e   :  { %v7602_v36 = vmax.f32 %v7572_v16, 0.0  ;;  %v7528_v23 = vadd.f32 %v7491_v58, %v18842_v21  ;;  %v7600_v43 = vmax.f32 %v7570_v5, 0.0  ;;  %v7571_v24 = vadd.f32 %v18886_v39, %v7524_v56 }
 0x74f   :  { %v7526_v52 = vadd.f32 %v7412_v59, %v18844_v20  ;;  %v7493_v37 = vpop.f32.mrf.mxu1  ;;  %v7414_v47 = vpop.f32.mrf.mxu0  ;;  %v7007_v20 = vadd.f32 %v18852_v30, %v18802_v48  ;;  %v7011_v56 = vadd.f32 %v18856_v4, %v18806_v12  ;;  %v7091_v12 = vadd.f32 %v18860_v0, %v18810_v6 }
 0x750   :  { %v18917_v54 = vpack.c.bf16 %v7602_v36, %v7599_v50  ;;  %v18919_v25 = vpack.c.bf16 %v7600_v43, %v7597_v41  ;;  %v7601_v22 = vmax.f32 %v7571_v24, 0.0  ;;  %v7527_v21 = vadd.f32 %v7414_v47, %v18846_v19 }
 0x751   :  { %v7494_v18 = vpop.f32.mrf.mxu1  ;;  %v7575_v63 = vadd.f32 %v18880_v35, %v7528_v23  ;;  %v7416_v34 = vpop.f32.mrf.mxu0  ;;  %v7573_v16 = vadd.f32 %v18883_v27, %v7526_v52  ;;  %v7015_v4 = vadd.f32 %v18862_v10, %v18812_v55 }
 0x752   :  { %v7531_v28 = vadd.f32 %v7494_v18, %v7083_v7  ;;  %v7529_v46 = vadd.f32 %v7416_v34, %v18850_v53  ;;  %v18927_v51 = vpack.c.bf16 %v7601_v22, %v7598_v11  ;;  %v7574_v58 = vadd.f32 %v18886_v39, %v7527_v21 }
 0x753   :  { %v7496_v57 = vpop.f32.mrf.mxu1  ;;  %v7418_v5 = vpop.f32.mrf.mxu0  ;;  %v7013_v53 = vadd.f32 %v18858_v38, %v18808_v8  ;;  %v7605_v36 = vmax.f32 %v7575_v63, 0.0  ;;  %v7603_v2 = vmax.f32 %v7573_v16, 0.0  ;;  %v7096_v34 = vadd.f32 %v18866_v32, %v18816_v40 }
 0x754   :  { %v7578_v19 = vadd.f32 %v18880_v35, %v7531_v28  ;;  %v7576_v48 = vadd.f32 %v18883_v27, %v7529_v46  ;;  %v7530_v30 = vadd.f32 %v7418_v5, %v7007_v20  ;;  %v7604_v8 = vmax.f32 %v7574_v58, 0.0 }
 0x755   :  { %v7499_v50 = vpop.f32.mrf.mxu1  ;;  %v7422_v41 = vpop.f32.mrf.mxu0  ;;  %v7017_v28 = vadd.f32 %v18864_v9, %v18814_v61  ;;  %v7021_v46 = vadd.f32 %v18868_v17, %v18818_v31  ;;  %v7099_v31 = vadd.f32 %v18872_v3, %v18822_v44  ;;  %v7025_v17 = vadd.f32 %v18874_v60, %v18824_v45 }
 0x756   :  { %v7608_v23 = vmax.f32 %v7578_v19, 0.0  ;;  %v7534_v59 = vadd.f32 %v7499_v50, %v7088_v15  ;;  %v7606_v33 = vmax.f32 %v7576_v48, 0.0  ;;  %v7577_v43 = vadd.f32 %v18886_v39, %v7530_v30 }
 0x757   :  { %v7532_v24 = vadd.f32 %v7422_v41, %v7011_v56  ;;  %v7501_v52 = vpop.f32.mrf.mxu1  ;;  %v7424_v7 = vpop.f32.mrf.mxu0  ;;  %v7023_v19 = vadd.f32 %v18870_v42, %v18820_v62 }
 0x758   :  { %v18943_v37 = vpack.c.bf16 %v7608_v23, %v7605_v36  ;;  %v18945_v38 = vpack.c.bf16 %v7606_v33, %v7603_v2  ;;  %v7607_v47 = vmax.f32 %v7577_v43, 0.0  ;;  %v7533_v11 = vadd.f32 %v7424_v7, %v7013_v53 }
 0x759   :  { %v7502_v22 = vpop.f32.mrf.mxu1  ;;  %v7581_v21 = vadd.f32 %v18880_v35, %v7534_v59  ;;  %v7426_v63 = vpop.f32.mrf.mxu0  ;;  %v7579_v6 = vadd.f32 %v18883_v27, %v7532_v24  ;;  %v7027_v52 = vadd.f32 %v18877_v1, %v18826_v49 }
 0x75a   :  { %v7537_v18 = vadd.f32 %v7502_v22, %v7091_v12  ;;  %v7535_v0 = vadd.f32 %v7426_v63, %v7015_v4  ;;  %v18951_v10 = vpack.c.bf16 %v7607_v47, %v7604_v8  ;;  %v7580_v57 = vadd.f32 %v18886_v39, %v7533_v11 }
 0x75b   :  { %v7504_v55 = vpop.f32.mrf.mxu1  ;;  %v7428_v16 = vpop.f32.mrf.mxu0  ;;  %v7611_v5 = vmax.f32 %v7581_v21, 0.0  ;;  %v7609_v40 = vmax.f32 %v7579_v6, 0.0 }
 0x75c   :  { %v7584_v20 = vadd.f32 %v18880_v35, %v7537_v18  ;;  %v7582_v15 = vadd.f32 %v18883_v27, %v7535_v0  ;;  %v7536_v61 = vadd.f32 %v7428_v16, %v7017_v28  ;;  %v7610_v62 = vmax.f32 %v7580_v57, 0.0  ;;  %v15245_v16 = vld [vmem:[%s20611_s14 + $0x8] sm:$0xff]  }
 0x75d   :  { %v7507_v9 = vpop.f32.mrf.mxu1  ;;  %v7432_v48 = vpop.f32.mrf.mxu0  ;;  %v20609_v55 = vmov 0.0   ;;  %v20617_v57 = vld [vmem:[#allocation80_spill] sm:$0xff] }
 0x75e   :  { %v7614_v56 = vmax.f32 %v7584_v20, 0.0  ;;  %v7540_v58 = vadd.f32 %v7507_v9, %v7096_v34  ;;  %v7612_v32 = vmax.f32 %v7582_v15, 0.0  ;;  %v7583_v30 = vadd.f32 %v18886_v39, %v7536_v61  ;;  %v15242_v34 = vld [vmem:[%s20610_s8 + $0x8] sm:$0xff]   ;;  %v15243_v20 = vld [vmem:[%s20610_s8 + $0x10] ss:$0 sps:$4 sm:$0xff]  }
 0x75f   :  { %v7538_v50 = vadd.f32 %v7432_v48, %v7021_v46  ;;  %v7509_v53 = vpop.f32.mrf.mxu1  ;;  %v7434_v23 = vpop.f32.mrf.mxu0  ;;  %v20616_v46 = vld [vmem:[#allocation81_spill] sm:$0xff]  ;;  %v20618_v9 = vld [vmem:[#allocation79_spill] sm:$0xff] }
 0x760   :  { %v18967_v36 = vpack.c.bf16 %v7614_v56, %v7611_v5  ;;  %v18969_v42 = vpack.c.bf16 %v7612_v32, %v7609_v40  ;;  %v7613_v59 = vmax.f32 %v7583_v30, 0.0  ;;  %v7539_v41 = vadd.f32 %v7434_v23, %v7023_v19  ;;  %v20619_v19 = vld [vmem:[#allocation78_spill] sm:$0xff]  ;;  %v15246_v56 = vld [vmem:[%s20611_s14 + $0x10] ss:$0 sps:$4 sm:$0xff]   ;;  %v20620_v48 = vld [vmem:[#allocation77_spill] sm:$0xff] }
 0x761   :  { %v7510_v2 = vpop.f32.mrf.mxu1  ;;  %v7587_v33 = vadd.f32 %v18880_v35, %v7540_v58  ;;  %v7436_v24 = vpop.f32.mrf.mxu0  ;;  %v7585_v44 = vadd.f32 %v18883_v27, %v7538_v50  ;;  %v13693_v15 = vcombine.high %v20617_v57, %v20616_v46  ;;  %v13692_v61 = vcombine.low %v20617_v57, %v20616_v46  ;;  %v20621_v40 = vld [vmem:[#allocation76_spill] sm:$0xff]  ;;  %v20622_v50 = vld [vmem:[#allocation75_spill] sm:$0xff]  ;;  %v20623_v53 = vld [vmem:[#allocation74_spill] sm:$0xff] }
 0x762   :  { %v7543_v43 = vadd.f32 %v7510_v2, %v7099_v31  ;;  %v7541_v3 = vadd.f32 %v7436_v24, %v7025_v17  ;;  %v7631_v60 = vpack.c.bf16 %v7613_v59, %v7610_v62  ;;  %v7586_v7 = vadd.f32 %v18886_v39, %v7539_v41  ;;  %v20625_v23 = vld [vmem:[#allocation72_spill] sm:$0xff]  ;;  %v20626_v59 = vld [vmem:[#allocation71_spill] sm:$0xff]  ;;  %v20627_v41 = vld [vmem:[#allocation70_spill] sm:$0xff] }
 0x763   :  { %v7512_v45 = vpop.f32.mrf.mxu1  ;;  %v7438_v4 = vpop.f32.mrf.mxu0  ;;  %v7617_v11 = vmax.f32 %v7587_v33, 0.0  ;;  %v7615_v21 = vmax.f32 %v7585_v44, 0.0  ;;  %v13691_v5 = vcombine.high %v20619_v19, %v20618_v9  ;;  %v13690_v58 = vcombine.low %v20619_v19, %v20618_v9  ;;  %v20629_v24 = vld [vmem:[#allocation100_spill] sm:$0xff] }
 0x764   :  { %v7590_v12 = vadd.f32 %v18880_v35, %v7543_v43  ;;  %v7588_v8 = vadd.f32 %v18883_v27, %v7541_v3  ;;  %v7542_v47 = vadd.f32 %v7438_v4, %v7027_v52  ;;  %v7616_v1 = vmax.f32 %v7586_v7, 0.0  ;;  %v20628_v43 = vld [vmem:[#allocation101_spill] sm:$0xff]  ;;  %v20630_v3 = vld [vmem:[#allocation99_spill] sm:$0xff]  ;;  %v20631_v45 = vld [vmem:[#allocation98_spill] sm:$0xff] }
 0x765   :  { %v13689_v32 = vcombine.high %v20621_v40, %v20620_v48  ;;  %v13688_v30 = vcombine.low %v20621_v40, %v20620_v48  ;;  %v13687_v31 = vcombine.high %v20623_v53, %v20622_v50  ;;  %v13686_v17 = vcombine.low %v20623_v53, %v20622_v50  ;;  %v20632_v4 = vld [vmem:[#allocation97_spill] sm:$0xff]  ;;  %v20633_v7 = vld [vmem:[#allocation96_spill] sm:$0xff] }
 0x766   :  { %v7620_v22 = vmax.f32 %v7590_v12, 0.0  ;;  %v7618_v18 = vmax.f32 %v7588_v8, 0.0  ;;  %v7589_v63 = vadd.f32 %v18886_v39, %v7542_v47  ;;  %v15241_v39 = vld [vmem:[%s20610_s8] sm:$0xff]   ;;  %v13683_v2 = vcombine.high %v20627_v41, %v20626_v59  ;;  %v20647_v46 = vld [vmem:[#allocation120_spill] sm:$0xff] }
 0x767   :  { %v13682_v33 = vcombine.low %v20627_v41, %v20626_v59  ;;  %v13713_v52 = vcombine.high %v20629_v24, %v20628_v43  ;;  %v13712_v44 = vcombine.low %v20629_v24, %v20628_v43  ;;  %v13710_v12 = vcombine.low %v20631_v45, %v20630_v3 }
 0x768   :  { %v7635_v49 = vpack.c.bf16 %v7620_v22, %v7617_v11  ;;  %v7633_v28 = vpack.c.bf16 %v7618_v18, %v7615_v21  ;;  %v7619_v6 = vmax.f32 %v7589_v63, 0.0  ;;  %v13709_v8 = vcombine.high %v20633_v7, %v20632_v4  ;;  %v20634_v11 = vld [vmem:[#allocation95_spill] sm:$0xff]  ;;  %v20635_v22 = vld [vmem:[#allocation94_spill] sm:$0xff]  ;;  %v20636_v63 = vld [vmem:[#allocation93_spill] sm:$0xff] }
 0x769   :  { %v13708_v47 = vcombine.low %v20633_v7, %v20632_v4  ;;  %v13707_v21 = vcombine.high %v20635_v22, %v20634_v11  ;;  %v13706_v18 = vcombine.low %v20635_v22, %v20634_v11 }
 0x76a   :  { %v7672_v0 = vsel %vm7664_vm10, %v7635_v49, 0  ;;  %v7634_v35 = vpack.c.bf16 %v7619_v6, %v7616_v1  ;;  %v7666_v27 = vsel %vm7664_vm10, %v7633_v28, 0  ;;  %v20637_v49 = vld [vmem:[#allocation92_spill] sm:$0xff]  ;;  %v20638_v6 = vld [vmem:[#allocation105_spill] sm:$0xff] }
 0x76b   :  { %14536 = vmatpush3.bf16.msra.mxu1 %v7672_v0  ;;  %v13705_v1 = vcombine.high %v20637_v49, %v20636_v63  ;;  %v13704_v28 = vcombine.low %v20637_v49, %v20636_v63 }
 0x76c   :  { %14537 = vmatprep.subr.bf16.mxu1 %v20609_v55  ;;  %13665 = vmatprep.subr.msk.bf16.mxu0 %vm7664_vm10, %v7634_v35 }
 0x76d   :  { %7681 = vmatpush1.bf16.msra.mxu0 %v7666_v27 }
 0x76e   :  { %7682 = vmatprep.subr.bf16.mxu0 %v7631_v60 }
 0x76f   :  { %14538 = vmatpush3.bf16.msra.mxu1 %v18967_v36 }
 0x770   :  { %14539 = vmatprep.subr.bf16.mxu1 %v20609_v55 }
 0x771   :  { %7683 = vmatpush1.bf16.msra.mxu0 %v18969_v42 }
 0x772   :  { %7684 = vmatprep.subr.bf16.mxu0 %v18951_v10 }
 0x773   :  { %14540 = vmatpush3.bf16.msra.mxu1 %v18943_v37 }
 0x774   :  { %14541 = vmatprep.subr.bf16.mxu1 %v20609_v55 }
 0x775   :  { %7685 = vmatpush1.bf16.msra.mxu0 %v18945_v38 }
 0x776   :  { %7686 = vmatprep.subr.bf16.mxu0 %v18927_v51 }
 0x777   :  { %14542 = vmatpush3.bf16.msra.mxu1 %v18917_v54 }
 0x778   :  { %14543 = vmatprep.subr.bf16.mxu1 %v20609_v55 }
 0x779   :  { %7687 = vmatpush1.bf16.msra.mxu0 %v18919_v25 }
 0x77a   :  { %7688 = vmatprep.subr.bf16.mxu0 %v18906_v26 }
 0x77b   :  { %14544 = vmatpush3.bf16.msra.mxu1 %v18897_v29 }
 0x77c   :  { %14557 = vmatprep.subr.bf16.mxu1 %v20609_v55 }
 0x77d   :  { %7689 = vmatpush1.bf16.msra.mxu0 %v18899_v14 }
 0x77e   :  { %14546 = vmatmul.mubr.msk.bf16.vlgmr.msra.gmra.mxu1 %vm7654_vm11, %v15241_v39  ;;  %13675 = vmatprep.subr.msk.bf16.mxu0 %vm7664_vm10, %v7634_v35 }
 0x77f   :  { %14558 = vmatpush3.bf16.msra.mxu1 %v7672_v0  ;;  %14549 = vmatprep.mubr.msk.bf16.mxu1 %vm15511_vm9, %v20609_v55  ;;  %v20639_v0 = vld [vmem:[#allocation104_spill] sm:$0xff] }
 0x780   :  { %14559 = vmatprep.subr.bf16.mxu1 %v20609_v55  ;;  %13666 = vmatmul.mubr.msk.bf16.vlgmr.msra.gmra.mxu0 %vm7654_vm11, %v15241_v39  ;;  %v13717_v35 = vcombine.high %v20639_v0, %v20638_v6  ;;  %v20640_v39 = vld [vmem:[#allocation91_spill] sm:$0xff] }
 0x781   :  { %7825 = vmatpush1.bf16.msra.mxu0 %v7666_v27  ;;  %7716 = vmatprep.mubr.bf16.mxu0 %v20604_v13  ;;  %v13716_v27 = vcombine.low %v20639_v0, %v20638_v6  ;;  %v20652_v6 = vld [vmem:[#allocation119_spill] sm:$0xff]  ;;  %v20653_v0 = vld [vmem:[#allocation118_spill] sm:$0xff] }
 0x782   :  { %7826 = vmatprep.subr.bf16.mxu0 %v7631_v60  ;;  %v13711_v60 = vcombine.high %v20631_v45, %v20630_v3 }
 0x783   :  { %14560 = vmatpush3.bf16.msra.mxu1 %v18967_v36  ;;  %v20624_v36 = vld [vmem:[#allocation73_spill] sm:$0xff] }
 0x784   :  { %14561 = vmatprep.subr.bf16.mxu1 %v20609_v55  ;;  %v13685_v62 = vcombine.high %v20625_v23, %v20624_v36 }
 0x785   :  { %7827 = vmatpush1.bf16.msra.mxu0 %v18969_v42  ;;  %v13684_v42 = vcombine.low %v20625_v23, %v20624_v36 }
 0x786   :  { %14550 = vmatmul.mubr.msk.bf16.gmra.mxu1 %vm7654_vm11, %v15242_v34  ;;  %7828 = vmatprep.subr.bf16.mxu0 %v18951_v10 }
 0x787   :  { %14562 = vmatpush3.bf16.msra.mxu1 %v18943_v37  ;;  %14553 = vmatprep.mubr.msk.bf16.mxu1 %vm15511_vm9, %v20609_v55  ;;  %v20612_v37 = vld [vmem:[#allocation85_spill] sm:$0xff] }
 0x788   :  { %14563 = vmatprep.subr.bf16.mxu1 %v20609_v55  ;;  %13667 = vmatmul.mubr.msk.bf16.gmra.mxu0 %vm7654_vm11, %v15242_v34  ;;  %v20641_v34 = vld [vmem:[#allocation90_spill] sm:$0xff] }
 0x789   :  { %7829 = vmatpush1.bf16.msra.mxu0 %v18945_v38  ;;  %7726 = vmatprep.mubr.bf16.mxu0 %v20604_v13  ;;  %v20613_v38 = vld [vmem:[#allocation84_spill] sm:$0xff] }
 0x78a   :  { %7830 = vmatprep.subr.bf16.mxu0 %v18927_v51  ;;  %v13697_v10 = vcombine.high %v20613_v38, %v20612_v37 }
 0x78b   :  { %14564 = vmatpush3.bf16.msra.mxu1 %v18917_v54  ;;  %v15244_v54 = vld [vmem:[%s20611_s14] sm:$0xff]  }
 0x78c   :  { %14565 = vmatprep.subr.bf16.mxu1 %v20609_v55 }
 0x78d   :  { %7831 = vmatpush1.bf16.msra.mxu0 %v18919_v25  ;;  %v20615_v25 = vld [vmem:[#allocation82_spill] sm:$0xff] }
 0x78e   :  { %14554 = vmatmul.mubr.msk.bf16.gmra.mxu1 %vm7654_vm11, %v15243_v20  ;;  %7832 = vmatprep.subr.bf16.mxu0 %v18906_v26  ;;  %v13696_v26 = vcombine.low %v20613_v38, %v20612_v37  ;;  %v13702_v37 = vcombine.low %v20641_v34, %v20640_v39  ;;  %v20642_v38 = vld [vmem:[#allocation103_spill] sm:$0xff] }
 0x78f   :  { %14566 = vmatpush3.bf16.msra.mxu1 %v18897_v29  ;;  %14567 = vmatprep.mubr.msk.bf16.mxu1 %vm15511_vm9, %v20609_v55  ;;  %v20614_v29 = vld [vmem:[#allocation83_spill] sm:$0xff] }
 0x790   :  { %13668 = vmatmul.mubr.msk.bf16.gmra.mxu0 %vm7654_vm11, %v15243_v20  ;;  %v13695_v51 = vcombine.high %v20615_v25, %v20614_v29  ;;  %8257 = vmatprep.subr.bf16.mxu1 %v13717_v35  ;;  %v13703_v20 = vcombine.high %v20641_v34, %v20640_v39  ;;  %v13734_v35 = vcombine.high %v20653_v0, %v20652_v6 }
 0x791   :  { %7833 = vmatpush1.bf16.msra.mxu0 %v18899_v14  ;;  %7850 = vmatprep.mubr.bf16.mxu0 %v20604_v13  ;;  %v13694_v14 = vcombine.low %v20615_v25, %v20614_v29  ;;  %v20644_v29 = vld [vmem:[#allocation89_spill] sm:$0xff]  ;;  %v20645_v25 = vld [vmem:[#allocation88_spill] sm:$0xff] }
 0x792   :  { %8184 = vmatprep.subr.bf16.mxu0 %v13697_v10  ;;  %v20643_v10 = vld [vmem:[#allocation102_spill] sm:$0xff] }
 0x796   :  { %14568 = vmatmul.mubr.msk.bf16.vlgmr.msra.gmra.mxu1 %vm7654_vm11, %v15244_v54 }
 0x797   :  { %14571 = vmatprep.mubr.msk.bf16.mxu1 %vm15511_vm9, %v20609_v55  ;;  %8258 = vmatpush1.bf16.msra.mxu1 %v13716_v27 }
 0x798   :  { %13676 = vmatmul.mubr.msk.bf16.vlgmr.msra.gmra.mxu0 %vm7654_vm11, %v15244_v54  ;;  %v13715_v54 = vcombine.high %v20643_v10, %v20642_v38 }
 0x799   :  { %7860 = vmatprep.mubr.bf16.mxu0 %v20604_v13  ;;  %8185 = vmatpush1.bf16.msra.mxu0 %v13696_v26  ;;  %v13714_v26 = vcombine.low %v20643_v10, %v20642_v38  ;;  %v13733_v10 = vcombine.low %v20653_v0, %v20652_v6 }
 0x79a   :  { %8186 = vmatprep.subr.bf16.mxu0 %v13695_v51  ;;  %8259 = vmatprep.subr.bf16.mxu1 %v13715_v54  ;;  %v13701_v51 = vcombine.high %v20645_v25, %v20644_v29 }
 0x79b   :  { %8260 = vmatpush1.bf16.msra.mxu1 %v13714_v26 }
 0x79d   :  { %8187 = vmatpush1.bf16.msra.mxu0 %v13694_v14  ;;  %v20646_v14 = vld [vmem:[#allocation121_spill] sm:$0xff] }
 0x79e   :  { %14572 = vmatmul.mubr.msk.bf16.gmra.mxu1 %vm7654_vm11, %v15245_v16  ;;  %8188 = vmatprep.subr.bf16.mxu0 %v13693_v15  ;;  %v13736_v57 = vcombine.high %v20647_v46, %v20646_v14  ;;  %v20648_v15 = vld [vmem:[#allocation87_spill] sm:$0xff]  ;;  %v13735_v63 = vcombine.low %v20647_v46, %v20646_v14 }
 0x79f   :  { %14575 = vmatprep.mubr.msk.bf16.mxu1 %vm15511_vm9, %v20609_v55 }
 0x7a0   :  { %13677 = vmatmul.mubr.msk.bf16.gmra.mxu0 %vm7654_vm11, %v15245_v16  ;;  %v13700_v16 = vcombine.low %v20645_v25, %v20644_v29  ;;  %8522 = vmatprep.subr.bf16.mxu1 %v13736_v57  ;;  %v20654_v29 = vld [vmem:[#allocation117_spill] sm:$0xff]  ;;  %v20655_v25 = vld [vmem:[#allocation116_spill] sm:$0xff] }
 0x7a1   :  { %7870 = vmatprep.mubr.bf16.mxu0 %v20604_v13  ;;  %8189 = vmatpush1.bf16.msra.mxu0 %v13692_v61  ;;  %v20649_v61 = vld [vmem:[#allocation86_spill] sm:$0xff] }
 0x7a2   :  { %8190 = vmatprep.subr.bf16.mxu0 %v13691_v5  ;;  %v13699_v9 = vcombine.high %v20649_v61, %v20648_v15  ;;  %v13698_v19 = vcombine.low %v20649_v61, %v20648_v15  ;;  %v20650_v5 = vld [vmem:[#allocation141_spill] sm:$0xff] }
 0x7a5   :  { %8191 = vmatpush1.bf16.msra.mxu0 %v13690_v58 }
 0x7a6   :  { %14576 = vmatmul.mubr.msk.bf16.gmra.mxu1 %vm7654_vm11, %v15246_v56  ;;  %8192 = vmatprep.subr.bf16.mxu0 %v13689_v32 }
 0x7a7   :  { %8277 = vmatprep.mubr.bf16.mxu1 %v20604_v13 }
 0x7a8   :  { %13678 = vmatmul.mubr.msk.bf16.gmra.mxu0 %vm7654_vm11, %v15246_v56  ;;  %v20651_v56 = vld [vmem:[#allocation140_spill] sm:$0xff] }
 0x7a9   :  { %8193 = vmatpush1.bf16.msra.mxu0 %v13688_v30  ;;  %v13756_v58 = vcombine.high %v20651_v56, %v20650_v5  ;;  %v13755_v46 = vcombine.low %v20651_v56, %v20650_v5  ;;  %v20658_v5 = vld [vmem:[#allocation115_spill] sm:$0xff]  ;;  %v20659_v56 = vld [vmem:[#allocation114_spill] sm:$0xff] }
 0x7aa   :  { %8194 = vmatprep.subr.bf16.mxu0 %v13687_v31 }
 0x7ad   :  { %8195 = vmatpush1.bf16.msra.mxu0 %v13686_v17 }
 0x7ae   :  { %8196 = vmatprep.subr.bf16.mxu0 %v13685_v62 }
 0x7b1   :  { %8197 = vmatpush1.bf16.msra.mxu0 %v13684_v42 }
 0x7b2   :  { %8198 = vmatprep.subr.bf16.mxu0 %v13683_v2 }
 0x7b5   :  { %8199 = vmatpush1.bf16.msra.mxu0 %v13682_v33 }
 0x7b6   :  { %8200 = vmatprep.subr.bf16.mxu0 %v13713_v52 }
 0x7b9   :  { %8201 = vmatpush2.bf16.msra.mxu0 %v13712_v44 }
 0x7ba   :  { %8202 = vmatprep.subr.bf16.mxu0 %v13711_v60 }
 0x7bd   :  { %8203 = vmatpush2.bf16.msra.mxu0 %v13710_v12 }
 0x7be   :  { %8204 = vmatprep.subr.bf16.mxu0 %v13709_v8 }
 0x7c1   :  { %8205 = vmatpush2.bf16.msra.mxu0 %v13708_v47 }
 0x7c2   :  { %8206 = vmatprep.subr.bf16.mxu0 %v13707_v21 }
 0x7c5   :  { %8207 = vmatpush2.bf16.msra.mxu0 %v13706_v18 }
 0x7c6   :  { %8208 = vmatprep.subr.bf16.mxu0 %v13705_v1 }
 0x7c9   :  { %8209 = vmatpush2.bf16.msra.mxu0 %v13704_v28 }
 0x7ca   :  { %8210 = vmatprep.subr.bf16.mxu0 %v13703_v20 }
 0x7cd   :  { %8211 = vmatpush2.bf16.msra.mxu0 %v13702_v37 }
 0x7ce   :  { %8212 = vmatprep.subr.bf16.mxu0 %v13701_v51  ;;  %v13732_v51 = vcombine.high %v20655_v25, %v20654_v29 }
 0x7d1   :  { %8213 = vmatpush2.bf16.msra.mxu0 %v13700_v16 }
 0x7d2   :  { %8214 = vmatprep.subr.bf16.mxu0 %v13699_v9  ;;  %v20656_v9 = vld [vmem:[#allocation139_spill] sm:$0xff] }
 0x7d5   :  { %8215 = vmatpush2.bf16.msra.mxu0 %v13698_v19  ;;  %v20657_v19 = vld [vmem:[#allocation138_spill] sm:$0xff] }
 0x7d6   :  { %8595 = vmatprep.subr.bf16.mxu0 %v13756_v58  ;;  %v13754_v58 = vcombine.high %v20657_v19, %v20656_v9 }
 0x83e   :  { %v7769_v48 = vpop.f32.mrf.mxu1 }
 0x840   :  { %v14547_v40 = vpop.f32.mrf.mxu1  ;;  %v7708_v32 = vpop.f32.mrf.mxu0 }
 0x841   :  { %v13731_v40 = vcombine.low %v20655_v25, %v20654_v29 }
 0x842   :  { %v7772_v30 = vpop.f32.mrf.mxu1  ;;  %v7710_v50 = vpop.f32.mrf.mxu0 }
 0x844   :  { %v14548_v53 = vpop.f32.mrf.mxu1  ;;  %v7712_v31 = vpop.f32.mrf.mxu0 }
 0x845   :  { %v13730_v53 = vcombine.high %v20659_v56, %v20658_v5 }
 0x846   :  { %v7777_v17 = vpop.f32.mrf.mxu1  ;;  %v7714_v36 = vpop.f32.mrf.mxu0 }
 0x848   :  { %v14551_v23 = vpop.f32.mrf.mxu1  ;;  %v19124_v62 = vpop.f32.mrf.mxu0 }
 0x849   :  { %v13753_v23 = vcombine.low %v20657_v19, %v20656_v9  ;;  %v20675_v19 = vld [vmem:[#allocation130_spill] sm:$0xff] }
 0x84a   :  { %v7780_v42 = vpop.f32.mrf.mxu1  ;;  %v19126_v59 = vpop.f32.mrf.mxu0 }
 0x84c   :  { %v14552_v41 = vpop.f32.mrf.mxu1  ;;  %v19128_v2 = vpop.f32.mrf.mxu0 }
 0x84d   :  { %v13729_v41 = vcombine.low %v20659_v56, %v20658_v5  ;;  %v20679_v56 = vld [vmem:[#allocation126_spill] sm:$0xff] }
 0x84e   :  { %v19130_v33 = vpop.f32.mrf.mxu1  ;;  %v19132_v43 = vpop.f32.mrf.mxu0 }
 0x850   :  { %v14555_v24 = vpop.f32.mrf.mxu1  ;;  %v19134_v52 = vpop.f32.mrf.mxu0 }
 0x852   :  { %v7788_v44 = vpop.f32.mrf.mxu1  ;;  %v19136_v3 = vpop.f32.mrf.mxu0 }
 0x854   :  { %v14556_v45 = vpop.f32.mrf.mxu1  ;;  %v7732_v60 = vpop.f32.mrf.mxu0 }
 0x855   :  { %v20660_v45 = vld [vmem:[#allocation113_spill] sm:$0xff]  ;;  %v20661_v60 = vld [vmem:[#allocation112_spill] sm:$0xff] }
 0x856   :  { %v7913_v12 = vpop.f32.mrf.mxu1  ;;  %v7733_v4 = vpop.f32.mrf.mxu0 }
 0x857   :  { %v7937_v11 = vmax.f32 %v7769_v48, %v7913_v12  ;;  %v13728_v12 = vcombine.high %v20661_v60, %v20660_v45 }
 0x858   :  { %v14569_v7 = vpop.f32.mrf.mxu1  ;;  %v7852_v8 = vpop.f32.mrf.mxu0 }
 0x859   :  { %v7935_v49 = vmax.f32 %v7708_v32, %v7852_v8 }
 0x85a   :  { %v7916_v47 = vpop.f32.mrf.mxu1  ;;  %v7854_v21 = vpop.f32.mrf.mxu0 }
 0x85b   :  { %v7940_v22 = vmax.f32 %v7772_v30, %v7916_v47  ;;  %v7936_v27 = vmax.f32 %v7710_v50, %v7854_v21  ;;  %v13727_v47 = vcombine.low %v20661_v60, %v20660_v45  ;;  %v20662_v21 = vld [vmem:[#allocation111_spill] sm:$0xff] }
 0x85c   :  { %v14570_v18 = vpop.f32.mrf.mxu1  ;;  %v7856_v28 = vpop.f32.mrf.mxu0 }
 0x85d   :  { %v19140_v1 = vpack.c.bf16 %v7940_v22, %v7937_v11  ;;  %v7938_v39 = vmax.f32 %v7712_v31, %v7856_v28  ;;  %v20663_v18 = vld [vmem:[#allocation110_spill] sm:$0xff] }
 0x85e   :  { %v7921_v34 = vpop.f32.mrf.mxu1  ;;  %v7858_v20 = vpop.f32.mrf.mxu0 }
 0x85f   :  { %13718 = vmatmul.mubr.msk.bf16.vlgmr.msra.gmra.mxu1 %vm5626_vm6, %v19140_v1  ;;  %v7939_v37 = vmax.f32 %v7714_v36, %v7858_v20  ;;  %v19149_v54 = vpack.c.bf16 %v7938_v39, %v7935_v49  ;;  %v7943_v57 = vmax.f32 %v7777_v17, %v7921_v34  ;;  %v20666_v34 = vld [vmem:[#allocation107_spill] sm:$0xff]  ;;  %v20667_v20 = vld [vmem:[#allocation106_spill] sm:$0xff] }
 0x860   :  { %8523 = vmatpush1.bf16.msra.mxu1 %v13735_v63  ;;  %v14573_v38 = vpop.f32.mrf.mxu1  ;;  %8287 = vmatprep.mubr.bf16.mxu1 %v20604_v13  ;;  %v7862_v26 = vpop.f32.mrf.mxu0  ;;  %v13726_v63 = vcombine.high %v20663_v18, %v20662_v21 }
 0x861   :  { %8524 = vmatprep.subr.bf16.mxu1 %v13734_v35  ;;  %v7951_v16 = vpack.c.bf16 %v7939_v37, %v7936_v27  ;;  %v7941_v32 = vmax.f32 %v19124_v62, %v7862_v26  ;;  %v20664_v35 = vld [vmem:[#allocation109_spill] sm:$0xff]  ;;  %v13722_v37 = vcombine.high %v20667_v20, %v20666_v34  ;;  %v13721_v38 = vcombine.low %v20667_v20, %v20666_v34  ;;  %v20669_v26 = vld [vmem:[#allocation136_spill] sm:$0xff] }
 0x862   :  { %v7924_v14 = vpop.f32.mrf.mxu1  ;;  %v7864_v61 = vpop.f32.mrf.mxu0 }
 0x863   :  { %v7946_v15 = vmax.f32 %v7780_v42, %v7924_v14  ;;  %8216 = vmatprep.mubr.bf16.mxu0 %v7951_v16  ;;  %v7942_v31 = vmax.f32 %v19126_v59, %v7864_v61 }
 0x864   :  { %8525 = vmatpush1.bf16.msra.mxu1 %v13733_v10  ;;  %v14574_v48 = vpop.f32.mrf.mxu1  ;;  %v7866_v50 = vpop.f32.mrf.mxu0  ;;  %8217 = vmatmul.mubr.bf16.vlgmr.msra.gmra.mxu0 %v19149_v54  ;;  %v20668_v10 = vld [vmem:[#allocation137_spill] sm:$0xff] }
 0x865   :  { %v19160_v30 = vpack.c.bf16 %v7946_v15, %v7943_v57  ;;  %8526 = vmatprep.subr.bf16.mxu1 %v13732_v51  ;;  %v7944_v17 = vmax.f32 %v19128_v2, %v7866_v50  ;;  %8596 = vmatpush1.bf16.msra.mxu0 %v13755_v46  ;;  %v13752_v29 = vcombine.high %v20669_v26, %v20668_v10  ;;  %v20670_v51 = vld [vmem:[#allocation135_spill] sm:$0xff]  ;;  %v20672_v57 = vld [vmem:[#allocation133_spill] sm:$0xff]  ;;  %v20673_v15 = vld [vmem:[#allocation132_spill] sm:$0xff] }
 0x866   :  { %v7929_v36 = vpop.f32.mrf.mxu1  ;;  %v7868_v42 = vpop.f32.mrf.mxu0  ;;  %8597 = vmatprep.subr.bf16.mxu0 %v13754_v58  ;;  %v13751_v25 = vcombine.low %v20669_v26, %v20668_v10  ;;  %v13748_v61 = vcombine.high %v20673_v15, %v20672_v57  ;;  %v13747_v9 = vcombine.low %v20673_v15, %v20672_v57 }
 0x867   :  { %13719 = vmatmul.mubr.msk.bf16.gmra.mxu1 %vm5626_vm6, %v19160_v30  ;;  %v7945_v62 = vmax.f32 %v19132_v43, %v7868_v42  ;;  %v19175_v2 = vpack.c.bf16 %v7944_v17, %v7941_v32  ;;  %v7949_v24 = vmax.f32 %v19130_v33, %v7929_v36  ;;  %v20677_v32 = vld [vmem:[#allocation128_spill] sm:$0xff]  ;;  %v20680_v17 = vld [vmem:[#allocation125_spill] sm:$0xff] }
 0x868   :  { %8527 = vmatpush1.bf16.msra.mxu1 %v13731_v40  ;;  %8297 = vmatprep.mubr.bf16.mxu1 %v20604_v13  ;;  %v14577_v59 = vpop.f32.mrf.mxu1  ;;  %v7872_v44 = vpop.f32.mrf.mxu0  ;;  %v20676_v40 = vld [vmem:[#allocation129_spill] sm:$0xff]  ;;  %v20681_v36 = vld [vmem:[#allocation124_spill] sm:$0xff] }
 0x869   :  { %8528 = vmatprep.subr.bf16.mxu1 %v13730_v53  ;;  %v19180_v4 = vpack.c.bf16 %v7945_v62, %v7942_v31  ;;  %8598 = vmatpush1.bf16.msra.mxu0 %v13753_v23  ;;  %v7958_v33 = vpack.c.bf16 %v7949_v24, %v7949_v24  ;;  %v7947_v22 = vmax.f32 %v19134_v52, %v7872_v44  ;;  %v20665_v52 = vld [vmem:[#allocation108_spill] sm:$0xff]  ;;  %v20682_v62 = vld [vmem:[#allocation123_spill] sm:$0xff] }
 0x86a   :  { %v7932_v43 = vpop.f32.mrf.mxu1  ;;  %v7874_v7 = vpop.f32.mrf.mxu0  ;;  %v13724_v27 = vcombine.high %v20665_v52, %v20664_v35  ;;  %v13723_v39 = vcombine.low %v20665_v52, %v20664_v35  ;;  %v13744_v50 = vcombine.high %v20677_v32, %v20676_v40  ;;  %v13743_v5 = vcombine.low %v20677_v32, %v20676_v40 }
 0x86b   :  { %8226 = vmatprep.mubr.bf16.mxu0 %v19180_v4  ;;  %v7948_v8 = vmax.f32 %v19136_v3, %v7874_v7  ;;  %v13725_v3 = vcombine.low %v20663_v18, %v20662_v21  ;;  %v7956_v0 = vpack.c.bf16 %v7947_v22, %v7947_v22  ;;  %v13740_v23 = vcombine.high %v20681_v36, %v20680_v17 }
 0x86c   :  { %8529 = vmatpush1.bf16.msra.mxu1 %v13729_v41  ;;  %v14578_v11 = vpop.f32.mrf.mxu1  ;;  %8227 = vmatmul.mubr.bf16.gmra.mxu0 %v19175_v2  ;;  %v7876_v49 = vpop.f32.mrf.mxu0  ;;  %v13739_v42 = vcombine.low %v20681_v36, %v20680_v17  ;;  %v20683_v41 = vld [vmem:[#allocation122_spill] sm:$0xff] }
 0x86d   :  { %8530 = vmatprep.subr.bf16.mxu1 %v13728_v12  ;;  %v7957_v28 = vpack.c.bf16 %v7948_v8, %v7948_v8  ;;  %v13738_v59 = vcombine.high %v20683_v41, %v20682_v62  ;;  %v13737_v24 = vcombine.low %v20683_v41, %v20682_v62 }
 0x86e   :  { %v7877_v6 = vpop.f32.mrf.mxu0 }
 0x86f   :  { %13720 = vmatmul.mubr.msk.bf16.gmra.mxu1 %vm5626_vm6, %v7958_v33  ;;  %8236 = vmatprep.mubr.bf16.mxu0 %v7957_v28 }
 0x870   :  { %8531 = vmatpush1.bf16.msra.mxu1 %v13727_v47  ;;  %8554 = vmatprep.mubr.bf16.mxu1 %v7951_v16  ;;  %v20671_v16 = vld [vmem:[#allocation134_spill] sm:$0xff] }
 0x871   :  { %8532 = vmatprep.subr.bf16.mxu1 %v13726_v63  ;;  %v13750_v14 = vcombine.high %v20671_v16, %v20670_v51  ;;  %v13749_v46 = vcombine.low %v20671_v16, %v20670_v51 }
 0x874   :  { %8533 = vmatpush1.bf16.msra.mxu1 %v13725_v3  ;;  %8237 = vmatmul.mubr.bf16.gmra.mxu0 %v7956_v0 }
 0x875   :  { %8534 = vmatprep.subr.bf16.mxu1 %v13724_v27  ;;  %8615 = vmatprep.mubr.bf16.mxu0 %v20604_v13 }
 0x878   :  { %8535 = vmatpush1.bf16.msra.mxu1 %v13723_v39 }
 0x879   :  { %8536 = vmatprep.subr.bf16.mxu1 %v13722_v37 }
 0x87c   :  { %8537 = vmatpush1.bf16.msra.mxu1 %v13721_v38  ;;  %13757 = vmatmul.mubr.msk.bf16.vlgmr.msra.gmra.mxu0 %vm5626_vm6, %v19140_v1  ;;  %v20674_v1 = vld [vmem:[#allocation131_spill] sm:$0xff] }
 0x87d   :  { %8538 = vmatprep.subr.bf16.mxu1 %v13752_v29  ;;  %8625 = vmatprep.mubr.bf16.mxu0 %v20604_v13  ;;  %v13746_v58 = vcombine.high %v20675_v19, %v20674_v1  ;;  %v13745_v48 = vcombine.low %v20675_v19, %v20674_v1 }
 0x880   :  { %8539 = vmatpush2.bf16.msra.mxu1 %v13751_v25 }
 0x881   :  { %8540 = vmatprep.subr.bf16.mxu1 %v13750_v14 }
 0x884   :  { %8541 = vmatpush2.bf16.msra.mxu1 %v13749_v46  ;;  %13758 = vmatmul.mubr.msk.bf16.gmra.mxu0 %vm5626_vm6, %v19160_v30  ;;  %v20678_v30 = vld [vmem:[#allocation127_spill] sm:$0xff] }
 0x885   :  { %8542 = vmatprep.subr.bf16.mxu1 %v13748_v61  ;;  %8635 = vmatprep.mubr.bf16.mxu0 %v20604_v13  ;;  %v13742_v53 = vcombine.high %v20679_v56, %v20678_v30  ;;  %v13741_v31 = vcombine.low %v20679_v56, %v20678_v30 }
 0x888   :  { %8543 = vmatpush2.bf16.msra.mxu1 %v13747_v9 }
 0x889   :  { %8544 = vmatprep.subr.bf16.mxu1 %v13746_v58 }
 0x88c   :  { %8545 = vmatpush2.bf16.msra.mxu1 %v13745_v48  ;;  %13759 = vmatmul.mubr.msk.bf16.gmra.mxu0 %vm5626_vm6, %v7958_v33 }
 0x88d   :  { %8546 = vmatprep.subr.bf16.mxu1 %v13744_v50 }
 0x890   :  { %8547 = vmatpush2.bf16.msra.mxu1 %v13743_v5 }
 0x891   :  { %8548 = vmatprep.subr.bf16.mxu1 %v13742_v53 }
 0x894   :  { %8549 = vmatpush2.bf16.msra.mxu1 %v13741_v31 }
 0x895   :  { %8550 = vmatprep.subr.bf16.mxu1 %v13740_v23 }
 0x898   :  { %8551 = vmatpush2.bf16.msra.mxu1 %v13739_v42 }
 0x899   :  { %8552 = vmatprep.subr.bf16.mxu1 %v13738_v59 }
 0x89c   :  { %8553 = vmatpush2.bf16.msra.mxu1 %v13737_v24 }
 0x89f   :  { %8555 = vmatmul.mubr.bf16.vlgmr.msra.gmra.mxu1 %v19149_v54 }
 0x8a0   :  { %8564 = vmatprep.mubr.bf16.mxu1 %v19180_v4 }
 0x8a7   :  { %8565 = vmatmul.mubr.bf16.gmra.mxu1 %v19175_v2 }
 0x8a8   :  { %8574 = vmatprep.mubr.bf16.mxu1 %v7957_v28 }
 0x8af   :  { %8575 = vmatmul.mubr.bf16.gmra.mxu1 %v7956_v0 }
 0x91f   :  { %v8279_v44 = vpop.f32.mrf.mxu1 }
 0x921   :  { %v8281_v45 = vpop.f32.mrf.mxu1 }
 0x923   :  { %v8283_v60 = vpop.f32.mrf.mxu1 }
 0x924   :  { %v8218_v12 = vpop.f32.mrf.mxu0 }
 0x925   :  { %v8285_v43 = vpop.f32.mrf.mxu1  ;;  %v8280_v46 = vadd.f32 %v8279_v44, %v8218_v12 }
 0x926   :  { %v8220_v7 = vpop.f32.mrf.mxu0 }
 0x927   :  { %v8289_v8 = vpop.f32.mrf.mxu1  ;;  %v8282_v61 = vadd.f32 %v8281_v45, %v8220_v7 }
 0x928   :  { %v8222_v47 = vpop.f32.mrf.mxu0 }
 0x929   :  { %v8291_v11 = vpop.f32.mrf.mxu1  ;;  %v8284_v58 = vadd.f32 %v8283_v60, %v8222_v47 }
 0x92a   :  { %v8224_v33 = vpop.f32.mrf.mxu0 }
 0x92b   :  { %v8293_v22 = vpop.f32.mrf.mxu1  ;;  %v8286_v50 = vadd.f32 %v8285_v43, %v8224_v33 }
 0x92c   :  { %v8228_v21 = vpop.f32.mrf.mxu0 }
 0x92d   :  { %v8295_v18 = vpop.f32.mrf.mxu1  ;;  %v8290_v53 = vadd.f32 %v8289_v8, %v8228_v21 }
 0x92e   :  { %v8230_v54 = vpop.f32.mrf.mxu0 }
 0x92f   :  { %v8299_v63 = vpop.f32.mrf.mxu1  ;;  %v8292_v23 = vadd.f32 %v8291_v11, %v8230_v54 }
 0x930   :  { %v8232_v4 = vpop.f32.mrf.mxu0 }
 0x931   :  { %v19244_v49 = vpop.f32.mrf.mxu1  ;;  %v8294_v59 = vadd.f32 %v8293_v22, %v8232_v4 }
 0x932   :  { %v8234_v2 = vpop.f32.mrf.mxu0 }
 0x933   :  { %v8303_v28 = vpop.f32.mrf.mxu1  ;;  %v8296_v60 = vadd.f32 %v8295_v18, %v8234_v2 }
 0x934   :  { %v8238_v6 = vpop.f32.mrf.mxu0 }
 0x935   :  { %v8304_v3 = vpop.f32.mrf.mxu1  ;;  %v8300_v8 = vadd.f32 %v8299_v63, %v8238_v6 }
 0x936   :  { %v8240_v0 = vpop.f32.mrf.mxu0 }
 0x937   :  { %v8302_v21 = vadd.f32 %v19244_v49, %v8240_v0 }
 0x938   :  { %v8242_v35 = vpop.f32.mrf.mxu0 }
 0x93a   :  { %v8243_v52 = vpop.f32.mrf.mxu0 }
 0x93c   :  { %v8617_v27 = vpop.f32.mrf.mxu0 }
 0x93e   :  { %v8619_v39 = vpop.f32.mrf.mxu0 }
 0x940   :  { %v8621_v34 = vpop.f32.mrf.mxu0 }
 0x942   :  { %v8623_v20 = vpop.f32.mrf.mxu0 }
 0x944   :  { %v8627_v37 = vpop.f32.mrf.mxu0 }
 0x946   :  { %v8629_v38 = vpop.f32.mrf.mxu0 }
 0x948   :  { %v8631_v10 = vpop.f32.mrf.mxu0 }
 0x94a   :  { %v8633_v26 = vpop.f32.mrf.mxu0 }
 0x94c   :  { %v8637_v29 = vpop.f32.mrf.mxu0 }
 0x94e   :  { %v8639_v25 = vpop.f32.mrf.mxu0 }
 0x950   :  { %v8641_v51 = vpop.f32.mrf.mxu0 }
 0x952   :  { %v8642_v16 = vpop.f32.mrf.mxu0 }
 0x95f   :  { %v8556_v14 = vpop.f32.mrf.mxu1 }
 0x960   :  { %v8618_v57 = vadd.f32 %v8617_v27, %v8556_v14 }
 0x961   :  { %v8558_v15 = vpop.f32.mrf.mxu1 }
 0x962   :  { %v8644_v9 = vmax.f32 %v8280_v46, %v8618_v57  ;;  %v8620_v1 = vadd.f32 %v8619_v39, %v8558_v15 }
 0x963   :  { %v8560_v19 = vpop.f32.mrf.mxu1 }
 0x964   :  { %8654 = vst [vmem:[#allocation15] sm:$0xff] %v8644_v9  ;;  %v8645_v48 = vmax.f32 %v8282_v61, %v8620_v1  ;;  %v8622_v40 = vadd.f32 %v8621_v34, %v8560_v19 }
 0x965   :  { %v8562_v32 = vpop.f32.mrf.mxu1 }
 0x966   :  { %8655 = vst.msk [vmem:[#allocation15 + $0x8] sm:$0xff] %vm5626_vm6, %v8645_v48  ;;  %v8646_v5 = vmax.f32 %v8284_v58, %v8622_v40  ;;  %v8624_v30 = vadd.f32 %v8623_v20, %v8562_v32 }
 0x967   :  { %v8566_v56 = vpop.f32.mrf.mxu1 }
 0x968   :  { %8656 = vst [vmem:[#allocation15 + $0x10] sm:$0xff] %v8646_v5  ;;  %v8647_v31 = vmax.f32 %v8286_v50, %v8624_v30  ;;  %v8628_v17 = vadd.f32 %v8627_v37, %v8566_v56 }
 0x969   :  { %v8568_v36 = vpop.f32.mrf.mxu1 }
 0x96a   :  { %8657 = vst.msk [vmem:[#allocation15 + $0x18] sm:$0xff] %vm5626_vm6, %v8647_v31  ;;  %v8648_v42 = vmax.f32 %v8290_v53, %v8628_v17  ;;  %v8630_v62 = vadd.f32 %v8629_v38, %v8568_v36 }
 0x96b   :  { %v8570_v41 = vpop.f32.mrf.mxu1 }
 0x96c   :  { %8658 = vst [vmem:[#allocation15 + $0x20] sm:$0xff] %v8648_v42  ;;  %v8649_v24 = vmax.f32 %v8292_v23, %v8630_v62  ;;  %v8632_v44 = vadd.f32 %v8631_v10, %v8570_v41 }
 0x96d   :  { %v8572_v45 = vpop.f32.mrf.mxu1 }
 0x96e   :  { %8659 = vst.msk [vmem:[#allocation15 + $0x28] sm:$0xff] %vm5626_vm6, %v8649_v24  ;;  %v8650_v12 = vmax.f32 %v8294_v59, %v8632_v44  ;;  %v8634_v43 = vadd.f32 %v8633_v26, %v8572_v45 }
 0x96f   :  { %v8576_v7 = vpop.f32.mrf.mxu1 }
 0x970   :  { %8660 = vst [vmem:[#allocation15 + $0x30] sm:$0xff] %v8650_v12  ;;  %v8651_v47 = vmax.f32 %v8296_v60, %v8634_v43  ;;  %v8638_v11 = vadd.f32 %v8637_v29, %v8576_v7 }
 0x971   :  { %v8578_v33 = vpop.f32.mrf.mxu1 }
 0x972   :  { %8661 = vst.msk [vmem:[#allocation15 + $0x38] sm:$0xff] %vm5626_vm6, %v8651_v47  ;;  %v8652_v22 = vmax.f32 %v8300_v8, %v8638_v11  ;;  %v8640_v54 = vadd.f32 %v8639_v25, %v8578_v33 }
 0x973   :  { %v8580_v4 = vpop.f32.mrf.mxu1 }
 0x974   :  { %8662 = vst [vmem:[#allocation15 + $0x40] sm:$0xff] %v8652_v22  ;;  %v8653_v28 = vmax.f32 %v8302_v21, %v8640_v54 }
 0x975   :  { %v8581_v18 = vpop.f32.mrf.mxu1 }
 0x976   :  { %8663 = vst.msk [vmem:[#allocation15 + $0x48] sm:$0xff] %vm5626_vm6, %v8653_v28 }
 0x977   :  { %15450 = dma.done.wait [#allocation19 + $0x3], 11520 }
 0x978   :  { %15451 = vsyncadd [#allocation19 + $0x3], 4294955776 }
 0x979   :  { %15452 = dma.done.wait [#allocation19 + $0x4], 4608 }
 0x97a   :  { %15453 = vsyncadd [#allocation19 + $0x4], 4294962688 }
 0x97b   :  { %15454 = dma.done.wait [#allocation19 + $0x5], 4608 }
 0x97c   :  { %15455 = vsyncadd [#allocation19 + $0x5], 4294962688  ;;  %9056 = vmatprep.subr.bf16.mxu1 %v20604_v13  ;;  %v15247_v63 = vld [vmem:[#allocation5 + $0x19c] ss:$12 sps:$4 sm:$0xff]   ;;  %v15249_v49 = vld [vmem:[#allocation5 + $0x1a0] ss:$12 sps:$4 sm:$0xff]  }
 0x97d   :  { %8995 = vmatprep.subr.bf16.mxu0 %v15247_v63  ;;  %v15250_v2 = vld [vmem:[#allocation5 + $0x198] ss:$12 sps:$4 sm:$0xff]   ;;  %9057 = vmatpush1.bf16.msra.mxu1 %v15249_v49  ;;  %v15253_v3 = vld [vmem:[#allocation5 + $0x188] ss:$12 sps:$4 sm:$0xff]   ;;  %v15254_v0 = vld [vmem:[#allocation5 + $0x180] ss:$12 sps:$4 sm:$0xff]  }
 0x97e   :  { %v15251_v6 = vld [vmem:[#allocation5 + $0x184] ss:$12 sps:$4 sm:$0xff]   ;;  %8996 = vmatpush1.bf16.msra.mxu0 %v15250_v2  ;;  %9058 = vmatprep.subr.bf16.mxu1 %v20604_v13  ;;  %v15255_v35 = vld [vmem:[#allocation5 + $0x16c] ss:$12 sps:$4 sm:$0xff]   ;;  %v15258_v27 = vld [vmem:[#allocation5 + $0x168] ss:$12 sps:$4 sm:$0xff]  }
 0x97f   :  { %8997 = vmatprep.subr.bf16.mxu0 %v15251_v6  ;;  %v15257_v52 = vld [vmem:[#allocation5 + $0x170] ss:$12 sps:$4 sm:$0xff]   ;;  %v15259_v39 = vld [vmem:[#allocation5 + $0x154] ss:$12 sps:$4 sm:$0xff]   ;;  %v15261_v34 = vld [vmem:[#allocation5 + $0x158] ss:$12 sps:$4 sm:$0xff]  }
 0x980   :  { %v15262_v20 = vld [vmem:[#allocation5 + $0x150] ss:$12 sps:$4 sm:$0xff]   ;;  %v15265_v38 = vld [vmem:[#allocation5 + $0x140] ss:$12 sps:$4 sm:$0xff]   ;;  %v15266_v10 = vld [vmem:[#allocation5 + $0x138] ss:$12 sps:$4 sm:$0xff]  }
 0x981   :  { %9059 = vmatpush1.bf16.msra.mxu1 %v15253_v3  ;;  %v15263_v37 = vld [vmem:[#allocation5 + $0x13c] ss:$12 sps:$4 sm:$0xff]   ;;  %v15267_v26 = vld [vmem:[#allocation5 + $0x124] ss:$12 sps:$4 sm:$0xff]   ;;  %v15270_v25 = vld [vmem:[#allocation5 + $0x120] ss:$12 sps:$4 sm:$0xff]  }
 0x982   :  { %8998 = vmatpush1.bf16.msra.mxu0 %v15254_v0  ;;  %9060 = vmatprep.subr.bf16.mxu1 %v20604_v13  ;;  %v15269_v29 = vld [vmem:[#allocation5 + $0x128] ss:$12 sps:$4 sm:$0xff]   ;;  %v15271_v51 = vld [vmem:[#allocation5 + $0x10c] ss:$12 sps:$4 sm:$0xff]   ;;  %v15273_v16 = vld [vmem:[#allocation5 + $0x110] ss:$12 sps:$4 sm:$0xff]  }
 0x983   :  { %8999 = vmatprep.subr.bf16.mxu0 %v15255_v35  ;;  %v15274_v14 = vld [vmem:[#allocation5 + $0x108] ss:$12 sps:$4 sm:$0xff]   ;;  %v8677_v15 = vld [vmem:[#allocation15 + $0x28] sm:$0xff]  ;;  %v8676_v48 = vld [vmem:[#allocation15 + $0x20] sm:$0xff]  ;;  %s20684_s19 = sld [smem:[#allocation57_spill]]  ;;  %vm9833_vm12 = vcmask 310272  }
 0x984   :  { %v15275_v46 = vld [vmem:[#allocation5 + $0xf4] ss:$12 sps:$4 sm:$0xff]   ;;  %v19261_v1 = vld [vmem:[#allocation15 + $0x10] sm:$0xff]  ;;  %v8728_v32 = vld [vmem:[#allocation15] sm:$0xfe]  ;;  %s20685_s24 = sld [smem:[#allocation56_spill]] }
 0x985   :  { %9061 = vmatpush1.bf16.msra.mxu1 %v15257_v52  ;;  %v19258_v57 = vld [vmem:[#allocation15 + $0x18] sm:$0xff]  ;;  %v8729_v9 = vld [vmem:[#allocation15 + $0x8] sm:$0xfe]  ;;  %v8678_v40 = vld [vmem:[#allocation15 + $0x30] sm:$0xff]  ;;  %v8732_v50 = vpack.c.bf16 %v19261_v1, %v8728_v32  ;;  %vm9840_vm13 = vcmask 1042432   ;;  %s20689_s30 = sld [smem:[#allocation58_spill]] }
 0x986   :  { %9000 = vmatpush1.bf16.msra.mxu0 %v15258_v27  ;;  %9062 = vmatprep.subr.bf16.mxu1 %v20604_v13  ;;  %v8679_v61 = vld [vmem:[#allocation15 + $0x38] sm:$0xff]  ;;  %v8733_v58 = vpack.c.bf16 %v19258_v57, %v8729_v9  ;;  %v15277_v5 = vld [vmem:[#allocation5 + $0xf8] ss:$12 sps:$4 sm:$0xff]   ;;  %v19268_v31 = vpack.c.bf16 %v8678_v40, %v8676_v48  ;;  %vm10729_vm14 = vcmask 392192   ;;  %vm10734_vm15 = vcmask 390144  }
 0x987   :  { %9001 = vmatprep.subr.bf16.mxu0 %v15259_v39  ;;  %v19263_v19 = vpack.c.bf16 %v8679_v61, %v8677_v15  ;;  %v15278_v17 = vld [vmem:[#allocation5 + $0xf0] ss:$12 sps:$4 sm:$0xff]   ;;  %v8780_v36 = vshll.u32 %v8732_v50, 16  ;;  %v15279_v23 = vld [vmem:[#allocation5 + $0x1cc] ss:$12 sps:$4 sm:$0xff]   ;;  %v8778_v59 = vshrl.u32 %v8732_v50, 16 }
 0x988   :  { %v8790_v30 = vshrl.u32 %v8733_v58, 16  ;;  %v8792_v56 = vshll.u32 %v8733_v58, 16  ;;  %v15281_v41 = vld [vmem:[#allocation5 + $0x1d0] ss:$12 sps:$4 sm:$0xff]   ;;  %v8785_v45 = vshll.u32 %v19268_v31, 16  ;;  %v8801_v18 = vshrl.u32 %v19268_v31, 16 }
 0x989   :  { %9063 = vmatpush1.bf16.msra.mxu1 %v15261_v34  ;;  %v8797_v53 = vshll.u32 %v19263_v19, 16  ;;  %v8782_v44 = vrot.slane %v8780_v36, 1  ;;  %v15282_v60 = vld [vmem:[#allocation5 + $0x1c8] ss:$12 sps:$4 sm:$0xff]   ;;  %v15285_v7 = vld [vmem:[#allocation5 + $0x1b8] ss:$12 sps:$4 sm:$0xff]  }
 0x98a   :  { %9002 = vmatpush1.bf16.msra.mxu0 %v15262_v20  ;;  %9064 = vmatprep.subr.bf16.mxu1 %v20604_v13  ;;  %v8794_v42 = vrot.slane %v8792_v56, 1  ;;  %v15283_v12 = vld [vmem:[#allocation5 + $0x1b4] ss:$12 sps:$4 sm:$0xff]   ;;  %v8787_v47 = vrot.slane %v8785_v45, 1  ;;  %v15286_v11 = vld [vmem:[#allocation5 + $0x1b0] ss:$12 sps:$4 sm:$0xff]  }
 0x98b   :  { %9003 = vmatprep.subr.bf16.mxu0 %v15263_v37  ;;  %v8799_v62 = vrot.slane %v8797_v53, 1  ;;  %v8783_v8 = vor.u32 %v8782_v44, %v8778_v59  ;;  %v15289_v33 = vld [vmem:[#allocation5 + $0xac] ss:$12 sps:$4 sm:$0xff]   ;;  %v15290_v21 = vld [vmem:[#allocation5 + $0xb0] ss:$12 sps:$4 sm:$0xff]   ;;  %v8809_v22 = vshrl.u32 %v19263_v19, 16 }
 0x98c   :  { %v8795_v24 = vor.u32 %v8794_v42, %v8790_v30  ;;  %v8731_v4 = vld [vmem:[#allocation15 + $0x48] sm:$0x7f]  ;;  %v8730_v28 = vld [vmem:[#allocation15 + $0x40] sm:$0x7f]  ;;  %v15287_v63 = vld [vmem:[#allocation5 + $0xa8] ss:$12 sps:$4 sm:$0xff]   ;;  %v8803_v27 = vor.u32 %v8801_v18, %v8787_v47 }
 0x98d   :  { %9065 = vmatpush1.bf16.msra.mxu1 %v15265_v38  ;;  %v8788_v54 = vsel %vm1774_vm1, %v8783_v8, %v8787_v47  ;;  %v8735_v49 = vpack.c.bf16 %v8731_v4, %v8731_v4  ;;  %v8734_v2 = vpack.c.bf16 %v8730_v28, %v8730_v28  ;;  %v15293_v6 = vld [vmem:[#allocation5 + $0x94] ss:$12 sps:$4 sm:$0xff]   ;;  %v8811_v3 = vor.u32 %v8809_v22, %v8799_v62  ;;  %v15294_v52 = vld [vmem:[#allocation5 + $0x98] ss:$12 sps:$4 sm:$0xff]   ;;  %v15291_v39 = vld [vmem:[#allocation5 + $0x90] ss:$12 sps:$4 sm:$0xff]  }
 0x98e   :  { %9004 = vmatpush1.bf16.msra.mxu0 %v15266_v10  ;;  %9066 = vmatprep.subr.bf16.mxu1 %v20604_v13  ;;  %v8800_v43 = vsel %vm1774_vm1, %v8795_v24, %v8799_v62  ;;  %v15297_v37 = vld [vmem:[#allocation5 + $0x7c] ss:$12 sps:$4 sm:$0xff]   ;;  %v15299_v15 = vld [vmem:[#allocation5 + $0x60] ss:$12 sps:$4 sm:$0xff]   ;;  %v15317_v36 = vld [vmem:[#allocation5 + $0x4] ss:$12 sps:$4 sm:$0xff]  }
 0x98f   :  { %9005 = vmatprep.subr.bf16.mxu0 %v15267_v26  ;;  %13793 = vmatprep.mubr.msk.bf16.mxu1 %vm5626_vm6, %v8800_v43  ;;  %v8813_v0 = vshll.u32 %v8735_v49, 16  ;;  %v8805_v35 = vshll.u32 %v8734_v2, 16  ;;  %v8820_v38 = vshrl.u32 %v8735_v49, 16  ;;  %v15298_v26 = vld [vmem:[#allocation5 + $0x80] ss:$12 sps:$4 sm:$0xff]   ;;  %v8672_v45 = vld [vmem:[#allocation15] sm:$0xff] }
 0x990   :  { %13790 = vmatprep.mubr.msk.bf16.mxu0 %vm5626_vm6, %v8800_v43  ;;  %v15305_v61 = vld [vmem:[#allocation5 + $0x4c] ss:$12 sps:$4 sm:$0xff]   ;;  %v8673_v58 = vld [vmem:[#allocation15 + $0x8] sm:$0xff]  ;;  %v15306_v48 = vld [vmem:[#allocation5 + $0x50] ss:$12 sps:$4 sm:$0xff]   ;;  %v9456_v47 = vrot.slane %v19263_v19, 1 }
 0x991   :  { %9067 = vmatpush1.bf16.msra.mxu1 %v15269_v29  ;;  %v8815_v34 = vrot.slane %v8813_v0, 1  ;;  %v8807_v20 = vrot.slane %v8805_v35, 1  ;;  %v15303_v40 = vld [vmem:[#allocation5 + $0x48] ss:$12 sps:$4 sm:$0xff]   ;;  %v8683_v50 = vpack.c.bf16 %v19258_v57, %v8673_v58  ;;  %v15307_v30 = vld [vmem:[#allocation5 + $0x30] ss:$12 sps:$4 sm:$0xff]  }
 0x992   :  { %9006 = vmatpush1.bf16.msra.mxu0 %v15270_v25  ;;  %9068 = vmatprep.subr.bf16.mxu1 %v20604_v13  ;;  %v15295_v25 = vld [vmem:[#allocation5 + $0x78] ss:$12 sps:$4 sm:$0xff]   ;;  %v15309_v32 = vld [vmem:[#allocation5 + $0x34] ss:$12 sps:$4 sm:$0xff]   ;;  %v15313_v56 = vld [vmem:[#allocation5 + $0x1c] ss:$12 sps:$4 sm:$0xff]  }
 0x993   :  { %9007 = vmatprep.subr.bf16.mxu0 %v15271_v51  ;;  %v8816_v10 = vsel %vm1774_vm1, %v8811_v3, %v8815_v34  ;;  %v8808_v29 = vsel %vm1774_vm1, %v8803_v27, %v8807_v20  ;;  %v15301_v51 = vld [vmem:[#allocation5 + $0x64] ss:$12 sps:$4 sm:$0xff]   ;;  %v15314_v53 = vld [vmem:[#allocation5 + $0x20] ss:$12 sps:$4 sm:$0xff]   ;;  %v15321_v62 = vld [vmem:[#allocation5 + $0xdc] ss:$12 sps:$4 sm:$0xff]  }
 0x994   :  { %v15315_v42 = vld [vmem:[#allocation5] ss:$12 sps:$4 sm:$0xff]   ;;  %v15319_v59 = vld [vmem:[#allocation5 + $0xd8] ss:$12 sps:$4 sm:$0xff]   ;;  %v15326_v44 = vld [vmem:[#allocation5 + $0xc8] ss:$12 sps:$4 sm:$0xff]  }
 0x995   :  { %9069 = vmatpush1.bf16.msra.mxu1 %v15273_v16  ;;  %v8822_v16 = vor.u32 %v8820_v38, %v8815_v34  ;;  %v15325_v24 = vld [vmem:[#allocation5 + $0xc4] ss:$12 sps:$4 sm:$0xff]   ;;  %v15329_v43 = vld [vmem:[#allocation5 + $0x28c] ss:$12 sps:$4 sm:$0xff]   ;;  %v15333_v22 = vld [vmem:[#allocation5 + $0x274] ss:$12 sps:$4 sm:$0xff]  }
 0x996   :  { %9008 = vmatpush1.bf16.msra.mxu0 %v15274_v14  ;;  %9070 = vmatprep.subr.bf16.mxu1 %v20604_v13  ;;  %v8817_v14 = vshrl.u32 %v8734_v2, 16  ;;  %v15331_v4 = vld [vmem:[#allocation5 + $0x270] ss:$12 sps:$4 sm:$0xff]   ;;  %v8681_v28 = vld [vmem:[#allocation15 + $0x48] sm:$0x3f] }
 0x997   :  { %9009 = vmatprep.subr.bf16.mxu0 %v15275_v46  ;;  %v15302_v46 = vld [vmem:[#allocation5 + $0x68] ss:$12 sps:$4 sm:$0xff]   ;;  %v8687_v49 = vpack.c.bf16 %v8681_v28, %v8681_v28  ;;  %v15335_v2 = vld [vmem:[#allocation5 + $0x258] ss:$12 sps:$4 sm:$0xff]   ;;  %v15339_v35 = vld [vmem:[#allocation5 + $0x240] ss:$12 sps:$4 sm:$0xff]  }
 0x998   :  { %v8819_v9 = vor.u32 %v8817_v14, %v8807_v20  ;;  %v15337_v18 = vld [vmem:[#allocation5 + $0x25c] ss:$12 sps:$4 sm:$0xff]   ;;  %v15349_v20 = vld [vmem:[#allocation5 + $0x214] ss:$12 sps:$4 sm:$0xff]   ;;  %v15359_v58 = vld [vmem:[#allocation5 + $0x2b8] ss:$12 sps:$4 sm:$0xff]  }
 0x999   :  { %9071 = vmatpush1.bf16.msra.mxu1 %v15277_v5  ;;  %v15310_v5 = vld [vmem:[#allocation5 + $0x38] ss:$12 sps:$4 sm:$0xff]   ;;  %v15342_v3 = vld [vmem:[#allocation5 + $0x248] ss:$12 sps:$4 sm:$0xff]   ;;  %v15347_v38 = vld [vmem:[#allocation5 + $0x210] ss:$12 sps:$4 sm:$0xff]  }
 0x99a   :  { %9010 = vmatpush1.bf16.msra.mxu0 %v15278_v17  ;;  %9084 = vmatprep.subr.bf16.mxu1 %v20604_v13  ;;  %v15311_v17 = vld [vmem:[#allocation5 + $0x18] ss:$12 sps:$4 sm:$0xff]   ;;  %v15343_v34 = vld [vmem:[#allocation5 + $0x228] ss:$12 sps:$4 sm:$0xff]  }
 0x99b   :  { %9023 = vmatprep.subr.bf16.mxu0 %v15279_v23  ;;  %v15318_v23 = vld [vmem:[#allocation5 + $0x8] ss:$12 sps:$4 sm:$0xff]   ;;  %v8680_v0 = vld [vmem:[#allocation15 + $0x40] sm:$0x3f] }
 0x99c   :  { %v8686_v27 = vpack.c.bf16 %v8680_v0, %v8680_v0  ;;  %v9397_v14 = vld [vmem:[#allocation15] sm:$0xfc] }
 0x99d   :  { %9085 = vmatpush2.bf16.msra.mxu1 %v15281_v41  ;;  %v15322_v41 = vld [vmem:[#allocation5 + $0xe0] ss:$12 sps:$4 sm:$0xff]  }
 0x99e   :  { %9024 = vmatpush2.bf16.msra.mxu0 %v15282_v60  ;;  %9086 = vmatprep.subr.bf16.mxu1 %v20604_v13  ;;  %v15323_v60 = vld [vmem:[#allocation5 + $0xc0] ss:$12 sps:$4 sm:$0xff]  }
 0x99f   :  { %9025 = vmatprep.subr.bf16.mxu0 %v15283_v12  ;;  %v9398_v12 = vld [vmem:[#allocation15 + $0x8] sm:$0xfc] }
 0x9a0   :  { %v9402_v8 = vpack.c.bf16 %v19258_v57, %v9398_v12  ;;  %v15334_v57 = vld [vmem:[#allocation5 + $0x278] ss:$12 sps:$4 sm:$0xff]  }
 0x9a1   :  { %9087 = vmatpush2.bf16.msra.mxu1 %v15285_v7  ;;  %v15330_v7 = vld [vmem:[#allocation5 + $0x290] ss:$12 sps:$4 sm:$0xff]  }
 0x9a2   :  { %9026 = vmatpush2.bf16.msra.mxu0 %v15286_v11  ;;  %9341 = vmatprep.subr.bf16.mxu1 %v20604_v13  ;;  %v8682_v11 = vpack.c.bf16 %v19261_v1, %v8672_v45 }
 0x9a3   :  { %9280 = vmatprep.subr.bf16.mxu0 %v15289_v33  ;;  %v9455_v33 = vrot.slane %v9402_v8, 1 }
 0x9a4   :  { %9089 = vmatmul.mubr.bf16.vlgmr.msra.gmra.mxu1 %v8788_v54 }
 0x9a5   :  { %9342 = vmatpush1.bf16.msra.mxu1 %v15290_v21  ;;  %9028 = vmatmul.mubr.bf16.vlgmr.msra.gmra.mxu0 %v8788_v54  ;;  %v15327_v21 = vld [vmem:[#allocation5 + $0x288] ss:$12 sps:$4 sm:$0xff]   ;;  %v9457_v54 = vsel %vm3785_vm3, %v9455_v33, %v9456_v47 }
 0x9a6   :  { %9281 = vmatpush1.bf16.msra.mxu0 %v15287_v63  ;;  %9343 = vmatprep.subr.bf16.mxu1 %v20604_v13  ;;  %v15338_v63 = vld [vmem:[#allocation5 + $0x260] ss:$12 sps:$4 sm:$0xff]  }
 0x9a7   :  { %9282 = vmatprep.subr.bf16.mxu0 %v15293_v6  ;;  %13794 = vmatprep.mubr.msk.bf16.mxu1 %vm5626_vm6, %v8816_v10  ;;  %v15341_v6 = vld [vmem:[#allocation5 + $0x244] ss:$12 sps:$4 sm:$0xff]  }
 0x9a8   :  { %13791 = vmatprep.mubr.msk.bf16.mxu0 %vm5626_vm6, %v8816_v10  ;;  %v15353_v10 = vld [vmem:[#allocation5 + $0x1fc] ss:$12 sps:$4 sm:$0xff]  }
 0x9a9   :  { %9344 = vmatpush1.bf16.msra.mxu1 %v15294_v52  ;;  %v15345_v52 = vld [vmem:[#allocation5 + $0x22c] ss:$12 sps:$4 sm:$0xff]  }
 0x9aa   :  { %9283 = vmatpush1.bf16.msra.mxu0 %v15291_v39  ;;  %9345 = vmatprep.subr.bf16.mxu1 %v20604_v13  ;;  %v15346_v39 = vld [vmem:[#allocation5 + $0x230] ss:$12 sps:$4 sm:$0xff]  }
 0x9ab   :  { %9284 = vmatprep.subr.bf16.mxu0 %v15297_v37  ;;  %v15350_v37 = vld [vmem:[#allocation5 + $0x218] ss:$12 sps:$4 sm:$0xff]  }
 0x9ac   :  { %9097 = vmatmul.mubr.bf16.gmra.mxu1 %v8808_v29 }
 0x9ad   :  { %9346 = vmatpush1.bf16.msra.mxu1 %v15298_v26  ;;  %9038 = vmatmul.mubr.bf16.gmra.mxu0 %v8808_v29  ;;  %v15354_v26 = vld [vmem:[#allocation5 + $0x200] ss:$12 sps:$4 sm:$0xff]   ;;  %v15351_v29 = vld [vmem:[#allocation5 + $0x1f8] ss:$12 sps:$4 sm:$0xff]  }
 0x9ae   :  { %9285 = vmatpush1.bf16.msra.mxu0 %v15295_v25  ;;  %9347 = vmatprep.subr.bf16.mxu1 %v20604_v13  ;;  %v15357_v25 = vld [vmem:[#allocation5 + $0x1e4] ss:$12 sps:$4 sm:$0xff]  }
 0x9af   :  { %9286 = vmatprep.subr.bf16.mxu0 %v15301_v51  ;;  %13795 = vmatprep.mubr.msk.bf16.mxu1 %vm5626_vm6, %v8822_v16  ;;  %v15358_v51 = vld [vmem:[#allocation5 + $0x1e8] ss:$12 sps:$4 sm:$0xff]  }
 0x9b0   :  { %13792 = vmatprep.mubr.msk.bf16.mxu0 %vm5626_vm6, %v8822_v16  ;;  %v15355_v16 = vld [vmem:[#allocation5 + $0x1e0] ss:$12 sps:$4 sm:$0xff]  }
 0x9b1   :  { %9348 = vmatpush1.bf16.msra.mxu1 %v15302_v46  ;;  %v15361_v46 = vld [vmem:[#allocation5 + $0x2bc] ss:$12 sps:$4 sm:$0xff]  }
 0x9b2   :  { %9287 = vmatpush1.bf16.msra.mxu0 %v15299_v15  ;;  %9349 = vmatprep.subr.bf16.mxu1 %v20604_v13  ;;  %v9400_v15 = vld [vmem:[#allocation15 + $0x48] sm:$0xff] }
 0x9b3   :  { %9288 = vmatprep.subr.bf16.mxu0 %v15305_v61  ;;  %v15362_v61 = vld [vmem:[#allocation5 + $0x2c0] ss:$12 sps:$4 sm:$0xff]  }
 0x9b4   :  { %9105 = vmatmul.mubr.bf16.gmra.mxu1 %v8819_v9 }
 0x9b5   :  { %9350 = vmatpush1.bf16.msra.mxu1 %v15306_v48  ;;  %9048 = vmatmul.mubr.bf16.gmra.mxu0 %v8819_v9  ;;  %v9401_v9 = vpack.c.bf16 %v19261_v1, %v9397_v14  ;;  %v9404_v48 = vpack.c.bf16 %v9400_v15, %v9400_v15 }
 0x9b6   :  { %9289 = vmatpush1.bf16.msra.mxu0 %v15303_v40  ;;  %9351 = vmatprep.subr.bf16.mxu1 %v20604_v13  ;;  %v15365_v40 = vld [vmem:[#allocation5 + $0x2a4] ss:$12 sps:$4 sm:$0xff]  }
 0x9b7   :  { %9290 = vmatprep.subr.bf16.mxu0 %v15309_v32  ;;  %13829 = vmatprep.mubr.msk.bf16.mxu1 %vm5626_vm6, %v8683_v50  ;;  %v15366_v32 = vld [vmem:[#allocation5 + $0x2a8] ss:$12 sps:$4 sm:$0xff]  }
 0x9b8   :  { %13826 = vmatprep.mubr.msk.bf16.mxu0 %vm5626_vm6, %v8683_v50  ;;  %v9452_v50 = vrot.slane %v9401_v9, 1 }
 0x9b9   :  { %9352 = vmatpush1.bf16.msra.mxu1 %v15310_v5  ;;  %v9453_v5 = vrot.slane %v19268_v31, 1 }
 0x9ba   :  { %9291 = vmatpush1.bf16.msra.mxu0 %v15307_v30  ;;  %9353 = vmatprep.subr.bf16.mxu1 %v20604_v13  ;;  %v15363_v30 = vld [vmem:[#allocation5 + $0x2a0] ss:$12 sps:$4 sm:$0xff]  }
 0x9bb   :  { %9292 = vmatprep.subr.bf16.mxu0 %v15313_v56  ;;  %v9460_v56 = vrot.slane %v9404_v48, 1  ;;  %v9454_v1 = vsel %vm3785_vm3, %v9452_v50, %v9453_v5  ;;  %v9766_v48 = vld [vmem:[%s20685_s24] sm:$0x7] }
 0x9bd   :  { %9354 = vmatpush1.bf16.msra.mxu1 %v15314_v53  ;;  %v9399_v53 = vld [vmem:[#allocation15 + $0x40] sm:$0xff] }
 0x9be   :  { %9293 = vmatpush1.bf16.msra.mxu0 %v15311_v17  ;;  %9355 = vmatprep.subr.bf16.mxu1 %v20604_v13  ;;  %v9403_v17 = vpack.c.bf16 %v9399_v53, %v9399_v53 }
 0x9bf   :  { %9294 = vmatprep.subr.bf16.mxu0 %v15317_v36  ;;  %v9461_v36 = vsel %vm3785_vm3, %v9456_v47, %v9460_v56 }
 0x9c1   :  { %9356 = vmatpush1.bf16.msra.mxu1 %v15318_v23 }
 0x9c2   :  { %9295 = vmatpush1.bf16.msra.mxu0 %v15315_v42  ;;  %9369 = vmatprep.subr.bf16.mxu1 %v20604_v13 }
 0x9c3   :  { %9308 = vmatprep.subr.bf16.mxu0 %v15321_v62 }
 0x9c5   :  { %9370 = vmatpush2.bf16.msra.mxu1 %v15322_v41 }
 0x9c6   :  { %9309 = vmatpush2.bf16.msra.mxu0 %v15319_v59  ;;  %9371 = vmatprep.subr.bf16.mxu1 %v20604_v13 }
 0x9c7   :  { %9310 = vmatprep.subr.bf16.mxu0 %v15325_v24 }
 0x9c9   :  { %9372 = vmatpush2.bf16.msra.mxu1 %v15326_v44 }
 0x9ca   :  { %9311 = vmatpush2.bf16.msra.mxu0 %v15323_v60  ;;  %9695 = vmatprep.subr.bf16.mxu1 %v20604_v13 }
 0x9cb   :  { %9634 = vmatprep.subr.bf16.mxu0 %v15329_v43 }
 0x9cc   :  { %9374 = vmatmul.mubr.bf16.vlgmr.msra.gmra.mxu1 %v8682_v11 }
 0x9cd   :  { %9313 = vmatmul.mubr.bf16.vlgmr.msra.gmra.mxu0 %v8682_v11  ;;  %9696 = vmatpush1.bf16.msra.mxu1 %v15330_v7 }
 0x9ce   :  { %9635 = vmatpush1.bf16.msra.mxu0 %v15327_v21  ;;  %9697 = vmatprep.subr.bf16.mxu1 %v20604_v13 }
 0x9cf   :  { %9636 = vmatprep.subr.bf16.mxu0 %v15333_v22  ;;  %13830 = vmatprep.mubr.msk.bf16.mxu1 %vm5626_vm6, %v19263_v19 }
 0x9d0   :  { %13827 = vmatprep.mubr.msk.bf16.mxu0 %vm5626_vm6, %v19263_v19  ;;  %v19338_v19 = vld [vmem:[%s20684_s19] sm:$0xff]  }
 0x9d1   :  { %9698 = vmatpush1.bf16.msra.mxu1 %v15334_v57 }
 0x9d2   :  { %9637 = vmatpush1.bf16.msra.mxu0 %v15331_v4  ;;  %9699 = vmatprep.subr.bf16.mxu1 %v20604_v13 }
 0x9d3   :  { %9638 = vmatprep.subr.bf16.mxu0 %v15337_v18 }
 0x9d4   :  { %9382 = vmatmul.mubr.bf16.gmra.mxu1 %v19268_v31 }
 0x9d5   :  { %9700 = vmatpush1.bf16.msra.mxu1 %v15338_v63  ;;  %13831 = vmatprep.mubr.msk.bf16.mxu1 %vm5626_vm6, %v8687_v49 }
 0x9d6   :  { %9639 = vmatpush1.bf16.msra.mxu0 %v15335_v2  ;;  %9701 = vmatprep.subr.bf16.mxu1 %v20604_v13 }
 0x9d7   :  { %9640 = vmatprep.subr.bf16.mxu0 %v15341_v6  ;;  %9323 = vmatmul.mubr.bf16.gmra.mxu0 %v19268_v31  ;;  %v9458_v31 = vrot.slane %v9403_v17, 1 }
 0x9d8   :  { %13828 = vmatprep.mubr.msk.bf16.mxu0 %vm5626_vm6, %v8687_v49 }
 0x9d9   :  { %9702 = vmatpush1.bf16.msra.mxu1 %v15342_v3  ;;  %v9459_v23 = vsel %vm3785_vm3, %v9453_v5, %v9458_v31 }
 0x9da   :  { %9641 = vmatpush1.bf16.msra.mxu0 %v15339_v35  ;;  %9703 = vmatprep.subr.bf16.mxu1 %v20604_v13 }
 0x9db   :  { %9642 = vmatprep.subr.bf16.mxu0 %v15345_v52 }
 0x9dc   :  { %9390 = vmatmul.mubr.bf16.gmra.mxu1 %v8686_v27 }
 0x9dd   :  { %9704 = vmatpush1.bf16.msra.mxu1 %v15346_v39  ;;  %13865 = vmatprep.mubr.msk.bf16.mxu1 %vm5626_vm6, %v9457_v54 }
 0x9de   :  { %9643 = vmatpush1.bf16.msra.mxu0 %v15343_v34  ;;  %9705 = vmatprep.subr.bf16.mxu1 %v20604_v13 }
 0x9df   :  { %9644 = vmatprep.subr.bf16.mxu0 %v15349_v20  ;;  %9333 = vmatmul.mubr.bf16.gmra.mxu0 %v8686_v27 }
 0x9e0   :  { %13862 = vmatprep.mubr.msk.bf16.mxu0 %vm5626_vm6, %v9457_v54 }
 0x9e1   :  { %9706 = vmatpush1.bf16.msra.mxu1 %v15350_v37 }
 0x9e2   :  { %9645 = vmatpush1.bf16.msra.mxu0 %v15347_v38  ;;  %9707 = vmatprep.subr.bf16.mxu1 %v20604_v13 }
 0x9e3   :  { %9646 = vmatprep.subr.bf16.mxu0 %v15353_v10 }
 0x9e5   :  { %9708 = vmatpush1.bf16.msra.mxu1 %v15354_v26 }
 0x9e6   :  { %9647 = vmatpush1.bf16.msra.mxu0 %v15351_v29  ;;  %9709 = vmatprep.subr.bf16.mxu1 %v20604_v13 }
 0x9e7   :  { %9648 = vmatprep.subr.bf16.mxu0 %v15357_v25 }
 0x9e9   :  { %9710 = vmatpush1.bf16.msra.mxu1 %v15358_v51 }
 0x9ea   :  { %9649 = vmatpush1.bf16.msra.mxu0 %v15355_v16  ;;  %9723 = vmatprep.subr.bf16.mxu1 %v20604_v13 }
 0x9eb   :  { %9662 = vmatprep.subr.bf16.mxu0 %v15361_v46 }
 0x9ed   :  { %9724 = vmatpush2.bf16.msra.mxu1 %v15362_v61 }
 0x9ee   :  { %9663 = vmatpush2.bf16.msra.mxu0 %v15359_v58  ;;  %9725 = vmatprep.subr.bf16.mxu1 %v20604_v13 }
 0x9ef   :  { %9664 = vmatprep.subr.bf16.mxu0 %v15365_v40 }
 0x9f1   :  { %9726 = vmatpush2.bf16.msra.mxu1 %v15366_v32 }
 0x9f2   :  { %9665 = vmatpush2.bf16.msra.mxu0 %v15363_v30  ;;  %v20686_v30 = vld [vmem:[#allocation286_spill] sm:$0xff] }
 0x9f4   :  { %9728 = vmatmul.mubr.bf16.vlgmr.msra.gmra.mxu1 %v9454_v1 }
 0x9f5   :  { %9667 = vmatmul.mubr.bf16.vlgmr.msra.gmra.mxu0 %v9454_v1  ;;  %13866 = vmatprep.mubr.msk.bf16.mxu1 %vm5626_vm6, %v9461_v36 }
 0x9f6   :  { %13863 = vmatprep.mubr.msk.bf16.mxu0 %vm5626_vm6, %v9461_v36  ;;  %v20687_v36 = vld [vmem:[#allocation320_spill] sm:$0xff] }
 0x9fc   :  { %9736 = vmatmul.mubr.bf16.gmra.mxu1 %v9459_v23 }
 0x9fd   :  { %9677 = vmatmul.mubr.bf16.gmra.mxu0 %v9459_v23  ;;  %13867 = vmatprep.mubr.msk.bf16.mxu1 %vm5626_vm6, %v9460_v56 }
 0x9fe   :  { %13864 = vmatprep.mubr.msk.bf16.mxu0 %vm5626_vm6, %v9460_v56  ;;  %v19368_v56 = vrot.slane %v9766_v48, %v20686_v30 }
 0xa04   :  { %9744 = vmatmul.mubr.bf16.gmra.mxu1 %v9458_v31 }
 0xa05   :  { %9687 = vmatmul.mubr.bf16.gmra.mxu0 %v9458_v31  ;;  %14585 = vmatprep.mubr.msk.bf16.mxu1 %vm9833_vm12, %v19338_v19  ;;  %v19371_v31 = vrot.slane %v9766_v48, %v20687_v36 }
 0xa06   :  { %9882 = vmatprep.mubr.bf16.mxu0 %v20604_v13 }
 0xa64   :  { %v9090_v42 = vpop.f32.mrf.mxu1 }
 0xa65   :  { %v9029_v62 = vpop.f32.mrf.mxu0 }
 0xa66   :  { %v9092_v41 = vpop.f32.mrf.mxu1 }
 0xa67   :  { %v9031_v59 = vpop.f32.mrf.mxu0 }
 0xa68   :  { %v9093_v24 = vpop.f32.mrf.mxu1 }
 0xa69   :  { %v9033_v44 = vpop.f32.mrf.mxu0 }
 0xa6a   :  { %v9095_v45 = vpop.f32.mrf.mxu1 }
 0xa6b   :  { %v9035_v60 = vpop.f32.mrf.mxu0 }
 0xa6c   :  { %v19342_v12 = vpop.f32.mrf.mxu1 }
 0xa6d   :  { %v19344_v43 = vpop.f32.mrf.mxu0 }
 0xa6e   :  { %v9100_v7 = vpop.f32.mrf.mxu1 }
 0xa6f   :  { %v19346_v8 = vpop.f32.mrf.mxu0 }
 0xa70   :  { %v19348_v47 = vpop.f32.mrf.mxu1 }
 0xa71   :  { %v19350_v11 = vpop.f32.mrf.mxu0 }
 0xa72   :  { %v9103_v33 = vpop.f32.mrf.mxu1 }
 0xa73   :  { %v19352_v21 = vpop.f32.mrf.mxu0 }
 0xa74   :  { %v19354_v22 = vpop.f32.mrf.mxu1 }
 0xa75   :  { %v19356_v54 = vpop.f32.mrf.mxu0 }
 0xa76   :  { %v9108_v57 = vpop.f32.mrf.mxu1 }
 0xa77   :  { %v19358_v4 = vpop.f32.mrf.mxu0  ;;  %v20688_v57 = vld [vmem:[#allocation319_spill] sm:$0xff] }
 0xa78   :  { %v9109_v28 = vpop.f32.mrf.mxu1 }
 0xa79   :  { %v9053_v18 = vpop.f32.mrf.mxu0  ;;  %v19374_v28 = vrot.slane %v9766_v48, %v20688_v57 }
 0xa7a   :  { %v9110_v63 = vpop.f32.mrf.mxu1 }
 0xa7b   :  { %v9054_v49 = vpop.f32.mrf.mxu0 }
 0xa8c   :  { %v9375_v2 = vpop.f32.mrf.mxu1 }
 0xa8d   :  { %v9314_v6 = vpop.f32.mrf.mxu0  ;;  %v9376_v40 = vadd.f32 %v9375_v2, %v9090_v42 }
 0xa8e   :  { %v9377_v3 = vpop.f32.mrf.mxu1  ;;  %v9315_v32 = vadd.f32 %v9314_v6, %v9029_v62 }
 0xa8f   :  { %v9316_v0 = vpop.f32.mrf.mxu0 }
 0xa90   :  { %v9378_v35 = vpop.f32.mrf.mxu1  ;;  %v9317_v1 = vadd.f32 %v9316_v0, %v9031_v59 }
 0xa91   :  { %v9318_v52 = vpop.f32.mrf.mxu0  ;;  %v9379_v41 = vadd.f32 %v9378_v35, %v9093_v24 }
 0xa92   :  { %v9380_v27 = vpop.f32.mrf.mxu1  ;;  %v9319_v7 = vadd.f32 %v9318_v52, %v9033_v44 }
 0xa93   :  { %v9320_v34 = vpop.f32.mrf.mxu0 }
 0xa94   :  { %v9383_v39 = vpop.f32.mrf.mxu1  ;;  %v9321_v49 = vadd.f32 %v9320_v34, %v9035_v60 }
 0xa95   :  { %v9384_v3 = vadd.f32 %v9383_v39, %v19342_v12 }
 0xa96   :  { %v9385_v20 = vpop.f32.mrf.mxu1 }
 0xa97   :  { %v9324_v37 = vpop.f32.mrf.mxu0 }
 0xa98   :  { %v9386_v38 = vpop.f32.mrf.mxu1  ;;  %v9325_v44 = vadd.f32 %v9324_v37, %v19344_v43 }
 0xa99   :  { %v9326_v10 = vpop.f32.mrf.mxu0  ;;  %v9387_v43 = vadd.f32 %v9386_v38, %v19348_v47 }
 0xa9a   :  { %v9388_v26 = vpop.f32.mrf.mxu1 }
 0xa9b   :  { %v9328_v29 = vpop.f32.mrf.mxu0  ;;  %v9327_v26 = vadd.f32 %v9326_v10, %v19346_v8 }
 0xa9c   :  { %v19360_v25 = vpop.f32.mrf.mxu1  ;;  %v9329_v37 = vadd.f32 %v9328_v29, %v19350_v11 }
 0xa9d   :  { %v9330_v51 = vpop.f32.mrf.mxu0  ;;  %v9392_v29 = vadd.f32 %v19360_v25, %v19354_v22 }
 0xa9e   :  { %v9393_v16 = vpop.f32.mrf.mxu1 }
 0xa9f   :  { %v19362_v14 = vpop.f32.mrf.mxu0 }
 0xaa0   :  { %v9394_v46 = vpop.f32.mrf.mxu1 }
 0xaa1   :  { %v19364_v15 = vpop.f32.mrf.mxu0 }
 0xaa2   :  { %v9395_v61 = vpop.f32.mrf.mxu1 }
 0xaa3   :  { %v9338_v9 = vpop.f32.mrf.mxu0 }
 0xaa5   :  { %v9339_v58 = vpop.f32.mrf.mxu0 }
 0xab4   :  { %v9729_v50 = vpop.f32.mrf.mxu1 }
 0xab5   :  { %v9753_v5 = vadd.f32 %v9729_v50, %v9376_v40  ;;  %v9668_v53 = vpop.f32.mrf.mxu0 }
 0xab6   :  { %v9751_v17 = vadd.f32 %v9668_v53, %v9315_v32  ;;  %v9731_v23 = vpop.f32.mrf.mxu1 }
 0xab7   :  { %v9670_v45 = vpop.f32.mrf.mxu0  ;;  %v9785_v62 = vadd.f32 %v19368_v56, %v9753_v5 }
 0xab8   :  { %v9752_v33 = vadd.f32 %v9670_v45, %v9317_v1  ;;  %v9732_v42 = vpop.f32.mrf.mxu1  ;;  %v9783_v59 = vadd.f32 %v19371_v31, %v9751_v17  ;;  %v9331_v17 = vadd.f32 %v9330_v51, %v19352_v21 }
 0xab9   :  { %v9756_v18 = vadd.f32 %v9732_v42, %v9379_v41  ;;  %v9672_v63 = vpop.f32.mrf.mxu0  ;;  %v9800_v60 = vmax.f32 %v9785_v62, 0.0  ;;  %v9337_v62 = vadd.f32 %v19364_v15, %v19358_v4 }
 0xaba   :  { %v9754_v2 = vadd.f32 %v9672_v63, %v9319_v7  ;;  %v9734_v6 = vpop.f32.mrf.mxu1  ;;  %v9784_v35 = vadd.f32 %v19374_v28, %v9752_v33  ;;  %v9798_v61 = vmax.f32 %v9783_v59, 0.0  ;;  %v9335_v33 = vadd.f32 %v19362_v14, %v19356_v54 }
 0xabb   :  { %v9788_v24 = vadd.f32 %v19368_v56, %v9756_v18  ;;  %v9674_v0 = vpop.f32.mrf.mxu0 }
 0xabc   :  { %v9786_v52 = vadd.f32 %v19371_v31, %v9754_v2  ;;  %v9755_v27 = vadd.f32 %v9674_v0, %v9321_v49  ;;  %v9737_v20 = vpop.f32.mrf.mxu1  ;;  %v9799_v32 = vmax.f32 %v9784_v35, 0.0 }
 0xabd   :  { %v9803_v34 = vmax.f32 %v9788_v24, 0.0  ;;  %v9759_v16 = vadd.f32 %v9737_v20, %v9384_v3  ;;  %v9678_v46 = vpop.f32.mrf.mxu0 }
 0xabe   :  { %v9801_v9 = vmax.f32 %v9786_v52, 0.0  ;;  %v9787_v12 = vadd.f32 %v19374_v28, %v9755_v27  ;;  %v9757_v39 = vadd.f32 %v9678_v46, %v9325_v44  ;;  %v9739_v58 = vpop.f32.mrf.mxu1 }
 0xabf   :  { %v19387_v48 = vpack.c.bf16 %v9803_v34, %v9800_v60  ;;  %v9680_v40 = vpop.f32.mrf.mxu0  ;;  %v9791_v30 = vadd.f32 %v19368_v56, %v9759_v16  ;;  %v15369_v58 = vld [vmem:[%s20689_s30] sm:$0xff]  }
 0xac0   :  { %v19389_v50 = vpack.c.bf16 %v9801_v9, %v9798_v61  ;;  %v9802_v8 = vmax.f32 %v9787_v12, 0.0  ;;  %v9758_v10 = vadd.f32 %v9680_v40, %v9327_v26  ;;  %v9740_v5 = vpop.f32.mrf.mxu1  ;;  %v9789_v23 = vadd.f32 %v19371_v31, %v9757_v39  ;;  %v15368_v39 = vld [vmem:[%s20684_s19 + $0x8] ss:$0 sps:$4 sm:$0x77]   ;;  %v20691_v40 = vld [vmem:[#allocation156_spill] sm:$0xff] }
 0xac1   :  { %v9762_v53 = vadd.f32 %v9740_v5, %v9387_v43  ;;  %v9682_v1 = vpop.f32.mrf.mxu0  ;;  %v9806_v18 = vmax.f32 %v9791_v30, 0.0  ;;  %v15370_v43 = vld [vmem:[%s20689_s30 + $0x8] ss:$0 sps:$4 sm:$0x77]   ;;  %v20694_v5 = vld [vmem:[#allocation153_spill] sm:$0xff]  ;;  %v20695_v30 = vld [vmem:[#allocation152_spill] sm:$0xff] }
 0xac2   :  { %v9760_v47 = vadd.f32 %v9682_v1, %v9329_v37  ;;  %v9742_v38 = vpop.f32.mrf.mxu1  ;;  %v19394_v11 = vpack.c.bf16 %v9802_v8, %v9799_v32  ;;  %v9790_v41 = vadd.f32 %v19374_v28, %v9758_v10  ;;  %v9804_v22 = vmax.f32 %v9789_v23, 0.0  ;;  %v20690_v37 = vld [vmem:[#allocation157_spill] sm:$0xff]  ;;  %v20692_v8 = vld [vmem:[#allocation155_spill] sm:$0xff]  ;;  %v20693_v10 = vld [vmem:[#allocation154_spill] sm:$0xff] }
 0xac3   :  { %v9794_v45 = vadd.f32 %v19368_v56, %v9762_v53  ;;  %v9684_v7 = vpop.f32.mrf.mxu0  ;;  %v13897_v32 = vcombine.high %v20691_v40, %v20690_v37  ;;  %v13893_v53 = vcombine.high %v20695_v30, %v20694_v5  ;;  %v13892_v1 = vcombine.low %v20695_v30, %v20694_v5  ;;  %v20697_v23 = vld [vmem:[#allocation150_spill] sm:$0xff]  ;;  %v20725_v5 = vld [vmem:[#allocation160_spill] sm:$0xff] }
 0xac4   :  { %v9792_v42 = vadd.f32 %v19371_v31, %v9760_v47  ;;  %v9761_v21 = vadd.f32 %v9684_v7, %v9331_v17  ;;  %v9745_v51 = vpop.f32.mrf.mxu1  ;;  %v9805_v24 = vmax.f32 %v9790_v41, 0.0  ;;  %v20696_v17 = vld [vmem:[#allocation151_spill] sm:$0xff] }
 0xac5   :  { %v9809_v63 = vmax.f32 %v9794_v45, 0.0  ;;  %v9765_v49 = vadd.f32 %v9745_v51, %v9392_v29  ;;  %v9688_v59 = vpop.f32.mrf.mxu0  ;;  %v13891_v47 = vcombine.high %v20697_v23, %v20696_v17  ;;  %v13890_v38 = vcombine.low %v20697_v23, %v20696_v17  ;;  %v20699_v29 = vld [vmem:[#allocation148_spill] sm:$0xff]  ;;  %v20700_v7 = vld [vmem:[#allocation147_spill] sm:$0xff]  ;;  %v20702_v51 = vld [vmem:[#allocation145_spill] sm:$0xff] }
 0xac6   :  { %v9807_v25 = vmax.f32 %v9792_v42, 0.0  ;;  %v9793_v2 = vadd.f32 %v19374_v28, %v9761_v21  ;;  %v9763_v6 = vadd.f32 %v9688_v59, %v9335_v33  ;;  %v9747_v3 = vpop.f32.mrf.mxu1  ;;  %v20701_v33 = vld [vmem:[#allocation146_spill] sm:$0xff] }
 0xac7   :  { %v9818_v0 = vpack.c.bf16 %v9809_v63, %v9806_v18  ;;  %v9797_v54 = vadd.f32 %v19368_v56, %v9765_v49  ;;  %v9690_v14 = vpop.f32.mrf.mxu0  ;;  %v13887_v42 = vcombine.high %v20701_v33, %v20700_v7  ;;  %v13886_v21 = vcombine.low %v20701_v33, %v20700_v7  ;;  %v20704_v49 = vld [vmem:[#allocation143_spill] sm:$0xff]  ;;  %v20705_v59 = vld [vmem:[#allocation142_spill] sm:$0xff] }
 0xac8   :  { %v9816_v44 = vpack.c.bf16 %v9807_v25, %v9804_v22  ;;  %v9808_v35 = vmax.f32 %v9793_v2, 0.0  ;;  %v9795_v52 = vadd.f32 %v19371_v31, %v9763_v6  ;;  %v9764_v4 = vadd.f32 %v9690_v14, %v9337_v62  ;;  %v9748_v15 = vpop.f32.mrf.mxu1  ;;  %v20703_v62 = vld [vmem:[#allocation144_spill] sm:$0xff]  ;;  %v20706_v2 = vld [vmem:[#allocation173_spill] sm:$0xff]  ;;  %v20727_v17 = vld [vmem:[#allocation158_spill] sm:$0xff] }
 0xac9   :  { %v9812_v27 = vmax.f32 %v9797_v54, 0.0  ;;  %v9692_v20 = vpop.f32.mrf.mxu0  ;;  %v13885_v18 = vcombine.high %v20703_v62, %v20702_v51  ;;  %v13884_v63 = vcombine.low %v20703_v62, %v20702_v51  ;;  %v13883_v22 = vcombine.high %v20705_v59, %v20704_v49  ;;  %v20707_v6 = vld [vmem:[#allocation172_spill] sm:$0xff]  ;;  %v20709_v54 = vld [vmem:[#allocation170_spill] sm:$0xff] }
 0xaca   :  { %v9810_v26 = vmax.f32 %v9795_v52, 0.0  ;;  %v9796_v60 = vadd.f32 %v19374_v28, %v9764_v4  ;;  %v9749_v34 = vpop.f32.mrf.mxu1  ;;  %v9817_v16 = vpack.c.bf16 %v9808_v35, %v9805_v24  ;;  %v13882_v25 = vcombine.low %v20705_v59, %v20704_v49  ;;  %v20710_v35 = vld [vmem:[#allocation169_spill] sm:$0xff]  ;;  %v20711_v52 = vld [vmem:[#allocation168_spill] sm:$0xff]  ;;  %v20713_v20 = vld [vmem:[#allocation166_spill] sm:$0xff] }
 0xacb   :  { %v9821_v46 = vpack.c.bf16 %v9812_v27, %v9812_v27  ;;  %v9693_v61 = vpop.f32.mrf.mxu0  ;;  %v13913_v3 = vcombine.high %v20707_v6, %v20706_v2  ;;  %v13912_v24 = vcombine.low %v20707_v6, %v20706_v2  ;;  %v13909_v4 = vcombine.high %v20711_v52, %v20710_v35  ;;  %v20712_v27 = vld [vmem:[#allocation167_spill] sm:$0xff]  ;;  %v20714_v34 = vld [vmem:[#allocation177_spill] sm:$0xff] }
 0xacc   :  { %v9819_v9 = vpack.c.bf16 %v9810_v26, %v9810_v26  ;;  %v9811_v56 = vmax.f32 %v9796_v60, 0.0  ;;  %v13908_v15 = vcombine.low %v20711_v52, %v20710_v35  ;;  %v13907_v26 = vcombine.high %v20713_v20, %v20712_v27  ;;  %v20716_v61 = vld [vmem:[#allocation165_spill] sm:$0xff]  ;;  %v20730_v35 = vld [vmem:[#allocation191_spill] sm:$0xff]  ;;  %v20731_v52 = vld [vmem:[#allocation190_spill] sm:$0xff] }
 0xacd   :  { %14710 = vmatprep.subr.msk.bf16.mxu1 %vm9840_vm13, %v9821_v46  ;;  %v9848_v31 = vsel %vm9840_vm13, %v9821_v46, 0  ;;  %v13906_v60 = vcombine.low %v20713_v20, %v20712_v27 }
 0xace   :  { %v9820_v12 = vpack.c.bf16 %v9811_v56, %v9811_v56  ;;  %14580 = vmatpush3.bf16.msra.mxu1 %v9848_v31  ;;  %v9842_v28 = vsel %vm9840_vm13, %v9819_v9, 0  ;;  %v20717_v9 = vld [vmem:[#allocation164_spill] sm:$0xff] }
 0xacf   :  { %14581 = vmatprep.subr.bf16.mxu1 %v9818_v0  ;;  %v13905_v56 = vcombine.high %v20717_v9, %v20716_v61 }
 0xad0   :  { %13870 = vmatprep.subr.msk.bf16.mxu0 %vm9840_vm13, %v9820_v12 }
 0xad1   :  { %9861 = vmatpush1.bf16.msra.mxu0 %v9842_v28 }
 0xad2   :  { %9862 = vmatprep.subr.bf16.mxu0 %v9817_v16  ;;  %14582 = vmatpush3.bf16.msra.mxu1 %v9818_v0 }
 0xad3   :  { %14583 = vmatprep.subr.bf16.mxu1 %v19387_v48 }
 0xad5   :  { %9863 = vmatpush1.bf16.msra.mxu0 %v9816_v44 }
 0xad6   :  { %9864 = vmatprep.subr.bf16.mxu0 %v19394_v11  ;;  %14584 = vmatpush3.bf16.msra.mxu1 %v19387_v48 }
 0xad7   :  { %14711 = vmatprep.subr.msk.bf16.mxu1 %vm9840_vm13, %v9821_v46 }
 0xad9   :  { %9865 = vmatpush1.bf16.msra.mxu0 %v19389_v50  ;;  %14586 = vmatmul.mubr.msk.bf16.vlgmr.msra.gmra.mxu1 %vm9833_vm12, %v15368_v39 }
 0xada   :  { %13877 = vmatprep.subr.msk.bf16.mxu0 %vm9840_vm13, %v9820_v12  ;;  %14590 = vmatpush3.bf16.msra.mxu1 %v9848_v31  ;;  %v13904_v12 = vcombine.low %v20717_v9, %v20716_v61  ;;  %v20733_v61 = vld [vmem:[#allocation188_spill] sm:$0xff] }
 0xadb   :  { %14591 = vmatprep.subr.bf16.mxu1 %v9818_v0  ;;  %14595 = vmatprep.mubr.msk.bf16.mxu1 %vm9833_vm12, %v15369_v58 }
 0xadc   :  { %13871 = vmatmul.mubr.msk.bf16.vlgmr.msra.gmra.mxu0 %vm9833_vm12, %v19338_v19  ;;  %v13896_v19 = vcombine.low %v20691_v40, %v20690_v37  ;;  %v20721_v37 = vld [vmem:[#allocation162_spill] sm:$0xff] }
 0xadd   :  { %9977 = vmatpush1.bf16.msra.mxu0 %v9842_v28  ;;  %9892 = vmatprep.mubr.bf16.mxu0 %v20604_v13  ;;  %v20718_v28 = vld [vmem:[#allocation175_spill] sm:$0xff] }
 0xade   :  { %9978 = vmatprep.subr.bf16.mxu0 %v9817_v16  ;;  %14592 = vmatpush3.bf16.msra.mxu1 %v9818_v0  ;;  %v20708_v0 = vld [vmem:[#allocation171_spill] sm:$0xff]  ;;  %v20715_v16 = vld [vmem:[#allocation176_spill] sm:$0xff] }
 0xadf   :  { %14593 = vmatprep.subr.bf16.mxu1 %v19387_v48  ;;  %v13911_v14 = vcombine.high %v20709_v54, %v20708_v0  ;;  %v13917_v46 = vcombine.high %v20715_v16, %v20714_v34  ;;  %v13916_v31 = vcombine.low %v20715_v16, %v20714_v34 }
 0xae1   :  { %9979 = vmatpush1.bf16.msra.mxu0 %v9816_v44  ;;  %v13910_v44 = vcombine.low %v20709_v54, %v20708_v0 }
 0xae2   :  { %9980 = vmatprep.subr.bf16.mxu0 %v19394_v11  ;;  %14594 = vmatpush3.bf16.msra.mxu1 %v19387_v48  ;;  %v13895_v48 = vcombine.high %v20693_v10, %v20692_v8  ;;  %v20698_v11 = vld [vmem:[#allocation149_spill] sm:$0xff] }
 0xae3   :  { %v13889_v41 = vcombine.high %v20699_v29, %v20698_v11  ;;  %v13888_v45 = vcombine.low %v20699_v29, %v20698_v11  ;;  %10365 = vmatprep.subr.bf16.mxu1 %v13917_v46  ;;  %v20729_v11 = vld [vmem:[#allocation212_spill] sm:$0xff]  ;;  %v20732_v46 = vld [vmem:[#allocation189_spill] sm:$0xff] }
 0xae4   :  { %13872 = vmatmul.mubr.msk.bf16.gmra.mxu0 %vm9833_vm12, %v15368_v39  ;;  %v20719_v39 = vld [vmem:[#allocation174_spill] sm:$0xff]  ;;  %v13931_v9 = vcombine.high %v20733_v61, %v20732_v46 }
 0xae5   :  { %9981 = vmatpush1.bf16.msra.mxu0 %v19389_v50  ;;  %14596 = vmatmul.mubr.msk.bf16.vlgmr.msra.gmra.mxu1 %vm9833_vm12, %v15370_v43  ;;  %v13894_v50 = vcombine.low %v20693_v10, %v20692_v8  ;;  %v20722_v8 = vld [vmem:[#allocation193_spill] sm:$0xff]  ;;  %v20723_v10 = vld [vmem:[#allocation192_spill] sm:$0xff] }
 0xae6   :  { %9998 = vmatprep.mubr.bf16.mxu0 %v20604_v13  ;;  %10302 = vmatprep.subr.bf16.mxu0 %v13897_v32  ;;  %v13914_v32 = vcombine.low %v20719_v39, %v20718_v28  ;;  %v13934_v54 = vcombine.low %v20723_v10, %v20722_v8 }
 0xae7   :  { %10385 = vmatprep.mubr.bf16.mxu1 %v20604_v13  ;;  %10366 = vmatpush1.bf16.msra.mxu1 %v13916_v31 }
 0xaec   :  { %13878 = vmatmul.mubr.msk.bf16.vlgmr.msra.gmra.mxu0 %vm9833_vm12, %v15369_v58  ;;  %v13915_v58 = vcombine.high %v20719_v39, %v20718_v28  ;;  %v13930_v39 = vcombine.low %v20733_v61, %v20732_v46  ;;  %v20756_v61 = vld [vmem:[#allocation199_spill] sm:$0xff] }
 0xaed   :  { %10008 = vmatprep.mubr.bf16.mxu0 %v20604_v13  ;;  %10303 = vmatpush1.bf16.msra.mxu0 %v13896_v19 }
 0xaee   :  { %10304 = vmatprep.subr.bf16.mxu0 %v13895_v48  ;;  %10367 = vmatprep.subr.bf16.mxu1 %v13915_v58  ;;  %v13935_v48 = vcombine.high %v20723_v10, %v20722_v8  ;;  %v20736_v8 = vld [vmem:[#allocation211_spill] sm:$0xff]  ;;  %v20737_v10 = vld [vmem:[#allocation210_spill] sm:$0xff] }
 0xaef   :  { %10368 = vmatpush1.bf16.msra.mxu1 %v13914_v32  ;;  %v20735_v32 = vld [vmem:[#allocation186_spill] sm:$0xff] }
 0xaf0   :  { %10620 = vmatprep.subr.bf16.mxu1 %v13935_v48  ;;  %v13953_v48 = vcombine.high %v20737_v10, %v20736_v8 }
 0xaf1   :  { %10305 = vmatpush1.bf16.msra.mxu0 %v13894_v50  ;;  %v20724_v50 = vld [vmem:[#allocation161_spill] sm:$0xff] }
 0xaf2   :  { %10306 = vmatprep.subr.bf16.mxu0 %v13893_v53  ;;  %v13901_v30 = vcombine.high %v20725_v5, %v20724_v50  ;;  %v13900_v53 = vcombine.low %v20725_v5, %v20724_v50 }
 0xaf4   :  { %13879 = vmatmul.mubr.msk.bf16.gmra.mxu0 %vm9833_vm12, %v15370_v43  ;;  %v20720_v43 = vld [vmem:[#allocation163_spill] sm:$0xff] }
 0xaf5   :  { %10307 = vmatpush1.bf16.msra.mxu0 %v13892_v1  ;;  %v13903_v40 = vcombine.high %v20721_v37, %v20720_v43  ;;  %v13902_v19 = vcombine.low %v20721_v37, %v20720_v43  ;;  %v20726_v1 = vld [vmem:[#allocation159_spill] sm:$0xff] }
 0xaf6   :  { %10308 = vmatprep.subr.bf16.mxu0 %v13891_v47  ;;  %v13899_v23 = vcombine.high %v20727_v17, %v20726_v1  ;;  %v13898_v47 = vcombine.low %v20727_v17, %v20726_v1  ;;  %v13952_v17 = vcombine.low %v20737_v10, %v20736_v8 }
 0xaf9   :  { %10309 = vmatpush1.bf16.msra.mxu0 %v13890_v38  ;;  %v20728_v38 = vld [vmem:[#allocation213_spill] sm:$0xff] }
 0xafa   :  { %10310 = vmatprep.subr.bf16.mxu0 %v13889_v41  ;;  %v13955_v29 = vcombine.high %v20729_v11, %v20728_v38  ;;  %v13954_v58 = vcombine.low %v20729_v11, %v20728_v38 }
 0xafd   :  { %10311 = vmatpush1.bf16.msra.mxu0 %v13888_v45 }
 0xafe   :  { %10312 = vmatprep.subr.bf16.mxu0 %v13887_v42 }
 0xb01   :  { %10313 = vmatpush1.bf16.msra.mxu0 %v13886_v21 }
 0xb02   :  { %10314 = vmatprep.subr.bf16.mxu0 %v13885_v18 }
 0xb05   :  { %10315 = vmatpush1.bf16.msra.mxu0 %v13884_v63 }
 0xb06   :  { %10316 = vmatprep.subr.bf16.mxu0 %v13883_v22 }
 0xb09   :  { %10317 = vmatpush1.bf16.msra.mxu0 %v13882_v25 }
 0xb0a   :  { %10318 = vmatprep.subr.bf16.mxu0 %v13913_v3 }
 0xb0d   :  { %10319 = vmatpush2.bf16.msra.mxu0 %v13912_v24 }
 0xb0e   :  { %10320 = vmatprep.subr.bf16.mxu0 %v13911_v14 }
 0xb11   :  { %10321 = vmatpush2.bf16.msra.mxu0 %v13910_v44 }
 0xb12   :  { %10322 = vmatprep.subr.bf16.mxu0 %v13909_v4  ;;  %v13933_v4 = vcombine.high %v20731_v52, %v20730_v35 }
 0xb15   :  { %10323 = vmatpush2.bf16.msra.mxu0 %v13908_v15 }
 0xb16   :  { %10324 = vmatprep.subr.bf16.mxu0 %v13907_v26 }
 0xb19   :  { %10325 = vmatpush2.bf16.msra.mxu0 %v13906_v60  ;;  %v13932_v60 = vcombine.low %v20731_v52, %v20730_v35  ;;  %v20751_v35 = vld [vmem:[#allocation204_spill] sm:$0xff] }
 0xb1a   :  { %10326 = vmatprep.subr.bf16.mxu0 %v13905_v56 }
 0xb1d   :  { %10327 = vmatpush2.bf16.msra.mxu0 %v13904_v12 }
 0xb1e   :  { %10328 = vmatprep.subr.bf16.mxu0 %v13903_v40  ;;  %v20734_v40 = vld [vmem:[#allocation187_spill] sm:$0xff] }
 0xb1f   :  { %v13928_v1 = vcombine.low %v20735_v32, %v20734_v40 }
 0xb21   :  { %10329 = vmatpush2.bf16.msra.mxu0 %v13902_v19  ;;  %v13929_v19 = vcombine.high %v20735_v32, %v20734_v40  ;;  %v20761_v40 = vld [vmem:[#allocation194_spill] sm:$0xff] }
 0xb22   :  { %10330 = vmatprep.subr.bf16.mxu0 %v13901_v30 }
 0xb25   :  { %10331 = vmatpush2.bf16.msra.mxu0 %v13900_v53 }
 0xb26   :  { %10332 = vmatprep.subr.bf16.mxu0 %v13899_v23  ;;  %v20738_v23 = vld [vmem:[#allocation185_spill] sm:$0xff] }
 0xb29   :  { %10333 = vmatpush2.bf16.msra.mxu0 %v13898_v47  ;;  %v20739_v47 = vld [vmem:[#allocation184_spill] sm:$0xff] }
 0xb2a   :  { %10683 = vmatprep.subr.bf16.mxu0 %v13955_v29  ;;  %v13927_v38 = vcombine.high %v20739_v47, %v20738_v23 }
 0xb99   :  { %v14587_v41 = vpop.f32.mrf.mxu1 }
 0xb9b   :  { %v9935_v45 = vpop.f32.mrf.mxu1 }
 0xb9c   :  { %v9884_v7 = vpop.f32.mrf.mxu0 }
 0xb9d   :  { %v14588_v33 = vpop.f32.mrf.mxu1 }
 0xb9e   :  { %v9886_v42 = vpop.f32.mrf.mxu0 }
 0xb9f   :  { %v9938_v62 = vpop.f32.mrf.mxu1 }
 0xba0   :  { %v9888_v21 = vpop.f32.mrf.mxu0 }
 0xba2   :  { %v9890_v51 = vpop.f32.mrf.mxu0 }
 0xba4   :  { %v9894_v18 = vpop.f32.mrf.mxu0 }
 0xba5   :  { %v14597_v63 = vpop.f32.mrf.mxu1 }
 0xba6   :  { %v9896_v49 = vpop.f32.mrf.mxu0  ;;  %v10073_v34 = vmax.f32 %v14587_v41, %v14597_v63  ;;  %v13926_v41 = vcombine.low %v20739_v47, %v20738_v23  ;;  %v20744_v63 = vld [vmem:[#allocation179_spill] sm:$0xff] }
 0xba7   :  { %v10051_v59 = vpop.f32.mrf.mxu1 }
 0xba8   :  { %v9898_v22 = vpop.f32.mrf.mxu0  ;;  %v10067_v3 = vmax.f32 %v9935_v45, %v10051_v59  ;;  %v10079_v43 = vpack.c.bf16 %v10073_v34, %v10073_v34  ;;  %v20740_v45 = vld [vmem:[#allocation183_spill] sm:$0xff]  ;;  %v20755_v34 = vld [vmem:[#allocation200_spill] sm:$0xff] }
 0xba9   :  { %v14598_v25 = vpop.f32.mrf.mxu1 }
 0xbaa   :  { %v9899_v2 = vpop.f32.mrf.mxu0  ;;  %v20746_v25 = vld [vmem:[#allocation209_spill] sm:$0xff] }
 0xbab   :  { %v10054_v6 = vpop.f32.mrf.mxu1  ;;  %v20747_v2 = vld [vmem:[#allocation208_spill] sm:$0xff] }
 0xbac   :  { %v10070_v24 = vmax.f32 %v9938_v62, %v10054_v6  ;;  %v10000_v0 = vpop.f32.mrf.mxu0  ;;  %v13951_v6 = vcombine.high %v20747_v2, %v20746_v25 }
 0xbad   :  { %v10065_v15 = vmax.f32 %v9884_v7, %v10000_v0  ;;  %v20741_v7 = vld [vmem:[#allocation182_spill] sm:$0xff] }
 0xbae   :  { %v10076_v14 = vpack.c.bf16 %v10070_v24, %v10067_v3  ;;  %v10002_v44 = vpop.f32.mrf.mxu0  ;;  %v13925_v33 = vcombine.high %v20741_v7, %v20740_v45  ;;  %v13950_v3 = vcombine.low %v20747_v2, %v20746_v25  ;;  %v20748_v24 = vld [vmem:[#allocation207_spill] sm:$0xff]  ;;  %v20749_v0 = vld [vmem:[#allocation206_spill] sm:$0xff] }
 0xbaf   :  { %v10066_v20 = vmax.f32 %v9886_v42, %v10002_v44  ;;  %v13924_v42 = vcombine.low %v20741_v7, %v20740_v45  ;;  %v20750_v44 = vld [vmem:[#allocation205_spill] sm:$0xff] }
 0xbb0   :  { %v10004_v27 = vpop.f32.mrf.mxu0  ;;  %13918 = vmatmul.mubr.msk.bf16.vlgmr.msra.gmra.mxu1 %vm5626_vm6, %v10076_v14  ;;  %v13947_v52 = vcombine.high %v20751_v35, %v20750_v44 }
 0xbb1   :  { %v10068_v26 = vmax.f32 %v9888_v21, %v10004_v27  ;;  %10621 = vmatpush1.bf16.msra.mxu1 %v13934_v54  ;;  %10395 = vmatprep.mubr.bf16.mxu1 %v20604_v13  ;;  %v20742_v21 = vld [vmem:[#allocation181_spill] sm:$0xff]  ;;  %v13949_v54 = vcombine.high %v20749_v0, %v20748_v24  ;;  %v20753_v27 = vld [vmem:[#allocation202_spill] sm:$0xff] }
 0xbb2   :  { %v10006_v16 = vpop.f32.mrf.mxu0  ;;  %10622 = vmatprep.subr.bf16.mxu1 %v13933_v4  ;;  %v13946_v4 = vcombine.low %v20751_v35, %v20750_v44 }
 0xbb3   :  { %v10069_v56 = vmax.f32 %v9890_v51, %v10006_v16  ;;  %v19524_v31 = vpack.c.bf16 %v10068_v26, %v10065_v15  ;;  %v20743_v51 = vld [vmem:[#allocation180_spill] sm:$0xff]  ;;  %v20752_v15 = vld [vmem:[#allocation203_spill] sm:$0xff] }
 0xbb4   :  { %v10010_v12 = vpop.f32.mrf.mxu0  ;;  %v13923_v62 = vcombine.high %v20743_v51, %v20742_v21  ;;  %v13944_v26 = vcombine.low %v20753_v27, %v20752_v15 }
 0xbb5   :  { %v10075_v28 = vpack.c.bf16 %v10069_v56, %v10066_v20  ;;  %10623 = vmatpush1.bf16.msra.mxu1 %v13932_v60  ;;  %v10071_v5 = vmax.f32 %v9894_v18, %v10010_v12  ;;  %v13922_v18 = vcombine.low %v20743_v51, %v20742_v21  ;;  %v13945_v20 = vcombine.high %v20753_v27, %v20752_v15  ;;  %v20754_v60 = vld [vmem:[#allocation201_spill] sm:$0xff] }
 0xbb6   :  { %10624 = vmatprep.subr.bf16.mxu1 %v13931_v9  ;;  %v10012_v37 = vpop.f32.mrf.mxu0  ;;  %v13943_v16 = vcombine.high %v20755_v34, %v20754_v60  ;;  %v13942_v46 = vcombine.low %v20755_v34, %v20754_v60  ;;  %v20757_v9 = vld [vmem:[#allocation198_spill] sm:$0xff] }
 0xbb7   :  { %10334 = vmatprep.mubr.bf16.mxu0 %v10075_v28  ;;  %v10072_v50 = vmax.f32 %v9896_v49, %v10012_v37  ;;  %v10077_v29 = vpack.c.bf16 %v10071_v5, %v10071_v5  ;;  %v20745_v49 = vld [vmem:[#allocation178_spill] sm:$0xff]  ;;  %v13941_v56 = vcombine.high %v20757_v9, %v20756_v61  ;;  %v13940_v12 = vcombine.low %v20757_v9, %v20756_v61  ;;  %v20760_v37 = vld [vmem:[#allocation195_spill] sm:$0xff] }
 0xbb8   :  { %10335 = vmatmul.mubr.bf16.vlgmr.msra.gmra.mxu0 %v19524_v31  ;;  %13919 = vmatmul.mubr.msk.bf16.gmra.mxu1 %vm5626_vm6, %v10079_v43  ;;  %v10014_v30 = vpop.f32.mrf.mxu0  ;;  %v13921_v59 = vcombine.high %v20745_v49, %v20744_v63  ;;  %v13920_v22 = vcombine.low %v20745_v49, %v20744_v63  ;;  %v13937_v32 = vcombine.high %v20761_v40, %v20760_v37 }
 0xbb9   :  { %10625 = vmatpush1.bf16.msra.mxu1 %v13930_v39  ;;  %v19536_v53 = vpack.c.bf16 %v10072_v50, %v10072_v50  ;;  %10684 = vmatpush1.bf16.msra.mxu0 %v13954_v58  ;;  %v20759_v39 = vld [vmem:[#allocation196_spill] sm:$0xff] }
 0xbba   :  { %10626 = vmatprep.subr.bf16.mxu1 %v13929_v19  ;;  %10685 = vmatprep.subr.bf16.mxu0 %v13953_v48  ;;  %v10015_v11 = vpop.f32.mrf.mxu0  ;;  %v13936_v19 = vcombine.low %v20761_v40, %v20760_v37 }
 0xbbb   :  { %10344 = vmatprep.mubr.bf16.mxu0 %v19536_v53  ;;  %10652 = vmatprep.mubr.bf16.mxu1 %v10075_v28  ;;  %v20758_v28 = vld [vmem:[#allocation197_spill] sm:$0xff] }
 0xbbc   :  { %v13939_v58 = vcombine.high %v20759_v39, %v20758_v28 }
 0xbbd   :  { %10627 = vmatpush1.bf16.msra.mxu1 %v13928_v1  ;;  %10686 = vmatpush1.bf16.msra.mxu0 %v13952_v17 }
 0xbbe   :  { %10628 = vmatprep.subr.bf16.mxu1 %v13927_v38 }
 0xbc0   :  { %10345 = vmatmul.mubr.bf16.gmra.mxu0 %v10077_v29 }
 0xbc1   :  { %10629 = vmatpush1.bf16.msra.mxu1 %v13926_v41  ;;  %10703 = vmatprep.mubr.bf16.mxu0 %v20604_v13 }
 0xbc2   :  { %10630 = vmatprep.subr.bf16.mxu1 %v13925_v33 }
 0xbc5   :  { %10631 = vmatpush1.bf16.msra.mxu1 %v13924_v42 }
 0xbc6   :  { %10632 = vmatprep.subr.bf16.mxu1 %v13923_v62 }
 0xbc8   :  { %13956 = vmatmul.mubr.msk.bf16.vlgmr.msra.gmra.mxu0 %vm5626_vm6, %v10076_v14  ;;  %v13948_v14 = vcombine.low %v20749_v0, %v20748_v24 }
 0xbc9   :  { %10633 = vmatpush1.bf16.msra.mxu1 %v13922_v18  ;;  %10713 = vmatprep.mubr.bf16.mxu0 %v20604_v13 }
 0xbca   :  { %10634 = vmatprep.subr.bf16.mxu1 %v13921_v59 }
 0xbcd   :  { %10635 = vmatpush1.bf16.msra.mxu1 %v13920_v22 }
 0xbce   :  { %10636 = vmatprep.subr.bf16.mxu1 %v13951_v6 }
 0xbd0   :  { %13957 = vmatmul.mubr.msk.bf16.gmra.mxu0 %vm5626_vm6, %v10079_v43  ;;  %v13938_v43 = vcombine.low %v20759_v39, %v20758_v28 }
 0xbd1   :  { %10637 = vmatpush2.bf16.msra.mxu1 %v13950_v3 }
 0xbd2   :  { %10638 = vmatprep.subr.bf16.mxu1 %v13949_v54 }
 0xbd5   :  { %10639 = vmatpush2.bf16.msra.mxu1 %v13948_v14 }
 0xbd6   :  { %10640 = vmatprep.subr.bf16.mxu1 %v13947_v52 }
 0xbd9   :  { %10641 = vmatpush2.bf16.msra.mxu1 %v13946_v4 }
 0xbda   :  { %10642 = vmatprep.subr.bf16.mxu1 %v13945_v20 }
 0xbdd   :  { %10643 = vmatpush2.bf16.msra.mxu1 %v13944_v26 }
 0xbde   :  { %10644 = vmatprep.subr.bf16.mxu1 %v13943_v16 }
 0xbe1   :  { %10645 = vmatpush2.bf16.msra.mxu1 %v13942_v46 }
 0xbe2   :  { %10646 = vmatprep.subr.bf16.mxu1 %v13941_v56 }
 0xbe5   :  { %10647 = vmatpush2.bf16.msra.mxu1 %v13940_v12 }
 0xbe6   :  { %10648 = vmatprep.subr.bf16.mxu1 %v13939_v58 }
 0xbe9   :  { %10649 = vmatpush2.bf16.msra.mxu1 %v13938_v43 }
 0xbea   :  { %10650 = vmatprep.subr.bf16.mxu1 %v13937_v32 }
 0xbed   :  { %10651 = vmatpush2.bf16.msra.mxu1 %v13936_v19 }
 0xbf0   :  { %10653 = vmatmul.mubr.bf16.vlgmr.msra.gmra.mxu1 %v19524_v31 }
 0xbf1   :  { %10662 = vmatprep.mubr.bf16.mxu1 %v19536_v53 }
 0xbf8   :  { %10663 = vmatmul.mubr.bf16.gmra.mxu1 %v10077_v29 }
 0xc70   :  { %v10387_v8 = vpop.f32.mrf.mxu1 }
 0xc72   :  { %v10389_v10 = vpop.f32.mrf.mxu1 }
 0xc74   :  { %v10391_v48 = vpop.f32.mrf.mxu1 }
 0xc76   :  { %v10393_v50 = vpop.f32.mrf.mxu1 }
 0xc78   :  { %v10336_v5 = vpop.f32.mrf.mxu0  ;;  %v10397_v30 = vpop.f32.mrf.mxu1 }
 0xc79   :  { %v10388_v49 = vadd.f32 %v10387_v8, %v10336_v5 }
 0xc7a   :  { %v10338_v1 = vpop.f32.mrf.mxu0  ;;  %v10399_v17 = vpop.f32.mrf.mxu1 }
 0xc7b   :  { %v10390_v25 = vadd.f32 %v10389_v10, %v10338_v1 }
 0xc7c   :  { %v10340_v23 = vpop.f32.mrf.mxu0  ;;  %v10401_v47 = vpop.f32.mrf.mxu1 }
 0xc7d   :  { %v10392_v24 = vadd.f32 %v10391_v48, %v10340_v23 }
 0xc7e   :  { %v10342_v38 = vpop.f32.mrf.mxu0  ;;  %v10402_v11 = vpop.f32.mrf.mxu1 }
 0xc7f   :  { %v10394_v44 = vadd.f32 %v10393_v50, %v10342_v38 }
 0xc80   :  { %v10346_v41 = vpop.f32.mrf.mxu0 }
 0xc81   :  { %v10398_v15 = vadd.f32 %v10397_v30, %v10346_v41 }
 0xc82   :  { %v10348_v45 = vpop.f32.mrf.mxu0 }
 0xc83   :  { %v10400_v60 = vadd.f32 %v10399_v17, %v10348_v45 }
 0xc84   :  { %v10350_v7 = vpop.f32.mrf.mxu0 }
 0xc86   :  { %v10351_v33 = vpop.f32.mrf.mxu0 }
 0xc88   :  { %v10705_v31 = vpop.f32.mrf.mxu0 }
 0xc8a   :  { %v10707_v42 = vpop.f32.mrf.mxu0 }
 0xc8c   :  { %v10709_v53 = vpop.f32.mrf.mxu0 }
 0xc8e   :  { %v10711_v29 = vpop.f32.mrf.mxu0 }
 0xc90   :  { %v10715_v21 = vpop.f32.mrf.mxu0 }
 0xc92   :  { %v10717_v51 = vpop.f32.mrf.mxu0 }
 0xc94   :  { %v10719_v62 = vpop.f32.mrf.mxu0 }
 0xc96   :  { %v10720_v18 = vpop.f32.mrf.mxu0 }
 0xcb0   :  { %v10654_v63 = vpop.f32.mrf.mxu1 }
 0xcb1   :  { %v10706_v59 = vadd.f32 %v10705_v31, %v10654_v63 }
 0xcb2   :  { %v10656_v22 = vpop.f32.mrf.mxu1 }
 0xcb3   :  { %v10722_v2 = vmax.f32 %v10388_v49, %v10706_v59  ;;  %v10708_v6 = vadd.f32 %v10707_v42, %v10656_v22 }
 0xcb4   :  { %v10658_v3 = vpop.f32.mrf.mxu1 }
 0xcb5   :  { %10728 = vst [vmem:[#allocation16] sm:$0xff] %v10722_v2  ;;  %v10723_v0 = vmax.f32 %v10390_v25, %v10708_v6  ;;  %v10710_v54 = vadd.f32 %v10709_v53, %v10658_v3 }
 0xcb6   :  { %v10660_v14 = vpop.f32.mrf.mxu1 }
 0xcb7   :  { %10730 = vst.msk [vmem:[#allocation16 + $0x8] sm:$0xff] %vm10729_vm14, %v10723_v0  ;;  %v10724_v35 = vmax.f32 %v10392_v24, %v10710_v54  ;;  %v10712_v52 = vadd.f32 %v10711_v29, %v10660_v14 }
 0xcb8   :  { %v10664_v4 = vpop.f32.mrf.mxu1 }
 0xcb9   :  { %10731 = vst [vmem:[#allocation16 + $0x10] sm:$0xff] %v10724_v35  ;;  %v10725_v27 = vmax.f32 %v10394_v44, %v10712_v52  ;;  %v10716_v20 = vadd.f32 %v10715_v21, %v10664_v4 }
 0xcba   :  { %v10666_v26 = vpop.f32.mrf.mxu1 }
 0xcbb   :  { %10732 = vst.msk [vmem:[#allocation16 + $0x18] sm:$0xff] %vm10729_vm14, %v10725_v27  ;;  %v10726_v34 = vmax.f32 %v10398_v15, %v10716_v20  ;;  %v10718_v16 = vadd.f32 %v10717_v51, %v10666_v26 }
 0xcbc   :  { %v10668_v46 = vpop.f32.mrf.mxu1 }
 0xcbd   :  { %10733 = vst [vmem:[#allocation16 + $0x20] sm:$0x3f] %v10726_v34  ;;  %v10727_v61 = vmax.f32 %v10400_v60, %v10718_v16 }
 0xcbe   :  { %v10669_v9 = vpop.f32.mrf.mxu1 }
 0xcbf   :  { %10735 = vst.msk [vmem:[#allocation16 + $0x28] sm:$0x3f] %vm10734_vm15, %v10727_v61 }
 0xcc0   :  { %15456 = dma.done.wait [#allocation19 + $0x6], 8448 }
 0xcc1   :  { %15457 = vsyncadd [#allocation19 + $0x6], 4294958848 }
 0xcc2   :  { %15458 = dma.done.wait [#allocation19 + $0x7], 1152 }
 0xcc3   :  { %15459 = vsyncadd [#allocation19 + $0x7], 4294966144  ;;  %v20762_v56 = vld [vmem:[#allocation251_spill] sm:$0xff]  ;;  %v20763_v12 = vld [vmem:[#allocation250_spill] sm:$0xff] }
 0xcc4   :  { %v13973_v28 = vcombine.high %v20763_v12, %v20762_v56  ;;  %v20764_v39 = vld [vmem:[#allocation229_spill] sm:$0xff]  ;;  %v20765_v58 = vld [vmem:[#allocation228_spill] sm:$0xff]  ;;  %v13972_v37 = vcombine.low %v20763_v12, %v20762_v56 }
 0xcc5   :  { %v13997_v43 = vcombine.high %v20765_v58, %v20764_v39  ;;  %v13996_v40 = vcombine.low %v20765_v58, %v20764_v39 }
 0xcc6   :  { %15460 = dma.done.wait [#allocation19 + $0x8], 1152 }
 0xcc7   :  { %15461 = vsyncadd [#allocation19 + $0x8], 4294966144  ;;  %v20766_v32 = vld [vmem:[#allocation249_spill] sm:$0xff]  ;;  %v20767_v19 = vld [vmem:[#allocation248_spill] sm:$0xff]  ;;  %10957 = vmatprep.subr.bf16.mxu0 %v13973_v28  ;;  %11124 = vmatprep.subr.bf16.mxu1 %v13997_v43  ;;  %s20828_s6 = sld [smem:[#allocation59_spill]]  ;;  %vm11430_vm0 = vcmask 1041408  }
 0xcc8   :  { %v13971_v8 = vcombine.high %v20767_v19, %v20766_v32  ;;  %v20768_v10 = vld [vmem:[#allocation227_spill] sm:$0xff]  ;;  %v20769_v48 = vld [vmem:[#allocation226_spill] sm:$0xff]  ;;  %10958 = vmatpush1.bf16.msra.mxu0 %v13972_v37  ;;  %11125 = vmatpush1.bf16.msra.mxu1 %v13996_v40  ;;  %v13970_v5 = vcombine.low %v20767_v19, %v20766_v32  ;;  %v20772_v47 = vld [vmem:[#allocation225_spill] sm:$0xff]  ;;  %s20829_s12 = sld [smem:[#allocation60_spill]]  ;;  %vm11611_vm2 = vcmask 130048   ;;  %vm11773_vm4 = vcmask 914432  }
 0xcc9   :  { %v13995_v50 = vcombine.high %v20769_v48, %v20768_v10  ;;  %v13994_v30 = vcombine.low %v20769_v48, %v20768_v10  ;;  %v20770_v1 = vld [vmem:[#allocation247_spill] sm:$0xff]  ;;  %v20771_v17 = vld [vmem:[#allocation246_spill] sm:$0xff]  ;;  %v20773_v38 = vld [vmem:[#allocation224_spill] sm:$0xff]  ;;  %s20830_s20 = sld [smem:[#allocation61_spill]] }
 0xcca   :  { %10959 = vmatprep.subr.bf16.mxu0 %v13971_v8  ;;  %v13969_v23 = vcombine.high %v20771_v17, %v20770_v1  ;;  %v13993_v11 = vcombine.high %v20773_v38, %v20772_v47  ;;  %v13968_v41 = vcombine.low %v20771_v17, %v20770_v1  ;;  %v13992_v45 = vcombine.low %v20773_v38, %v20772_v47  ;;  %v20774_v7 = vld [vmem:[#allocation245_spill] sm:$0xff]  ;;  %v20775_v33 = vld [vmem:[#allocation244_spill] sm:$0xff]  ;;  %v20776_v42 = vld [vmem:[#allocation223_spill] sm:$0xff] }
 0xccb   :  { %11126 = vmatprep.subr.bf16.mxu1 %v13995_v50  ;;  %v13967_v31 = vcombine.high %v20775_v33, %v20774_v7  ;;  %v20777_v53 = vld [vmem:[#allocation222_spill] sm:$0xff]  ;;  %v19627_v21 = vld [vmem:[#allocation16 + $0x18] sm:$0xff]  ;;  %v13966_v63 = vcombine.low %v20775_v33, %v20774_v7  ;;  %v20778_v59 = vld [vmem:[#allocation243_spill] sm:$0xff] }
 0xccc   :  { %10960 = vmatpush1.bf16.msra.mxu0 %v13970_v5  ;;  %11127 = vmatpush1.bf16.msra.mxu1 %v13994_v30  ;;  %v13991_v29 = vcombine.high %v20777_v53, %v20776_v42  ;;  %v10779_v51 = vld [vmem:[#allocation16 + $0x8] sm:$0xfe]  ;;  %v13990_v49 = vcombine.low %v20777_v53, %v20776_v42  ;;  %v20780_v2 = vld [vmem:[#allocation221_spill] sm:$0xff]  ;;  %v20781_v6 = vld [vmem:[#allocation220_spill] sm:$0xff] }
 0xccd   :  { %10961 = vmatprep.subr.bf16.mxu0 %v13969_v23  ;;  %11128 = vmatprep.subr.bf16.mxu1 %v13993_v11  ;;  %v10781_v62 = vld [vmem:[#allocation16 + $0x28] sm:$0x1f]  ;;  %v13989_v3 = vcombine.high %v20781_v6, %v20780_v2  ;;  %v10783_v24 = vpack.c.bf16 %v19627_v21, %v10779_v51  ;;  %v13988_v52 = vcombine.low %v20781_v6, %v20780_v2  ;;  %v20782_v15 = vld [vmem:[#allocation241_spill] sm:$0xff]  ;;  %v20783_v27 = vld [vmem:[#allocation240_spill] sm:$0xff] }
 0xcce   :  { %v10747_v18 = vld [vmem:[#allocation16 + $0x8] sm:$0xff]  ;;  %v19638_v0 = vpack.c.bf16 %v10781_v62, %v10781_v62  ;;  %v13963_v20 = vcombine.high %v20783_v27, %v20782_v15  ;;  %v13962_v9 = vcombine.low %v20783_v27, %v20782_v15  ;;  %v20788_v58 = vld [vmem:[#allocation217_spill] sm:$0xff]  ;;  %v20789_v43 = vld [vmem:[#allocation216_spill] sm:$0xff] }
 0xccf   :  { %v20779_v22 = vld [vmem:[#allocation242_spill] sm:$0xff]  ;;  %v10753_v54 = vpack.c.bf16 %v19627_v21, %v10747_v18  ;;  %v10822_v14 = vshrl.u32 %v10783_v24, 16  ;;  %v10824_v44 = vshll.u32 %v10783_v24, 16  ;;  %v20784_v26 = vld [vmem:[#allocation219_spill] sm:$0xff]  ;;  %v13985_v37 = vcombine.high %v20789_v43, %v20788_v58  ;;  %v20790_v48 = vld [vmem:[#allocation237_spill] sm:$0xff] }
 0xcd0   :  { %10962 = vmatpush1.bf16.msra.mxu0 %v13968_v41  ;;  %11129 = vmatpush1.bf16.msra.mxu1 %v13992_v45  ;;  %v13965_v25 = vcombine.high %v20779_v22, %v20778_v59  ;;  %v13964_v35 = vcombine.low %v20779_v22, %v20778_v59  ;;  %v10829_v4 = vshll.u32 %v19638_v0, 16  ;;  %v20785_v60 = vld [vmem:[#allocation218_spill] sm:$0xff]  ;;  %v20786_v12 = vld [vmem:[#allocation239_spill] sm:$0xff]  ;;  %v13984_v10 = vcombine.low %v20789_v43, %v20788_v58  ;;  %v20791_v50 = vld [vmem:[#allocation236_spill] sm:$0xff] }
 0xcd1   :  { %10963 = vmatprep.subr.bf16.mxu0 %v13967_v31  ;;  %11130 = vmatprep.subr.bf16.mxu1 %v13991_v29  ;;  %v13987_v34 = vcombine.high %v20785_v60, %v20784_v26  ;;  %v10826_v16 = vrot.slane %v10824_v44, 1  ;;  %v13986_v56 = vcombine.low %v20785_v60, %v20784_v26  ;;  %v20787_v28 = vld [vmem:[#allocation238_spill] sm:$0xff]  ;;  %v19664_v32 = vld [vmem:[#allocation16 + $0x10] sm:$0xff]  ;;  %v13959_v5 = vcombine.high %v20791_v50, %v20790_v48  ;;  %v20794_v11 = vld [vmem:[#allocation257_spill] sm:$0xff] }
 0xcd2   :  { %v19650_v46 = vrot.slane %v10829_v4, 1  ;;  %14004 = vmatprep.mubr.msk.bf16.mxu1 %vm10729_vm14, %v10753_v54  ;;  %v13961_v39 = vcombine.high %v20787_v28, %v20786_v12  ;;  %v10778_v19 = vld [vmem:[#allocation16] sm:$0xfe]  ;;  %v13960_v8 = vcombine.low %v20787_v28, %v20786_v12  ;;  %v20792_v30 = vld [vmem:[#allocation215_spill] sm:$0xff]  ;;  %v13958_v23 = vcombine.low %v20791_v50, %v20790_v48  ;;  %v20795_v41 = vld [vmem:[#allocation256_spill] sm:$0xff] }
 0xcd3   :  { %v10827_v61 = vor.u32 %v10826_v16, %v10822_v14  ;;  %v20793_v1 = vld [vmem:[#allocation214_spill] sm:$0xff]  ;;  %v10782_v38 = vpack.c.bf16 %v19664_v32, %v10778_v19  ;;  %v13979_v45 = vcombine.high %v20795_v41, %v20794_v11  ;;  %v20796_v7 = vld [vmem:[#allocation235_spill] sm:$0xff]  ;;  %v10780_v42 = vld [vmem:[#allocation16 + $0x20] sm:$0x1f]  ;;  %v13978_v53 = vcombine.low %v20795_v41, %v20794_v11 }
 0xcd4   :  { %10964 = vmatpush1.bf16.msra.mxu0 %v13966_v63  ;;  %11131 = vmatpush1.bf16.msra.mxu1 %v13990_v49  ;;  %v13983_v17 = vcombine.high %v20793_v1, %v20792_v30  ;;  %v13982_v47 = vcombine.low %v20793_v1, %v20792_v30  ;;  %v20797_v33 = vld [vmem:[#allocation234_spill] sm:$0xff]  ;;  %v10784_v51 = vpack.c.bf16 %v10780_v42, %v10780_v42  ;;  %v20798_v18 = vld [vmem:[#allocation255_spill] sm:$0xff]  ;;  %v20800_v59 = vld [vmem:[#allocation233_spill] sm:$0xff]  ;;  %v10836_v26 = vshrl.u32 %v19638_v0, 16 }
 0xcd5   :  { %10965 = vmatprep.subr.bf16.mxu0 %v13965_v25  ;;  %11132 = vmatprep.subr.bf16.mxu1 %v13989_v3  ;;  %v10832_v40 = vsel %vm1774_vm1, %v10827_v61, %v19650_v46  ;;  %v14003_v31 = vcombine.high %v20797_v33, %v20796_v7  ;;  %v14002_v29 = vcombine.low %v20797_v33, %v20796_v7  ;;  %v10812_v62 = vshll.u32 %v10782_v38, 16  ;;  %v20799_v63 = vld [vmem:[#allocation254_spill] sm:$0xff]  ;;  %v20801_v22 = vld [vmem:[#allocation232_spill] sm:$0xff]  ;;  %v20802_v14 = vld [vmem:[#allocation253_spill] sm:$0xff] }
 0xcd6   :  { %13980 = vmatprep.mubr.msk.bf16.mxu0 %vm10729_vm14, %v10832_v40  ;;  %v13977_v49 = vcombine.high %v20799_v63, %v20798_v18  ;;  %v14001_v25 = vcombine.high %v20801_v22, %v20800_v59  ;;  %v13976_v2 = vcombine.low %v20799_v63, %v20798_v18  ;;  %v14000_v6 = vcombine.low %v20801_v22, %v20800_v59  ;;  %v20803_v44 = vld [vmem:[#allocation252_spill] sm:$0xff]  ;;  %v20805_v4 = vld [vmem:[#allocation230_spill] sm:$0xff]  ;;  %v20806_v61 = vld [vmem:[#allocation273_spill] sm:$0xff] }
 0xcd7   :  { %v10810_v3 = vshrl.u32 %v10782_v38, 16  ;;  %v10814_v24 = vrot.slane %v10812_v62, 1  ;;  %v10817_v54 = vshll.u32 %v10784_v51, 16  ;;  %v13974_v27 = vcombine.low %v20803_v44, %v20802_v14  ;;  %v10746_v16 = vld [vmem:[#allocation16] sm:$0xff]  ;;  %v10751_v12 = vld [vmem:[#allocation16 + $0x28] sm:$0xf] }
 0xcd8   :  { %10966 = vmatpush1.bf16.msra.mxu0 %v13964_v35  ;;  %11133 = vmatpush1.bf16.msra.mxu1 %v13988_v52  ;;  %v13975_v35 = vcombine.high %v20803_v44, %v20802_v14  ;;  %v20804_v52 = vld [vmem:[#allocation231_spill] sm:$0xff]  ;;  %v10752_v58 = vpack.c.bf16 %v19664_v32, %v10746_v16  ;;  %v10838_v43 = vor.u32 %v10836_v26, %v19650_v46  ;;  %v20809_v19 = vld [vmem:[#allocation270_spill] sm:$0xff]  ;;  %v10750_v30 = vld [vmem:[#allocation16 + $0x20] sm:$0xf] }
 0xcd9   :  { %10967 = vmatprep.subr.bf16.mxu0 %v13963_v20  ;;  %11134 = vmatprep.subr.bf16.mxu1 %v13987_v34  ;;  %v13999_v15 = vcombine.high %v20805_v4, %v20804_v52  ;;  %v13998_v20 = vcombine.low %v20805_v4, %v20804_v52  ;;  %v10815_v60 = vor.u32 %v10814_v24, %v10810_v3  ;;  %v10819_v34 = vrot.slane %v10817_v54, 1  ;;  %v11176_v28 = vld [vmem:[#allocation16 + $0x8] sm:$0xfc]  ;;  %v20810_v1 = vld [vmem:[#allocation269_spill] sm:$0xff] }
 0xcda   :  { %v20808_v40 = vld [vmem:[#allocation271_spill] sm:$0xff]  ;;  %v11180_v48 = vpack.c.bf16 %v19627_v21, %v11176_v28  ;;  %v10754_v11 = vpack.c.bf16 %v10750_v30, %v10750_v30  ;;  %v20813_v7 = vld [vmem:[#allocation266_spill] sm:$0xff]  ;;  %v20818_v22 = vld [vmem:[#allocation261_spill] sm:$0xff] }
 0xcdb   :  { %v14018_v46 = vcombine.low %v20809_v19, %v20808_v40  ;;  %v20816_v18 = vld [vmem:[#allocation263_spill] sm:$0xff]  ;;  %v20817_v63 = vld [vmem:[#allocation262_spill] sm:$0xff] }
 0xcdc   :  { %10968 = vmatpush1.bf16.msra.mxu0 %v13962_v9  ;;  %11135 = vmatpush1.bf16.msra.mxu1 %v13986_v56  ;;  %v20807_v9 = vld [vmem:[#allocation272_spill] sm:$0xff]  ;;  %v14010_v59 = vcombine.low %v20817_v63, %v20816_v18  ;;  %v20820_v3 = vld [vmem:[#allocation259_spill] sm:$0xff]  ;;  %v20821_v24 = vld [vmem:[#allocation258_spill] sm:$0xff] }
 0xcdd   :  { %10969 = vmatprep.subr.bf16.mxu0 %v13961_v39  ;;  %11136 = vmatprep.subr.bf16.mxu1 %v13985_v37  ;;  %v14021_v56 = vcombine.high %v20807_v9, %v20806_v61  ;;  %v11178_v39 = vld [vmem:[#allocation16 + $0x28] sm:$0x3f]  ;;  %v10820_v37 = vsel %vm1774_vm1, %v10815_v60, %v10819_v34  ;;  %v14020_v0 = vcombine.low %v20807_v9, %v20806_v61  ;;  %v20822_v44 = vld [vmem:[#allocation279_spill] sm:$0xff]  ;;  %v11175_v26 = vld [vmem:[#allocation16] sm:$0xfc]  ;;  %vm11426_vm1 = vcmask 162816  }
 0xcde   :  { %v11182_v50 = vpack.c.bf16 %v11178_v39, %v11178_v39  ;;  %v14007_v54 = vcombine.high %v20821_v24, %v20820_v3  ;;  %v14006_v14 = vcombine.low %v20821_v24, %v20820_v3  ;;  %v11177_v60 = vld [vmem:[#allocation16 + $0x20] sm:$0x3f]  ;;  %v11179_v16 = vpack.c.bf16 %v19664_v32, %v11175_v26  ;;  %v20826_v9 = vld [vmem:[#allocation275_spill] sm:$0xff] }
 0xcdf   :  { %v11181_v61 = vpack.c.bf16 %v11177_v60, %v11177_v60  ;;  %v15374_v32 = vld [vmem:[#allocation10 + $0x38] sm:$0xff]  }
 0xce0   :  { %10970 = vmatpush1.bf16.msra.mxu0 %v13960_v8  ;;  %11137 = vmatpush1.bf16.msra.mxu1 %v13984_v10  ;;  %v14019_v8 = vcombine.high %v20809_v19, %v20808_v40  ;;  %v10755_v10 = vpack.c.bf16 %v10751_v12, %v10751_v12  ;;  %v11214_v38 = vrot.slane %v11182_v50, 1  ;;  %v11210_v39 = vrot.slane %v11179_v16, 1  ;;  %v15380_v40 = vld [vmem:[#allocation10 + $0x20] sm:$0xff]  }
 0xce1   :  { %10971 = vmatprep.subr.bf16.mxu0 %v13959_v5  ;;  %11138 = vmatprep.subr.bf16.mxu1 %v13983_v17  ;;  %v10833_v5 = vshrl.u32 %v10784_v51, 16  ;;  %v20811_v17 = vld [vmem:[#allocation268_spill] sm:$0xff] }
 0xce2   :  { %v14016_v41 = vcombine.low %v20811_v17, %v20810_v1 }
 0xce3   :  { %v10835_v21 = vor.u32 %v10833_v5, %v10819_v34 }
 0xce4   :  { %10972 = vmatpush1.bf16.msra.mxu0 %v13958_v23  ;;  %11139 = vmatpush1.bf16.msra.mxu1 %v13982_v47  ;;  %v14017_v23 = vcombine.high %v20811_v17, %v20810_v1  ;;  %v11213_v47 = vrot.slane %v11180_v48, 1 }
 0xce5   :  { %10983 = vmatprep.subr.bf16.mxu0 %v13979_v45  ;;  %11150 = vmatprep.subr.bf16.mxu1 %v14003_v31  ;;  %v20812_v45 = vld [vmem:[#allocation267_spill] sm:$0xff] }
 0xce6   :  { %v14015_v33 = vcombine.high %v20813_v7, %v20812_v45  ;;  %v11215_v31 = vsel %vm3785_vm3, %v11213_v47, %v11214_v38  ;;  %v14014_v42 = vcombine.low %v20813_v7, %v20812_v45 }
 0xce8   :  { %10984 = vmatpush2.bf16.msra.mxu0 %v13978_v53  ;;  %11151 = vmatpush2.bf16.msra.mxu1 %v14002_v29  ;;  %v20814_v53 = vld [vmem:[#allocation265_spill] sm:$0xff]  ;;  %v20815_v29 = vld [vmem:[#allocation264_spill] sm:$0xff] }
 0xce9   :  { %10985 = vmatprep.subr.bf16.mxu0 %v13977_v49  ;;  %11152 = vmatprep.subr.bf16.mxu1 %v14001_v25  ;;  %v14013_v51 = vcombine.high %v20815_v29, %v20814_v53  ;;  %v14012_v62 = vcombine.low %v20815_v29, %v20814_v53  ;;  %v14011_v49 = vcombine.high %v20817_v63, %v20816_v18  ;;  %v20819_v25 = vld [vmem:[#allocation260_spill] sm:$0xff] }
 0xcec   :  { %10986 = vmatpush2.bf16.msra.mxu0 %v13976_v2  ;;  %11153 = vmatpush2.bf16.msra.mxu1 %v14000_v6  ;;  %v14009_v2 = vcombine.high %v20819_v25, %v20818_v22  ;;  %v14008_v6 = vcombine.low %v20819_v25, %v20818_v22 }
 0xced   :  { %10987 = vmatprep.subr.bf16.mxu0 %v13975_v35  ;;  %11154 = vmatprep.subr.bf16.mxu1 %v13999_v15  ;;  %v20823_v35 = vld [vmem:[#allocation278_spill] sm:$0xff]  ;;  %v20824_v15 = vld [vmem:[#allocation277_spill] sm:$0xff] }
 0xcee   :  { %v14027_v52 = vcombine.high %v20823_v35, %v20822_v44  ;;  %v14026_v4 = vcombine.low %v20823_v35, %v20822_v44 }
 0xcf0   :  { %10988 = vmatpush2.bf16.msra.mxu0 %v13974_v27  ;;  %11155 = vmatpush2.bf16.msra.mxu1 %v13998_v20  ;;  %v20825_v27 = vld [vmem:[#allocation276_spill] sm:$0xff] }
 0xcf1   :  { %11334 = vmatprep.subr.bf16.mxu0 %v14021_v56  ;;  %v14025_v20 = vcombine.high %v20825_v27, %v20824_v15  ;;  %v14024_v34 = vcombine.low %v20825_v27, %v20824_v15  ;;  %v20827_v56 = vld [vmem:[#allocation274_spill] sm:$0xff] }
 0xcf2   :  { %v14023_v12 = vcombine.high %v20827_v56, %v20826_v9  ;;  %v14022_v28 = vcombine.low %v20827_v56, %v20826_v9 }
 0xcf3   :  { %10990 = vmatmul.mubr.bf16.vlgmr.msra.gmra.mxu0 %v10820_v37  ;;  %11157 = vmatmul.mubr.bf16.vlgmr.msra.gmra.mxu1 %v10752_v58  ;;  %v11211_v58 = vrot.slane %v11181_v61, 1  ;;  %v15376_v37 = vld [vmem:[#allocation10 + $0x30] sm:$0xff]  }
 0xcf4   :  { %11335 = vmatpush1.bf16.msra.mxu0 %v14020_v0  ;;  %13981 = vmatprep.mubr.msk.bf16.mxu0 %vm10729_vm14, %v10838_v43  ;;  %v15378_v0 = vld [vmem:[#allocation10 + $0x28] sm:$0xff]  }
 0xcf5   :  { %11336 = vmatprep.subr.bf16.mxu0 %v14019_v8  ;;  %14005 = vmatprep.mubr.msk.bf16.mxu1 %vm10729_vm14, %v10755_v10  ;;  %v11212_v43 = vsel %vm3785_vm3, %v11210_v39, %v11211_v58  ;;  %vm11771_vm3 = vcmask 916480  }
 0xcf8   :  { %11337 = vmatpush1.bf16.msra.mxu0 %v14018_v46 }
 0xcf9   :  { %11338 = vmatprep.subr.bf16.mxu0 %v14017_v23 }
 0xcfb   :  { %11000 = vmatmul.mubr.bf16.gmra.mxu0 %v10835_v21  ;;  %11167 = vmatmul.mubr.bf16.gmra.mxu1 %v10754_v11 }
 0xcfc   :  { %11339 = vmatpush1.bf16.msra.mxu0 %v14016_v41  ;;  %14028 = vmatprep.mubr.msk.bf16.mxu0 %vm10729_vm14, %v11215_v31 }
 0xcfd   :  { %11340 = vmatprep.subr.bf16.mxu0 %v14015_v33  ;;  %11469 = vmatprep.mubr.bf16.mxu1 %v20604_v13 }
 0xd00   :  { %11341 = vmatpush1.bf16.msra.mxu0 %v14014_v42  ;;  %v11391_v42 = vld [vmem:[%s20828_s6] sm:$0x3] }
 0xd01   :  { %11342 = vmatprep.subr.bf16.mxu0 %v14013_v51  ;;  %v11396_v63 = vrot.slane %v11391_v42, %v20687_v36  ;;  %v11400_v25 = vrot.slane %v11391_v42, %v20688_v57 }
 0xd04   :  { %11343 = vmatpush1.bf16.msra.mxu0 %v14012_v62 }
 0xd05   :  { %11344 = vmatprep.subr.bf16.mxu0 %v14011_v49 }
 0xd08   :  { %11345 = vmatpush1.bf16.msra.mxu0 %v14010_v59 }
 0xd09   :  { %11346 = vmatprep.subr.bf16.mxu0 %v14009_v2 }
 0xd0c   :  { %11347 = vmatpush1.bf16.msra.mxu0 %v14008_v6 }
 0xd0d   :  { %11348 = vmatprep.subr.bf16.mxu0 %v14007_v54 }
 0xd10   :  { %11349 = vmatpush1.bf16.msra.mxu0 %v14006_v14 }
 0xd11   :  { %11360 = vmatprep.subr.bf16.mxu0 %v14027_v52 }
 0xd14   :  { %11361 = vmatpush2.bf16.msra.mxu0 %v14026_v4 }
 0xd15   :  { %11362 = vmatprep.subr.bf16.mxu0 %v14025_v20 }
 0xd18   :  { %11363 = vmatpush2.bf16.msra.mxu0 %v14024_v34 }
 0xd19   :  { %11364 = vmatprep.subr.bf16.mxu0 %v14023_v12 }
 0xd1c   :  { %11365 = vmatpush2.bf16.msra.mxu0 %v14022_v28 }
 0xd1d   :  { %11728 = vmatprep.subr.bf16.mxu0 %v20604_v13 }
 0xd1f   :  { %11367 = vmatmul.mubr.bf16.vlgmr.msra.gmra.mxu0 %v11212_v43  ;;  %v15372_v43 = vld [vmem:[%s20830_s20] sm:$0x7f]  }
 0xd20   :  { %14029 = vmatprep.mubr.msk.bf16.mxu0 %vm10729_vm14, %v11214_v38  ;;  %11729 = vmatpush1.bf16.msra.mxu0 %v15374_v32  ;;  %v15373_v32 = vld [vmem:[#allocation9 + $0x38] sm:$0xff]  }
 0xd21   :  { %11730 = vmatprep.subr.bf16.mxu0 %v20604_v13 }
 0xd24   :  { %11731 = vmatpush1.bf16.msra.mxu0 %v15376_v37  ;;  %v15375_v37 = vld [vmem:[#allocation9 + $0x30] sm:$0xff]  }
 0xd25   :  { %11732 = vmatprep.subr.bf16.mxu0 %v20604_v13 }
 0xd27   :  { %11377 = vmatmul.mubr.bf16.gmra.mxu0 %v11211_v58  ;;  %v15371_v58 = vld [vmem:[%s20829_s12] sm:$0x7f]  }
 0xd28   :  { %11733 = vmatpush1.bf16.msra.mxu0 %v15378_v0  ;;  %v15377_v0 = vld [vmem:[#allocation9 + $0x28] sm:$0xff]  }
 0xd29   :  { %11734 = vmatprep.subr.bf16.mxu0 %v20604_v13 }
 0xd2c   :  { %11735 = vmatpush1.bf16.msra.mxu0 %v15380_v40  ;;  %v15379_v40 = vld [vmem:[#allocation9 + $0x20] sm:$0xff]  }
 0xd2d   :  { %11736 = vmatprep.subr.bf16.mxu0 %v20604_v13 }
 0xdb3   :  { %v10991_v19 = vpop.f32.mrf.mxu0  ;;  %v11158_v8 = vpop.f32.mrf.mxu1 }
 0xdb4   :  { %v11159_v6 = vadd.f32 %v11158_v8, %v10991_v19  ;;  %v15381_v19 = vld [vmem:[#allocation9 + $0x18] sm:$0xff]   ;;  %v15382_v8 = vld [vmem:[#allocation10 + $0x18] sm:$0xff]  }
 0xdb5   :  { %v10993_v10 = vpop.f32.mrf.mxu0  ;;  %v11160_v48 = vpop.f32.mrf.mxu1  ;;  %11737 = vmatpush1.bf16.msra.mxu0 %v15382_v8 }
 0xdb6   :  { %v11161_v29 = vadd.f32 %v11160_v48, %v10993_v10  ;;  %11738 = vmatprep.subr.bf16.mxu0 %v20604_v13  ;;  %v15383_v10 = vld [vmem:[#allocation9 + $0x10] sm:$0xff]   ;;  %v15384_v48 = vld [vmem:[#allocation10 + $0x10] sm:$0xff]  }
 0xdb7   :  { %v10995_v50 = vpop.f32.mrf.mxu0  ;;  %v11162_v5 = vpop.f32.mrf.mxu1 }
 0xdb8   :  { %v11163_v18 = vadd.f32 %v11162_v5, %v10995_v50  ;;  %v15385_v50 = vld [vmem:[#allocation9 + $0x8] sm:$0xff]   ;;  %v15386_v5 = vld [vmem:[#allocation10 + $0x8] sm:$0xff]  }
 0xdb9   :  { %v10997_v46 = vpop.f32.mrf.mxu0  ;;  %v11164_v30 = vpop.f32.mrf.mxu1  ;;  %11739 = vmatpush1.bf16.msra.mxu0 %v15384_v48 }
 0xdba   :  { %v11165_v31 = vadd.f32 %v11164_v30, %v10997_v46  ;;  %11740 = vmatprep.subr.bf16.mxu0 %v20604_v13  ;;  %v15387_v46 = vld [vmem:[#allocation9] sm:$0xff]   ;;  %v15388_v30 = vld [vmem:[#allocation10] sm:$0xff]  }
 0xdbb   :  { %v11001_v1 = vpop.f32.mrf.mxu0  ;;  %v11168_v17 = vpop.f32.mrf.mxu1 }
 0xdbc   :  { %v11169_v51 = vadd.f32 %v11168_v17, %v11001_v1  ;;  %v15389_v1 = vld [vmem:[#allocation9 + $0x40] sm:$0xff]   ;;  %v15390_v17 = vld [vmem:[#allocation10 + $0x40] sm:$0xff]  }
 0xdbd   :  { %v11003_v23 = vpop.f32.mrf.mxu0  ;;  %v11170_v47 = vpop.f32.mrf.mxu1  ;;  %11741 = vmatpush1.bf16.msra.mxu0 %v15386_v5 }
 0xdbe   :  { %v11171_v59 = vadd.f32 %v11170_v47, %v11003_v23  ;;  %11742 = vmatprep.subr.bf16.mxu0 %v20604_v13 }
 0xdbf   :  { %v11005_v38 = vpop.f32.mrf.mxu0  ;;  %v11172_v21 = vpop.f32.mrf.mxu1 }
 0xdc1   :  { %v11006_v11 = vpop.f32.mrf.mxu0  ;;  %v11173_v41 = vpop.f32.mrf.mxu1  ;;  %11743 = vmatpush1.bf16.msra.mxu0 %v15388_v30 }
 0xdc2   :  { %11758 = vmatprep.subr.bf16.mxu0 %v20604_v13 }
 0xdc5   :  { %11759 = vmatpush2.bf16.msra.mxu0 %v15390_v17 }
 0xddf   :  { %v11368_v45 = vpop.f32.mrf.mxu0 }
 0xde0   :  { %v11385_v35 = vadd.f32 %v11368_v45, %v11159_v6 }
 0xde1   :  { %v11370_v7 = vpop.f32.mrf.mxu0 }
 0xde2   :  { %v11386_v22 = vadd.f32 %v11370_v7, %v11161_v29  ;;  %v11403_v16 = vadd.f32 %v11396_v63, %v11385_v35 }
 0xde3   :  { %v11372_v33 = vpop.f32.mrf.mxu0 }
 0xde4   :  { %v11387_v3 = vadd.f32 %v11372_v33, %v11163_v18  ;;  %v11404_v4 = vadd.f32 %v11400_v25, %v11386_v22  ;;  %v11409_v28 = vmax.f32 %v11403_v16, 0.0 }
 0xde5   :  { %v11374_v53 = vpop.f32.mrf.mxu0 }
 0xde6   :  { %v11388_v62 = vadd.f32 %v11374_v53, %v11165_v31  ;;  %v11405_v20 = vadd.f32 %v11396_v63, %v11387_v3  ;;  %v11410_v57 = vmax.f32 %v11404_v4, 0.0 }
 0xde7   :  { %v11378_v49 = vpop.f32.mrf.mxu0 }
 0xde8   :  { %v11389_v2 = vadd.f32 %v11378_v49, %v11169_v51  ;;  %v11406_v54 = vadd.f32 %v11400_v25, %v11388_v62  ;;  %v11411_v9 = vmax.f32 %v11405_v20, 0.0 }
 0xde9   :  { %v11380_v24 = vpop.f32.mrf.mxu0 }
 0xdea   :  { %v11407_v14 = vadd.f32 %v11396_v63, %v11389_v2  ;;  %v11390_v44 = vadd.f32 %v11380_v24, %v11171_v59  ;;  %v11412_v36 = vmax.f32 %v11406_v54, 0.0  ;;  %v11415_v39 = vpack.c.bf16 %v11411_v9, %v11409_v28 }
 0xdeb   :  { %v11382_v52 = vpop.f32.mrf.mxu0 }
 0xdec   :  { %v11413_v15 = vmax.f32 %v11407_v14, 0.0  ;;  %v11408_v27 = vadd.f32 %v11400_v25, %v11390_v44  ;;  %v11416_v12 = vpack.c.bf16 %v11412_v36, %v11410_v57 }
 0xded   :  { %v11383_v26 = vpop.f32.mrf.mxu0 }
 0xdee   :  { %v11417_v60 = vpack.c.bf16 %v11413_v15, %v11413_v15  ;;  %v11414_v34 = vmax.f32 %v11408_v27, 0.0 }
 0xdf0   :  { %v11418_v61 = vpack.c.bf16 %v11414_v34, %v11414_v34  ;;  %v11432_v56 = vsel %vm11430_vm0, %v11417_v60, 0 }
 0xdf2   :  { %14031 = vmatprep.subr.msk.bf16.mxu1 %vm11430_vm0, %v11418_v61 }
 0xdf3   :  { %11450 = vmatpush1.bf16.msra.mxu1 %v11432_v56 }
 0xdf4   :  { %11451 = vmatprep.subr.bf16.mxu1 %v11416_v12 }
 0xdf7   :  { %11452 = vmatpush1.bf16.msra.mxu1 %v11415_v39 }
 0xdf8   :  { %14034 = vmatprep.subr.msk.bf16.mxu1 %vm11430_vm0, %v11418_v61 }
 0xdfa   :  { %14032 = vmatmul.mubr.msk.bf16.vlgmr.msra.gmra.mxu1 %vm11426_vm1, %v15371_v58 }
 0xdfb   :  { %11503 = vmatpush1.bf16.msra.mxu1 %v11432_v56  ;;  %11522 = vmatprep.mubr.bf16.mxu1 %v20604_v13 }
 0xdfc   :  { %11504 = vmatprep.subr.bf16.mxu1 %v11416_v12 }
 0xdff   :  { %11505 = vmatpush1.bf16.msra.mxu1 %v11415_v39 }
 0xe00   :  { %11615 = vmatprep.subr.bf16.mxu1 %v20604_v13 }
 0xe02   :  { %14035 = vmatmul.mubr.msk.bf16.vlgmr.msra.gmra.mxu1 %vm11426_vm1, %v15372_v43 }
 0xe03   :  { %11616 = vmatpush1.bf16.msra.mxu1 %v15373_v32 }
 0xe04   :  { %11617 = vmatprep.subr.bf16.mxu1 %v20604_v13 }
 0xe07   :  { %11618 = vmatpush1.bf16.msra.mxu1 %v15375_v37 }
 0xe08   :  { %11619 = vmatprep.subr.bf16.mxu1 %v20604_v13 }
 0xe0b   :  { %11620 = vmatpush1.bf16.msra.mxu1 %v15377_v0 }
 0xe0c   :  { %11621 = vmatprep.subr.bf16.mxu1 %v20604_v13 }
 0xe0f   :  { %11622 = vmatpush1.bf16.msra.mxu1 %v15379_v40 }
 0xe10   :  { %11623 = vmatprep.subr.bf16.mxu1 %v20604_v13 }
 0xe13   :  { %11624 = vmatpush1.bf16.msra.mxu1 %v15381_v19 }
 0xe14   :  { %11625 = vmatprep.subr.bf16.mxu1 %v20604_v13 }
 0xe17   :  { %11626 = vmatpush1.bf16.msra.mxu1 %v15383_v10 }
 0xe18   :  { %11627 = vmatprep.subr.bf16.mxu1 %v20604_v13 }
 0xe1b   :  { %11628 = vmatpush1.bf16.msra.mxu1 %v15385_v50 }
 0xe1c   :  { %11629 = vmatprep.subr.bf16.mxu1 %v20604_v13 }
 0xe1f   :  { %11630 = vmatpush1.bf16.msra.mxu1 %v15387_v46 }
 0xe20   :  { %11645 = vmatprep.subr.bf16.mxu1 %v20604_v13 }
 0xe23   :  { %11646 = vmatpush2.bf16.msra.mxu1 %v15389_v1 }
 0xeba   :  { %v11471_v23 = vpop.f32.mrf.mxu1 }
 0xebc   :  { %v11473_v47 = vpop.f32.mrf.mxu1 }
 0xebe   :  { %v11475_v38 = vpop.f32.mrf.mxu1 }
 0xec0   :  { %v11477_v21 = vpop.f32.mrf.mxu1 }
 0xec2   :  { %v11524_v11 = vpop.f32.mrf.mxu1 }
 0xec3   :  { %v11533_v53 = vmax.f32 %v11471_v23, %v11524_v11 }
 0xec4   :  { %v11526_v41 = vpop.f32.mrf.mxu1 }
 0xec5   :  { %v11534_v31 = vmax.f32 %v11473_v47, %v11526_v41 }
 0xec6   :  { %v11528_v45 = vpop.f32.mrf.mxu1 }
 0xec7   :  { %v11535_v7 = vmax.f32 %v11475_v38, %v11528_v45 }
 0xec8   :  { %v11530_v33 = vpop.f32.mrf.mxu1 }
 0xec9   :  { %v11536_v42 = vmax.f32 %v11477_v21, %v11530_v33  ;;  %v11537_v51 = vpack.c.bf16 %v11535_v7, %v11533_v53 }
 0xecb   :  { %v11538_v29 = vpack.c.bf16 %v11536_v42, %v11534_v31 }
 0xecd   :  { %14045 = vmatprep.mubr.msk.bf16.mxu1 %vm11611_vm2, %v11538_v29  ;;  %14055 = vmatprep.mubr.msk.bf16.mxu0 %vm11611_vm2, %v11538_v29 }
 0xece   :  { %11648 = vmatmul.mubr.bf16.vlgmr.msra.gmra.mxu1 %v11537_v51  ;;  %11761 = vmatmul.mubr.bf16.vlgmr.msra.gmra.mxu0 %v11537_v51 }
 0xf8e   :  { %v11649_v62 = vpop.f32.mrf.mxu1  ;;  %v11762_v18 = vpop.f32.mrf.mxu0 }
 0xf8f   :  { %v11769_v63 = vmax.f32 %v11649_v62, %v11762_v18 }
 0xf90   :  { %v11651_v49 = vpop.f32.mrf.mxu1  ;;  %v11764_v59 = vpop.f32.mrf.mxu0 }
 0xf91   :  { %11772 = vst.msk [vmem:[#allocation17] sm:$0xff] %vm11771_vm3, %v11769_v63 }
 0xf92   :  { %v11652_v22 = vpop.f32.mrf.mxu1  ;;  %v11765_v25 = vpop.f32.mrf.mxu0 }
 0xf93   :  { %v11770_v2 = vmax.f32 %v11652_v22, %v11765_v25 }
 0xf94   :  { %v11654_v6 = vpop.f32.mrf.mxu1  ;;  %v11767_v3 = vpop.f32.mrf.mxu0 }
 0xf95   :  { %11774 = vst.msk [vmem:[#allocation17 + $0x8] sm:$0x3f] %vm11773_vm4, %v11770_v2 }
 0xf96   :  { %15462 = dma.done.wait [#allocation19 + $0x9], 2688 }
 0xf97   :  { %15463 = vsyncadd [#allocation19 + $0x9], 4294964608 }
 0xf98   :  { %15464 = dma.done.wait [#allocation19 + $0xa], 640 }
 0xf99   :  { %15465 = vsyncadd [#allocation19 + $0xa], 4294966656 }
 0xf9a   :  { %15466 = dma.done.wait [#allocation19 + $0xb], 640 }
 0xf9b   :  { %15467 = vsyncadd [#allocation19 + $0xb], 4294966656  ;;  %14599 = vmatprep.subr.bf16.mxu1 %v20609_v55  ;;  %14617 = vmatprep.subr.bf16.mxu0 %v20609_v55  ;;  %v15393_v24 = vld [vmem:[#allocation11 + $0x68] sm:$0xff]   ;;  %v15394_v54 = vld [vmem:[#allocation11 + $0x30] sm:$0xff]   ;;  %s20831_s27 = sld [smem:[#allocation62_spill]]  ;;  %vm12115_vm5 = vcmask 1045504  }
 0xf9c   :  { %14613 = vmatprep.mubr.msk.bf16.mxu1 %vm15511_vm9, %v20609_v55  ;;  %14631 = vmatprep.mubr.msk.bf16.mxu0 %vm15511_vm9, %v20609_v55  ;;  %v15395_v14 = vld [vmem:[#allocation11 + $0x60] sm:$0xff]   ;;  %v15396_v44 = vld [vmem:[#allocation11 + $0x28] sm:$0xff]   ;;  %v15397_v35 = vld [vmem:[#allocation11 + $0x58] sm:$0xff]   ;;  %s20832_s4 = sld [smem:[#allocation63_spill]]  ;;  %vm12111_vm6 = vcmask 97280   ;;  %vm12245_vm7 = vcmask 654336  }
 0xf9d   :  { %15391 = vset.pattern.permute.xlu1 %v20604_v13  ;;  %15392 = vset.pattern.permute.xlu0 %v20604_v13  ;;  %v15398_v52 = vld [vmem:[#allocation11 + $0x20] sm:$0xff]   ;;  %v15399_v13 = vld [vmem:[#allocation11 + $0x50] sm:$0xff]   ;;  %v15400_v4 = vld [vmem:[#allocation11 + $0x18] sm:$0xff]   ;;  %s20833_s22 = sld [smem:[#allocation64_spill]]  ;;  %vm12370_vm8 = vcmask 386048   ;;  %s15513_s28 = smov 96  }
 0xf9e   :  { %14600 = vmatpush3.bf16.msra.mxu1 %v15393_v24  ;;  %14618 = vmatpush3.bf16.msra.mxu0 %v15394_v54  ;;  %v15401_v15 = vld [vmem:[#allocation11 + $0x48] sm:$0xff]   ;;  %v15402_v27 = vld [vmem:[#allocation11 + $0x10] sm:$0xff]   ;;  %v15403_v20 = vld [vmem:[#allocation11 + $0x40] sm:$0xff]   ;;  %s20834_s23 = sld [smem:[#allocation65_spill]]  ;;  %s15514_s1 = smov 48   ;;  %vm12400_vm10 = vcmask 1042176  }
 0xf9f   :  { %14601 = vmatprep.subr.bf16.mxu1 %v20609_v55  ;;  %14619 = vmatprep.subr.bf16.mxu0 %v20609_v55  ;;  %v15404_v26 = vld [vmem:[#allocation11 + $0x8] sm:$0xff]   ;;  %v15405_v36 = vld [vmem:[#allocation11 + $0x38] sm:$0xff]   ;;  %v15406_v60 = vld [vmem:[#allocation11] sm:$0xff]   ;;  %s20835_s26 = sld [smem:[#allocation69_spill]]  ;;  %vm12401_vm11 = vcmask 125954   ;;  %vm12397_vm12 = vcmask 785408  }
 0xfa0   :  { %v11802_v34 = vld [vmem:[#allocation17 + $0x1] sm:$0xff]  ;;  %v11803_v16 = vld [vmem:[#allocation17 + $0x9] sm:$0xf]  ;;  %v15409_v39 = vld [vmem:[#allocation11 + $0x90] sm:$0xff]   ;;  %s20837_s2 = sld [smem:[#allocation67_spill]]  ;;  %vm12384_vm13 = vcmask 779648  }
 0xfa1   :  { %v11785_v57 = vld [vmem:[#allocation17] sm:$0xff]  ;;  %v11786_v61 = vld [vmem:[#allocation17 + $0x8] sm:$0xf]  ;;  %v11804_v56 = vpack.c.bf16 %v11803_v16, %v11802_v34  ;;  %v15410_v58 = vld [vmem:[#allocation11 + $0x88] sm:$0xff]   ;;  %s20838_s7 = sld [smem:[#allocation66_spill]]  ;;  %vm12522_vm15 = vcmask 80896  }
 0xfa2   :  { %14602 = vmatpush3.bf16.msra.mxu1 %v15395_v14  ;;  %14620 = vmatpush3.bf16.msra.mxu0 %v15396_v44  ;;  %v15407_v9 = vld [vmem:[#allocation11 + $0xa0] sm:$0xff]   ;;  %v11787_v12 = vpack.c.bf16 %v11786_v61, %v11785_v57  ;;  %v15408_v28 = vld [vmem:[#allocation11 + $0x98] sm:$0xff]   ;;  %v15413_v37 = vld [vmem:[#allocation11 + $0x70] sm:$0xff]   ;;  %s20839_s10 = sld [smem:[#allocation68_spill]]  ;;  %vm12599_vm1 = vcmask 41984  }
 0xfa3   :  { %14603 = vmatprep.subr.bf16.mxu1 %v20609_v55  ;;  %14621 = vmatprep.subr.bf16.mxu0 %v20609_v55  ;;  %v15411_v43 = vld [vmem:[#allocation11 + $0x80] sm:$0xff]   ;;  %v15412_v32 = vld [vmem:[#allocation11 + $0x78] sm:$0xff]   ;;  %v15414_v8 = vld [vmem:[#allocation12 + $0x20] sm:$0xff]  }
 0xfa4   :  { %v11992_v0 = vld [vmem:[#allocation17 + $0x2] sm:$0xff]  ;;  %v11993_v40 = vld [vmem:[#allocation17 + $0xa] sm:$0xf]  ;;  %v14080_v11 = vld [vmem:[%s20831_s27] ss:$0 sm:$0xff] }
 0xfa5   :  { %v11994_v19 = vpack.c.bf16 %v11993_v40, %v11992_v0  ;;  %v15416_v10 = vld [vmem:[#allocation12 + $0x18] sm:$0xff]   ;;  %v12110_v63 = vld [vmem:[%s20832_s4] sm:$0x7]  ;;  %v15417_v22 = vld [vmem:[#allocation13 + $0x18] sm:$0xff]  }
 0xfa6   :  { %14604 = vmatpush3.bf16.msra.mxu1 %v15397_v35  ;;  %14622 = vmatpush3.bf16.msra.mxu0 %v15398_v52  ;;  %v12159_v49 = vld [vmem:[%s20833_s22] sm:$0x7]  ;;  %v15418_v25 = vld [vmem:[#allocation12 + $0x10] sm:$0xff]   ;;  %v15419_v2 = vld [vmem:[#allocation13 + $0x10] sm:$0xff]  }
 0xfa7   :  { %14605 = vmatprep.subr.bf16.mxu1 %v20609_v55  ;;  %14623 = vmatprep.subr.bf16.mxu0 %v20609_v55  ;;  %v15415_v59 = vld [vmem:[#allocation13 + $0x20] sm:$0xff]   ;;  %v15421_v3 = vld [vmem:[#allocation13 + $0x8] sm:$0xff]   ;;  %v15422_v24 = vld [vmem:[#allocation12] sm:$0xff]  }
 0xfa8   :  { %v15420_v6 = vld [vmem:[#allocation12 + $0x8] sm:$0xff]   ;;  %v12419_v34 = vld [vmem:[%s20834_s23 + $0x70] sm:$0xff]  ;;  %v12418_v57 = vld [vmem:[%s20834_s23 + $0x68] sm:$0xff] }
 0xfa9   :  { %v15423_v54 = vld [vmem:[#allocation13] sm:$0xff]   ;;  %v12620_v16 = vld [vmem:[%s20835_s26 + $0x70] sm:$0xff]  ;;  %v12619_v61 = vld [vmem:[%s20835_s26 + $0x68] sm:$0xff] }
 0xfaa   :  { %14606 = vmatpush3.bf16.msra.mxu1 %v15399_v13  ;;  %14624 = vmatpush3.bf16.msra.mxu0 %v15400_v4  ;;  %v12614_v0 = vld [vmem:[%s20835_s26 + $0x40] sm:$0xff]  ;;  %v12412_v40 = vld [vmem:[%s20834_s23 + $0x38] sm:$0xff]  ;;  %vm12402_vm14 = vmor %vm12401_vm11, %vm12400_vm10 }
 0xfab   :  { %14607 = vmatprep.subr.bf16.mxu1 %v20609_v55  ;;  %14625 = vmatprep.subr.bf16.mxu0 %v20609_v55 }
 0xfae   :  { %14608 = vmatpush3.bf16.msra.mxu1 %v15401_v15  ;;  %14626 = vmatpush3.bf16.msra.mxu0 %v15402_v27 }
 0xfaf   :  { %14609 = vmatprep.subr.bf16.mxu1 %v20609_v55  ;;  %14627 = vmatprep.subr.bf16.mxu0 %v20609_v55 }
 0xfb2   :  { %14610 = vmatpush3.bf16.msra.mxu1 %v15403_v20  ;;  %14628 = vmatpush3.bf16.msra.mxu0 %v15404_v26 }
 0xfb3   :  { %14611 = vmatprep.subr.bf16.mxu1 %v20609_v55  ;;  %14629 = vmatprep.subr.bf16.mxu0 %v20609_v55 }
 0xfb6   :  { %14612 = vmatpush3.bf16.msra.mxu1 %v15405_v36  ;;  %14630 = vmatpush3.bf16.msra.mxu0 %v15406_v60  ;;  %v12420_v36 = vld [vmem:[%s20834_s23 + $0x78] sm:$0xff] }
 0xfb7   :  { %14635 = vmatprep.subr.bf16.mxu1 %v20609_v55  ;;  %14653 = vmatprep.subr.bf16.mxu0 %v20609_v55  ;;  %v12621_v60 = vld [vmem:[%s20835_s26 + $0x78] sm:$0xff] }
 0xfb9   :  { %14614 = vmatmul.mubr.msk.bf16.vlgmr.msra.gmra.mxu1 %vm11771_vm3, %v11804_v56  ;;  %14632 = vmatmul.mubr.msk.bf16.vlgmr.msra.gmra.mxu0 %vm11771_vm3, %v11787_v12  ;;  %v12618_v56 = vld [vmem:[%s20835_s26 + $0x60] sm:$0xff]  ;;  %v12416_v12 = vld [vmem:[%s20834_s23 + $0x58] sm:$0xff] }
 0xfba   :  { %14636 = vmatpush3.bf16.msra.mxu1 %v15407_v9  ;;  %14649 = vmatprep.mubr.msk.bf16.mxu1 %vm15511_vm9, %v20609_v55  ;;  %v12417_v9 = vld [vmem:[%s20834_s23 + $0x60] sm:$0xff] }
 0xfbb   :  { %14637 = vmatprep.subr.bf16.mxu1 %v20609_v55  ;;  %14655 = vmatprep.mubr.msk.bf16.mxu0 %vm15511_vm9, %v20609_v55 }
 0xfbe   :  { %14638 = vmatpush3.bf16.msra.mxu1 %v15408_v28  ;;  %v12617_v28 = vld [vmem:[%s20835_s26 + $0x58] sm:$0xff] }
 0xfbf   :  { %14639 = vmatprep.subr.bf16.mxu1 %v20609_v55 }
 0xfc2   :  { %14640 = vmatpush3.bf16.msra.mxu1 %v15409_v39  ;;  %v12415_v39 = vld [vmem:[%s20834_s23 + $0x50] sm:$0xff] }
 0xfc3   :  { %14641 = vmatprep.subr.bf16.mxu1 %v20609_v55 }
 0xfc6   :  { %14642 = vmatpush3.bf16.msra.mxu1 %v15410_v58  ;;  %v12616_v58 = vld [vmem:[%s20835_s26 + $0x50] sm:$0xff] }
 0xfc7   :  { %14643 = vmatprep.subr.bf16.mxu1 %v20609_v55 }
 0xfca   :  { %14644 = vmatpush3.bf16.msra.mxu1 %v15411_v43  ;;  %v12414_v43 = vld [vmem:[%s20834_s23 + $0x48] sm:$0xff] }
 0xfcb   :  { %14645 = vmatprep.subr.bf16.mxu1 %v20609_v55 }
 0xfce   :  { %14646 = vmatpush3.bf16.msra.mxu1 %v15412_v32  ;;  %v12615_v32 = vld [vmem:[%s20835_s26 + $0x48] sm:$0xff] }
 0xfcf   :  { %14647 = vmatprep.subr.bf16.mxu1 %v20609_v55 }
 0xfd2   :  { %14648 = vmatpush3.bf16.msra.mxu1 %v15413_v37  ;;  %v12413_v37 = vld [vmem:[%s20834_s23 + $0x40] sm:$0xff] }
 0xfd3   :  { %14665 = vmatprep.subr.bf16.mxu1 %v20609_v55 }
 0xfd5   :  { %14650 = vmatmul.mubr.msk.bf16.vlgmr.msra.gmra.mxu1 %vm11771_vm3, %v11994_v19  ;;  %v12613_v19 = vld [vmem:[%s20835_s26 + $0x38] sm:$0xff] }
 0xfd6   :  { %14675 = vmatprep.mubr.msk.bf16.mxu1 %vm15511_vm9, %v20609_v55  ;;  %14666 = vmatpush3.bf16.msra.mxu1 %v15414_v8  ;;  %v12411_v8 = vld [vmem:[%s20834_s23 + $0x30] sm:$0xff] }
 0xfd7   :  { %14667 = vmatprep.subr.bf16.mxu1 %v20609_v55 }
 0xfda   :  { %14668 = vmatpush3.bf16.msra.mxu1 %v15416_v10  ;;  %v12612_v10 = vld [vmem:[%s20835_s26 + $0x30] sm:$0xff] }
 0xfdb   :  { %14669 = vmatprep.subr.bf16.mxu1 %v20609_v55 }
 0xfde   :  { %14670 = vmatpush3.bf16.msra.mxu1 %v15418_v25  ;;  %v12422_v25 = vld [vmem:[%s20834_s23 + $0x88] sm:$0xff] }
 0xfdf   :  { %14671 = vmatprep.subr.bf16.mxu1 %v20609_v55 }
 0xfe2   :  { %14672 = vmatpush3.bf16.msra.mxu1 %v15420_v6 }
 0xfe3   :  { %14673 = vmatprep.subr.bf16.mxu1 %v20609_v55 }
 0xfe6   :  { %14674 = vmatpush3.bf16.msra.mxu1 %v15422_v24  ;;  %v12421_v24 = vld [vmem:[%s20834_s23 + $0x80] sm:$0xff] }
 0xfe7   :  { %12442 = vmatprep.subr.mxu1 %v20609_v55 }
0x1079   :  { %v11899_v48 = vpop.f32.mrf.mxu1  ;;  %v11985_v50 = vpop.f32.mrf.mxu0 }
0x107a   :  { %v11986_v47 = vadd.f32 %v11985_v50, %v11899_v48  ;;  %v15512_v48 = vmov 1983009808  }
0x107b   :  { %v14615_v5 = vpop.f32.mrf.mxu1  ;;  %v14633_v46 = vpop.f32.mrf.mxu0  ;;  %v12374_v50 = vunpack.c.l.s4 %v15512_v48 }
0x107c   :  { %v12410_v5 = vld [vmem:[%s20834_s23 + $0x28] sm:$0xff] }
0x107d   :  { %v11902_v30 = vpop.f32.mrf.mxu1  ;;  %v11988_v1 = vpop.f32.mrf.mxu0  ;;  %v12611_v46 = vld [vmem:[%s20835_s26 + $0x28] sm:$0xff] }
0x107e   :  { %v11989_v45 = vadd.f32 %v11988_v1, %v11902_v30  ;;  %v12409_v30 = vld [vmem:[%s20834_s23 + $0x20] sm:$0xff] }
0x107f   :  { %v14616_v17 = vpop.f32.mrf.mxu1  ;;  %v14634_v23 = vpop.f32.mrf.mxu0  ;;  %v12610_v1 = vld [vmem:[%s20835_s26 + $0x20] sm:$0xff] }
0x1080   :  { %v12375_v17 = vunpack.c.0.s8 %v12374_v50  ;;  %v12408_v23 = vld [vmem:[%s20834_s23 + $0x18] sm:$0xff] }
0x1095   :  { %v12089_v38 = vpop.f32.mrf.mxu1 }
0x1096   :  { %v12096_v21 = vadd.f32 %v12089_v38, %v11986_v47  ;;  %v12609_v47 = vld [vmem:[%s20835_s26 + $0x18] sm:$0xff]  ;;  %v12407_v38 = vld [vmem:[%s20834_s23 + $0x10] sm:$0xff] }
0x1097   :  { %v14651_v41 = vpop.f32.mrf.mxu1 }
0x1098   :  { %v12105_v33 = vadd.f32 %v14080_v11, %v12096_v21  ;;  %v12608_v41 = vld [vmem:[%s20835_s26 + $0x10] sm:$0xff] }
0x1099   :  { %v12092_v7 = vpop.f32.mrf.mxu1 }
0x109a   :  { %v12097_v31 = vadd.f32 %v12092_v7, %v11989_v45  ;;  %v12107_v29 = vmax.f32 %v12105_v33, 0.0  ;;  %v20836_v7 = vld [vmem:[#allocation280_spill] sm:$0xff] }
0x109b   :  { %v14652_v42 = vpop.f32.mrf.mxu1  ;;  %v12378_v33 = vsub.s32 %v12375_v17, %v20836_v7 }
0x109c   :  { %v12106_v53 = vadd.f32 %v14080_v11, %v12097_v31  ;;  %v12406_v31 = vld [vmem:[%s20834_s23 + $0x8] sm:$0xff] }
0x109d   :  { %v12607_v42 = vld [vmem:[%s20835_s26 + $0x8] sm:$0xff] }
0x109e   :  { %v12108_v51 = vmax.f32 %v12106_v53, 0.0 }
0x10a0   :  { %v12109_v62 = vpack.c.bf16 %v12108_v51, %v12107_v29 }
0x10a2   :  { %v12117_v18 = vsel %vm12115_vm5, %v12109_v62, 0  ;;  %v12405_v62 = vld [vmem:[%s20834_s23] sm:$0xff] }
0x10a3   :  { %14654 = vmatpush3.bf16.msra.mxu0 %v12117_v18 }
0x10a4   :  { %14659 = vmatprep.subr.bf16.mxu0 %v20609_v55 }
0x10a6   :  { %14656 = vmatmul.mubr.msk.bf16.vlgmr.msra.gmra.mxu0 %vm12111_vm6, %v12110_v63 }
0x10a7   :  { %14660 = vmatpush3.bf16.msra.mxu0 %v12117_v18  ;;  %14661 = vmatprep.mubr.msk.bf16.mxu0 %vm15511_vm9, %v20609_v55  ;;  %v12606_v18 = vld [vmem:[%s20835_s26] sm:$0xff] }
0x10a8   :  { %14679 = vmatprep.subr.bf16.mxu0 %v20609_v55 }
0x10ae   :  { %14662 = vmatmul.mubr.msk.bf16.vlgmr.msra.gmra.mxu0 %vm12111_vm6, %v12159_v49 }
0x10af   :  { %14680 = vmatpush3.bf16.msra.mxu0 %v15415_v59  ;;  %14689 = vmatprep.mubr.msk.bf16.mxu0 %vm15511_vm9, %v20609_v55 }
0x10b0   :  { %14681 = vmatprep.subr.bf16.mxu0 %v20609_v55 }
0x10b3   :  { %14682 = vmatpush3.bf16.msra.mxu0 %v15417_v22 }
0x10b4   :  { %14683 = vmatprep.subr.bf16.mxu0 %v20609_v55 }
0x10b7   :  { %14684 = vmatpush3.bf16.msra.mxu0 %v15419_v2 }
0x10b8   :  { %14685 = vmatprep.subr.bf16.mxu0 %v20609_v55 }
0x10bb   :  { %14686 = vmatpush3.bf16.msra.mxu0 %v15421_v3  ;;  %v12623_v3 = vld [vmem:[%s20835_s26 + $0x88] sm:$0xff] }
0x10bc   :  { %14687 = vmatprep.subr.bf16.mxu0 %v20609_v55 }
0x10bf   :  { %14688 = vmatpush3.bf16.msra.mxu0 %v15423_v54 }
0x10c0   :  { %12631 = vmatprep.subr.mxu0 %v20609_v55 }
0x1166   :  { %v12153_v14 = vpop.f32.mrf.mxu0 }
0x1168   :  { %v14657_v44 = vpop.f32.mrf.mxu0 }
0x116a   :  { %v12156_v35 = vpop.f32.mrf.mxu0 }
0x116c   :  { %v14658_v52 = vpop.f32.mrf.mxu0 }
0x116e   :  { %v12197_v13 = vpop.f32.mrf.mxu0 }
0x116f   :  { %v12203_v4 = vmax.f32 %v12153_v14, %v12197_v13  ;;  %v12622_v14 = vld [vmem:[%s20835_s26 + $0x80] sm:$0xff] }
0x1170   :  { %v14663_v15 = vpop.f32.mrf.mxu0 }
0x1171   :  { %v12204_v27 = vpack.c.bf16 %v12203_v4, %v12203_v4 }
0x1172   :  { %v12200_v20 = vpop.f32.mrf.mxu0 }
0x1173   :  { %14676 = vmatmul.mubr.msk.bf16.vlgmr.msra.gmra.mxu1 %vm12245_vm7, %v12204_v27  ;;  %14690 = vmatmul.mubr.msk.bf16.vlgmr.msra.gmra.mxu0 %vm12245_vm7, %v12204_v27  ;;  %v12514_v27 = vld [vmem:[%s20837_s2 + $0x8] sm:$0x3]  ;;  %v12513_v20 = vld [vmem:[%s20837_s2] sm:$0xff] }
0x1174   :  { %v14664_v26 = vpop.f32.mrf.mxu0  ;;  %12443 = vmatpush1.msra.mxu1 %v12420_v36  ;;  %12632 = vmatpush1.msra.mxu0 %v12621_v60  ;;  %v14101_v60 = vld [vmem:[%s15704_s25] ss:$0 sm:$0xff] }
0x1175   :  { %12444 = vmatprep.subr.mxu1 %v20609_v55  ;;  %12633 = vmatprep.subr.mxu0 %v20609_v55  ;;  %v14095_v26 = vld [vmem:[%s20838_s7] ss:$0 sm:$0xff] }
0x1176   :  { %12445 = vmatpush1.msra.mxu1 %v12419_v34  ;;  %12634 = vmatpush1.msra.mxu0 %v12620_v16 }
0x1177   :  { %12446 = vmatprep.subr.mxu1 %v20609_v55  ;;  %12635 = vmatprep.subr.mxu0 %v20609_v55 }
0x1178   :  { %12447 = vmatpush1.msra.mxu1 %v12418_v57  ;;  %12636 = vmatpush1.msra.mxu0 %v12619_v61 }
0x1179   :  { %12448 = vmatprep.subr.mxu1 %v20609_v55  ;;  %12637 = vmatprep.subr.mxu0 %v20609_v55 }
0x117a   :  { %12449 = vmatpush1.msra.mxu1 %v12417_v9  ;;  %12638 = vmatpush1.msra.mxu0 %v12618_v56 }
0x117b   :  { %12450 = vmatprep.subr.mxu1 %v20609_v55  ;;  %12639 = vmatprep.subr.mxu0 %v20609_v55 }
0x117c   :  { %12451 = vmatpush1.msra.mxu1 %v12416_v12  ;;  %12640 = vmatpush1.msra.mxu0 %v12617_v28  ;;  %v12703_v12 = vld [vmem:[%s15709_s13 + $0x8] sm:$0x3]  ;;  %v12702_v28 = vld [vmem:[%s15709_s13] sm:$0xff]  ;;  %s15515_s13 = smov [#allocation21]  }
0x117d   :  { %12452 = vmatprep.subr.mxu1 %v20609_v55  ;;  %12641 = vmatprep.subr.mxu0 %v20609_v55  ;;  %s12800_s25 = sshll.u32 %s15515_s13, 4  ;;  %s12801_s25 = int_to_ptr.vmem [resolvable:$true] %s12800_s25 }
0x117e   :  { %12453 = vmatpush1.msra.mxu1 %v12415_v39  ;;  %12642 = vmatpush1.msra.mxu0 %v12616_v58  ;;  %v14098_v58 = vld [vmem:[%s20839_s10] ss:$0 sm:$0xff]  ;;  %s15424_s11 = scalar_lea.vmem %s12801_s25, 32  ;;  %p15429_p1 = scmp.lt.s32.totalorder %s12801_s25, %s12801_s25 }
0x117f   :  { %12454 = vmatprep.subr.mxu1 %v20609_v55  ;;  %12643 = vmatprep.subr.mxu0 %v20609_v55  ;;  %p15425_p0 = scmp.ne.s32.totalorder %s12801_s25, %s15424_s11  ;;  %p15430_p2 = scmp.lt.s32.totalorder %s15424_s11, %s15424_s11 }
0x1180   :  { %12455 = vmatpush1.msra.mxu1 %v12414_v43  ;;  %12644 = vmatpush1.msra.mxu0 %v12615_v32 }
0x1181   :  { %12456 = vmatprep.subr.mxu1 %v20609_v55  ;;  %12645 = vmatprep.subr.mxu0 %v20609_v55  ;;  %p15431_p3 = por %p15430_p2, %p15429_p1 }
0x1182   :  { %12457 = vmatpush1.msra.mxu1 %v12413_v37  ;;  %12646 = vmatpush1.msra.mxu0 %v12614_v0 }
0x1183   :  { %12458 = vmatprep.subr.mxu1 %v20609_v55  ;;  %12647 = vmatprep.subr.mxu0 %v20609_v55  ;;  %p15432_p4 = pnand %p15431_p3, %p15425_p0 }
0x1184   :  { %12459 = vmatpush1.msra.mxu1 %v12412_v40  ;;  %12648 = vmatpush1.msra.mxu0 %v12613_v19 }
0x1185   :  { %12460 = vmatprep.subr.mxu1 %v20609_v55  ;;  %12649 = vmatprep.subr.mxu0 %v20609_v55 }
0x1186   :  { %12461 = vmatpush1.msra.mxu1 %v12411_v8  ;;  %12650 = vmatpush1.msra.mxu0 %v12612_v10  ;;  %v14103_v8 = vld [vmem:[#allocation20] ss:$0 sm:$0xff] }
0x1187   :  { %12462 = vmatprep.subr.mxu1 %v20609_v55  ;;  %12651 = vmatprep.subr.mxu0 %v20609_v55 }
0x1188   :  { %12463 = vmatpush1.msra.mxu1 %v12410_v5  ;;  %12652 = vmatpush1.msra.mxu0 %v12611_v46 }
0x1189   :  { %12464 = vmatprep.subr.mxu1 %v20609_v55  ;;  %12653 = vmatprep.subr.mxu0 %v20609_v55 }
0x118a   :  { %12465 = vmatpush1.msra.mxu1 %v12409_v30  ;;  %12654 = vmatpush1.msra.mxu0 %v12610_v1 }
0x118b   :  { %12466 = vmatprep.subr.mxu1 %v20609_v55  ;;  %12655 = vmatprep.subr.mxu0 %v20609_v55 }
0x118c   :  { %12467 = vmatpush1.msra.mxu1 %v12408_v23  ;;  %12656 = vmatpush1.msra.mxu0 %v12609_v47 }
0x118d   :  { %12468 = vmatprep.subr.mxu1 %v20609_v55  ;;  %12657 = vmatprep.subr.mxu0 %v20609_v55 }
0x118e   :  { %12469 = vmatpush1.msra.mxu1 %v12407_v38  ;;  %12658 = vmatpush1.msra.mxu0 %v12608_v41 }
0x118f   :  { %12470 = vmatprep.subr.mxu1 %v20609_v55  ;;  %12659 = vmatprep.subr.mxu0 %v20609_v55 }
0x1190   :  { %12471 = vmatpush1.msra.mxu1 %v12406_v31  ;;  %12660 = vmatpush1.msra.mxu0 %v12607_v42 }
0x1191   :  { %12472 = vmatprep.subr.mxu1 %v20609_v55  ;;  %12661 = vmatprep.subr.mxu0 %v20609_v55 }
0x1192   :  { %12473 = vmatpush1.msra.mxu1 %v12405_v62  ;;  %12662 = vmatpush1.msra.mxu0 %v12606_v18 }
0x1193   :  { %12502 = vmatprep.subr.mxu1 %v20609_v55  ;;  %12691 = vmatprep.subr.mxu0 %v20609_v55 }
0x1194   :  { %12503 = vmatpush2.msra.mxu1 %v12422_v25  ;;  %12692 = vmatpush2.msra.mxu0 %v12623_v3 }
0x1195   :  { %12504 = vmatprep.subr.mxu1 %v20609_v55  ;;  %12693 = vmatprep.subr.mxu0 %v20609_v55 }
0x1196   :  { %12505 = vmatpush2.msra.mxu1 %v12421_v24  ;;  %12694 = vmatpush2.msra.mxu0 %v12622_v14 }
0x1197   :  { %14693 = vmatprep.subr.mxu1 %v20609_v55 }
0x1233   :  { %v12283_v21 = vpop.f32.mrf.mxu1  ;;  %v12363_v11 = vpop.f32.mrf.mxu0 }
0x1234   :  { %v12369_v45 = vmax.f32 %v12283_v21, %v12363_v11 }
0x1235   :  { %v14677_v53 = vpop.f32.mrf.mxu1  ;;  %v14691_v29 = vpop.f32.mrf.mxu0 }
0x1236   :  { %12371 = vst.msk [vmem:[#allocation18] sm:$0x3] %vm12370_vm8, %v12369_v45  ;;  %v12386_v51 = vcombine.high %v12369_v45, %v12369_v45  ;;  %v12379_v22 = vrot.slane %v12369_v45, %v12378_v33 }
0x1237   :  { %v12286_v63 = vpop.f32.mrf.mxu1  ;;  %v12366_v49 = vpop.f32.mrf.mxu0 }
0x1238   :  { %v12393_v59 = vrot.slane %v12386_v51, %v12378_v33  ;;  %v12380_v54 = vcombine.high %v12379_v22, %v12379_v22 }
0x1239   :  { %v14678_v2 = vpop.f32.mrf.mxu1  ;;  %v14692_v6 = vpop.f32.mrf.mxu0 }
0x123a   :  { %12394 = vrot.lane.b32.xlu0 %v12393_v59, %s15513_s28 }
0x123e   :  { %12381 = vrot.lane.b32.xlu0 %v12380_v54, %s15514_s1 }
0x12ac   :  { %v12395_v44 = vpop.permute.xlu0 %12394 }
0x12ad   :  { %v12396_v35 = vrot.slane %v12395_v44, 6 }
0x12af   :  { %v12398_v13 = vsel %vm12397_vm12, %v12396_v35, %v12395_v44 }
0x12b0   :  { %v12382_v52 = vpop.permute.xlu0 %12381 }
0x12b1   :  { %12385 = vst.msk [vmem:[#allocation18] sm:$0x3] %vm12384_vm13, %v12382_v52 }
0x12b2   :  { %12403 = vst.msk [vmem:[#allocation18] sm:$0xf] %vm12402_vm14, %v12398_v13 }
0x12b9   :  { %v14096_v4 = vld.sshfl [vmem:[#allocation18] sm:$0x33 pattern:$0x76325410] }
0x12ba   :  { %v12438_v15 = vcombine.high %v14096_v4, %v14096_v4 }
0x12bc   :  { %14097 = vmatprep.mubr.msk.f32.mxu1 %vm11611_vm2, %v12438_v15  ;;  %14102 = vmatprep.mubr.msk.f32.mxu0 %vm11611_vm2, %v12438_v15 }
0x12bd   :  { %12507 = vmatmul.mubr.f32.vlgmr.msra.gmra.mxu1 %v14096_v4  ;;  %12696 = vmatmul.mubr.f32.vlgmr.msra.gmra.mxu0 %v14096_v4 }
0x12be   :  { %14697 = vmatprep.mubr.msk.f32.mxu1 %vm15511_vm9, %v20609_v55  ;;  %14694 = vmatpush3.msk.msra.mxu1 %vm11430_vm0, %v12514_v27 }
0x12bf   :  { %14695 = vmatprep.subr.mxu1 %v20609_v55 }
0x12c0   :  { %14696 = vmatpush3.msra.mxu1 %v12513_v20 }
0x12c1   :  { %14700 = vmatprep.subr.mxu1 %v20609_v55 }
0x137d   :  { %v12508_v36 = vpop.f32.mrf.mxu1  ;;  %v12697_v34 = vpop.f32.mrf.mxu0 }
0x137e   :  { %v12509_v16 = vadd.f32 %v14095_v26, %v12508_v36  ;;  %v12698_v56 = vadd.f32 %v14101_v60, %v12697_v34 }
0x137f   :  { %v12510_v57 = vpop.f32.mrf.mxu1  ;;  %v12699_v61 = vpop.f32.mrf.mxu0 }
0x1380   :  { %v12512_v9 = vmax.f32 %v12509_v16, 0.0  ;;  %v12701_v39 = vmax.f32 %v12698_v56, 0.0 }
0x1382   :  { %14698 = vmatmul.mubr.msk.f32.vlgmr.msra.gmra.mxu1 %vm12522_vm15, %v12512_v9 }
0x1383   :  { %14701 = vmatpush3.msk.msra.mxu1 %vm11430_vm0, %v12703_v12  ;;  %14704 = vmatprep.mubr.msk.f32.mxu1 %vm15511_vm9, %v20609_v55 }
0x1384   :  { %14702 = vmatprep.subr.mxu1 %v20609_v55 }
0x1385   :  { %14703 = vmatpush3.msra.mxu1 %v12702_v28 }
0x1386   :  { %14705 = vmatmul.mubr.msk.f32.vlgmr.msra.gmra.mxu1 %vm12522_vm15, %v12701_v39 }
0x1442   :  { %v12595_v43 = vpop.f32.mrf.mxu1 }
0x1443   :  { %v12596_v32 = vadd.f32 %v14098_v58, %v12595_v43 }
0x1444   :  { %v14699_v37 = vpop.f32.mrf.mxu1 }
0x1445   :  { %v12600_v0 = vsel %vm12599_vm1, %v12596_v32, 0.0 }
0x1446   :  { %12601 = vadd.xlane.f32.xlu1 %v12600_v0  ;;  %v12783_v40 = vpop.f32.mrf.mxu1 }
0x1447   :  { %v12784_v10 = vadd.f32 %v14103_v8, %v12783_v40 }
0x1448   :  { %v14706_v19 = vpop.f32.mrf.mxu1 }
0x1457   :  { %12789 = vperm.xlu1 %15391, %v12784_v10  }
0x14cf   :  { %v12602_v48 = vpop.xlane.xlu1 %12601 }
0x14d0   :  { %v12604_v50 = vmul.f32 0.16666667, %v12602_v48 }
0x14d2   :  { %v12605_v55 = vsub.f32 %v12596_v32, %v12604_v50 }
0x14d3   :  { %v12790_v5 = vpop.permute.xlu1 %12789 }
0x14d4   :  { %v12792_v46 = vadd.f32 %v12790_v5, %v12605_v55 }
0x14d6   :  { %12793 = vst.msk [vmem:[#allocation21] sm:$0x3] %vm12599_vm1, %v12792_v46 }
0x14d7   :  { %15435 = shalt.err (!%p15432_p4)
}
0x14d8   :  { %12803 = dma.vmem_to_hbm [thread:$0]  %s12801_s25, 32, %s15717_s29, [#allocation22]  }
0x14d9   :  { %15468 = dma.done.wait [#allocation22], 32  }
0x14da   :  { %15469 = vsyncadd [#allocation22], 4294967264 }
0x14db   :  { %12807 = vsyncpa [#allocation22], 1 }
0x14dc   :  { %12808 = vsyncmov [#allocation19] }
0x14df   :  { %s12809_s16 = vpop.sfrf %12808 }
0x14e0   :  { %p14106_p5 = scmp.ne.s32.totalorder %s12809_s16, 0 }
0x14e2   :  { %12813 = shalt.err (%p14106_p5)  }
0x14e3   :  { %12815 = vsyncmov [#allocation19 + $0x1] }
0x14e6   :  { %s12816_s15 = vpop.sfrf %12815 }
0x14e7   :  { %p14107_p6 = scmp.ne.s32.totalorder %s12816_s15, 0 }
0x14e9   :  { %12820 = shalt.err (%p14107_p6)  }
0x14ea   :  { %12822 = vsyncmov [#allocation19 + $0x2] }
0x14ed   :  { %s12823_s18 = vpop.sfrf %12822 }
0x14ee   :  { %p14108_p7 = scmp.ne.s32.totalorder %s12823_s18, 0 }
0x14f0   :  { %12827 = shalt.err (%p14108_p7)  }
0x14f1   :  { %12829 = vsyncmov [#allocation19 + $0x3] }
0x14f4   :  { %s12830_s0 = vpop.sfrf %12829 }
0x14f5   :  { %p14109_p8 = scmp.ne.s32.totalorder %s12830_s0, 0 }
0x14f7   :  { %12834 = shalt.err (%p14109_p8)  }
0x14f8   :  { %12836 = vsyncmov [#allocation19 + $0x4] }
0x14fb   :  { %s12837_s29 = vpop.sfrf %12836 }
0x14fc   :  { %p14110_p9 = scmp.ne.s32.totalorder %s12837_s29, 0 }
0x14fe   :  { %12841 = shalt.err (%p14110_p9)  }
0x14ff   :  { %12843 = vsyncmov [#allocation19 + $0x5] }
0x1502   :  { %s12844_s5 = vpop.sfrf %12843 }
0x1503   :  { %p14111_p10 = scmp.ne.s32.totalorder %s12844_s5, 0 }
0x1505   :  { %12848 = shalt.err (%p14111_p10)  }
0x1506   :  { %12850 = vsyncmov [#allocation19 + $0x6] }
0x1509   :  { %s12851_s9 = vpop.sfrf %12850 }
0x150a   :  { %p14112_p11 = scmp.ne.s32.totalorder %s12851_s9, 0 }
0x150c   :  { %12855 = shalt.err (%p14112_p11)  }
0x150d   :  { %12857 = vsyncmov [#allocation19 + $0x7] }
0x1510   :  { %s12858_s17 = vpop.sfrf %12857 }
0x1511   :  { %p14113_p12 = scmp.ne.s32.totalorder %s12858_s17, 0 }
0x1513   :  { %12862 = shalt.err (%p14113_p12)  }
0x1514   :  { %12864 = vsyncmov [#allocation19 + $0x8] }
0x1517   :  { %s12865_s21 = vpop.sfrf %12864 }
0x1518   :  { %p14114_p13 = scmp.ne.s32.totalorder %s12865_s21, 0 }
0x151a   :  { %12869 = shalt.err (%p14114_p13)  }
0x151b   :  { %12871 = vsyncmov [#allocation19 + $0x9] }
0x151e   :  { %s12872_s3 = vpop.sfrf %12871 }
0x151f   :  { %p14115_p0 = scmp.ne.s32.totalorder %s12872_s3, 0 }
0x1521   :  { %12876 = shalt.err (%p14115_p0)  }
0x1522   :  { %12878 = vsyncmov [#allocation19 + $0xa] }
0x1525   :  { %s12879_s8 = vpop.sfrf %12878 }
0x1526   :  { %p14116_p1 = scmp.ne.s32.totalorder %s12879_s8, 0 }
0x1528   :  { %12883 = shalt.err (%p14116_p1)  }
0x1529   :  { %12885 = vsyncmov [#allocation19 + $0xb] }
0x152c   :  { %s12886_s14 = vpop.sfrf %12885 }
0x152d   :  { %p14117_p2 = scmp.ne.s32.totalorder %s12886_s14, 0 }
0x152f   :  { %12890 = shalt.err (%p14117_p2)  }

</bundles_post_ra>
